<compile_context>
chip_gen: v5e
topology: v5e:2x2
jax: 0.10.0
libtpu: 0.0.40
codegen_flags: <defaults>
</compile_context>

<pallas_src>
from functools import partial

import jax
import jax.numpy as jnp
from jax.experimental import pallas as pl
from jax.experimental.pallas import tpu as pltpu

EPS = 1e-5
# Explicit VMEM budget: comfortably under v7x's 64 MiB physical VMEM, above the
# 32 MiB scoped default so larger tiles still compile on v5e/v6e.
_VMEM_LIMIT = 48 * 1024 * 1024


def _pick_tile(m):
    """Largest convenient row tile that divides m (prefers pipelined grids)."""
    for t in (128, 256, 512, 64, 32, 16, 8):
        if m % t == 0:
            return t
    return m


def _compiler_params(n_axes=1):
    return pltpu.CompilerParams(
        dimension_semantics=("parallel",) * n_axes,
        vmem_limit_bytes=_VMEM_LIMIT)


# --------------------------------------------------------------------------
# Pass A: conv1 (1x1) + bn1 partial statistics
# --------------------------------------------------------------------------
def _conv1x1_stats_kernel(x_ref, w_ref, y_ref, st_ref):
    y = jnp.dot(x_ref[...].astype(jnp.bfloat16), w_ref[...],
                preferred_element_type=jnp.float32)
    y_ref[...] = y
    # single-pass BN stats (sum / sum-of-squares), f32 accumulation
    st_ref[0, 0:1, :] = jnp.sum(y, axis=0, keepdims=True)
    st_ref[0, 1:2, :] = jnp.sum(y * y, axis=0, keepdims=True)


def _conv1x1_stats(x2d, w_bf16):
    m, cin = x2d.shape
    cout = w_bf16.shape[1]
    tm = _pick_tile(m)
    nt = m // tm
    return pl.pallas_call(
        _conv1x1_stats_kernel,
        grid=(nt,),
        in_specs=[pl.BlockSpec((tm, cin), lambda i: (i, 0)),
                  pl.BlockSpec((cin, cout), lambda i: (0, 0))],
        out_specs=(pl.BlockSpec((tm, cout), lambda i: (i, 0)),
                   pl.BlockSpec((1, 2, cout), lambda i: (i, 0, 0))),
        out_shape=(jax.ShapeDtypeStruct((m, cout), jnp.float32),
                   jax.ShapeDtypeStruct((nt, 2, cout), jnp.float32)),
        compiler_params=_compiler_params(),
    )(x2d, w_bf16)


# --------------------------------------------------------------------------
# Pass B: bn1 + ReLU fused into grouped 3x3 conv (im2col) + bn2 partial stats
# --------------------------------------------------------------------------
def _bnrelu_gconv3x3_stats_kernel(y_ref, a_ref, b_ref, w_ref,
                                  o_ref, st_ref, pad_ref, col_ref, *, groups):
    _, H, W, width = y_ref.shape
    cg = width // groups
    HW = H * W

    # bn1 normalize + ReLU in f32, one cast to bf16 for the MXU path.
    a = a_ref[...].reshape(1, 1, width)
    b = b_ref[...].reshape(1, 1, width)
    act = jnp.maximum(y_ref[0] * a + b, 0.0).astype(jnp.bfloat16)

    # Zero only the 1-pixel halo (4 strips); the interior is fully overwritten
    # every grid step (megacore-safe: no reliance on program_id==0 init).
    zrow = jnp.zeros((1, W + 2, width), jnp.bfloat16)
    zcol = jnp.zeros((H, 1, width), jnp.bfloat16)
    pad_ref[0:1, :, :] = zrow
    pad_ref[H + 1:H + 2, :, :] = zrow
    pad_ref[1:H + 1, 0:1, :] = zcol
    pad_ref[1:H + 1, W + 1:W + 2, :] = zcol
    pad_ref[1:H + 1, 1:W + 1, :] = act

    # Grouped 3x3 conv as ONE im2col matmul per group (K = 9*cg) instead of
    # 9 shallow dots + VPU adds.  All slice offsets are static constants,
    # so the tap loads/stores lower to aligned accesses.
    outs = []
    for g in range(groups):
        c0 = g * cg
        tap = 0
        for ky in range(3):
            for kx in range(3):
                col_ref[:, tap * cg:(tap + 1) * cg] = (
                    pad_ref[ky:ky + H, kx:kx + W, c0:c0 + cg].reshape(HW, cg))
                tap += 1
        outs.append(jnp.dot(col_ref[...], w_ref[:, c0:c0 + cg],
                            preferred_element_type=jnp.float32))
    y2 = outs[0] if groups == 1 else jnp.concatenate(outs, axis=-1)

    o_ref[0] = y2
    st_ref[0, 0:1, :] = jnp.sum(y2, axis=0, keepdims=True)
    st_ref[0, 1:2, :] = jnp.sum(y2 * y2, axis=0, keepdims=True)


def _bnrelu_gconv3x3_stats(y1_nhwc, a, b, w2col_bf16, groups):
    n, H, W, width = y1_nhwc.shape
    cg = width // groups
    kernel = partial(_bnrelu_gconv3x3_stats_kernel, groups=groups)
    return pl.pallas_call(
        kernel,
        grid=(n,),
        in_specs=[pl.BlockSpec((1, H, W, width), lambda i: (i, 0, 0, 0)),
                  pl.BlockSpec((1, width), lambda i: (0, 0)),
                  pl.BlockSpec((1, width), lambda i: (0, 0)),
                  pl.BlockSpec((9 * cg, width), lambda i: (0, 0))],
        out_specs=(pl.BlockSpec((1, H * W, width), lambda i: (i, 0, 0)),
                   pl.BlockSpec((1, 2, width), lambda i: (i, 0, 0))),
        out_shape=(jax.ShapeDtypeStruct((n, H * W, width), jnp.float32),
                   jax.ShapeDtypeStruct((n, 2, width), jnp.float32)),
        scratch_shapes=[pltpu.VMEM((H + 2, W + 2, width), jnp.bfloat16),
                        pltpu.VMEM((H * W, 9 * cg), jnp.bfloat16)],
        compiler_params=_compiler_params(),
    )(y1_nhwc, a, b, w2col_bf16)


# --------------------------------------------------------------------------
# Pass C: bn2 + ReLU fused into conv3 (1x1) + bn3 partial stats
# --------------------------------------------------------------------------
def _bnrelu_conv1x1_stats_kernel(y_ref, a_ref, b_ref, w_ref, z_ref, st_ref):
    t = jnp.maximum(y_ref[...] * a_ref[...] + b_ref[...], 0.0)
    z = jnp.dot(t.astype(jnp.bfloat16), w_ref[...],
                preferred_element_type=jnp.float32)
    z_ref[...] = z
    st_ref[0, 0:1, :] = jnp.sum(z, axis=0, keepdims=True)
    st_ref[0, 1:2, :] = jnp.sum(z * z, axis=0, keepdims=True)


def _bnrelu_conv1x1_stats(y2d, a, b, w_bf16):
    m, cin = y2d.shape
    cout = w_bf16.shape[1]
    tm = _pick_tile(m)
    nt = m // tm
    return pl.pallas_call(
        _bnrelu_conv1x1_stats_kernel,
        grid=(nt,),
        in_specs=[pl.BlockSpec((tm, cin), lambda i: (i, 0)),
                  pl.BlockSpec((1, cin), lambda i: (0, 0)),
                  pl.BlockSpec((1, cin), lambda i: (0, 0)),
                  pl.BlockSpec((cin, cout), lambda i: (0, 0))],
        out_specs=(pl.BlockSpec((tm, cout), lambda i: (i, 0)),
                   pl.BlockSpec((1, 2, cout), lambda i: (i, 0, 0))),
        out_shape=(jax.ShapeDtypeStruct((m, cout), jnp.float32),
                   jax.ShapeDtypeStruct((nt, 2, cout), jnp.float32)),
        compiler_params=_compiler_params(),
    )(y2d, a, b, w_bf16)


# --------------------------------------------------------------------------
# Pass D: bn3 normalize + identity residual add + ReLU
# --------------------------------------------------------------------------
def _bn_add_relu_kernel(z_ref, a_ref, b_ref, x_ref, o_ref):
    o_ref[...] = jnp.maximum(
        z_ref[...] * a_ref[...] + b_ref[...] + x_ref[...], 0.0)


def _bn_add_relu(z, a, b, x2d):
    m, c = z.shape
    tm = _pick_tile(m)
    return pl.pallas_call(
        _bn_add_relu_kernel,
        grid=(m // tm,),
        in_specs=[pl.BlockSpec((tm, c), lambda i: (i, 0)),
                  pl.BlockSpec((1, c), lambda i: (0, 0)),
                  pl.BlockSpec((1, c), lambda i: (0, 0)),
                  pl.BlockSpec((tm, c), lambda i: (i, 0))],
        out_specs=pl.BlockSpec((tm, c), lambda i: (i, 0)),
        out_shape=jax.ShapeDtypeStruct((m, c), jnp.float32),
        compiler_params=_compiler_params(),
    )(z, a, b, x2d)


# --------------------------------------------------------------------------
# BN stat finalization (tiny, plain JAX between pallas_calls)
# --------------------------------------------------------------------------
def _finalize_bn(partial_stats, gamma, beta, count):
    s = jnp.sum(partial_stats, axis=0)                       # (2, C)
    mean = s[0] / count
    var = jnp.maximum(s[1] / count - mean * mean, 0.0)       # biased (training) var
    scale = gamma.reshape(-1) * jax.lax.rsqrt(var + EPS)
    bias = beta.reshape(-1) - mean * scale
    return scale.reshape(1, -1), bias.reshape(1, -1)


# --------------------------------------------------------------------------
# Full BottleNeck forward
# --------------------------------------------------------------------------
def bottleneck_forward(x_nhwc, params, groups=1):
    w1, g1, b1, w2, g2, b2, w3, g3, b3 = params
    n, H, W, cin = x_nhwc.shape
    width = w1.shape[1]
    cout = w3.shape[1]
    assert cin == cout, "downsample=None requires inchannels == outchannels*expansion"
    assert width % groups == 0
    m = n * H * W
    cg = width // groups

    # One-time wrapper-side weight prep: bf16 MXU operands, grouped 3x3 weight
    # flattened to the im2col layout (9*cg, width).
    w1b = w1.astype(jnp.bfloat16)
    w2b = w2.reshape(9 * cg, width).astype(jnp.bfloat16)
    w3b = w3.astype(jnp.bfloat16)

    x2d = x_nhwc.reshape(m, cin)                 # metadata-only reshape

    # A) conv1 + bn1 partial stats
    y1, st1 = _conv1x1_stats(x2d, w1b)
    a1, c1 = _finalize_bn(st1, g1, b1, m)

    # B) bn1+ReLU -> grouped 3x3 conv + bn2 partial stats
    y2, st2 = _bnrelu_gconv3x3_stats(y1.reshape(n, H, W, width), a1, c1, w2b, groups)
    a2, c2 = _finalize_bn(st2, g2, b2, m)

    # C) bn2+ReLU -> conv3 + bn3 partial stats
    z, st3 = _bnrelu_conv1x1_stats(y2.reshape(m, width), a2, c2, w3b)
    a3, c3 = _finalize_bn(st3, g3, b3, m)

    # D) bn3 + residual add + ReLU
    out = _bn_add_relu(z, a3, c3, x2d)
    return out.reshape(n, H, W, cout)


# --------------------------------------------------------------------------
# Plain-JAX reference (f32) for correctness checking
# --------------------------------------------------------------------------
def reference(x_nhwc, params, groups=1):
    w1, g1, b1, w2, g2, b2, w3, g3, b3 = params

    def bn(y, g, b):
        mean = y.mean(axis=(0, 1, 2), keepdims=True)
        var = ((y - mean) ** 2).mean(axis=(0, 1, 2), keepdims=True)
        return (y - mean) * jax.lax.rsqrt(var + EPS) * g.reshape(1, 1, 1, -1) \
            + b.reshape(1, 1, 1, -1)

    y = jnp.einsum('nhwc,co->nhwo', x_nhwc, w1)
    y = jax.nn.relu(bn(y, g1, b1))
    y = jax.lax.conv_general_dilated(
        y, w2, (1, 1), 'SAME',
        dimension_numbers=('NHWC', 'HWIO', 'NHWC'),
        feature_group_count=groups)
    y = jax.nn.relu(bn(y, g2, b2))
    y = jnp.einsum('nhwc,co->nhwo', y, w3)
    y = bn(y, g3, b3)
    return jax.nn.relu(y + x_nhwc)


if __name__ == "__main__":
    key = jax.random.PRNGKey(0)

    def make_case(k, N, H, W, outchannels, groups, width_per_group=64):
        expansion = 4
        inchannels = outchannels * expansion          # identity add requires this
        width = int(outchannels * (width_per_group / 64.0)) * groups
        cout = outchannels * expansion
        ks = jax.random.split(k, 10)
        x_nchw = jax.random.normal(ks[0], (N, inchannels, H, W), jnp.float32)
        x = jnp.transpose(x_nchw, (0, 2, 3, 1))       # -> NHWC for the kernels
        w1 = 0.1 * jax.random.normal(ks[1], (inchannels, width), jnp.float32)
        w2 = 0.1 * jax.random.normal(ks[2], (3, 3, width // groups, width), jnp.float32)
        w3 = 0.1 * jax.random.normal(ks[3], (width, cout), jnp.float32)
        g1 = 1.0 + 0.1 * jax.random.normal(ks[4], (1, width), jnp.float32)
        b1 = 0.1 * jax.random.normal(ks[5], (1, width), jnp.float32)
        g2 = 1.0 + 0.1 * jax.random.normal(ks[6], (1, width), jnp.float32)
        b2 = 0.1 * jax.random.normal(ks[7], (1, width), jnp.float32)
        g3 = 1.0 + 0.1 * jax.random.normal(ks[8], (1, cout), jnp.float32)
        b3 = 0.1 * jax.random.normal(ks[9], (1, cout), jnp.float32)
        return x, (w1, g1, b1, w2, g2, b2, w3, g3, b3)

    fwd = jax.jit(bottleneck_forward, static_argnames=("groups",))

    k1, k2 = jax.random.split(key)
    cases = [
        ("groups=1", make_case(k1, 2, 16, 16, outchannels=4, groups=1), 1),
        ("groups=2", make_case(k2, 2, 16, 16, outchannels=8, groups=2), 2),
    ]
    for name, (x, params), groups in cases:
        out = jax.block_until_ready(fwd(x, params, groups=groups))
        ref = reference(x, params, groups=groups)
        assert out.shape == ref.shape
        max_err = float(jnp.max(jnp.abs(out - ref)))
        # bf16 MXU operands with f32 accumulation -> allow bf16-level tolerance
        assert jnp.allclose(out, ref, atol=5e-2, rtol=5e-2), (name, max_err)

    print("KERNEL_OK")
</pallas_src>

<mosaic_0001>
module attributes {stable_mosaic.version = 11 : i64} {
  func.func @_conv1x1_stats_kernel(%arg0: i32, %arg1: memref<128x16xf32, #tpu.memory_space<vmem>>, %arg2: memref<16x4xbf16, #tpu.memory_space<vmem>>, %arg3: memref<128x4xf32, #tpu.memory_space<vmem>>, %arg4: memref<1x2x4xf32, #tpu.memory_space<vmem>>) attributes {dimension_semantics = [#tpu.dimension_semantics<parallel>], iteration_bounds = array<i64: 4>, scalar_prefetch = 0 : i64, scratch_operands = 0 : i64, tpu.core_type = #tpu.core_type<tc>, window_params = [{transform_indices = @transform_0, window_bounds = array<i64: 128, 16>}, {pipeline_mode = #tpu.pipeline_mode<synchronous>, transform_indices = @transform_1, window_bounds = array<i64: 16, 4>}, {transform_indices = @transform_2, window_bounds = array<i64: 128, 4>}, {transform_indices = @transform_3, window_bounds = array<i64: 1, 2, 4>}]} {
    %c0 = arith.constant 0 : index
    %c0_0 = arith.constant 0 : index
    %0 = vector.load %arg1[%c0, %c0_0] : memref<128x16xf32, #tpu.memory_space<vmem>>, vector<128x16xf32>
    %1 = arith.truncf %0 : vector<128x16xf32> to vector<128x16xbf16>
    %c0_1 = arith.constant 0 : index
    %c0_2 = arith.constant 0 : index
    %2 = vector.load %arg2[%c0_1, %c0_2] : memref<16x4xbf16, #tpu.memory_space<vmem>>, vector<16x4xbf16>
    %cst = arith.constant dense<0.000000e+00> : vector<128x4xf32>
    %3 = tpu.matmul %1, %2, %cst {dimension_numbers = #tpu.dot_dimension_numbers<[1], [0], [0], [1], [0, 0, 1, 1], [], []>} : vector<128x16xbf16>, vector<16x4xbf16>, vector<128x4xf32> -> vector<128x4xf32>
    %c0_3 = arith.constant 0 : index
    %c0_4 = arith.constant 0 : index
    %4 = vector.load %arg3[%c0_3, %c0_4] : memref<128x4xf32, #tpu.memory_space<vmem>>, vector<128x4xf32>
    tpu.vector_store %arg3[%c0_3, %c0_4], %3 {strides = array<i32>} : memref<128x4xf32, #tpu.memory_space<vmem>>, vector<128x4xf32>,
    %cst_5 = arith.constant dense<0.000000e+00> : vector<4xf32>
    %5 = vector.multi_reduction <add>, %3, %cst_5 [0] : vector<128x4xf32> to vector<4xf32>
    %6 = vector.shape_cast %5 : vector<4xf32> to vector<1x4xf32>
    %c0_6 = arith.constant 0 : index
    %c0_7 = arith.constant 0 : index
    %c0_8 = arith.constant 0 : index
    %7 = vector.load %arg4[%c0_6, %c0_7, %c0_8] : memref<1x2x4xf32, #tpu.memory_space<vmem>>, vector<1x1x4xf32>
    %8 = vector.shape_cast %7 : vector<1x1x4xf32> to vector<1x4xf32>
    %9 = vector.shape_cast %6 : vector<1x4xf32> to vector<1x1x4xf32>
    tpu.vector_store %arg4[%c0_6, %c0_7, %c0_8], %9 {strides = array<i32>} : memref<1x2x4xf32, #tpu.memory_space<vmem>>, vector<1x1x4xf32>,
    %10 = arith.mulf %3, %3 : vector<128x4xf32>
    %cst_9 = arith.constant dense<0.000000e+00> : vector<4xf32>
    %11 = vector.multi_reduction <add>, %10, %cst_9 [0] : vector<128x4xf32> to vector<4xf32>
    %12 = vector.shape_cast %11 : vector<4xf32> to vector<1x4xf32>
    %c0_10 = arith.constant 0 : index
    %c1 = arith.constant 1 : index
    %c0_11 = arith.constant 0 : index
    %13 = vector.load %arg4[%c0_10, %c1, %c0_11] : memref<1x2x4xf32, #tpu.memory_space<vmem>>, vector<1x1x4xf32>
    %14 = vector.shape_cast %13 : vector<1x1x4xf32> to vector<1x4xf32>
    %15 = vector.shape_cast %12 : vector<1x4xf32> to vector<1x1x4xf32>
    tpu.vector_store %arg4[%c0_10, %c1, %c0_11], %15 {strides = array<i32>} : memref<1x2x4xf32, #tpu.memory_space<vmem>>, vector<1x1x4xf32>,
    return
  }
  func.func @transform_0(%arg0: i32) -> (i32, i32) {
    %c0_i32 = arith.constant 0 : i32
    %c0_i32_0 = arith.constant 0 : i32
    return %arg0, %c0_i32 : i32, i32
  }
  func.func @transform_1(%arg0: i32) -> (i32, i32) {
    %c0_i32 = arith.constant 0 : i32
    %c0_i32_0 = arith.constant 0 : i32
    %c0_i32_1 = arith.constant 0 : i32
    return %c0_i32, %c0_i32_0 : i32, i32
  }
  func.func @transform_2(%arg0: i32) -> (i32, i32) {
    %c0_i32 = arith.constant 0 : i32
    %c0_i32_0 = arith.constant 0 : i32
    return %arg0, %c0_i32 : i32, i32
  }
  func.func @transform_3(%arg0: i32) -> (i32, i32, i32) {
    %c0_i32 = arith.constant 0 : i32
    %c0_i32_0 = arith.constant 0 : i32
    %c0_i32_1 = arith.constant 0 : i32
    return %arg0, %c0_i32, %c0_i32_0 : i32, i32, i32
  }
}

module attributes {stable_mosaic.version = 11 : i64} {
  func.func @_bnrelu_gconv3x3_stats_kernel(%arg0: i32, %arg1: memref<1x16x16x4xf32, #tpu.memory_space<vmem>>, %arg2: memref<1x4xf32, #tpu.memory_space<vmem>>, %arg3: memref<1x4xf32, #tpu.memory_space<vmem>>, %arg4: memref<36x4xbf16, #tpu.memory_space<vmem>>, %arg5: memref<1x256x4xf32, #tpu.memory_space<vmem>>, %arg6: memref<1x2x4xf32, #tpu.memory_space<vmem>>, %arg7: memref<18x18x4xbf16, #tpu.memory_space<vmem>>, %arg8: memref<256x36xbf16, #tpu.memory_space<vmem>>) attributes {dimension_semantics = [#tpu.dimension_semantics<parallel>], iteration_bounds = array<i64: 2>, scalar_prefetch = 0 : i64, scratch_operands = 2 : i64, tpu.core_type = #tpu.core_type<tc>, window_params = [{transform_indices = @transform_0, window_bounds = array<i64: 1, 16, 16, 4>}, {pipeline_mode = #tpu.pipeline_mode<synchronous>, transform_indices = @transform_1, window_bounds = array<i64: 1, 4>}, {pipeline_mode = #tpu.pipeline_mode<synchronous>, transform_indices = @transform_2, window_bounds = array<i64: 1, 4>}, {pipeline_mode = #tpu.pipeline_mode<synchronous>, transform_indices = @transform_3, window_bounds = array<i64: 36, 4>}, {transform_indices = @transform_4, window_bounds = array<i64: 1, 256, 4>}, {transform_indices = @transform_5, window_bounds = array<i64: 1, 2, 4>}]} {
    %c0 = arith.constant 0 : index
    %c0_0 = arith.constant 0 : index
    %0 = vector.load %arg2[%c0, %c0_0] : memref<1x4xf32, #tpu.memory_space<vmem>>, vector<1x4xf32>
    %1 = vector.shape_cast %0 : vector<1x4xf32> to vector<1x1x4xf32>
    %c0_1 = arith.constant 0 : index
    %c0_2 = arith.constant 0 : index
    %2 = vector.load %arg3[%c0_1, %c0_2] : memref<1x4xf32, #tpu.memory_space<vmem>>, vector<1x4xf32>
    %3 = vector.shape_cast %2 : vector<1x4xf32> to vector<1x1x4xf32>
    %c0_3 = arith.constant 0 : index
    %c0_4 = arith.constant 0 : index
    %c0_5 = arith.constant 0 : index
    %c0_6 = arith.constant 0 : index
    %4 = vector.load %arg1[%c0_3, %c0_4, %c0_5, %c0_6] : memref<1x16x16x4xf32, #tpu.memory_space<vmem>>, vector<1x16x16x4xf32>
    %5 = vector.shape_cast %4 : vector<1x16x16x4xf32> to vector<16x16x4xf32>
    %6 = vector.broadcast %1 : vector<1x1x4xf32> to vector<16x16x4xf32>
    %7 = arith.mulf %5, %6 : vector<16x16x4xf32>
    %8 = vector.broadcast %3 : vector<1x1x4xf32> to vector<16x16x4xf32>
    %9 = arith.addf %7, %8 : vector<16x16x4xf32>
    %cst = arith.constant 0.000000e+00 : f32
    %10 = vector.broadcast %cst : f32 to vector<16x16x4xf32>
    %11 = arith.maximumf %9, %10 : vector<16x16x4xf32>
    %12 = arith.truncf %11 : vector<16x16x4xf32> to vector<16x16x4xbf16>
    %cst_7 = arith.constant 0.000000e+00 : bf16
    %13 = vector.broadcast %cst_7 : bf16 to vector<1x18x4xbf16>
    %cst_8 = arith.constant 0.000000e+00 : bf16
    %14 = vector.broadcast %cst_8 : bf16 to vector<16x1x4xbf16>
    %c0_9 = arith.constant 0 : index
    %c0_10 = arith.constant 0 : index
    %c0_11 = arith.constant 0 : index
    %15 = vector.load %arg7[%c0_9, %c0_10, %c0_11] : memref<18x18x4xbf16, #tpu.memory_space<vmem>>, vector<1x18x4xbf16>
    tpu.vector_store %arg7[%c0_9, %c0_10, %c0_11], %13 {strides = array<i32>} : memref<18x18x4xbf16, #tpu.memory_space<vmem>>, vector<1x18x4xbf16>,
    %c17 = arith.constant 17 : index
    %c0_12 = arith.constant 0 : index
    %c0_13 = arith.constant 0 : index
    %16 = vector.load %arg7[%c17, %c0_12, %c0_13] : memref<18x18x4xbf16, #tpu.memory_space<vmem>>, vector<1x18x4xbf16>
    tpu.vector_store %arg7[%c17, %c0_12, %c0_13], %13 {strides = array<i32>} : memref<18x18x4xbf16, #tpu.memory_space<vmem>>, vector<1x18x4xbf16>,
    %c1 = arith.constant 1 : index
    %c0_14 = arith.constant 0 : index
    %c0_15 = arith.constant 0 : index
    %17 = vector.load %arg7[%c1, %c0_14, %c0_15] : memref<18x18x4xbf16, #tpu.memory_space<vmem>>, vector<16x1x4xbf16>
    tpu.vector_store %arg7[%c1, %c0_14, %c0_15], %14 {strides = array<i32>} : memref<18x18x4xbf16, #tpu.memory_space<vmem>>, vector<16x1x4xbf16>,
    %c1_16 = arith.constant 1 : index
    %c17_17 = arith.constant 17 : index
    %c0_18 = arith.constant 0 : index
    %18 = vector.load %arg7[%c1_16, %c17_17, %c0_18] : memref<18x18x4xbf16, #tpu.memory_space<vmem>>, vector<16x1x4xbf16>
    tpu.vector_store %arg7[%c1_16, %c17_17, %c0_18], %14 {strides = array<i32>} : memref<18x18x4xbf16, #tpu.memory_space<vmem>>, vector<16x1x4xbf16>,
    %c1_19 = arith.constant 1 : index
    %c1_20 = arith.constant 1 : index
    %c0_21 = arith.constant 0 : index
    %19 = vector.load %arg7[%c1_19, %c1_20, %c0_21] : memref<18x18x4xbf16, #tpu.memory_space<vmem>>, vector<16x16x4xbf16>
    tpu.vector_store %arg7[%c1_19, %c1_20, %c0_21], %12 {strides = array<i32>} : memref<18x18x4xbf16, #tpu.memory_space<vmem>>, vector<16x16x4xbf16>,
    %c0_22 = arith.constant 0 : index
    %c0_23 = arith.constant 0 : index
    %c0_24 = arith.constant 0 : index
    %20 = vector.load %arg7[%c0_22, %c0_23, %c0_24] : memref<18x18x4xbf16, #tpu.memory_space<vmem>>, vector<16x16x4xbf16>
    %21 = vector.shape_cast %20 : vector<16x16x4xbf16> to vector<256x4xbf16>
    %c0_25 = arith.constant 0 : index
    %c0_26 = arith.constant 0 : index
    %22 = vector.load %arg8[%c0_25, %c0_26] : memref<256x36xbf16, #tpu.memory_space<vmem>>, vector<256x4xbf16>
    tpu.vector_store %arg8[%c0_25, %c0_26], %21 {strides = array<i32>} : memref<256x36xbf16, #tpu.memory_space<vmem>>, vector<256x4xbf16>,
    %c0_27 = arith.constant 0 : index
    %c1_28 = arith.constant 1 : index
    %c0_29 = arith.constant 0 : index
    %23 = vector.load %arg7[%c0_27, %c1_28, %c0_29] : memref<18x18x4xbf16, #tpu.memory_space<vmem>>, vector<16x16x4xbf16>
    %24 = vector.shape_cast %23 : vector<16x16x4xbf16> to vector<256x4xbf16>
    %c0_30 = arith.constant 0 : index
    %c4 = arith.constant 4 : index
    %25 = vector.load %arg8[%c0_30, %c4] : memref<256x36xbf16, #tpu.memory_space<vmem>>, vector<256x4xbf16>
    tpu.vector_store %arg8[%c0_30, %c4], %24 {strides = array<i32>} : memref<256x36xbf16, #tpu.memory_space<vmem>>, vector<256x4xbf16>,
    %c0_31 = arith.constant 0 : index
    %c2 = arith.constant 2 : index
    %c0_32 = arith.constant 0 : index
    %26 = vector.load %arg7[%c0_31, %c2, %c0_32] : memref<18x18x4xbf16, #tpu.memory_space<vmem>>, vector<16x16x4xbf16>
    %27 = vector.shape_cast %26 : vector<16x16x4xbf16> to vector<256x4xbf16>
    %c0_33 = arith.constant 0 : index
    %c8 = arith.constant 8 : index
    %28 = vector.load %arg8[%c0_33, %c8] : memref<256x36xbf16, #tpu.memory_space<vmem>>, vector<256x4xbf16>
    tpu.vector_store %arg8[%c0_33, %c8], %27 {strides = array<i32>} : memref<256x36xbf16, #tpu.memory_space<vmem>>, vector<256x4xbf16>,
    %c1_34 = arith.constant 1 : index
    %c0_35 = arith.constant 0 : index
    %c0_36 = arith.constant 0 : index
    %29 = vector.load %arg7[%c1_34, %c0_35, %c0_36] : memref<18x18x4xbf16, #tpu.memory_space<vmem>>, vector<16x16x4xbf16>
    %30 = vector.shape_cast %29 : vector<16x16x4xbf16> to vector<256x4xbf16>
    %c0_37 = arith.constant 0 : index
    %c12 = arith.constant 12 : index
    %31 = vector.load %arg8[%c0_37, %c12] : memref<256x36xbf16, #tpu.memory_space<vmem>>, vector<256x4xbf16>
    tpu.vector_store %arg8[%c0_37, %c12], %30 {strides = array<i32>} : memref<256x36xbf16, #tpu.memory_space<vmem>>, vector<256x4xbf16>,
    %c1_38 = arith.constant 1 : index
    %c1_39 = arith.constant 1 : index
    %c0_40 = arith.constant 0 : index
    %32 = vector.load %arg7[%c1_38, %c1_39, %c0_40] : memref<18x18x4xbf16, #tpu.memory_space<vmem>>, vector<16x16x4xbf16>
    %33 = vector.shape_cast %32 : vector<16x16x4xbf16> to vector<256x4xbf16>
    %c0_41 = arith.constant 0 : index
    %c16 = arith.constant 16 : index
    %34 = vector.load %arg8[%c0_41, %c16] : memref<256x36xbf16, #tpu.memory_space<vmem>>, vector<256x4xbf16>
    tpu.vector_store %arg8[%c0_41, %c16], %33 {strides = array<i32>} : memref<256x36xbf16, #tpu.memory_space<vmem>>, vector<256x4xbf16>,
    %c1_42 = arith.constant 1 : index
    %c2_43 = arith.constant 2 : index
    %c0_44 = arith.constant 0 : index
    %35 = vector.load %arg7[%c1_42, %c2_43, %c0_44] : memref<18x18x4xbf16, #tpu.memory_space<vmem>>, vector<16x16x4xbf16>
    %36 = vector.shape_cast %35 : vector<16x16x4xbf16> to vector<256x4xbf16>
    %c0_45 = arith.constant 0 : index
    %c20 = arith.constant 20 : index
    %37 = vector.load %arg8[%c0_45, %c20] : memref<256x36xbf16, #tpu.memory_space<vmem>>, vector<256x4xbf16>
    tpu.vector_store %arg8[%c0_45, %c20], %36 {strides = array<i32>} : memref<256x36xbf16, #tpu.memory_space<vmem>>, vector<256x4xbf16>,
    %c2_46 = arith.constant 2 : index
    %c0_47 = arith.constant 0 : index
    %c0_48 = arith.constant 0 : index
    %38 = vector.load %arg7[%c2_46, %c0_47, %c0_48] : memref<18x18x4xbf16, #tpu.memory_space<vmem>>, vector<16x16x4xbf16>
    %39 = vector.shape_cast %38 : vector<16x16x4xbf16> to vector<256x4xbf16>
    %c0_49 = arith.constant 0 : index
    %c24 = arith.constant 24 : index
    %40 = vector.load %arg8[%c0_49, %c24] : memref<256x36xbf16, #tpu.memory_space<vmem>>, vector<256x4xbf16>
    tpu.vector_store %arg8[%c0_49, %c24], %39 {strides = array<i32>} : memref<256x36xbf16, #tpu.memory_space<vmem>>, vector<256x4xbf16>,
    %c2_50 = arith.constant 2 : index
    %c1_51 = arith.constant 1 : index
    %c0_52 = arith.constant 0 : index
    %41 = vector.load %arg7[%c2_50, %c1_51, %c0_52] : memref<18x18x4xbf16, #tpu.memory_space<vmem>>, vector<16x16x4xbf16>
    %42 = vector.shape_cast %41 : vector<16x16x4xbf16> to vector<256x4xbf16>
    %c0_53 = arith.constant 0 : index
    %c28 = arith.constant 28 : index
    %43 = vector.load %arg8[%c0_53, %c28] : memref<256x36xbf16, #tpu.memory_space<vmem>>, vector<256x4xbf16>
    tpu.vector_store %arg8[%c0_53, %c28], %42 {strides = array<i32>} : memref<256x36xbf16, #tpu.memory_space<vmem>>, vector<256x4xbf16>,
    %c2_54 = arith.constant 2 : index
    %c2_55 = arith.constant 2 : index
    %c0_56 = arith.constant 0 : index
    %44 = vector.load %arg7[%c2_54, %c2_55, %c0_56] : memref<18x18x4xbf16, #tpu.memory_space<vmem>>, vector<16x16x4xbf16>
    %45 = vector.shape_cast %44 : vector<16x16x4xbf16> to vector<256x4xbf16>
    %c0_57 = arith.constant 0 : index
    %c32 = arith.constant 32 : index
    %46 = vector.load %arg8[%c0_57, %c32] : memref<256x36xbf16, #tpu.memory_space<vmem>>, vector<256x4xbf16>
    tpu.vector_store %arg8[%c0_57, %c32], %45 {strides = array<i32>} : memref<256x36xbf16, #tpu.memory_space<vmem>>, vector<256x4xbf16>,
    %c0_58 = arith.constant 0 : index
    %c0_59 = arith.constant 0 : index
    %47 = vector.load %arg8[%c0_58, %c0_59] : memref<256x36xbf16, #tpu.memory_space<vmem>>, vector<256x36xbf16>
    %c0_60 = arith.constant 0 : index
    %c0_61 = arith.constant 0 : index
    %48 = vector.load %arg4[%c0_60, %c0_61] : memref<36x4xbf16, #tpu.memory_space<vmem>>, vector<36x4xbf16>
    %cst_62 = arith.constant dense<0.000000e+00> : vector<256x4xf32>
    %49 = tpu.matmul %47, %48, %cst_62 {dimension_numbers = #tpu.dot_dimension_numbers<[1], [0], [0], [1], [0, 0, 1, 1], [], []>} : vector<256x36xbf16>, vector<36x4xbf16>, vector<256x4xf32> -> vector<256x4xf32>
    %c0_63 = arith.constant 0 : index
    %c0_64 = arith.constant 0 : index
    %c0_65 = arith.constant 0 : index
    %50 = vector.load %arg5[%c0_63, %c0_64, %c0_65] : memref<1x256x4xf32, #tpu.memory_space<vmem>>, vector<1x256x4xf32>
    %51 = vector.shape_cast %50 : vector<1x256x4xf32> to vector<256x4xf32>
    %52 = vector.shape_cast %49 : vector<256x4xf32> to vector<1x256x4xf32>
    tpu.vector_store %arg5[%c0_63, %c0_64, %c0_65], %52 {strides = array<i32>} : memref<1x256x4xf32, #tpu.memory_space<vmem>>, vector<1x256x4xf32>,
    %cst_66 = arith.constant dense<0.000000e+00> : vector<4xf32>
    %53 = vector.multi_reduction <add>, %49, %cst_66 [0] : vector<256x4xf32> to vector<4xf32>
    %54 = vector.shape_cast %53 : vector<4xf32> to vector<1x4xf32>
    %c0_67 = arith.constant 0 : index
    %c0_68 = arith.constant 0 : index
    %c0_69 = arith.constant 0 : index
    %55 = vector.load %arg6[%c0_67, %c0_68, %c0_69] : memref<1x2x4xf32, #tpu.memory_space<vmem>>, vector<1x1x4xf32>
    %56 = vector.shape_cast %55 : vector<1x1x4xf32> to vector<1x4xf32>
    %57 = vector.shape_cast %54 : vector<1x4xf32> to vector<1x1x4xf32>
    tpu.vector_store %arg6[%c0_67, %c0_68, %c0_69], %57 {strides = array<i32>} : memref<1x2x4xf32, #tpu.memory_space<vmem>>, vector<1x1x4xf32>,
    %58 = arith.mulf %49, %49 : vector<256x4xf32>
    %cst_70 = arith.constant dense<0.000000e+00> : vector<4xf32>
    %59 = vector.multi_reduction <add>, %58, %cst_70 [0] : vector<256x4xf32> to vector<4xf32>
    %60 = vector.shape_cast %59 : vector<4xf32> to vector<1x4xf32>
    %c0_71 = arith.constant 0 : index
    %c1_72 = arith.constant 1 : index
    %c0_73 = arith.constant 0 : index
    %61 = vector.load %arg6[%c0_71, %c1_72, %c0_73] : memref<1x2x4xf32, #tpu.memory_space<vmem>>, vector<1x1x4xf32>
    %62 = vector.shape_cast %61 : vector<1x1x4xf32> to vector<1x4xf32>
    %63 = vector.shape_cast %60 : vector<1x4xf32> to vector<1x1x4xf32>
    tpu.vector_store %arg6[%c0_71, %c1_72, %c0_73], %63 {strides = array<i32>} : memref<1x2x4xf32, #tpu.memory_space<vmem>>, vector<1x1x4xf32>,
    return
  }
  func.func @transform_0(%arg0: i32) -> (i32, i32, i32, i32) {
    %c0_i32 = arith.constant 0 : i32
    %c0_i32_0 = arith.constant 0 : i32
    %c0_i32_1 = arith.constant 0 : i32
    %c0_i32_2 = arith.constant 0 : i32
    return %arg0, %c0_i32, %c0_i32_0, %c0_i32_1 : i32, i32, i32, i32
  }
  func.func @transform_1(%arg0: i32) -> (i32, i32) {
    %c0_i32 = arith.constant 0 : i32
    %c0_i32_0 = arith.constant 0 : i32
    %c0_i32_1 = arith.constant 0 : i32
    return %c0_i32, %c0_i32_0 : i32, i32
  }
  func.func @transform_2(%arg0: i32) -> (i32, i32) {
    %c0_i32 = arith.constant 0 : i32
    %c0_i32_0 = arith.constant 0 : i32
    %c0_i32_1 = arith.constant 0 : i32
    return %c0_i32, %c0_i32_0 : i32, i32
  }
  func.func @transform_3(%arg0: i32) -> (i32, i32) {
    %c0_i32 = arith.constant 0 : i32
    %c0_i32_0 = arith.constant 0 : i32
    %c0_i32_1 = arith.constant 0 : i32
    return %c0_i32, %c0_i32_0 : i32, i32
  }
  func.func @transform_4(%arg0: i32) -> (i32, i32, i32) {
    %c0_i32 = arith.constant 0 : i32
    %c0_i32_0 = arith.constant 0 : i32
    %c0_i32_1 = arith.constant 0 : i32
    return %arg0, %c0_i32, %c0_i32_0 : i32, i32, i32
  }
  func.func @transform_5(%arg0: i32) -> (i32, i32, i32) {
    %c0_i32 = arith.constant 0 : i32
    %c0_i32_0 = arith.constant 0 : i32
    %c0_i32_1 = arith.constant 0 : i32
    return %arg0, %c0_i32, %c0_i32_0 : i32, i32, i32
  }
}

module attributes {stable_mosaic.version = 11 : i64} {
  func.func @_bnrelu_conv1x1_stats_kernel(%arg0: i32, %arg1: memref<128x4xf32, #tpu.memory_space<vmem>>, %arg2: memref<1x4xf32, #tpu.memory_space<vmem>>, %arg3: memref<1x4xf32, #tpu.memory_space<vmem>>, %arg4: memref<4x16xbf16, #tpu.memory_space<vmem>>, %arg5: memref<128x16xf32, #tpu.memory_space<vmem>>, %arg6: memref<1x2x16xf32, #tpu.memory_space<vmem>>) attributes {dimension_semantics = [#tpu.dimension_semantics<parallel>], iteration_bounds = array<i64: 4>, scalar_prefetch = 0 : i64, scratch_operands = 0 : i64, tpu.core_type = #tpu.core_type<tc>, window_params = [{transform_indices = @transform_0, window_bounds = array<i64: 128, 4>}, {pipeline_mode = #tpu.pipeline_mode<synchronous>, transform_indices = @transform_1, window_bounds = array<i64: 1, 4>}, {pipeline_mode = #tpu.pipeline_mode<synchronous>, transform_indices = @transform_2, window_bounds = array<i64: 1, 4>}, {pipeline_mode = #tpu.pipeline_mode<synchronous>, transform_indices = @transform_3, window_bounds = array<i64: 4, 16>}, {transform_indices = @transform_4, window_bounds = array<i64: 128, 16>}, {transform_indices = @transform_5, window_bounds = array<i64: 1, 2, 16>}]} {
    %c0 = arith.constant 0 : index
    %c0_0 = arith.constant 0 : index
    %0 = vector.load %arg1[%c0, %c0_0] : memref<128x4xf32, #tpu.memory_space<vmem>>, vector<128x4xf32>
    %c0_1 = arith.constant 0 : index
    %c0_2 = arith.constant 0 : index
    %1 = vector.load %arg2[%c0_1, %c0_2] : memref<1x4xf32, #tpu.memory_space<vmem>>, vector<1x4xf32>
    %2 = vector.broadcast %1 : vector<1x4xf32> to vector<128x4xf32>
    %3 = arith.mulf %0, %2 : vector<128x4xf32>
    %c0_3 = arith.constant 0 : index
    %c0_4 = arith.constant 0 : index
    %4 = vector.load %arg3[%c0_3, %c0_4] : memref<1x4xf32, #tpu.memory_space<vmem>>, vector<1x4xf32>
    %5 = vector.broadcast %4 : vector<1x4xf32> to vector<128x4xf32>
    %6 = arith.addf %3, %5 : vector<128x4xf32>
    %cst = arith.constant 0.000000e+00 : f32
    %7 = vector.broadcast %cst : f32 to vector<128x4xf32>
    %8 = arith.maximumf %6, %7 : vector<128x4xf32>
    %9 = arith.truncf %8 : vector<128x4xf32> to vector<128x4xbf16>
    %c0_5 = arith.constant 0 : index
    %c0_6 = arith.constant 0 : index
    %10 = vector.load %arg4[%c0_5, %c0_6] : memref<4x16xbf16, #tpu.memory_space<vmem>>, vector<4x16xbf16>
    %cst_7 = arith.constant dense<0.000000e+00> : vector<128x16xf32>
    %11 = tpu.matmul %9, %10, %cst_7 {dimension_numbers = #tpu.dot_dimension_numbers<[1], [0], [0], [1], [0, 0, 1, 1], [], []>} : vector<128x4xbf16>, vector<4x16xbf16>, vector<128x16xf32> -> vector<128x16xf32>
    %c0_8 = arith.constant 0 : index
    %c0_9 = arith.constant 0 : index
    %12 = vector.load %arg5[%c0_8, %c0_9] : memref<128x16xf32, #tpu.memory_space<vmem>>, vector<128x16xf32>
    tpu.vector_store %arg5[%c0_8, %c0_9], %11 {strides = array<i32>} : memref<128x16xf32, #tpu.memory_space<vmem>>, vector<128x16xf32>,
    %cst_10 = arith.constant dense<0.000000e+00> : vector<16xf32>
    %13 = vector.multi_reduction <add>, %11, %cst_10 [0] : vector<128x16xf32> to vector<16xf32>
    %14 = vector.shape_cast %13 : vector<16xf32> to vector<1x16xf32>
    %c0_11 = arith.constant 0 : index
    %c0_12 = arith.constant 0 : index
    %c0_13 = arith.constant 0 : index
    %15 = vector.load %arg6[%c0_11, %c0_12, %c0_13] : memref<1x2x16xf32, #tpu.memory_space<vmem>>, vector<1x1x16xf32>
    %16 = vector.shape_cast %15 : vector<1x1x16xf32> to vector<1x16xf32>
    %17 = vector.shape_cast %14 : vector<1x16xf32> to vector<1x1x16xf32>
    tpu.vector_store %arg6[%c0_11, %c0_12, %c0_13], %17 {strides = array<i32>} : memref<1x2x16xf32, #tpu.memory_space<vmem>>, vector<1x1x16xf32>,
    %18 = arith.mulf %11, %11 : vector<128x16xf32>
    %cst_14 = arith.constant dense<0.000000e+00> : vector<16xf32>
    %19 = vector.multi_reduction <add>, %18, %cst_14 [0] : vector<128x16xf32> to vector<16xf32>
    %20 = vector.shape_cast %19 : vector<16xf32> to vector<1x16xf32>
    %c0_15 = arith.constant 0 : index
    %c1 = arith.constant 1 : index
    %c0_16 = arith.constant 0 : index
    %21 = vector.load %arg6[%c0_15, %c1, %c0_16] : memref<1x2x16xf32, #tpu.memory_space<vmem>>, vector<1x1x16xf32>
    %22 = vector.shape_cast %21 : vector<1x1x16xf32> to vector<1x16xf32>
    %23 = vector.shape_cast %20 : vector<1x16xf32> to vector<1x1x16xf32>
    tpu.vector_store %arg6[%c0_15, %c1, %c0_16], %23 {strides = array<i32>} : memref<1x2x16xf32, #tpu.memory_space<vmem>>, vector<1x1x16xf32>,
    return
  }
  func.func @transform_0(%arg0: i32) -> (i32, i32) {
    %c0_i32 = arith.constant 0 : i32
    %c0_i32_0 = arith.constant 0 : i32
    return %arg0, %c0_i32 : i32, i32
  }
  func.func @transform_1(%arg0: i32) -> (i32, i32) {
    %c0_i32 = arith.constant 0 : i32
    %c0_i32_0 = arith.constant 0 : i32
    %c0_i32_1 = arith.constant 0 : i32
    return %c0_i32, %c0_i32_0 : i32, i32
  }
  func.func @transform_2(%arg0: i32) -> (i32, i32) {
    %c0_i32 = arith.constant 0 : i32
    %c0_i32_0 = arith.constant 0 : i32
    %c0_i32_1 = arith.constant 0 : i32
    return %c0_i32, %c0_i32_0 : i32, i32
  }
  func.func @transform_3(%arg0: i32) -> (i32, i32) {
    %c0_i32 = arith.constant 0 : i32
    %c0_i32_0 = arith.constant 0 : i32
    %c0_i32_1 = arith.constant 0 : i32
    return %c0_i32, %c0_i32_0 : i32, i32
  }
  func.func @transform_4(%arg0: i32) -> (i32, i32) {
    %c0_i32 = arith.constant 0 : i32
    %c0_i32_0 = arith.constant 0 : i32
    return %arg0, %c0_i32 : i32, i32
  }
  func.func @transform_5(%arg0: i32) -> (i32, i32, i32) {
    %c0_i32 = arith.constant 0 : i32
    %c0_i32_0 = arith.constant 0 : i32
    %c0_i32_1 = arith.constant 0 : i32
    return %arg0, %c0_i32, %c0_i32_0 : i32, i32, i32
  }
}

module attributes {stable_mosaic.version = 11 : i64} {
  func.func @_bn_add_relu_kernel(%arg0: i32, %arg1: memref<128x16xf32, #tpu.memory_space<vmem>>, %arg2: memref<1x16xf32, #tpu.memory_space<vmem>>, %arg3: memref<1x16xf32, #tpu.memory_space<vmem>>, %arg4: memref<128x16xf32, #tpu.memory_space<vmem>>, %arg5: memref<128x16xf32, #tpu.memory_space<vmem>>) attributes {dimension_semantics = [#tpu.dimension_semantics<parallel>], iteration_bounds = array<i64: 4>, scalar_prefetch = 0 : i64, scratch_operands = 0 : i64, tpu.core_type = #tpu.core_type<tc>, window_params = [{transform_indices = @transform_0, window_bounds = array<i64: 128, 16>}, {pipeline_mode = #tpu.pipeline_mode<synchronous>, transform_indices = @transform_1, window_bounds = array<i64: 1, 16>}, {pipeline_mode = #tpu.pipeline_mode<synchronous>, transform_indices = @transform_2, window_bounds = array<i64: 1, 16>}, {transform_indices = @transform_3, window_bounds = array<i64: 128, 16>}, {transform_indices = @transform_4, window_bounds = array<i64: 128, 16>}]} {
    %c0 = arith.constant 0 : index
    %c0_0 = arith.constant 0 : index
    %0 = vector.load %arg1[%c0, %c0_0] : memref<128x16xf32, #tpu.memory_space<vmem>>, vector<128x16xf32>
    %c0_1 = arith.constant 0 : index
    %c0_2 = arith.constant 0 : index
    %1 = vector.load %arg2[%c0_1, %c0_2] : memref<1x16xf32, #tpu.memory_space<vmem>>, vector<1x16xf32>
    %2 = vector.broadcast %1 : vector<1x16xf32> to vector<128x16xf32>
    %3 = arith.mulf %0, %2 : vector<128x16xf32>
    %c0_3 = arith.constant 0 : index
    %c0_4 = arith.constant 0 : index
    %4 = vector.load %arg3[%c0_3, %c0_4] : memref<1x16xf32, #tpu.memory_space<vmem>>, vector<1x16xf32>
    %5 = vector.broadcast %4 : vector<1x16xf32> to vector<128x16xf32>
    %6 = arith.addf %3, %5 : vector<128x16xf32>
    %c0_5 = arith.constant 0 : index
    %c0_6 = arith.constant 0 : index
    %7 = vector.load %arg4[%c0_5, %c0_6] : memref<128x16xf32, #tpu.memory_space<vmem>>, vector<128x16xf32>
    %8 = arith.addf %6, %7 : vector<128x16xf32>
    %cst = arith.constant 0.000000e+00 : f32
    %9 = vector.broadcast %cst : f32 to vector<128x16xf32>
    %10 = arith.maximumf %8, %9 : vector<128x16xf32>
    %c0_7 = arith.constant 0 : index
    %c0_8 = arith.constant 0 : index
    %11 = vector.load %arg5[%c0_7, %c0_8] : memref<128x16xf32, #tpu.memory_space<vmem>>, vector<128x16xf32>
    tpu.vector_store %arg5[%c0_7, %c0_8], %10 {strides = array<i32>} : memref<128x16xf32, #tpu.memory_space<vmem>>, vector<128x16xf32>,
    return
  }
  func.func @transform_0(%arg0: i32) -> (i32, i32) {
    %c0_i32 = arith.constant 0 : i32
    %c0_i32_0 = arith.constant 0 : i32
    return %arg0, %c0_i32 : i32, i32
  }
  func.func @transform_1(%arg0: i32) -> (i32, i32) {
    %c0_i32 = arith.constant 0 : i32
    %c0_i32_0 = arith.constant 0 : i32
    %c0_i32_1 = arith.constant 0 : i32
    return %c0_i32, %c0_i32_0 : i32, i32
  }
  func.func @transform_2(%arg0: i32) -> (i32, i32) {
    %c0_i32 = arith.constant 0 : i32
    %c0_i32_0 = arith.constant 0 : i32
    %c0_i32_1 = arith.constant 0 : i32
    return %c0_i32, %c0_i32_0 : i32, i32
  }
  func.func @transform_3(%arg0: i32) -> (i32, i32) {
    %c0_i32 = arith.constant 0 : i32
    %c0_i32_0 = arith.constant 0 : i32
    return %arg0, %c0_i32 : i32, i32
  }
  func.func @transform_4(%arg0: i32) -> (i32, i32) {
    %c0_i32 = arith.constant 0 : i32
    %c0_i32_0 = arith.constant 0 : i32
    return %arg0, %c0_i32 : i32, i32
  }
}

</mosaic_0001>

<bundles_post_ra>
// kernel: bottleneck_forward.4
= control target key start
LH: loop header
LB: loop body
LE: loop exit
PB: predicated region body
PF: predicated region fallthrough
CT: control target
= control target key end

     0   :  { %9 = vsyncpa [#allocation3], 0  ;;  %s902_s0 = inlined_call_operand.hbm [shape: f32[512,16], index: 0, kind: input, shape index: {}]   ;;  %s903_s1 = inlined_call_operand.vmem [shape: bf16[16,4], index: 1, kind: input, shape index: {}]   ;;  %s904_s2 = inlined_call_operand.vmem [shape: f32[512,4], index: 2, kind: output, shape index: {0}]   ;;  %s905_s3 = inlined_call_operand.vmem [shape: f32[4,2,4], index: 3, kind: output, shape index: {1}]  }
   0x1   :  { %11 = vsyncpa [#allocation3 + $0x1], 0  ;;  %s681_s12 = smov 0   ;;  %s683_s13 = smov 0  }
   0x2   :  { %s685_s14 = smov 0   ;;  %s687_s15 = smov 0  }
   0x3 LB: > { %s700_s16 = sadd.s32 4294967295, %s657_s15   ;;  %s703_s17 = sadd.s32 1, %s657_s15   ;;  %s657_s15 = sphi %s687_s15, %s912_s15   ;;  %s653_s14 = sphi %s685_s14, %s911_s14   ;;  %s649_s13 = sphi %s683_s13, %s910_s13   ;;  %s645_s12 = sphi %s681_s12, %s909_s12  }
   0x4   : > { %s21_s18 = ssub.s32 %s657_s15, %s703_s17  ;;  %s24_s19 = sadd.s32 1, %s653_s14 }
   0x5   : > { %p22_p0 = scmp.eq.s32.totalorder %s21_s18, 0  ;;  %p31_p1 = scmp.ne.s32.totalorder %s653_s14, %s649_s13 }
   0x6   : > { %p32_p2 = scmp.eq.s32.totalorder %s657_s15, 0  ;;  %p37_p3 = scmp.ne.s32.totalorder %s649_s13, %s645_s12 }
   0x7   : > { %s713_s20 = scalar_select %p22_p0, %s653_s14, %s24_s19  }
   0x8   : > { %p715_p4 = por %p32_p2, %p31_p1  ;;  %p38_p5 = scmp.eq.s32.totalorder %s700_s16, 0 }
   0x9   : > { %p558_p6 = scmp.lt.s32.totalorder %s657_s15, 4  ;;  %s137_s23 = sand.u32 1, %s653_s14  }
   0xa   : > { %p721_p7 = por %p38_p5, %p37_p3  ;;  %s525_s24 = sshll.u32 %s137_s23, 7 }
   0xb   : > { %s547_s25 = sshll.u32 %s657_s15, 7  ;;  %s141_s29 = scalar_lea.vmem [#allocation2], %s525_s24 }
   0xc   : > { %s146_s28 = scalar_lea.hbm %s902_s0, %s547_s25  ;;  %s149_s30 = sshll.u32 %s141_s29, 4  ;;  %s150_s30 = int_to_ptr.vmem [resolvable:$true] %s149_s30 }
   0xd   : > { %s147_s4 = sshll.u32 %s146_s28, 4  ;;  %p732_p8 = pnand %p558_p6, %p715_p4  ;;  %s148_s4 = int_to_ptr.hbm [resolvable:$true] %s147_s4 }
   0xe   : > { %p528_p9 = scmp.ge.s32.totalorder %s657_s15, 1  ;;  %s138_s6 = scalar_lea.sflag [#allocation3], %s137_s23 }
   0xf   : > { %s593_s7 = sshra.s32 %s148_s4, 4  ;;  %p597_p11 = pneg %p732_p8  ;;  %s594_s7 = int_to_ptr.hbm [resolvable:$true] %s593_s7 }
  0x10   : > { %s595_s8 = scalar_lea.hbm %s594_s7, 128  ;;  %s600_s11 = scalar_lea.hbm %s902_s0, 512 }
  0x11   : > { %p596_p10 = scmp.ne.s32.totalorder %s594_s7, %s595_s8  ;;  %p601_p0 = scmp.lt.s32.totalorder %s594_s7, %s902_s0 }
  0x12   : > { %p602_p1 = scmp.lt.s32.totalorder %s600_s11, %s595_s8 }
  0x13   : > { %p598_p12 = pnand %p597_p11, %p596_p10 }
  0x14   : > { %p603_p2 = por %p602_p1, %p601_p0 }
  0x15   : > { %p599_p13 = pneg %p598_p12 }
  0x17   : > { %p604_p3 = pnand %p603_p2, %p599_p13 }
  0x19   : > { %607 = shalt.err (!%p604_p3)
}
  0x1a   : > { %s659_s19 = smov 128   ;;  %s660_s21 = smov 8  }
  0x1b   : > { %557 = dma.hbm_to_vmem [thread:$0]  (!%p732_p8), %s148_s4, 2048, %s150_s30, %s138_s6, %s659_s19, %s659_s19, %s660_s21  }
  0x1c   : > { %p157_p4 = scmp.lt.s32.totalorder %s657_s15, 5 }
  0x1e   : > { %p158_p5 = pnand %p528_p9, %p157_p4 }
  0x1f   : > { %s163_s23 = sand.u32 (!%p158_p5), 1, %s649_s13  }
  0x20   : > { %161 = sbr.rel (%p158_p5) target bundleno = 234 (0xea), region = 28  ;;  %s529_s24 = sshll.u32 (!%p158_p5), %s163_s23, 7 }
  0x21   : > { %s164_s25 = scalar_lea.sflag (!%p158_p5), [#allocation3], %s163_s23  ;;  %s751_s26 = scalar_lea.vmem (!%p158_p5), [#allocation2], %s529_s24 }
  0x25   : > { %640 = dma.done.wait (%p721_p7), %s164_s25, 2048  }
  0x26   : > { %642 = vsyncadd (%p721_p7), %s164_s25, 4294965248  ;;  %v548_v0 = vld [vmem:[%s903_s1] sm:$0xff]  ;;  %v208_v2 = vld [vmem:[%s751_s26 + $0x8] sm:$0xff]  ;;  %vm239_vm0 = vcmask 130048   ;;  %s530_s15 = sshll.u32 %s700_s16, 4  ;;  %vm313_vm1 = vcmask 31744  }
  0x27   : > { %v207_v1 = vld [vmem:[%s751_s26] sm:$0xff]  ;;  %v212_v5 = vld [vmem:[%s751_s26 + $0x28] sm:$0xff]  ;;  %271 = vmatpush.bf16.msra.mxu0 %v548_v0  ;;  %549 = vmatpush.bf16.msra.mxu1 %v548_v0  ;;  %v209_v13 = vld [vmem:[%s751_s26 + $0x10] sm:$0xff]  ;;  %p197_p6 = scmp.lt.s32.totalorder %s530_s15, 63  ;;  %p202_p7 = scmp.lt.s32.totalorder %s700_s16, 3  ;;  %vm367_vm2 = vcmask 24576  }
  0x28   : > { %v223_v3 = vpack.c.bf16 %v208_v2, %v207_v1  ;;  %v211_v4 = vld [vmem:[%s751_s26 + $0x20] sm:$0xff]  ;;  %v216_v8 = vld [vmem:[%s751_s26 + $0x48] sm:$0xff]  ;;  %550 = vmatpush.bf16.msra.mxu2 %v548_v0  ;;  %551 = vmatpush.bf16.msra.mxu3 %v548_v0  ;;  %v210_v14 = vld [vmem:[%s751_s26 + $0x18] sm:$0xff] }
  0x29   : > { %v215_v6 = vld [vmem:[%s751_s26 + $0x40] sm:$0xff]  ;;  %v225_v7 = vpack.c.bf16 %v212_v5, %v211_v4  ;;  %v220_v10 = vld [vmem:[%s751_s26 + $0x68] sm:$0xff]  ;;  %v213_v15 = vld [vmem:[%s751_s26 + $0x30] sm:$0xff]  ;;  %v224_v21 = vpack.c.bf16 %v210_v14, %v209_v13  ;;  %s914_s15 = smov (!%p197_p6, %s530_s15), 63  ;;  %s916_s16 = smov (!%p202_p7, %s700_s16), 3 }
  0x2a   : > { %v219_v9 = vld [vmem:[%s751_s26 + $0x60] sm:$0xff]  ;;  %v227_v11 = vpack.c.bf16 %v216_v8, %v215_v6  ;;  %537 = vmatmul.msk.bf16.vlgmr.msra.gmra.mxu0 %vm239_vm0, %v223_v3  ;;  %v214_v16 = vld [vmem:[%s751_s26 + $0x38] sm:$0xff]  ;;  %v217_v17 = vld [vmem:[%s751_s26 + $0x50] sm:$0xff]  ;;  %s531_s22 = sshll.u32 %s914_s15, 3  ;;  %s532_s5 = sshll.u32 %s916_s16, 1 }
  0x2b   : > { %v229_v12 = vpack.c.bf16 %v220_v10, %v219_v9  ;;  %539 = vmatmul.msk.bf16.vlgmr.msra.gmra.mxu1 %vm239_vm0, %v225_v7  ;;  %v218_v18 = vld [vmem:[%s751_s26 + $0x58] sm:$0xff]  ;;  %v221_v19 = vld [vmem:[%s751_s26 + $0x70] sm:$0xff]  ;;  %v226_v22 = vpack.c.bf16 %v214_v16, %v213_v15  ;;  %s788_s4 = scalar_lea.vmem %s904_s2, %s531_s22  ;;  %s205_s8 = scalar_lea.vmem %s905_s3, %s532_s5 }
  0x2c   : > { %541 = vmatmul.msk.bf16.vlgmr.msra.gmra.mxu2 %vm239_vm0, %v227_v11  ;;  %v222_v20 = vld [vmem:[%s751_s26 + $0x78] sm:$0xff]  ;;  %v228_v23 = vpack.c.bf16 %v218_v18, %v217_v17 }
  0x2d   : > { %543 = vmatmul.msk.bf16.vlgmr.msra.gmra.mxu3 %vm239_vm0, %v229_v12  ;;  %v230_v24 = vpack.c.bf16 %v222_v20, %v221_v19 }
  0x3a   : > { %538 = vmatmul.msk.bf16.gmra.mxu0 %vm239_vm0, %v224_v21 }
  0x3b   : > { %540 = vmatmul.msk.bf16.gmra.mxu1 %vm239_vm0, %v226_v22 }
  0x3c   : > { %542 = vmatmul.msk.bf16.gmra.mxu2 %vm239_vm0, %v228_v23 }
  0x3d   : > { %544 = vmatmul.msk.bf16.gmra.mxu3 %vm239_vm0, %v230_v24 }
  0xa7   : > { %v273_v25 = vpop.f32.mrf.mxu0 }
  0xa8   : > { %v283_v26 = vpop.f32.mrf.mxu1  ;;  %314 = vst.msk [vmem:[%s788_s4] sm:$0xff] %vm313_vm1, %v273_v25  ;;  %v369_v36 = vmul.f32 %v273_v25, %v273_v25  ;;  %v330_v39 = vsel %vm313_vm1, %v273_v25, 0.0 }
  0xa9   : > { %318 = vst.msk [vmem:[%s788_s4 + $0x20] sm:$0xff] %vm313_vm1, %v283_v26  ;;  %v373_v51 = vmul.f32 %v283_v26, %v283_v26  ;;  %v337_v56 = vsel %vm313_vm1, %v283_v26, 0.0 }
  0xaa   : > { %v385_v43 = vsel %vm313_vm1, %v369_v36, 0.0 }
  0xab   : > { %v392_v61 = vsel %vm313_vm1, %v373_v51, 0.0 }
  0xaf   : > { %v794_v27 = vpop.f32.mrf.mxu2  ;;  %v275_v29 = vpop.f32.mrf.mxu0 }
  0xb0   : > { %v796_v28 = vpop.f32.mrf.mxu3  ;;  %v285_v30 = vpop.f32.mrf.mxu1  ;;  %322 = vst.msk [vmem:[%s788_s4 + $0x40] sm:$0xff] %vm313_vm1, %v794_v27  ;;  %v370_v35 = vmul.f32 %v275_v29, %v275_v29  ;;  %v331_v37 = vsel %vm313_vm1, %v275_v29, 0.0  ;;  %v377_v9 = vmul.f32 %v794_v27, %v794_v27  ;;  %v345_v14 = vsel %vm313_vm1, %v794_v27, 0.0 }
  0xb1   : > { %315 = vst.msk [vmem:[%s788_s4 + $0x8] sm:$0xff] %vm313_vm1, %v275_v29  ;;  %v332_v42 = vadd.f32 %v331_v37, %v330_v39  ;;  %v374_v57 = vmul.f32 %v285_v30, %v285_v30  ;;  %v339_v62 = vsel %vm313_vm1, %v285_v30, 0.0 }
  0xb2   : > { %319 = vst.msk [vmem:[%s788_s4 + $0x28] sm:$0xff] %vm313_vm1, %v285_v30  ;;  %v386_v40 = vsel %vm313_vm1, %v370_v35, 0.0  ;;  %v400_v19 = vsel %vm313_vm1, %v377_v9, 0.0  ;;  %v381_v30 = vmul.f32 %v796_v28, %v796_v28 }
  0xb3   : > { %326 = vst.msk [vmem:[%s788_s4 + $0x60] sm:$0xff] %vm313_vm1, %v796_v28  ;;  %v387_v47 = vadd.f32 %v386_v40, %v385_v43  ;;  %v394_v2 = vsel %vm313_vm1, %v374_v57, 0.0 }
  0xb7   : > { %v808_v31 = vpop.f32.mrf.mxu2  ;;  %v278_v33 = vpop.f32.mrf.mxu0 }
  0xb8   : > { %v810_v32 = vpop.f32.mrf.mxu3  ;;  %v288_v34 = vpop.f32.mrf.mxu1  ;;  %323 = vst.msk [vmem:[%s788_s4 + $0x48] sm:$0xff] %vm313_vm1, %v808_v31  ;;  %v371_v38 = vmul.f32 %v278_v33, %v278_v33  ;;  %v333_v41 = vsel %vm313_vm1, %v278_v33, 0.0  ;;  %v378_v15 = vmul.f32 %v808_v31, %v808_v31  ;;  %v347_v20 = vsel %vm313_vm1, %v808_v31, 0.0 }
  0xb9   : > { %316 = vst.msk [vmem:[%s788_s4 + $0x10] sm:$0xff] %vm313_vm1, %v278_v33  ;;  %v334_v48 = vadd.f32 %v333_v41, %v332_v42  ;;  %v375_v63 = vmul.f32 %v288_v34, %v288_v34  ;;  %v341_v3 = vsel %vm313_vm1, %v288_v34, 0.0  ;;  %v353_v31 = vsel %vm313_vm1, %v796_v28, 0.0 }
  0xba   : > { %320 = vst.msk [vmem:[%s788_s4 + $0x30] sm:$0xff] %vm313_vm1, %v288_v34  ;;  %v388_v44 = vsel %vm313_vm1, %v371_v38, 0.0  ;;  %v402_v24 = vsel %vm313_vm1, %v378_v15, 0.0  ;;  %v382_v37 = vmul.f32 %v810_v32, %v810_v32  ;;  %v408_v41 = vsel %vm313_vm1, %v381_v30, 0.0 }
  0xbb   : > { %327 = vst.msk [vmem:[%s788_s4 + $0x68] sm:$0xff] %vm313_vm1, %v810_v32  ;;  %v389_v54 = vadd.f32 %v388_v44, %v387_v47  ;;  %v396_v10 = vsel %vm313_vm1, %v375_v63, 0.0  ;;  %v355_v42 = vsel %vm313_vm1, %v810_v32, 0.0 }
  0xbc   : > { %v410_v28 = vsel %vm313_vm1, %v382_v37, 0.0 }
  0xbf   : > { %v298_v45 = vpop.f32.mrf.mxu2  ;;  %v280_v49 = vpop.f32.mrf.mxu0 }
  0xc0   : > { %v828_v46 = vpop.f32.mrf.mxu3  ;;  %v290_v50 = vpop.f32.mrf.mxu1  ;;  %324 = vst.msk [vmem:[%s788_s4 + $0x50] sm:$0xff] %vm313_vm1, %v298_v45  ;;  %v335_v52 = vsel %vm313_vm1, %v280_v49, 0.0  ;;  %v372_v53 = vmul.f32 %v280_v49, %v280_v49  ;;  %v379_v21 = vmul.f32 %v298_v45, %v298_v45  ;;  %v349_v25 = vsel %vm313_vm1, %v298_v45, 0.0 }
  0xc1   : > { %317 = vst.msk [vmem:[%s788_s4 + $0x18] sm:$0xff] %vm313_vm1, %v280_v49  ;;  %v336_v55 = vadd.f32 %v335_v52, %v334_v48  ;;  %v376_v4 = vmul.f32 %v290_v50, %v290_v50  ;;  %v343_v11 = vsel %vm313_vm1, %v290_v50, 0.0  ;;  %v383_v43 = vmul.f32 %v828_v46, %v828_v46 }
  0xc2   : > { %321 = vst.msk [vmem:[%s788_s4 + $0x38] sm:$0xff] %vm313_vm1, %v290_v50  ;;  %v390_v58 = vsel %vm313_vm1, %v372_v53, 0.0  ;;  %v404_v33 = vsel %vm313_vm1, %v379_v21, 0.0  ;;  %v357_v47 = vsel %vm313_vm1, %v828_v46, 0.0 }
  0xc3   : > { %328 = vst.msk [vmem:[%s788_s4 + $0x70] sm:$0xff] %vm313_vm1, %v828_v46  ;;  %v338_v59 = vadd.f32 %v337_v56, %v336_v55  ;;  %v391_v60 = vadd.f32 %v390_v58, %v389_v54  ;;  %v398_v16 = vsel %vm313_vm1, %v376_v4, 0.0  ;;  %v412_v51 = vsel %vm313_vm1, %v383_v43, 0.0 }
  0xc5   : > { %v393_v0 = vadd.f32 %v392_v61, %v391_v60  ;;  %v340_v1 = vadd.f32 %v339_v62, %v338_v59 }
  0xc7   : > { %v300_v5 = vpop.f32.mrf.mxu2  ;;  %v342_v7 = vadd.f32 %v341_v3, %v340_v1  ;;  %v395_v8 = vadd.f32 %v394_v2, %v393_v0 }
  0xc8   : > { %v310_v6 = vpop.f32.mrf.mxu3  ;;  %325 = vst.msk [vmem:[%s788_s4 + $0x58] sm:$0xff] %vm313_vm1, %v300_v5  ;;  %v380_v26 = vmul.f32 %v300_v5, %v300_v5  ;;  %v351_v34 = vsel %vm313_vm1, %v300_v5, 0.0 }
  0xc9   : > { %329 = vst.msk [vmem:[%s788_s4 + $0x78] sm:$0xff] %vm313_vm1, %v310_v6  ;;  %v344_v12 = vadd.f32 %v343_v11, %v342_v7  ;;  %v397_v13 = vadd.f32 %v396_v10, %v395_v8  ;;  %v384_v48 = vmul.f32 %v310_v6, %v310_v6  ;;  %v359_v52 = vsel %vm313_vm1, %v310_v6, 0.0 }
  0xca   : > { %v406_v38 = vsel %vm313_vm1, %v380_v26, 0.0 }
  0xcb   : > { %v346_v17 = vadd.f32 %v345_v14, %v344_v12  ;;  %v399_v18 = vadd.f32 %v398_v16, %v397_v13  ;;  %v414_v54 = vsel %vm313_vm1, %v384_v48, 0.0 }
  0xcd   : > { %v401_v22 = vadd.f32 %v400_v19, %v399_v18  ;;  %v348_v23 = vadd.f32 %v347_v20, %v346_v17 }
  0xcf   : > { %v350_v27 = vadd.f32 %v349_v25, %v348_v23  ;;  %v403_v29 = vadd.f32 %v402_v24, %v401_v22 }
  0xd1   : > { %v405_v35 = vadd.f32 %v404_v33, %v403_v29  ;;  %v352_v36 = vadd.f32 %v351_v34, %v350_v27 }
  0xd3   : > { %v354_v39 = vadd.f32 %v353_v31, %v352_v36  ;;  %v407_v40 = vadd.f32 %v406_v38, %v405_v35 }
  0xd5   : > { %v409_v44 = vadd.f32 %v408_v41, %v407_v40  ;;  %v356_v45 = vadd.f32 %v355_v42, %v354_v39 }
  0xd7   : > { %v358_v49 = vadd.f32 %v357_v47, %v356_v45  ;;  %v411_v50 = vadd.f32 %v410_v28, %v409_v44 }
  0xd9   : > { %v413_v53 = vadd.f32 %v412_v51, %v411_v50  ;;  %v360_v32 = vadd.f32 %v359_v52, %v358_v49 }
  0xdb   : > { %v361_v55 = vrot.slane %v360_v32, 4  ;;  %v415_v56 = vadd.f32 %v414_v54, %v413_v53 }
  0xdd   : > { %v362_v57 = vadd.f32 %v361_v55, %v360_v32  ;;  %v416_v58 = vrot.slane %v415_v56, 4 }
  0xdf   : > { %v363_v59 = vrot.slane %v362_v57, 2  ;;  %v417_v60 = vadd.f32 %v416_v58, %v415_v56 }
  0xe1   : > { %v364_v46 = vadd.f32 %v363_v59, %v362_v57  ;;  %v418_v61 = vrot.slane %v417_v60, 2 }
  0xe3   : > { %v365_v62 = vrot.slane %v364_v46, 1  ;;  %v419_v63 = vadd.f32 %v418_v61, %v417_v60 }
  0xe5   : > { %v366_v0 = vadd.f32 %v365_v62, %v364_v46  ;;  %v420_v1 = vrot.slane %v419_v63, 1 }
  0xe7   : > { %368 = vst.msk [vmem:[%s205_s8] sm:$0x1] %vm367_vm2, %v366_v0  ;;  %v421_v2 = vadd.f32 %v420_v1, %v419_v63 }
  0xe9   : > { %422 = vst.msk [vmem:[%s205_s8 + $0x1] sm:$0x1] %vm367_vm2, %v421_v2 }
  0xea PF: > { %p14_p8 = scmp.ge.s32.totalorder %s703_s17, 6   ;;  %s909_s12 = smov %s649_s13 }
  0xeb   : > { %s910_s13 = smov %s653_s14  ;;  %s911_s14 = smov %s713_s20 }
  0xec   : > { %s912_s15 = smov %s703_s17  ;;  %16 = sbr.rel (!%p14_p8) target bundleno = 3 (0x3), region = 80 }
  0xf1   :  { %459 = vsyncpa [#allocation3], 1 }
  0xf2   :  { %461 = vsyncpa [#allocation3 + $0x1], 1 }

// kernel: bottleneck_forward.7
= control target key start
LH: loop header
LB: loop body
LE: loop exit
PB: predicated region body
PF: predicated region fallthrough
CT: control target
= control target key end

     0   :  { %9 = vsyncpa [#allocation3], 0  ;;  %s907_s0 = inlined_call_operand.vmem [shape: f32[512,16], index: 0, kind: input, shape index: {}]   ;;  %s908_s1 = inlined_call_operand.vmem [shape: f32[1,16], index: 1, kind: input, shape index: {}]   ;;  %s909_s2 = inlined_call_operand.vmem [shape: f32[1,16], index: 2, kind: input, shape index: {}]   ;;  %s910_s3 = inlined_call_operand.hbm [shape: f32[512,16], index: 3, kind: input, shape index: {}]   ;;  %s911_s4 = inlined_call_operand.hbm [shape: f32[512,16], index: 4, kind: output, shape index: {}]  }
   0x1   :  { %11 = vsyncpa [#allocation3 + $0x1], 0 }
   0x2   :  { %12 = vsyncpa [#allocation4], 0 }
   0x3   :  { %14 = vsyncpa [#allocation4 + $0x1], 0  ;;  %s661_s15 = smov 0   ;;  %s663_s16 = smov 0  }
   0x4   :  { %s665_s17 = smov 0   ;;  %s667_s18 = smov 0  }
   0x5 LB: > { %s682_s19 = sadd.s32 4294967295, %s630_s18   ;;  %s464_s20 = sadd.s32 4294967294, %s630_s18   ;;  %s630_s18 = sphi %s667_s18, %s920_s18   ;;  %s626_s17 = sphi %s665_s17, %s919_s17   ;;  %s622_s16 = sphi %s663_s16, %s918_s16   ;;  %s618_s15 = sphi %s661_s15, %s917_s15  }
   0x6   : > { %s686_s21 = sadd.s32 1, %s630_s18   ;;  %s95_s22 = sadd.s32 1, %s626_s17 }
   0x7   : > { %s92_s23 = ssub.s32 %s630_s18, %s686_s21  ;;  %p102_p0 = scmp.ne.s32.totalorder %s626_s17, %s622_s16 }
   0x8   : > { %p93_p1 = scmp.eq.s32.totalorder %s92_s23, 0  ;;  %p103_p2 = scmp.eq.s32.totalorder %s630_s18, 0 }
   0x9   : > { %p108_p3 = scmp.ne.s32.totalorder %s622_s16, %s618_s15  ;;  %p109_p4 = scmp.eq.s32.totalorder %s682_s19, 0 }
   0xa   : > { %s698_s24 = scalar_select %p93_p1, %s626_s17, %s95_s22  }
   0xb   : > { %p700_p5 = por %p103_p2, %p102_p0  ;;  %p704_p6 = por %p109_p4, %p108_p3 }
   0xc   : > { %p132_p7 = scmp.eq.s32.totalorder %s682_s19, 3  ;;  %p138_p8 = scmp.eq.s32.totalorder %s464_s20, 3 }
   0xd   : > { %p494_p9 = scmp.lt.s32.totalorder %s630_s18, 4  ;;  %s173_s29 = sand.u32 1, %s626_s17  }
   0xe   : > { %p710_p10 = por %p132_p7, %p102_p0  ;;  %p714_p11 = por %p138_p8, %p108_p3 }
   0xf   : > { %s480_s30 = sshll.u32 %s630_s18, 7  ;;  %s467_s5 = sshll.u32 %s173_s29, 7 }
  0x10   : > { %s182_s8 = scalar_lea.hbm %s910_s3, %s480_s30  ;;  %s177_s10 = scalar_lea.vmem [#allocation2], %s467_s5 }
  0x11   : > { %s183_s9 = sshll.u32 %s182_s8, 4  ;;  %s185_s11 = sshll.u32 %s177_s10, 4  ;;  %s184_s9 = int_to_ptr.hbm [resolvable:$true] %s183_s9  ;;  %s186_s11 = int_to_ptr.vmem [resolvable:$true] %s185_s11 }
  0x12   : > { %p725_p12 = pnand %p494_p9, %p700_p5  ;;  %p470_p13 = scmp.ge.s32.totalorder %s630_s18, 1 }
  0x13   : > { %p193_p0 = scmp.lt.s32.totalorder %s630_s18, 5  ;;  %s174_s13 = scalar_lea.sflag [#allocation3], %s173_s29 }
  0x14   : > { %s534_s14 = sshra.s32 %s184_s9, 4  ;;  %p538_p2 = pneg %p725_p12  ;;  %s535_s14 = int_to_ptr.hbm [resolvable:$true] %s534_s14 }
  0x15   : > { %s536_s20 = scalar_lea.hbm %s535_s14, 128  ;;  %s541_s25 = scalar_lea.hbm %s910_s3, 512 }
  0x16   : > { %p537_p1 = scmp.ne.s32.totalorder %s535_s14, %s536_s20  ;;  %p542_p5 = scmp.lt.s32.totalorder %s535_s14, %s910_s3 }
  0x17   : > { %p543_p7 = scmp.lt.s32.totalorder %s541_s25, %s536_s20 }
  0x18   : > { %p539_p3 = pnand %p538_p2, %p537_p1 }
  0x19   : > { %p544_p8 = por %p543_p7, %p542_p5 }
  0x1a   : > { %p540_p4 = pneg %p539_p3 }
  0x1c   : > { %p545_p9 = pnand %p544_p8, %p540_p4 }
  0x1e   : > { %548 = shalt.err (!%p545_p9)
}
  0x1f   : > { %s632_s29 = smov 128   ;;  %s633_s6 = smov 8  }
  0x20   : > { %489 = dma.hbm_to_vmem [thread:$0]  (!%p725_p12), %s184_s9, 2048, %s186_s11, %s174_s13, %s632_s29, %s632_s29, %s633_s6  }
  0x21   : > { %p194_p1 = pnand %p470_p13, %p193_p0 }
  0x22   : > { %s746_s7 = sand.u32 (!%p194_p1), 1, %s622_s16  }
  0x23   : > { %197 = sbr.rel (%p194_p1) target bundleno = 75 (0x4b), region = 36  ;;  %s471_s8 = sshll.u32 (!%p194_p1), %s746_s7, 7 }
  0x24   : > { %s200_s10 = scalar_lea.sflag (!%p194_p1), [#allocation3], %s746_s7  ;;  %s752_s14 = scalar_lea.vmem (!%p194_p1), [#allocation2], %s471_s8 }
  0x28   : > { %609 = dma.done.wait (%p704_p6), %s200_s10, 2048  }
  0x29   : > { %611 = vsyncadd (%p704_p6), %s200_s10, 4294965248  ;;  %s473_s9 = sshll.u32 %s682_s19, 4  ;;  %v768_v1 = vld [vmem:[%s908_s1] ss:$0 sm:$0xff]  ;;  %v299_v8 = vld [vmem:[%s752_s14 + $0x8] sm:$0xff]  ;;  %vm346_vm0 = vcmask 130048  }
  0x2a   : > { %p235_p12 = scmp.lt.s32.totalorder %s473_s9, 63  ;;  %v773_v2 = vld [vmem:[%s909_s2] ss:$0 sm:$0xff]  ;;  %v300_v12 = vld [vmem:[%s752_s14 + $0x10] sm:$0xff]  ;;  %v301_v18 = vld [vmem:[%s752_s14 + $0x18] sm:$0xff]  ;;  %s811_s30 = scalar_lea.vmem [#allocation5], %s471_s8 }
  0x2b   : > { %v298_v6 = vld [vmem:[%s752_s14] sm:$0xff]  ;;  %v303_v25 = vld [vmem:[%s752_s14 + $0x28] sm:$0xff]  ;;  %v304_v32 = vld [vmem:[%s752_s14 + $0x30] sm:$0xff]  ;;  %s481_s5 = sshll.u32 %s682_s19, 7  ;;  %s376_s8 = sshll.u32 %s811_s30, 4  ;;  %s377_s8 = int_to_ptr.vmem [resolvable:$true] %s376_s8 }
  0x2c   : > { %s922_s9 = smov (!%p235_p12, %s473_s9), 63  ;;  %v302_v24 = vld [vmem:[%s752_s14 + $0x20] sm:$0xff]  ;;  %v305_v44 = vld [vmem:[%s752_s14 + $0x38] sm:$0xff]  ;;  %v307_v61 = vld [vmem:[%s752_s14 + $0x48] sm:$0xff]  ;;  %s375_s6 = scalar_lea.hbm %s911_s4, %s481_s5 }
  0x2d   : > { %s474_s11 = sshll.u32 %s922_s9, 3  ;;  %v306_v54 = vld [vmem:[%s752_s14 + $0x40] sm:$0xff]  ;;  %v308_v62 = vld [vmem:[%s752_s14 + $0x50] sm:$0xff]  ;;  %s378_s10 = sshll.u32 %s375_s6, 4  ;;  %s379_s10 = int_to_ptr.hbm [resolvable:$true] %s378_s10 }
  0x2e   : > { %s762_s20 = scalar_lea.vmem %s907_s0, %s474_s11  ;;  %s578_s9 = sshra.s32 %s379_s10, 4  ;;  %s579_s9 = int_to_ptr.hbm [resolvable:$true] %s578_s9 }
  0x2f   : > { %v242_v0 = vld [vmem:[%s762_s20] sm:$0xff]  ;;  %v243_v4 = vld [vmem:[%s762_s20 + $0x8] sm:$0xff]  ;;  %v244_v5 = vld [vmem:[%s762_s20 + $0x10] sm:$0xff]  ;;  %s580_s11 = scalar_lea.hbm %s579_s9, 128  ;;  %p585_p2 = scmp.lt.s32.totalorder %s579_s9, %s911_s4 }
  0x30   : > { %v262_v3 = vmul.f32 %v768_v1, %v242_v0  ;;  %v263_v7 = vmul.f32 %v768_v1, %v243_v4  ;;  %v264_v9 = vmul.f32 %v768_v1, %v244_v5  ;;  %v245_v10 = vld [vmem:[%s762_s20 + $0x18] sm:$0xff]  ;;  %v246_v14 = vld [vmem:[%s762_s20 + $0x20] sm:$0xff]  ;;  %v247_v15 = vld [vmem:[%s762_s20 + $0x28] sm:$0xff]  ;;  %p581_p6 = scmp.ne.s32.totalorder %s579_s9, %s580_s11 }
  0x31   : > { %v265_v13 = vmul.f32 %v768_v1, %v245_v10  ;;  %v266_v19 = vmul.f32 %v768_v1, %v246_v14  ;;  %v267_v20 = vmul.f32 %v768_v1, %v247_v15  ;;  %v248_v21 = vld [vmem:[%s762_s20 + $0x30] sm:$0xff]  ;;  %v249_v27 = vld [vmem:[%s762_s20 + $0x38] sm:$0xff]  ;;  %v250_v33 = vld [vmem:[%s762_s20 + $0x40] sm:$0xff] }
  0x32   : > { %v282_v11 = vadd.f32 %v773_v2, %v262_v3  ;;  %v283_v16 = vadd.f32 %v773_v2, %v263_v7  ;;  %v284_v17 = vadd.f32 %v773_v2, %v264_v9  ;;  %v268_v26 = vmul.f32 %v768_v1, %v248_v21  ;;  %v251_v38 = vld [vmem:[%s762_s20 + $0x48] sm:$0xff]  ;;  %v252_v39 = vld [vmem:[%s762_s20 + $0x50] sm:$0xff]  ;;  %v253_v45 = vld [vmem:[%s762_s20 + $0x58] sm:$0xff]  ;;  %p582_p13 = pnand %p581_p6, %p710_p10 }
  0x33   : > { %v285_v23 = vadd.f32 %v773_v2, %v265_v13  ;;  %v286_v30 = vadd.f32 %v773_v2, %v266_v19  ;;  %v287_v31 = vadd.f32 %v773_v2, %v267_v20  ;;  %v269_v37 = vmul.f32 %v768_v1, %v249_v27  ;;  %v254_v50 = vld [vmem:[%s762_s20 + $0x60] sm:$0xff]  ;;  %v255_v51 = vld [vmem:[%s762_s20 + $0x68] sm:$0xff]  ;;  %v256_v57 = vld [vmem:[%s762_s20 + $0x70] sm:$0xff] }
  0x34   : > { %v314_v22 = vadd.f32 %v298_v6, %v282_v11  ;;  %v315_v28 = vadd.f32 %v299_v8, %v283_v16  ;;  %v316_v29 = vadd.f32 %v300_v12, %v284_v17  ;;  %v288_v36 = vadd.f32 %v773_v2, %v268_v26  ;;  %v309_v4 = vld [vmem:[%s752_s14 + $0x58] sm:$0xff]  ;;  %v310_v11 = vld [vmem:[%s752_s14 + $0x60] sm:$0xff]  ;;  %v311_v12 = vld [vmem:[%s752_s14 + $0x68] sm:$0xff]  ;;  %p583_p0 = pneg %p582_p13 }
  0x35   : > { %v317_v35 = vadd.f32 %v301_v18, %v285_v23  ;;  %v318_v42 = vadd.f32 %v302_v24, %v286_v30  ;;  %v319_v43 = vadd.f32 %v303_v25, %v287_v31  ;;  %v289_v48 = vadd.f32 %v773_v2, %v269_v37  ;;  %v257_v7 = vld [vmem:[%s762_s20 + $0x78] sm:$0xff]  ;;  %v312_v18 = vld [vmem:[%s752_s14 + $0x70] sm:$0xff]  ;;  %s584_s20 = scalar_lea.hbm %s911_s4, 512 }
  0x36   : > { %v330_v34 = vmax.f32 %v314_v22, 0.0  ;;  %v331_v40 = vmax.f32 %v315_v28, 0.0  ;;  %v332_v41 = vmax.f32 %v316_v29, 0.0  ;;  %v320_v47 = vadd.f32 %v304_v32, %v288_v36  ;;  %v313_v27 = vld [vmem:[%s752_s14 + $0x78] sm:$0xff]  ;;  %s364_s14 = scalar_lea.sflag [#allocation4], %s746_s7  ;;  %p586_p3 = scmp.lt.s32.totalorder %s584_s20, %s580_s11 }
  0x37   : > { %v333_v46 = vmax.f32 %v317_v35, 0.0  ;;  %v270_v49 = vmul.f32 %v768_v1, %v250_v33  ;;  %v334_v52 = vmax.f32 %v318_v42, 0.0  ;;  %v335_v53 = vmax.f32 %v319_v43, 0.0 }
  0x38   : > { %347 = vst.msk [vmem:[%s811_s30] sm:$0xff] %vm346_vm0, %v330_v34  ;;  %v271_v55 = vmul.f32 %v768_v1, %v251_v38  ;;  %v272_v56 = vmul.f32 %v768_v1, %v252_v39  ;;  %v336_v58 = vmax.f32 %v320_v47, 0.0  ;;  %v321_v59 = vadd.f32 %v305_v44, %v289_v48  ;;  %p587_p4 = por %p586_p3, %p585_p2 }
  0x39   : > { %348 = vst.msk [vmem:[%s811_s30 + $0x8] sm:$0xff] %vm346_vm0, %v331_v40  ;;  %v290_v60 = vadd.f32 %v773_v2, %v270_v49  ;;  %v273_v63 = vmul.f32 %v768_v1, %v253_v45  ;;  %v274_v5 = vmul.f32 %v768_v1, %v254_v50  ;;  %v275_v6 = vmul.f32 %v768_v1, %v255_v51 }
  0x3a   : > { %349 = vst.msk [vmem:[%s811_s30 + $0x10] sm:$0xff] %vm346_vm0, %v332_v41  ;;  %v291_v0 = vadd.f32 %v773_v2, %v271_v55  ;;  %v292_v3 = vadd.f32 %v773_v2, %v272_v56  ;;  %v337_v8 = vmax.f32 %v321_v59, 0.0  ;;  %v276_v13 = vmul.f32 %v768_v1, %v256_v57  ;;  %p588_p5 = pnand %p587_p4, %p583_p0 }
  0x3b   : > { %350 = vst.msk [vmem:[%s811_s30 + $0x18] sm:$0xff] %vm346_vm0, %v333_v46  ;;  %v322_v9 = vadd.f32 %v306_v54, %v290_v60  ;;  %v293_v10 = vadd.f32 %v773_v2, %v273_v63  ;;  %v294_v16 = vadd.f32 %v773_v2, %v274_v5  ;;  %v295_v17 = vadd.f32 %v773_v2, %v275_v6 }
  0x3c   : > { %351 = vst.msk [vmem:[%s811_s30 + $0x20] sm:$0xff] %vm346_vm0, %v334_v52  ;;  %v323_v14 = vadd.f32 %v307_v61, %v291_v0  ;;  %v324_v15 = vadd.f32 %v308_v62, %v292_v3  ;;  %v296_v21 = vadd.f32 %v773_v2, %v276_v13  ;;  %v277_v22 = vmul.f32 %v768_v1, %v257_v7 }
  0x3d   : > { %352 = vst.msk [vmem:[%s811_s30 + $0x28] sm:$0xff] %vm346_vm0, %v335_v53  ;;  %v338_v19 = vmax.f32 %v322_v9, 0.0  ;;  %v325_v20 = vadd.f32 %v309_v4, %v293_v10  ;;  %v326_v25 = vadd.f32 %v310_v11, %v294_v16  ;;  %v327_v26 = vadd.f32 %v311_v12, %v295_v17 }
  0x3e   : > { %353 = vst.msk [vmem:[%s811_s30 + $0x30] sm:$0xff] %vm346_vm0, %v336_v58  ;;  %v339_v23 = vmax.f32 %v323_v14, 0.0  ;;  %v340_v24 = vmax.f32 %v324_v15, 0.0  ;;  %v328_v29 = vadd.f32 %v312_v18, %v296_v21  ;;  %v297_v1 = vadd.f32 %v773_v2, %v277_v22 }
  0x3f   : > { %354 = vst.msk [vmem:[%s811_s30 + $0x38] sm:$0xff] %vm346_vm0, %v337_v8  ;;  %v341_v28 = vmax.f32 %v325_v20, 0.0  ;;  %v342_v30 = vmax.f32 %v326_v25, 0.0  ;;  %v343_v31 = vmax.f32 %v327_v26, 0.0 }
  0x40   : > { %355 = vst.msk [vmem:[%s811_s30 + $0x40] sm:$0xff] %vm346_vm0, %v338_v19  ;;  %v344_v32 = vmax.f32 %v328_v29, 0.0  ;;  %v329_v33 = vadd.f32 %v313_v27, %v297_v1 }
  0x41   : > { %356 = vst.msk [vmem:[%s811_s30 + $0x48] sm:$0xff] %vm346_vm0, %v339_v23 }
  0x42   : > { %357 = vst.msk [vmem:[%s811_s30 + $0x50] sm:$0xff] %vm346_vm0, %v340_v24  ;;  %v345_v34 = vmax.f32 %v329_v33, 0.0 }
  0x43   : > { %358 = vst.msk [vmem:[%s811_s30 + $0x58] sm:$0xff] %vm346_vm0, %v341_v28 }
  0x44   : > { %359 = vst.msk [vmem:[%s811_s30 + $0x60] sm:$0xff] %vm346_vm0, %v342_v30 }
  0x45   : > { %360 = vst.msk [vmem:[%s811_s30 + $0x68] sm:$0xff] %vm346_vm0, %v343_v31 }
  0x46   : > { %361 = vst.msk [vmem:[%s811_s30 + $0x70] sm:$0xff] %vm346_vm0, %v344_v32 }
  0x47   : > { %362 = vst.msk [vmem:[%s811_s30 + $0x78] sm:$0xff] %vm346_vm0, %v345_v34 }
  0x48   : > { %591 = shalt.err (!%p588_p5)
}
  0x49   : > { %s634_s7 = smov 128   ;;  %s635_s23 = smov 8  }
  0x4a   : > { %484 = dma.vmem_to_hbm [thread:$0]  (%p710_p10), %s377_s8, 2048, %s379_s10, %s364_s14, %s634_s7, %s634_s7, %s635_s23  }
  0x4b PF: > { %p495_p7 = scmp.ge.s32.totalorder %s630_s18, 2  ;;  %s393_s25 = sand.u32 1, %s618_s15  }
  0x4c   : > { %s394_s30 = scalar_lea.sflag [#allocation4], %s393_s25 }
  0x4d   : > { %p491_p8 = pnand %p495_p7, %p714_p11 }
  0x4f   : > { %p492_p9 = pneg %p491_p8 }
  0x51   : > { %613 = dma.done.wait (%p492_p9), %s394_s30, 2048  }
  0x52   : > { %615 = vsyncadd (%p492_p9), %s394_s30, 4294965248  ;;  %p17_p1 = scmp.ge.s32.totalorder %s686_s21, 6   ;;  %s917_s15 = smov %s622_s16 }
  0x53   : > { %s918_s16 = smov %s626_s17  ;;  %s919_s17 = smov %s698_s24 }
  0x54   : > { %s920_s18 = smov %s686_s21  ;;  %19 = sbr.rel (!%p17_p1) target bundleno = 5 (0x5), region = 84 }
  0x59   :  { %400 = vsyncpa [#allocation3], 1 }
  0x5a   :  { %402 = vsyncpa [#allocation3 + $0x1], 1 }
  0x5b   :  { %403 = vsyncpa [#allocation4], 1 }
  0x5c   :  { %405 = vsyncpa [#allocation4 + $0x1], 1 }

// kernel: bottleneck_forward.6
= control target key start
LH: loop header
LB: loop body
LE: loop exit
PB: predicated region body
PF: predicated region fallthrough
CT: control target
= control target key end

     0   :  { %s667_s18 = smov 0   ;;  %s842_s0 = inlined_call_operand.vmem [shape: f32[512,4], index: 0, kind: input, shape index: {}]   ;;  %s843_s1 = inlined_call_operand.vmem [shape: f32[1,4], index: 1, kind: input, shape index: {}]   ;;  %s844_s2 = inlined_call_operand.vmem [shape: f32[1,4], index: 2, kind: input, shape index: {}]   ;;  %s845_s3 = inlined_call_operand.vmem [shape: bf16[4,16], index: 3, kind: input, shape index: {}]   ;;  %s846_s4 = inlined_call_operand.vmem [shape: f32[512,16], index: 4, kind: output, shape index: {0}]   ;;  %s847_s5 = inlined_call_operand.vmem [shape: f32[4,2,16], index: 5, kind: output, shape index: {1}]  }
   0x1 LB: > { %s673_s19 = sadd.s32 4294967295, %s635_s18   ;;  %p600_p0 = scmp.ge.s32.totalorder %s635_s18, 1  ;;  %s635_s18 = sphi %s667_s18, %s16_s18  }
   0x2   : > { %p191_p1 = scmp.lt.s32.totalorder %s635_s18, 5 }
   0x4   : > { %p192_p2 = pnand %p600_p0, %p191_p1 }
   0x5   : > { %s601_s22 = sshll.u32 (!%p192_p2), %s673_s19, 4  ;;  %p235_p4 = scmp.lt.s32.totalorder (!%p192_p2), %s673_s19, 3 }
   0x6   : > { %195 = sbr.rel (%p192_p2) target bundleno = 215 (0xd7), region = 36  ;;  %p224_p3 = scmp.lt.s32.totalorder (!%p192_p2), %s601_s22, 63 }
   0xb   : > { %v320_v0 = vld [vmem:[%s845_s3] sm:$0x3]  ;;  %vm346_vm0 = vcmask 1041408   ;;  %s849_s22 = smov (!%p224_p3, %s601_s22), 63  ;;  %vm321_vm1 = vcmask 31744   ;;  %vm399_vm2 = vcmask 130048  }
   0xc   : > { %v348_v1 = vsel %vm346_vm0, %v320_v0, 0  ;;  %v627_v2 = vld [vmem:[%s843_s1] ss:$0 sm:$0xff]  ;;  %s602_s25 = sshll.u32 %s849_s22, 3  ;;  %s851_s19 = smov (!%p235_p4, %s673_s19), 3  ;;  %vm453_vm3 = vcmask 122880  }
   0xd   : > { %357 = vmatpush.bf16.msra.mxu0 %v348_v1  ;;  %616 = vmatpush.bf16.msra.mxu1 %v348_v1  ;;  %s692_s28 = scalar_lea.vmem %s842_s0, %s602_s25  ;;  %v697_v3 = vld [vmem:[%s844_s2] ss:$0 sm:$0xff]  ;;  %s744_s8 = scalar_lea.vmem %s846_s4, %s602_s25 }
   0xe   : > { %617 = vmatpush.bf16.msra.mxu2 %v348_v1  ;;  %618 = vmatpush.bf16.msra.mxu3 %v348_v1  ;;  %v240_v4 = vld [vmem:[%s692_s28] sm:$0xff]  ;;  %v241_v5 = vld [vmem:[%s692_s28 + $0x8] sm:$0xff]  ;;  %v242_v30 = vld [vmem:[%s692_s28 + $0x10] sm:$0xff]  ;;  %s605_s9 = sshll.u32 %s851_s19, 1 }
   0xf   : > { %v244_v6 = vld [vmem:[%s692_s28 + $0x20] sm:$0xff]  ;;  %v260_v7 = vmul.f32 %v627_v2, %v240_v4  ;;  %v261_v8 = vmul.f32 %v627_v2, %v241_v5  ;;  %v245_v9 = vld [vmem:[%s692_s28 + $0x28] sm:$0xff]  ;;  %v243_v35 = vld [vmem:[%s692_s28 + $0x18] sm:$0xff]  ;;  %v262_v45 = vmul.f32 %v627_v2, %v242_v30  ;;  %s238_s12 = scalar_lea.vmem %s847_s5, %s605_s9 }
  0x10   : > { %v264_v10 = vmul.f32 %v627_v2, %v244_v6  ;;  %v248_v11 = vld [vmem:[%s692_s28 + $0x40] sm:$0xff]  ;;  %v249_v12 = vld [vmem:[%s692_s28 + $0x48] sm:$0xff]  ;;  %v265_v13 = vmul.f32 %v627_v2, %v245_v9  ;;  %v246_v36 = vld [vmem:[%s692_s28 + $0x30] sm:$0xff]  ;;  %v263_v46 = vmul.f32 %v627_v2, %v243_v35 }
  0x11   : > { %v268_v14 = vmul.f32 %v627_v2, %v248_v11  ;;  %v269_v15 = vmul.f32 %v627_v2, %v249_v12  ;;  %v252_v16 = vld [vmem:[%s692_s28 + $0x60] sm:$0xff]  ;;  %v253_v17 = vld [vmem:[%s692_s28 + $0x68] sm:$0xff]  ;;  %v280_v18 = vadd.f32 %v697_v3, %v260_v7  ;;  %v281_v19 = vadd.f32 %v697_v3, %v261_v8  ;;  %v247_v37 = vld [vmem:[%s692_s28 + $0x38] sm:$0xff] }
  0x12   : > { %v284_v20 = vadd.f32 %v697_v3, %v264_v10  ;;  %v272_v21 = vmul.f32 %v627_v2, %v252_v16  ;;  %v285_v22 = vadd.f32 %v697_v3, %v265_v13  ;;  %v273_v25 = vmul.f32 %v627_v2, %v253_v17  ;;  %v250_v40 = vld [vmem:[%s692_s28 + $0x50] sm:$0xff]  ;;  %v251_v41 = vld [vmem:[%s692_s28 + $0x58] sm:$0xff] }
  0x13   : > { %v288_v23 = vadd.f32 %v697_v3, %v268_v14  ;;  %v289_v24 = vadd.f32 %v697_v3, %v269_v15  ;;  %v296_v26 = vmax.f32 %v280_v18, 0.0  ;;  %v297_v27 = vmax.f32 %v281_v19, 0.0  ;;  %v254_v49 = vld [vmem:[%s692_s28 + $0x70] sm:$0xff]  ;;  %v255_v50 = vld [vmem:[%s692_s28 + $0x78] sm:$0xff] }
  0x14   : > { %v300_v28 = vmax.f32 %v284_v20, 0.0  ;;  %v292_v29 = vadd.f32 %v697_v3, %v272_v21  ;;  %v301_v31 = vmax.f32 %v285_v22, 0.0  ;;  %v293_v34 = vadd.f32 %v697_v3, %v273_v25 }
  0x15   : > { %v304_v32 = vmax.f32 %v288_v23, 0.0  ;;  %v305_v33 = vmax.f32 %v289_v24, 0.0  ;;  %v312_v38 = vpack.c.bf16 %v297_v27, %v296_v26  ;;  %v266_v47 = vmul.f32 %v627_v2, %v246_v36 }
  0x16   : > { %v308_v39 = vmax.f32 %v292_v29, 0.0  ;;  %v314_v42 = vpack.c.bf16 %v301_v31, %v300_v28  ;;  %v309_v44 = vmax.f32 %v293_v34, 0.0  ;;  %v267_v48 = vmul.f32 %v627_v2, %v247_v37 }
  0x17   : > { %v316_v43 = vpack.c.bf16 %v305_v33, %v304_v32  ;;  %606 = vmatmul.msk.bf16.vlgmr.msra.gmra.mxu0 %vm321_vm1, %v312_v38  ;;  %v270_v52 = vmul.f32 %v627_v2, %v250_v40  ;;  %v271_v53 = vmul.f32 %v627_v2, %v251_v41  ;;  %v274_v54 = vmul.f32 %v627_v2, %v254_v49 }
  0x18   : > { %608 = vmatmul.msk.bf16.vlgmr.msra.gmra.mxu1 %vm321_vm1, %v314_v42  ;;  %v318_v51 = vpack.c.bf16 %v309_v44, %v308_v39  ;;  %v275_v55 = vmul.f32 %v627_v2, %v255_v50  ;;  %v282_v56 = vadd.f32 %v697_v3, %v262_v45  ;;  %v283_v57 = vadd.f32 %v697_v3, %v263_v46 }
  0x19   : > { %610 = vmatmul.msk.bf16.vlgmr.msra.gmra.mxu2 %vm321_vm1, %v316_v43  ;;  %v286_v58 = vadd.f32 %v697_v3, %v266_v47  ;;  %v287_v59 = vadd.f32 %v697_v3, %v267_v48  ;;  %v290_v60 = vadd.f32 %v697_v3, %v270_v52  ;;  %v291_v61 = vadd.f32 %v697_v3, %v271_v53 }
  0x1a   : > { %612 = vmatmul.msk.bf16.vlgmr.msra.gmra.mxu3 %vm321_vm1, %v318_v51  ;;  %v294_v62 = vadd.f32 %v697_v3, %v274_v54  ;;  %v295_v63 = vadd.f32 %v697_v3, %v275_v55  ;;  %v298_v0 = vmax.f32 %v282_v56, 0.0  ;;  %v299_v1 = vmax.f32 %v283_v57, 0.0 }
  0x1b   : > { %v302_v2 = vmax.f32 %v286_v58, 0.0  ;;  %v303_v4 = vmax.f32 %v287_v59, 0.0  ;;  %v306_v5 = vmax.f32 %v290_v60, 0.0  ;;  %v307_v6 = vmax.f32 %v291_v61, 0.0 }
  0x1c   : > { %v310_v7 = vmax.f32 %v294_v62, 0.0  ;;  %v311_v8 = vmax.f32 %v295_v63, 0.0  ;;  %v313_v9 = vpack.c.bf16 %v299_v1, %v298_v0 }
  0x1d   : > { %v315_v10 = vpack.c.bf16 %v303_v4, %v302_v2  ;;  %v317_v11 = vpack.c.bf16 %v307_v6, %v306_v5 }
  0x1e   : > { %v319_v12 = vpack.c.bf16 %v311_v8, %v310_v7 }
  0x27   : > { %607 = vmatmul.msk.bf16.gmra.mxu0 %vm321_vm1, %v313_v9 }
  0x28   : > { %609 = vmatmul.msk.bf16.gmra.mxu1 %vm321_vm1, %v315_v10 }
  0x29   : > { %611 = vmatmul.msk.bf16.gmra.mxu2 %vm321_vm1, %v317_v11 }
  0x2a   : > { %613 = vmatmul.msk.bf16.gmra.mxu3 %vm321_vm1, %v319_v12 }
  0x94   : > { %v359_v3 = vpop.f32.mrf.mxu0 }
  0x95   : > { %400 = vst.msk [vmem:[%s744_s8] sm:$0xff] %vm399_vm2, %v359_v3  ;;  %v369_v13 = vpop.f32.mrf.mxu1  ;;  %v455_v23 = vmul.f32 %v359_v3, %v359_v3  ;;  %v416_v26 = vsel %vm399_vm2, %v359_v3, 0.0 }
  0x96   : > { %404 = vst.msk [vmem:[%s744_s8 + $0x20] sm:$0xff] %vm399_vm2, %v369_v13  ;;  %v459_v36 = vmul.f32 %v369_v13, %v369_v13  ;;  %v423_v43 = vsel %vm399_vm2, %v369_v13, 0.0 }
  0x97   : > { %v471_v30 = vsel %vm399_vm2, %v455_v23, 0.0 }
  0x98   : > { %v478_v48 = vsel %vm399_vm2, %v459_v36, 0.0 }
  0x9c   : > { %v750_v14 = vpop.f32.mrf.mxu2  ;;  %v361_v15 = vpop.f32.mrf.mxu0 }
  0x9d   : > { %408 = vst.msk [vmem:[%s744_s8 + $0x40] sm:$0xff] %vm399_vm2, %v750_v14  ;;  %v371_v16 = vpop.f32.mrf.mxu1  ;;  %v757_v17 = vpop.f32.mrf.mxu3  ;;  %v456_v20 = vmul.f32 %v361_v15, %v361_v15  ;;  %v417_v24 = vsel %vm399_vm2, %v361_v15, 0.0  ;;  %v463_v59 = vmul.f32 %v750_v14, %v750_v14  ;;  %v431_v1 = vsel %vm399_vm2, %v750_v14, 0.0 }
  0x9e   : > { %401 = vst.msk [vmem:[%s744_s8 + $0x8] sm:$0xff] %vm399_vm2, %v361_v15  ;;  %v418_v29 = vadd.f32 %v417_v24, %v416_v26  ;;  %v460_v44 = vmul.f32 %v371_v16, %v371_v16  ;;  %v425_v49 = vsel %vm399_vm2, %v371_v16, 0.0 }
  0x9f   : > { %405 = vst.msk [vmem:[%s744_s8 + $0x28] sm:$0xff] %vm399_vm2, %v371_v16  ;;  %v472_v27 = vsel %vm399_vm2, %v456_v20, 0.0  ;;  %v486_v7 = vsel %vm399_vm2, %v463_v59, 0.0  ;;  %v467_v16 = vmul.f32 %v757_v17, %v757_v17 }
  0xa0   : > { %412 = vst.msk [vmem:[%s744_s8 + $0x60] sm:$0xff] %vm399_vm2, %v757_v17  ;;  %v473_v33 = vadd.f32 %v472_v27, %v471_v30  ;;  %v480_v53 = vsel %vm399_vm2, %v460_v44, 0.0 }
  0xa4   : > { %v764_v18 = vpop.f32.mrf.mxu2  ;;  %v364_v19 = vpop.f32.mrf.mxu0 }
  0xa5   : > { %409 = vst.msk [vmem:[%s744_s8 + $0x48] sm:$0xff] %vm399_vm2, %v764_v18  ;;  %v374_v21 = vpop.f32.mrf.mxu1  ;;  %v771_v22 = vpop.f32.mrf.mxu3  ;;  %v457_v25 = vmul.f32 %v364_v19, %v364_v19  ;;  %v419_v28 = vsel %vm399_vm2, %v364_v19, 0.0  ;;  %v464_v2 = vmul.f32 %v764_v18, %v764_v18  ;;  %v433_v8 = vsel %vm399_vm2, %v764_v18, 0.0 }
  0xa6   : > { %402 = vst.msk [vmem:[%s744_s8 + $0x10] sm:$0xff] %vm399_vm2, %v364_v19  ;;  %v420_v34 = vadd.f32 %v419_v28, %v418_v29  ;;  %v461_v50 = vmul.f32 %v374_v21, %v374_v21  ;;  %v427_v54 = vsel %vm399_vm2, %v374_v21, 0.0  ;;  %v439_v18 = vsel %vm399_vm2, %v757_v17, 0.0 }
  0xa7   : > { %406 = vst.msk [vmem:[%s744_s8 + $0x30] sm:$0xff] %vm399_vm2, %v374_v21  ;;  %v474_v31 = vsel %vm399_vm2, %v457_v25, 0.0  ;;  %v488_v12 = vsel %vm399_vm2, %v464_v2, 0.0  ;;  %v468_v24 = vmul.f32 %v771_v22, %v771_v22  ;;  %v494_v28 = vsel %vm399_vm2, %v467_v16, 0.0 }
  0xa8   : > { %413 = vst.msk [vmem:[%s744_s8 + $0x68] sm:$0xff] %vm399_vm2, %v771_v22  ;;  %v475_v41 = vadd.f32 %v474_v31, %v473_v33  ;;  %v482_v60 = vsel %vm399_vm2, %v461_v50, 0.0  ;;  %v441_v29 = vsel %vm399_vm2, %v771_v22, 0.0 }
  0xa9   : > { %v496_v33 = vsel %vm399_vm2, %v468_v24, 0.0 }
  0xac   : > { %v384_v32 = vpop.f32.mrf.mxu2  ;;  %v366_v35 = vpop.f32.mrf.mxu0 }
  0xad   : > { %410 = vst.msk [vmem:[%s744_s8 + $0x50] sm:$0xff] %vm399_vm2, %v384_v32  ;;  %v421_v37 = vsel %vm399_vm2, %v366_v35, 0.0  ;;  %v458_v38 = vmul.f32 %v366_v35, %v366_v35  ;;  %v376_v39 = vpop.f32.mrf.mxu1  ;;  %v394_v40 = vpop.f32.mrf.mxu3  ;;  %v465_v9 = vmul.f32 %v384_v32, %v384_v32  ;;  %v435_v3 = vsel %vm399_vm2, %v384_v32, 0.0 }
  0xae   : > { %403 = vst.msk [vmem:[%s744_s8 + $0x18] sm:$0xff] %vm399_vm2, %v366_v35  ;;  %v422_v42 = vadd.f32 %v421_v37, %v420_v34  ;;  %v462_v55 = vmul.f32 %v376_v39, %v376_v39  ;;  %v429_v61 = vsel %vm399_vm2, %v376_v39, 0.0  ;;  %v469_v30 = vmul.f32 %v394_v40, %v394_v40 }
  0xaf   : > { %407 = vst.msk [vmem:[%s744_s8 + $0x38] sm:$0xff] %vm399_vm2, %v376_v39  ;;  %v476_v45 = vsel %vm399_vm2, %v458_v38, 0.0  ;;  %v490_v19 = vsel %vm399_vm2, %v465_v9, 0.0  ;;  %v443_v17 = vsel %vm399_vm2, %v394_v40, 0.0 }
  0xb0   : > { %414 = vst.msk [vmem:[%s744_s8 + $0x70] sm:$0xff] %vm399_vm2, %v394_v40  ;;  %v424_v46 = vadd.f32 %v423_v43, %v422_v42  ;;  %v477_v47 = vadd.f32 %v476_v45, %v475_v41  ;;  %v484_v4 = vsel %vm399_vm2, %v462_v55, 0.0  ;;  %v498_v37 = vsel %vm399_vm2, %v469_v30, 0.0 }
  0xb2   : > { %v479_v51 = vadd.f32 %v478_v48, %v477_v47  ;;  %v426_v52 = vadd.f32 %v425_v49, %v424_v46 }
  0xb4   : > { %v386_v56 = vpop.f32.mrf.mxu2  ;;  %v428_v57 = vadd.f32 %v427_v54, %v426_v52  ;;  %v481_v58 = vadd.f32 %v480_v53, %v479_v51 }
  0xb5   : > { %411 = vst.msk [vmem:[%s744_s8 + $0x58] sm:$0xff] %vm399_vm2, %v386_v56  ;;  %v396_v62 = vpop.f32.mrf.mxu3  ;;  %v466_v13 = vmul.f32 %v386_v56, %v386_v56  ;;  %v437_v20 = vsel %vm399_vm2, %v386_v56, 0.0 }
  0xb6   : > { %v430_v63 = vadd.f32 %v429_v61, %v428_v57  ;;  %v483_v0 = vadd.f32 %v482_v60, %v481_v58  ;;  %415 = vst.msk [vmem:[%s744_s8 + $0x78] sm:$0xff] %vm399_vm2, %v396_v62  ;;  %v470_v34 = vmul.f32 %v396_v62, %v396_v62  ;;  %v445_v38 = vsel %vm399_vm2, %v396_v62, 0.0 }
  0xb7   : > { %v492_v25 = vsel %vm399_vm2, %v466_v13, 0.0 }
  0xb8   : > { %v432_v5 = vadd.f32 %v431_v1, %v430_v63  ;;  %v485_v6 = vadd.f32 %v484_v4, %v483_v0  ;;  %v500_v22 = vsel %vm399_vm2, %v470_v34, 0.0 }
  0xba   : > { %v487_v10 = vadd.f32 %v486_v7, %v485_v6  ;;  %v434_v11 = vadd.f32 %v433_v8, %v432_v5 }
  0xbc   : > { %v436_v14 = vadd.f32 %v435_v3, %v434_v11  ;;  %v489_v15 = vadd.f32 %v488_v12, %v487_v10 }
  0xbe   : > { %v491_v21 = vadd.f32 %v490_v19, %v489_v15  ;;  %v438_v23 = vadd.f32 %v437_v20, %v436_v14 }
  0xc0   : > { %v440_v26 = vadd.f32 %v439_v18, %v438_v23  ;;  %v493_v27 = vadd.f32 %v492_v25, %v491_v21 }
  0xc2   : > { %v495_v31 = vadd.f32 %v494_v28, %v493_v27  ;;  %v442_v32 = vadd.f32 %v441_v29, %v440_v26 }
  0xc4   : > { %v444_v35 = vadd.f32 %v443_v17, %v442_v32  ;;  %v497_v36 = vadd.f32 %v496_v33, %v495_v31 }
  0xc6   : > { %v499_v39 = vadd.f32 %v498_v37, %v497_v36  ;;  %v446_v41 = vadd.f32 %v445_v38, %v444_v35 }
  0xc8   : > { %v447_v42 = vrot.slane %v446_v41, 4  ;;  %v501_v43 = vadd.f32 %v500_v22, %v499_v39 }
  0xca   : > { %v448_v44 = vadd.f32 %v447_v42, %v446_v41  ;;  %v502_v45 = vrot.slane %v501_v43, 4 }
  0xcc   : > { %v449_v46 = vrot.slane %v448_v44, 2  ;;  %v503_v47 = vadd.f32 %v502_v45, %v501_v43 }
  0xce   : > { %v450_v40 = vadd.f32 %v449_v46, %v448_v44  ;;  %v504_v48 = vrot.slane %v503_v47, 2 }
  0xd0   : > { %v451_v49 = vrot.slane %v450_v40, 1  ;;  %v505_v50 = vadd.f32 %v504_v48, %v503_v47 }
  0xd2   : > { %v452_v51 = vadd.f32 %v451_v49, %v450_v40  ;;  %v506_v52 = vrot.slane %v505_v50, 1 }
  0xd4   : > { %454 = vst.msk [vmem:[%s238_s12] sm:$0x1] %vm453_vm3, %v452_v51  ;;  %v507_v53 = vadd.f32 %v506_v52, %v505_v50 }
  0xd6   : > { %508 = vst.msk [vmem:[%s238_s12 + $0x1] sm:$0x1] %vm453_vm3, %v507_v53 }
  0xd7 PF: > { %s16_s18 = sadd.s32 1, %s635_s18  }
  0xd8   : > { %p13_p5 = scmp.ge.s32.totalorder %s16_s18, 6  }
  0xda   :  { %15 = sbr.rel (!%p13_p5) target bundleno = 1 (0x1), region = 78 }

// kernel: bottleneck_forward.5
= control target key start
LH: loop header
LB: loop body
LE: loop exit
PB: predicated region body
PF: predicated region fallthrough
CT: control target
= control target key end

     0   :  { %s4915_s18 = smov 0   ;;  %s6957_s0 = inlined_call_operand.vmem [shape: f32[2,16,16,4], index: 0, kind: input, shape index: {}]   ;;  %s6958_s1 = inlined_call_operand.vmem [shape: f32[1,4], index: 1, kind: input, shape index: {}]   ;;  %s6959_s2 = inlined_call_operand.vmem [shape: f32[1,4], index: 2, kind: input, shape index: {}]   ;;  %s6960_s3 = inlined_call_operand.vmem [shape: bf16[36,4], index: 3, kind: input, shape index: {}]   ;;  %s6961_s4 = inlined_call_operand.vmem [shape: f32[2,256,4], index: 4, kind: output, shape index: {0}]   ;;  %s6962_s5 = inlined_call_operand.vmem [shape: f32[2,2,4], index: 5, kind: output, shape index: {1}]  }
   0x1 LB: > { %s4668_s19 = sadd.s32 4294967295, %s4874_s18   ;;  %p4672_p0 = scmp.ge.s32.totalorder %s4874_s18, 1  ;;  %s4874_s18 = sphi %s4915_s18, %s16_s18  }
   0x2   : > { %p190_p1 = scmp.lt.s32.totalorder %s4874_s18, 3 }
   0x4   : > { %p191_p2 = pnand %p4672_p0, %p190_p1 }
   0x5   : > { %p222_p3 = scmp.lt.s32.totalorder (!%p191_p2), %s4668_s19, 1  ;;  %s4877_s28 = smov (!%p191_p2), 4  }
   0x6   : > { %194 = sbr.rel (%p191_p2) target bundleno = 1055 (0x41f), region = 36  ;;  %s4878_s8 = smov (!%p191_p2), 8  }
   0x7   : > { %s4879_s9 = smov (!%p191_p2), 12   ;;  %s4880_s14 = smov (!%p191_p2), 16  }
   0x8   : > { %s4881_s15 = smov (!%p191_p2), 20   ;;  %s4882_s16 = smov (!%p191_p2), 28  }
   0x9   : > { %s4883_s17 = smov (!%p191_p2), 32   ;;  %s4884_s20 = smov (!%p191_p2), 24  }
   0xb   : > { %vm405_vm0 = vcmask 27648   ;;  %v4876_v0 = vmov 0   ;;  %vm408_vm1 = vcmask 24576   ;;  %vm416_vm2 = vsmask.f32 256  ;;  %s6976_s19 = smov (!%p222_p3, %s4668_s19), 1 }
   0xc   : > { %406 = vst.msk [vmem:[#allocation2] sm:$0xf] %vm405_vm0, %v4876_v0  ;;  %vm1064_vm3 = vsmask.f32 3328  ;;  %vm1065_vm4 = vsmask.f32 7440  ;;  %vm4928_vm5 = vmand %vm408_vm1, %vm416_vm2 }
   0xd   : > { %407 = vst.msk [vmem:[#allocation2 + $0x4] sm:$0xf] %vm405_vm0, %v4876_v0  ;;  %vm466_vm6 = vsmask.f32 7938  ;;  %v4945_v3 = vld [vmem:[%s6958_s1] ss:$0 sm:$0xff]  ;;  %vm4983_vm9 = vmor %vm1064_vm3, %vm1065_vm4 }
   0xe   : > { %411 = vst.msk [vmem:[#allocation2 + $0xcc] sm:$0xf] %vm405_vm0, %v4876_v0  ;;  %vm4938_vm7 = vmand %vm408_vm1, %vm466_vm6  ;;  %v418_v4 = vld [vmem:[#allocation2 + $0xc] sm:$0x1]  ;;  %s4816_s22 = sshll.u32 %s6976_s19, 8  ;;  %vm1676_vm12 = vcmask 1042432  }
   0xf   : > { %412 = vst.msk [vmem:[#allocation2 + $0xd0] sm:$0xf] %vm405_vm0, %v4876_v0  ;;  %v4952_v5 = vld [vmem:[%s6959_s2] ss:$0 sm:$0xff]  ;;  %v419_v6 = vsel %vm4928_vm5, 0, %v418_v4  ;;  %s4961_s27 = scalar_lea.vmem %s6957_s0, %s4816_s22  ;;  %vm4996_vm10 = vmand %vm405_vm0, %vm466_vm6  ;;  %vm1677_vm13 = vcmask 1046532   ;;  %s6689_s30 = scalar_lea.vmem %s6961_s4, %s4816_s22 }
  0x10   : > { %409 = vst.msk [vmem:[#allocation2 + $0x8] sm:$0x1] %vm408_vm1, %v4876_v0  ;;  %v424_v7 = vld [vmem:[#allocation2 + $0x24] sm:$0x1]  ;;  %v468_v8 = vld [vmem:[#allocation2 + $0x14] sm:$0x1]  ;;  %vm5487_vm14 = vmor %vm1676_vm12, %vm1677_vm13 }
  0x11   : > { %413 = vst.msk [vmem:[#allocation2 + $0xd4] sm:$0x1] %vm408_vm1, %v4876_v0  ;;  %v239_v10 = vld [vmem:[%s4961_s27] sm:$0xff]  ;;  %v240_v11 = vld [vmem:[%s4961_s27 + $0x8] sm:$0xff]  ;;  %v425_v12 = vsel %vm4928_vm5, 0, %v424_v7  ;;  %v469_v13 = vsel %vm4938_vm7, 0, %v468_v8 }
  0x12   : > { %420 = vst [vmem:[#allocation2 + $0xc] sm:$0x1] %v419_v6  ;;  %v274_v17 = vmul.f32 %v4945_v3, %v239_v10  ;;  %v275_v18 = vmul.f32 %v4945_v3, %v240_v11  ;;  %vm516_vm8 = vsmask.f32 4368  ;;  %v243_v19 = vld [vmem:[%s4961_s27 + $0x20] sm:$0xff]  ;;  %v244_v20 = vld [vmem:[%s4961_s27 + $0x28] sm:$0xff] }
  0x13   : > { %v1016_v9 = vld [vmem:[#allocation2] sm:$0xf]  ;;  %v278_v23 = vmul.f32 %v4945_v3, %v243_v19  ;;  %v279_v24 = vmul.f32 %v4945_v3, %v244_v20  ;;  %426 = vst [vmem:[#allocation2 + $0x24] sm:$0x1] %v425_v12  ;;  %v245_v29 = vld [vmem:[%s4961_s27 + $0x30] sm:$0xff]  ;;  %v246_v39 = vld [vmem:[%s4961_s27 + $0x38] sm:$0xff] }
  0x14   : > { %v1017_v14 = vld [vmem:[#allocation2 + $0x4] sm:$0xf]  ;;  %v1068_v15 = vshrl.u32 %v1016_v9, 16  ;;  %v1071_v16 = vshll.u32 %v1016_v9, 16  ;;  %v309_v27 = vadd.f32 %v4952_v5, %v274_v17  ;;  %v310_v28 = vadd.f32 %v4952_v5, %v275_v18  ;;  %470 = vst [vmem:[#allocation2 + $0x14] sm:$0x1] %v469_v13  ;;  %vm5002_vm11 = vmor %vm416_vm2, %vm516_vm8 }
  0x15   : > { %v1077_v21 = vshll.u32 %v1017_v14, 16  ;;  %v1081_v22 = vshrl.u32 %v1017_v14, 16  ;;  %v313_v33 = vadd.f32 %v4952_v5, %v278_v23  ;;  %v314_v34 = vadd.f32 %v4952_v5, %v279_v24  ;;  %v477_v57 = vld [vmem:[#allocation2 + $0x38] sm:$0x1]  ;;  %v474_v7 = vld [vmem:[#allocation2 + $0x2c] sm:$0x1] }
  0x16   : > { %v1070_v25 = vrot.slane %v1068_v15, 4  ;;  %v1073_v26 = vrot.slane %v1071_v16, 5  ;;  %v341_v37 = vmax.f32 %v309_v27, 0.0  ;;  %v342_v38 = vmax.f32 %v310_v28, 0.0  ;;  %v249_v24 = vld [vmem:[%s4961_s27 + $0x50] sm:$0xff]  ;;  %s4677_s22 = sshll.u32 %s6976_s19, 1 }
  0x17   : > { %v1079_v30 = vrot.slane %v1077_v21, 5  ;;  %v1083_v31 = vrot.slane %v1081_v22, 4  ;;  %v1018_v32 = vld [vmem:[#allocation2 + $0x8] sm:$0x1]  ;;  %v345_v42 = vmax.f32 %v313_v33, 0.0  ;;  %v346_v43 = vmax.f32 %v314_v34, 0.0 }
  0x18   : > { %v1074_v35 = vor.u32 %v1073_v26, %v1070_v25  ;;  %v1087_v36 = vshll.u32 %v1018_v32, 16  ;;  %v280_v44 = vmul.f32 %v4945_v3, %v245_v29  ;;  %v373_v47 = vpack.c.bf16 %v341_v37, %v341_v37  ;;  %v250_v29 = vld [vmem:[%s4961_s27 + $0x58] sm:$0xff] }
  0x19   : > { %v1084_v41 = vor.u32 %v1083_v31, %v1079_v30  ;;  %v374_v48 = vpack.c.bf16 %v342_v38, %v342_v38  ;;  %v377_v50 = vpack.c.bf16 %v345_v42, %v345_v42  ;;  %v378_v51 = vpack.c.bf16 %v346_v43, %v346_v43  ;;  %v840_v9 = vld [vmem:[#allocation2 + $0xc] sm:$0xf]  ;;  %v241_v31 = vld [vmem:[%s4961_s27 + $0x10] sm:$0xff]  ;;  %v421_v42 = vld [vmem:[#allocation2 + $0x18] sm:$0x1] }
  0x1a   : > { %v1075_v45 = vrot.slane %v1074_v35, 4  ;;  %v1089_v46 = vrot.slane %v1087_v36, 5  ;;  %v281_v52 = vmul.f32 %v4945_v3, %v246_v39  ;;  %v519_v54 = vshrl.u32 %v373_v47, 16  ;;  %v854_v11 = vld [vmem:[#allocation2 + $0x24] sm:$0xf]  ;;  %v242_v36 = vld [vmem:[%s4961_s27 + $0x18] sm:$0xff] }
  0x1b   : > { %v1085_v49 = vrot.slane %v1084_v41, 4  ;;  %v522_v55 = vshll.u32 %v373_v47, 16  ;;  %v527_v56 = vshrl.u32 %v374_v48, 16  ;;  %v530_v59 = vshll.u32 %v374_v48, 16  ;;  %v844_v19 = vld [vmem:[#allocation2 + $0x14] sm:$0x1] }
  0x1c   : > { %v1080_v53 = vsel %vm4983_vm9, %v1075_v45, %v1079_v30  ;;  %v553_v60 = vshrl.u32 %v377_v50, 16  ;;  %v556_v61 = vshll.u32 %v377_v50, 16  ;;  %v521_v63 = vrot.slane %v519_v54, 7  ;;  %v433_v30 = vld [vmem:[#allocation2 + $0x48] sm:$0x1]  ;;  %v247_v47 = vld [vmem:[%s4961_s27 + $0x40] sm:$0xff] }
  0x1d   : > { %1451 = vrot.lane.b32.xlu0 %v1080_v53, %s4877_s28  ;;  %v1090_v58 = vsel %vm4983_vm9, %v1085_v49, %v1089_v46  ;;  %v529_v0 = vrot.slane %v527_v56, 7  ;;  %v561_v4 = vshrl.u32 %v378_v51, 16  ;;  %v564_v6 = vshll.u32 %v378_v51, 16 }
  0x1e   : > { %v555_v10 = vrot.slane %v553_v60, 7  ;;  %v315_v12 = vadd.f32 %v4952_v5, %v280_v44  ;;  %v316_v13 = vadd.f32 %v4952_v5, %v281_v52  ;;  %v478_v14 = vsel %vm4938_vm7, 0, %v477_v57  ;;  %v248_v52 = vld [vmem:[%s4961_s27 + $0x48] sm:$0xff] }
  0x1f   : > { %v524_v15 = vor.u32 %v522_v55, %v521_v63  ;;  %v525_v16 = vrot.slane %v521_v63, 4  ;;  %v532_v17 = vor.u32 %v530_v59, %v529_v0  ;;  %v5010_v18 = vrot.slane %v561_v4, 7  ;;  %479 = vst [vmem:[#allocation2 + $0x38] sm:$0x1] %v478_v14 }
  0x20   : > { %v558_v20 = vor.u32 %v556_v61, %v555_v10  ;;  %v559_v21 = vrot.slane %v555_v10, 4  ;;  %v534_v22 = vrot.slane %v529_v0, 4  ;;  %v347_v23 = vmax.f32 %v315_v12, 0.0 }
  0x21   : > { %v533_v25 = vsel %vm5002_vm11, %v525_v16, %v532_v17  ;;  %v841_v26 = vsel %vm4996_vm10, %v524_v15, %v840_v9  ;;  %v566_v27 = vor.u32 %v564_v6, %v5010_v18  ;;  %v348_v28 = vmax.f32 %v316_v13, 0.0 }
  0x22   : > { %842 = vst [vmem:[#allocation2 + $0xc] sm:$0xf] %v841_v26  ;;  %v855_v32 = vsel %vm4996_vm10, %v558_v20, %v854_v11  ;;  %v845_v33 = vsel %vm4928_vm5, %v534_v22, %v844_v19  ;;  %v5024_v34 = vpack.c.bf16 %v347_v23, %v347_v23  ;;  %v475_v35 = vsel %vm4938_vm7, 0, %v474_v7 }
  0x23   : > { %843 = vst.msk [vmem:[#allocation2 + $0x10] sm:$0xf] %vm405_vm0, %v533_v25  ;;  %v567_v37 = vsel %vm5002_vm11, %v559_v21, %v566_v27  ;;  %v380_v38 = vpack.c.bf16 %v348_v28, %v348_v28  ;;  %v568_v39 = vrot.slane %v5010_v18, 4  ;;  %v284_v41 = vmul.f32 %v4945_v3, %v249_v24 }
  0x24   : > { %856 = vst [vmem:[#allocation2 + $0x24] sm:$0xf] %v855_v32  ;;  %v570_v43 = vshrl.u32 %v5024_v34, 16  ;;  %v285_v44 = vmul.f32 %v4945_v3, %v250_v29  ;;  %v434_v45 = vsel %vm4928_vm5, 0, %v433_v30  ;;  %v276_v46 = vmul.f32 %v4945_v3, %v241_v31 }
  0x25   : > { %1453 = vrot.lane.b32.xlu0 %v1090_v58, %s4877_s28  ;;  %857 = vst.msk [vmem:[#allocation2 + $0x28] sm:$0xf] %vm405_vm0, %v567_v37  ;;  %v578_v48 = vshrl.u32 %v380_v38, 16  ;;  %v581_v49 = vshll.u32 %v380_v38, 16  ;;  %v319_v50 = vadd.f32 %v4952_v5, %v284_v41  ;;  %v277_v51 = vmul.f32 %v4945_v3, %v242_v36 }
  0x26   : > { %846 = vst [vmem:[#allocation2 + $0x14] sm:$0x1] %v845_v33  ;;  %v5045_v53 = vrot.slane %v570_v43, 7  ;;  %v320_v54 = vadd.f32 %v4952_v5, %v285_v44  ;;  %v311_v55 = vadd.f32 %v4952_v5, %v276_v46  ;;  %v422_v56 = vsel %vm4928_vm5, 0, %v421_v42  ;;  %v865_v58 = vld [vmem:[#allocation2 + $0x38] sm:$0x1] }
  0x27   : > { %v580_v57 = vrot.slane %v578_v48, 7  ;;  %476 = vst [vmem:[#allocation2 + $0x2c] sm:$0x1] %v475_v35  ;;  %v351_v59 = vmax.f32 %v319_v50, 0.0  ;;  %v312_v60 = vadd.f32 %v4952_v5, %v277_v51  ;;  %v5053_v61 = vmul.f32 %v4945_v3, %v247_v47 }
  0x28   : > { %v576_v63 = vrot.slane %v5045_v53, 4  ;;  %v352_v0 = vmax.f32 %v320_v54, 0.0  ;;  %435 = vst [vmem:[#allocation2 + $0x48] sm:$0x1] %v434_v45  ;;  %v343_v4 = vmax.f32 %v311_v55, 0.0  ;;  %v5057_v6 = vmul.f32 %v4945_v3, %v248_v52 }
  0x29   : > { %v1019_v7 = vld [vmem:[#allocation2 + $0xc] sm:$0xf]  ;;  %v583_v9 = vor.u32 %v581_v49, %v580_v57  ;;  %v585_v10 = vrot.slane %v580_v57, 4  ;;  %v383_v11 = vpack.c.bf16 %v351_v59, %v351_v59  ;;  %v344_v12 = vmax.f32 %v312_v60, 0.0  ;;  %423 = vst [vmem:[#allocation2 + $0x18] sm:$0x1] %v422_v56 }
  0x2a   : > { %v1020_v13 = vld [vmem:[#allocation2 + $0x10] sm:$0xf]  ;;  %v1092_v14 = vshrl.u32 %v1019_v7, 16  ;;  %v1095_v15 = vshll.u32 %v1019_v7, 16  ;;  %v384_v16 = vpack.c.bf16 %v352_v0, %v352_v0  ;;  %v5059_v17 = vpack.c.bf16 %v343_v4, %v343_v4  ;;  %v2113_v62 = vld [vmem:[#allocation2 + $0xc] sm:$0xf] }
  0x2b   : > { %v1101_v19 = vshll.u32 %v1020_v13, 16  ;;  %v1105_v20 = vshrl.u32 %v1020_v13, 16  ;;  %v1025_v21 = vld [vmem:[#allocation2 + $0x24] sm:$0xf]  ;;  %v584_v22 = vsel %vm5002_vm11, %v576_v63, %v583_v9  ;;  %v866_v23 = vsel %vm4928_vm5, %v585_v10, %v865_v58 }
  0x2c   : > { %v1094_v24 = vrot.slane %v1092_v14, 4  ;;  %v1097_v25 = vrot.slane %v1095_v15, 5  ;;  %v1026_v26 = vld [vmem:[#allocation2 + $0x28] sm:$0xf]  ;;  %v1140_v27 = vshrl.u32 %v1025_v21, 16  ;;  %v1143_v28 = vshll.u32 %v1025_v21, 16 }
  0x2d   : > { %v1103_v29 = vrot.slane %v1101_v19, 5  ;;  %v1107_v30 = vrot.slane %v1105_v20, 4  ;;  %v1149_v31 = vshll.u32 %v1026_v26, 16  ;;  %v1153_v32 = vshrl.u32 %v1026_v26, 16  ;;  %v1021_v33 = vld [vmem:[#allocation2 + $0x14] sm:$0x1] }
  0x2e   : > { %v1098_v35 = vor.u32 %v1097_v25, %v1094_v24  ;;  %v1142_v36 = vrot.slane %v1140_v27, 4  ;;  %v1145_v37 = vrot.slane %v1143_v28, 5  ;;  %v1111_v38 = vshll.u32 %v1021_v33, 16  ;;  %864 = vst.msk [vmem:[#allocation2 + $0x34] sm:$0xf] %vm405_vm0, %v584_v22  ;;  %v252_v24 = vld [vmem:[%s4961_s27 + $0x68] sm:$0xff] }
  0x2f   : > { %v1151_v41 = vrot.slane %v1149_v31, 5  ;;  %v1108_v42 = vor.u32 %v1107_v30, %v1103_v29  ;;  %867 = vst [vmem:[#allocation2 + $0x38] sm:$0x1] %v866_v23  ;;  %v858_v43 = vld [vmem:[#allocation2 + $0x2c] sm:$0x1]  ;;  %v1155_v44 = vrot.slane %v1153_v32, 4  ;;  %v376_v45 = vpack.c.bf16 %v344_v12, %v344_v12 }
  0x30   : > { %v1099_v46 = vrot.slane %v1098_v35, 4  ;;  %v1146_v47 = vor.u32 %v1145_v37, %v1142_v36  ;;  %v1113_v48 = vrot.slane %v1111_v38, 5  ;;  %v859_v49 = vsel %vm4928_vm5, %v568_v39, %v858_v43  ;;  %v875_v39 = vld [vmem:[#allocation2 + $0x48] sm:$0xf]  ;;  %v847_v10 = vld [vmem:[#allocation2 + $0x18] sm:$0xf] }
  0x31   : > { %v1109_v50 = vrot.slane %v1108_v42, 4  ;;  %860 = vst [vmem:[#allocation2 + $0x2c] sm:$0x1] %v859_v49  ;;  %v1156_v51 = vor.u32 %v1155_v44, %v1151_v41  ;;  %v604_v52 = vshrl.u32 %v383_v11, 16  ;;  %v607_v54 = vshll.u32 %v383_v11, 16  ;;  %v251_v23 = vld [vmem:[%s4961_s27 + $0x60] sm:$0xff] }
  0x32   : > { %v1104_v55 = vsel %vm4983_vm9, %v1099_v46, %v1103_v29  ;;  %v1147_v56 = vrot.slane %v1146_v47, 4  ;;  %v612_v57 = vshrl.u32 %v384_v16, 16  ;;  %v615_v58 = vshll.u32 %v384_v16, 16  ;;  %v430_v28 = vld [vmem:[#allocation2 + $0x3c] sm:$0x1] }
  0x33   : > { %1455 = vrot.lane.b32.xlu1 %v1104_v55, %s4877_s28  ;;  %v1114_v59 = vsel %vm4983_vm9, %v1109_v50, %v1113_v48  ;;  %v5075_v18 = vrot.slane %v1156_v51, 4  ;;  %v606_v60 = vrot.slane %v604_v52, 7  ;;  %v536_v63 = vshrl.u32 %v5059_v17, 16  ;;  %v486_v29 = vld [vmem:[#allocation2 + $0x5c] sm:$0x1] }
  0x34   : > { %v1152_v0 = vsel %vm4983_vm9, %v1147_v56, %v1151_v41  ;;  %v5080_v4 = vrot.slane %v612_v57, 7  ;;  %v539_v7 = vshll.u32 %v5059_v17, 16  ;;  %v544_v9 = vshrl.u32 %v376_v45, 16  ;;  %v471_v42 = vld [vmem:[#allocation2 + $0x20] sm:$0x1] }
  0x35   : > { %1463 = vrot.lane.b32.xlu0 %v1152_v0, %s4877_s28  ;;  %v1029_v11 = vld [vmem:[#allocation2 + $0x34] sm:$0xf]  ;;  %v609_v12 = vor.u32 %v607_v54, %v606_v60  ;;  %v610_v13 = vrot.slane %v606_v60, 4  ;;  %v538_v14 = vrot.slane %v536_v63, 7  ;;  %v547_v15 = vshll.u32 %v376_v45, 16 }
  0x36   : > { %v1030_v16 = vld [vmem:[#allocation2 + $0x38] sm:$0x1]  ;;  %v1173_v19 = vshll.u32 %v1029_v11, 16  ;;  %v1177_v20 = vshrl.u32 %v1029_v11, 16  ;;  %v617_v21 = vor.u32 %v615_v58, %v5080_v4  ;;  %v5085_v22 = vrot.slane %v544_v9, 7 }
  0x37   : > { %v1183_v25 = vshll.u32 %v1030_v16, 16  ;;  %v876_v17 = vsel %vm4996_vm10, %v609_v12, %v875_v39  ;;  %v541_v26 = vor.u32 %v539_v7, %v538_v14  ;;  %v542_v27 = vrot.slane %v538_v14, 4  ;;  %v483_v50 = vld [vmem:[#allocation2 + $0x50] sm:$0x1] }
  0x38   : > { %v5091_v30 = vrot.slane %v1173_v19, 5  ;;  %v1179_v31 = vrot.slane %v1177_v20, 4  ;;  %v1027_v32 = vld [vmem:[#allocation2 + $0x2c] sm:$0x1]  ;;  %v618_v33 = vsel %vm5002_vm11, %v610_v13, %v617_v21  ;;  %877 = vst [vmem:[#allocation2 + $0x48] sm:$0xf] %v876_v17  ;;  %v549_v35 = vor.u32 %v547_v15, %v5085_v22 }
  0x39   : > { %v1185_v36 = vrot.slane %v1183_v25, 5  ;;  %v1159_v37 = vshll.u32 %v1027_v32, 16  ;;  %878 = vst.msk [vmem:[#allocation2 + $0x4c] sm:$0xf] %vm405_vm0, %v618_v33  ;;  %v848_v38 = vsel %vm4996_vm10, %v541_v26, %v847_v10  ;;  %v317_v41 = vadd.f32 %v4952_v5, %v5053_v61 }
  0x3a   : > { %v1180_v43 = vor.u32 %v1179_v31, %v5091_v30  ;;  %v550_v44 = vsel %vm5002_vm11, %v542_v27, %v549_v35  ;;  %849 = vst [vmem:[#allocation2 + $0x18] sm:$0xf] %v848_v38  ;;  %v318_v45 = vadd.f32 %v4952_v5, %v5057_v6  ;;  %v431_v46 = vsel %vm4928_vm5, 0, %v430_v28 }
  0x3b   : > { %1457 = vrot.lane.b32.xlu1 %v1114_v59, %s4877_s28  ;;  %v1161_v47 = vrot.slane %v1159_v37, 5  ;;  %850 = vst.msk [vmem:[#allocation2 + $0x1c] sm:$0xf] %vm405_vm0, %v550_v44  ;;  %v349_v48 = vmax.f32 %v317_v41, 0.0  ;;  %v286_v61 = vmul.f32 %v4945_v3, %v251_v23  ;;  %v287_v49 = vmul.f32 %v4945_v3, %v252_v24 }
  0x3c   : > { %v1181_v51 = vrot.slane %v1180_v43, 4  ;;  %v350_v52 = vmax.f32 %v318_v45, 0.0  ;;  %432 = vst [vmem:[#allocation2 + $0x3c] sm:$0x1] %v431_v46  ;;  %v487_v6 = vsel %vm4938_vm7, 0, %v486_v29  ;;  %v472_v54 = vsel %vm4938_vm7, 0, %v471_v42 }
  0x3d   : > { %v1162_v55 = vsel %vm4983_vm9, %v5075_v18, %v1161_v47  ;;  %v381_v56 = vpack.c.bf16 %v349_v48, %v349_v48  ;;  %v321_v57 = vadd.f32 %v4952_v5, %v286_v61  ;;  %v322_v58 = vadd.f32 %v4952_v5, %v287_v49  ;;  %488 = vst [vmem:[#allocation2 + $0x5c] sm:$0x1] %v487_v6  ;;  %v442_v61 = vld [vmem:[#allocation2 + $0x6c] sm:$0x1]  ;;  %v255_v6 = vld [vmem:[%s4961_s27 + $0x80] sm:$0xff] }
  0x3e   : > { %v1186_v59 = vsel %vm4983_vm9, %v1181_v51, %v1185_v36  ;;  %v382_v60 = vpack.c.bf16 %v350_v52, %v350_v52  ;;  %473 = vst [vmem:[#allocation2 + $0x20] sm:$0x1] %v472_v54  ;;  %v551_v39 = vrot.slane %v5085_v22, 4  ;;  %v484_v63 = vsel %vm4938_vm7, 0, %v483_v50  ;;  %v427_v54 = vld [vmem:[#allocation2 + $0x30] sm:$0x1] }
  0x3f   : > { %1469 = vrot.lane.b32.xlu0 %v1186_v59, %s4877_s28  ;;  %v1034_v0 = vld [vmem:[#allocation2 + $0x48] sm:$0xf]  ;;  %v587_v18 = vshrl.u32 %v381_v56, 16  ;;  %v590_v7 = vshll.u32 %v381_v56, 16  ;;  %v353_v9 = vmax.f32 %v321_v57, 0.0  ;;  %v354_v10 = vmax.f32 %v322_v58, 0.0 }
  0x40   : > { %v1035_v11 = vld [vmem:[#allocation2 + $0x4c] sm:$0xf]  ;;  %v1212_v12 = vshrl.u32 %v1034_v0, 16  ;;  %v1215_v13 = vshll.u32 %v1034_v0, 16  ;;  %v595_v14 = vshrl.u32 %v382_v60, 16  ;;  %v598_v15 = vshll.u32 %v382_v60, 16 }
  0x41   : > { %v1221_v16 = vshll.u32 %v1035_v11, 16  ;;  %v1225_v19 = vshrl.u32 %v1035_v11, 16  ;;  %v1022_v20 = vld [vmem:[#allocation2 + $0x18] sm:$0xf]  ;;  %v589_v21 = vrot.slane %v587_v18, 7  ;;  %v5127_v22 = vpack.c.bf16 %v353_v9, %v353_v9  ;;  %v256_v59 = vld [vmem:[%s4961_s27 + $0x88] sm:$0xff] }
  0x42   : > { %v1214_v23 = vrot.slane %v1212_v12, 4  ;;  %v1217_v24 = vrot.slane %v1215_v13, 5  ;;  %v1023_v25 = vld [vmem:[#allocation2 + $0x1c] sm:$0xf]  ;;  %v1116_v17 = vshrl.u32 %v1022_v20, 16  ;;  %v1119_v26 = vshll.u32 %v1022_v20, 16 }
  0x43   : > { %1465 = vrot.lane.b32.xlu1 %v1162_v55, %s4877_s28  ;;  %v1223_v27 = vrot.slane %v1221_v16, 5  ;;  %v1125_v28 = vshll.u32 %v1023_v25, 16  ;;  %v1129_v29 = vshrl.u32 %v1023_v25, 16  ;;  %v592_v31 = vor.u32 %v590_v7, %v589_v21  ;;  %v868_v32 = vld [vmem:[#allocation2 + $0x3c] sm:$0xf] }
  0x44   : > { %v1218_v33 = vor.u32 %v1217_v24, %v1214_v23  ;;  %v1118_v35 = vrot.slane %v1116_v17, 4  ;;  %v1121_v36 = vrot.slane %v1119_v26, 5  ;;  %v593_v37 = vrot.slane %v589_v21, 4  ;;  %485 = vst [vmem:[#allocation2 + $0x50] sm:$0x1] %v484_v63  ;;  %v254_v11 = vld [vmem:[%s4961_s27 + $0x78] sm:$0xff] }
  0x45   : > { %v1127_v38 = vrot.slane %v1125_v28, 5  ;;  %v1131_v41 = vrot.slane %v1129_v29, 4  ;;  %v5130_v42 = vrot.slane %v595_v14, 7  ;;  %v869_v43 = vsel %vm4996_vm10, %v592_v31, %v868_v32  ;;  %v851_v44 = vld [vmem:[#allocation2 + $0x20] sm:$0x1] }
  0x46   : > { %v1219_v45 = vrot.slane %v1218_v33, 4  ;;  %v1122_v46 = vor.u32 %v1121_v36, %v1118_v35  ;;  %870 = vst [vmem:[#allocation2 + $0x3c] sm:$0xf] %v869_v43  ;;  %v386_v47 = vpack.c.bf16 %v354_v10, %v354_v10  ;;  %v621_v48 = vshrl.u32 %v5127_v22, 16  ;;  %v253_v10 = vld [vmem:[%s4961_s27 + $0x70] sm:$0xff] }
  0x47   : > { %v600_v49 = vor.u32 %v598_v15, %v5130_v42  ;;  %v852_v50 = vsel %vm4928_vm5, %v551_v39, %v851_v44  ;;  %v1132_v51 = vor.u32 %v1131_v41, %v1127_v38  ;;  %v619_v52 = vrot.slane %v5080_v4, 4  ;;  %v886_v12 = vld [vmem:[#allocation2 + $0x5c] sm:$0x1] }
  0x48   : > { %v1224_v55 = vsel %vm4983_vm9, %v1219_v45, %v1223_v27  ;;  %v1123_v56 = vrot.slane %v1122_v46, 4  ;;  %v5142_v57 = vrot.slane %v621_v48, 7  ;;  %v629_v58 = vshrl.u32 %v386_v47, 16  ;;  %853 = vst [vmem:[#allocation2 + $0x20] sm:$0x1] %v852_v50 }
  0x49   : > { %1475 = vrot.lane.b32.xlu0 %v1224_v55, %s4877_s28  ;;  %v601_v60 = vsel %vm5002_vm11, %v593_v37, %v600_v49  ;;  %v632_v39 = vshll.u32 %v386_v47, 16  ;;  %v5148_v4 = vrot.slane %v1132_v51, 4  ;;  %v1227_v63 = vrot.slane %v1225_v19, 4 }
  0x4a   : > { %v1128_v0 = vsel %vm4983_vm9, %v1123_v56, %v1127_v38  ;;  %871 = vst.msk [vmem:[#allocation2 + $0x40] sm:$0xf] %vm405_vm0, %v601_v60  ;;  %v627_v18 = vrot.slane %v5142_v57, 4  ;;  %v631_v7 = vrot.slane %v629_v58, 7  ;;  %v290_v9 = vmul.f32 %v4945_v3, %v255_v6  ;;  %v258_v60 = vld [vmem:[%s4961_s27 + $0x98] sm:$0xff] }
  0x4b   : > { %1459 = vrot.lane.b32.xlu2 %v1128_v0, %s4877_s28  ;;  %v1228_v13 = vor.u32 %v1227_v63, %v1223_v27  ;;  %v291_v14 = vmul.f32 %v4945_v3, %v256_v59  ;;  %v443_v15 = vsel %vm4928_vm5, 0, %v442_v61  ;;  %v428_v16 = vsel %vm4928_vm5, 0, %v427_v54  ;;  %v879_v33 = vld [vmem:[#allocation2 + $0x50] sm:$0x1] }
  0x4c   : > { %v634_v19 = vor.u32 %v632_v39, %v631_v7  ;;  %v636_v20 = vrot.slane %v631_v7, 4  ;;  %v325_v21 = vadd.f32 %v4952_v5, %v290_v9  ;;  %444 = vst [vmem:[#allocation2 + $0x6c] sm:$0x1] %v443_v15  ;;  %v573_v23 = vshll.u32 %v5024_v34, 16  ;;  %v439_v34 = vld [vmem:[#allocation2 + $0x60] sm:$0x1] }
  0x4d   : > { %v1031_v24 = vld [vmem:[#allocation2 + $0x3c] sm:$0xf]  ;;  %v5165_v25 = vrot.slane %v1228_v13, 4  ;;  %v326_v17 = vadd.f32 %v4952_v5, %v291_v14  ;;  %429 = vst [vmem:[#allocation2 + $0x30] sm:$0x1] %v428_v16  ;;  %v288_v26 = vmul.f32 %v4945_v3, %v253_v10  ;;  %v289_v27 = vmul.f32 %v4945_v3, %v254_v11  ;;  %v257_v59 = vld [vmem:[%s4961_s27 + $0x90] sm:$0xff] }
  0x4e   : > { %v1188_v28 = vshrl.u32 %v1031_v24, 16  ;;  %v1191_v29 = vshll.u32 %v1031_v24, 16  ;;  %v635_v31 = vsel %vm5002_vm11, %v627_v18, %v634_v19  ;;  %v887_v32 = vsel %vm4928_vm5, %v636_v20, %v886_v12 }
  0x4f   : > { %885 = vst.msk [vmem:[#allocation2 + $0x58] sm:$0xf] %vm405_vm0, %v635_v31  ;;  %v1024_v35 = vld [vmem:[#allocation2 + $0x20] sm:$0x1]  ;;  %v880_v36 = vsel %vm4928_vm5, %v619_v52, %v879_v33  ;;  %v357_v37 = vmax.f32 %v325_v21, 0.0  ;;  %v358_v38 = vmax.f32 %v326_v17, 0.0  ;;  %v575_v41 = vor.u32 %v573_v23, %v5045_v53 }
  0x50   : > { %v1190_v43 = vrot.slane %v1188_v28, 4  ;;  %v1193_v44 = vrot.slane %v1191_v29, 5  ;;  %888 = vst [vmem:[#allocation2 + $0x5c] sm:$0x1] %v887_v32  ;;  %v1135_v45 = vshll.u32 %v1024_v35, 16  ;;  %v323_v46 = vadd.f32 %v4952_v5, %v288_v26 }
  0x51   : > { %v5179_v47 = vld [vmem:[#allocation2 + $0x40] sm:$0xf]  ;;  %881 = vst [vmem:[#allocation2 + $0x50] sm:$0x1] %v880_v36  ;;  %v389_v48 = vpack.c.bf16 %v357_v37, %v357_v37  ;;  %v390_v61 = vpack.c.bf16 %v358_v38, %v358_v38  ;;  %v324_v49 = vadd.f32 %v4952_v5, %v289_v27  ;;  %v440_v50 = vsel %vm4928_vm5, 0, %v439_v34 }
  0x52   : > { %v1194_v51 = vor.u32 %v1193_v44, %v1190_v43  ;;  %v1197_v53 = vshll.u32 %v5179_v47, 16  ;;  %v1201_v52 = vshrl.u32 %v5179_v47, 16  ;;  %v1137_v6 = vrot.slane %v1135_v45, 5  ;;  %441 = vst [vmem:[#allocation2 + $0x60] sm:$0x1] %v440_v50 }
  0x53   : > { %v655_v54 = vshrl.u32 %v389_v48, 16  ;;  %v658_v55 = vshll.u32 %v389_v48, 16  ;;  %v663_v56 = vshrl.u32 %v390_v61, 16  ;;  %v666_v58 = vshll.u32 %v390_v61, 16  ;;  %v896_v15 = vld [vmem:[#allocation2 + $0x6c] sm:$0xf] }
  0x54   : > { %v1195_v39 = vrot.slane %v1194_v51, 4  ;;  %v5188_v63 = vrot.slane %v1197_v53, 5  ;;  %v1138_v0 = vsel %vm4983_vm9, %v5148_v4, %v1137_v6  ;;  %v861_v18 = vld [vmem:[#allocation2 + $0x30] sm:$0xf]  ;;  %v355_v7 = vmax.f32 %v323_v46, 0.0 }
  0x55   : > { %1461 = vrot.lane.b32.xlu2 %v1138_v0, %s4877_s28  ;;  %v657_v9 = vrot.slane %v655_v54, 7  ;;  %v5194_v10 = vrot.slane %v663_v56, 7  ;;  %v862_v11 = vsel %vm4996_vm10, %v575_v41, %v861_v18  ;;  %v356_v12 = vmax.f32 %v324_v49, 0.0  ;;  %v495_v32 = vld [vmem:[#allocation2 + $0x80] sm:$0x1] }
  0x56   : > { %v1200_v13 = vsel %vm4983_vm9, %v1195_v39, %v5188_v63  ;;  %v1038_v14 = vld [vmem:[#allocation2 + $0x58] sm:$0xf]  ;;  %863 = vst [vmem:[#allocation2 + $0x30] sm:$0xf] %v862_v11  ;;  %v387_v16 = vpack.c.bf16 %v355_v7, %v355_v7  ;;  %v292_v4 = vmul.f32 %v4945_v3, %v257_v59  ;;  %v293_v19 = vmul.f32 %v4945_v3, %v258_v60  ;;  %v480_v6 = vld [vmem:[#allocation2 + $0x44] sm:$0x1] }
  0x57   : > { %1471 = vrot.lane.b32.xlu1 %v1200_v13, %s4877_s28  ;;  %v1039_v20 = vld [vmem:[#allocation2 + $0x5c] sm:$0x1]  ;;  %v1245_v21 = vshll.u32 %v1038_v14, 16  ;;  %v1249_v23 = vshrl.u32 %v1038_v14, 16  ;;  %v660_v24 = vor.u32 %v658_v55, %v657_v9  ;;  %v661_v17 = vrot.slane %v657_v9, 4 }
  0x58   : > { %v1255_v26 = vshll.u32 %v1039_v20, 16  ;;  %v1036_v27 = vld [vmem:[#allocation2 + $0x50] sm:$0x1]  ;;  %v668_v28 = vor.u32 %v666_v58, %v5194_v10  ;;  %v388_v29 = vpack.c.bf16 %v356_v12, %v356_v12  ;;  %v638_v31 = vshrl.u32 %v387_v16, 16  ;;  %v492_v54 = vld [vmem:[#allocation2 + $0x74] sm:$0x1] }
  0x59   : > { %v5205_v33 = vrot.slane %v1245_v21, 5  ;;  %v1251_v34 = vrot.slane %v1249_v23, 4  ;;  %v1231_v35 = vshll.u32 %v1036_v27, 16  ;;  %v897_v36 = vsel %vm4996_vm10, %v660_v24, %v896_v15  ;;  %v889_v37 = vld [vmem:[#allocation2 + $0x60] sm:$0xf]  ;;  %v261_v12 = vld [vmem:[%s4961_s27 + $0xb0] sm:$0xff] }
  0x5a   : > { %v1257_v38 = vrot.slane %v1255_v26, 5  ;;  %v669_v41 = vsel %vm5002_vm11, %v661_v17, %v668_v28  ;;  %898 = vst [vmem:[#allocation2 + $0x6c] sm:$0xf] %v897_v36  ;;  %v640_v43 = vrot.slane %v638_v31, 7  ;;  %v641_v44 = vshll.u32 %v387_v16, 16 }
  0x5b   : > { %v1252_v45 = vor.u32 %v1251_v34, %v5205_v33  ;;  %v1233_v46 = vrot.slane %v1231_v35, 5  ;;  %899 = vst.msk [vmem:[#allocation2 + $0x70] sm:$0xf] %vm405_vm0, %v669_v41  ;;  %v646_v48 = vshrl.u32 %v388_v29, 16  ;;  %v649_v61 = vshll.u32 %v388_v29, 16 }
  0x5c   : > { %v643_v49 = vor.u32 %v641_v44, %v640_v43  ;;  %v644_v50 = vrot.slane %v640_v43, 4  ;;  %v327_v51 = vadd.f32 %v4952_v5, %v292_v4  ;;  %v328_v53 = vadd.f32 %v4952_v5, %v293_v19 }
  0x5d   : > { %v1253_v55 = vrot.slane %v1252_v45, 4  ;;  %v1234_v56 = vsel %vm4983_vm9, %v5165_v25, %v1233_v46  ;;  %v1028_v58 = vld [vmem:[#allocation2 + $0x30] sm:$0xf]  ;;  %v5218_v59 = vrot.slane %v646_v48, 7  ;;  %v496_v60 = vsel %vm4938_vm7, 0, %v495_v32 }
  0x5e   : > { %v1164_v39 = vshrl.u32 %v1028_v58, 16  ;;  %v1167_v0 = vshll.u32 %v1028_v58, 16  ;;  %v890_v18 = vsel %vm4996_vm10, %v643_v49, %v889_v37  ;;  %v359_v5 = vmax.f32 %v327_v51, 0.0  ;;  %497 = vst [vmem:[#allocation2 + $0x80] sm:$0x1] %v496_v60  ;;  %v259_v58 = vld [vmem:[%s4961_s27 + $0xa0] sm:$0xff] }
  0x5f   : > { %v1258_v7 = vsel %vm4983_vm9, %v1253_v55, %v1257_v38  ;;  %1477 = vrot.lane.b32.xlu1 %v1234_v56, %s4877_s28  ;;  %v651_v25 = vor.u32 %v649_v61, %v5218_v59  ;;  %891 = vst [vmem:[#allocation2 + $0x60] sm:$0xf] %v890_v18  ;;  %v360_v9 = vmax.f32 %v328_v53, 0.0  ;;  %v481_v11 = vsel %vm4938_vm7, 0, %v480_v6  ;;  %v262_v53 = vld [vmem:[%s4961_s27 + $0xb8] sm:$0xff] }
  0x60   : > { %1481 = vrot.lane.b32.xlu0 %v1258_v7, %s4877_s28  ;;  %v1166_v13 = vrot.slane %v1164_v39, 4  ;;  %v1169_v14 = vrot.slane %v1167_v0, 5  ;;  %v5232_v15 = vpack.c.bf16 %v359_v5, %v359_v5  ;;  %482 = vst [vmem:[#allocation2 + $0x44] sm:$0x1] %v481_v11  ;;  %v602_v16 = vrot.slane %v5130_v42, 4  ;;  %v263_v7 = vld [vmem:[%s4961_s27 + $0xc0] sm:$0xff] }
  0x61   : > { %v1043_v4 = vld [vmem:[#allocation2 + $0x6c] sm:$0xf]  ;;  %v652_v19 = vsel %vm5002_vm11, %v644_v50, %v651_v25  ;;  %v392_v20 = vpack.c.bf16 %v360_v9, %v360_v9  ;;  %v1203_v21 = vrot.slane %v1201_v52, 4  ;;  %v493_v23 = vsel %vm4938_vm7, 0, %v492_v54  ;;  %v451_v6 = vld [vmem:[#allocation2 + $0x90] sm:$0x1] }
  0x62   : > { %v1044_v24 = vld [vmem:[#allocation2 + $0x70] sm:$0xf]  ;;  %v1284_v17 = vshrl.u32 %v1043_v4, 16  ;;  %v1287_v26 = vshll.u32 %v1043_v4, 16  ;;  %v1170_v27 = vor.u32 %v1169_v14, %v1166_v13  ;;  %892 = vst.msk [vmem:[#allocation2 + $0x64] sm:$0xf] %vm405_vm0, %v652_v19  ;;  %v296_v28 = vmul.f32 %v4945_v3, %v261_v12 }
  0x63   : > { %v1293_v42 = vshll.u32 %v1044_v24, 16  ;;  %v1297_v29 = vshrl.u32 %v1044_v24, 16  ;;  %v672_v31 = vshrl.u32 %v5232_v15, 16  ;;  %v680_v32 = vshrl.u32 %v392_v20, 16  ;;  %494 = vst [vmem:[#allocation2 + $0x74] sm:$0x1] %v493_v23 }
  0x64   : > { %v1286_v34 = vrot.slane %v1284_v17, 4  ;;  %v1289_v47 = vrot.slane %v1287_v26, 5  ;;  %v1171_v52 = vrot.slane %v1170_v27, 4  ;;  %v683_v35 = vshll.u32 %v392_v20, 16  ;;  %v5279_v19 = vld [vmem:[%s6958_s1] ss:$0 sm:$0xff] }
  0x65   : > { %v1295_v36 = vrot.slane %v1293_v42, 5  ;;  %v5244_v37 = vrot.slane %v672_v31, 7  ;;  %v682_v38 = vrot.slane %v680_v32, 7  ;;  %v1204_v41 = vor.u32 %v1203_v21, %v5188_v63  ;;  %v907_v45 = vld [vmem:[#allocation2 + $0x80] sm:$0x1]  ;;  %v260_v21 = vld [vmem:[%s4961_s27 + $0xa8] sm:$0xff] }
  0x66   : > { %v1290_v43 = vor.u32 %v1289_v47, %v1286_v34  ;;  %v1176_v3 = vsel %vm4983_vm9, %v1171_v52, %v5091_v30  ;;  %v1040_v44 = vld [vmem:[#allocation2 + $0x60] sm:$0xf]  ;;  %v670_v46 = vrot.slane %v5194_v10, 4  ;;  %v1299_v48 = vrot.slane %v1297_v29, 4  ;;  %v436_v10 = vld [vmem:[#allocation2 + $0x54] sm:$0x1] }
  0x67   : > { %1467 = vrot.lane.b32.xlu2 %v1176_v3, %s4877_s28  ;;  %v1260_v61 = vshrl.u32 %v1040_v44, 16  ;;  %v1263_v49 = vshll.u32 %v1040_v44, 16  ;;  %v678_v50 = vrot.slane %v5244_v37, 4  ;;  %v685_v51 = vor.u32 %v683_v35, %v682_v38  ;;  %v872_v63 = vld [vmem:[#allocation2 + $0x44] sm:$0x1]  ;;  %v264_v47 = vld [vmem:[%s4961_s27 + $0xc8] sm:$0xff] }
  0x68   : > { %v1291_v54 = vrot.slane %v1290_v43, 4  ;;  %v687_v55 = vrot.slane %v682_v38, 4  ;;  %v873_v30 = vsel %vm4928_vm5, %v602_v16, %v872_v63  ;;  %v5256_v56 = vrot.slane %v1204_v41, 4  ;;  %v448_v23 = vld [vmem:[#allocation2 + $0x84] sm:$0x1] }
  0x69   : > { %v5259_v60 = vld [vmem:[#allocation2 + $0x64] sm:$0xf]  ;;  %v1262_v39 = vrot.slane %v1260_v61, 4  ;;  %v1265_v0 = vrot.slane %v1263_v49, 5  ;;  %v686_v18 = vsel %vm5002_vm11, %v678_v50, %v685_v51  ;;  %874 = vst [vmem:[#allocation2 + $0x44] sm:$0x1] %v873_v30  ;;  %v1300_v5 = vor.u32 %v1299_v48, %v1295_v36 }
  0x6a   : > { %v1296_v25 = vsel %vm4983_vm9, %v1291_v54, %v1295_v36  ;;  %v1269_v9 = vshll.u32 %v5259_v60, 16  ;;  %v1273_v11 = vshrl.u32 %v5259_v60, 16  ;;  %906 = vst.msk [vmem:[#allocation2 + $0x7c] sm:$0xf] %vm405_vm0, %v686_v18  ;;  %v908_v12 = vsel %vm4928_vm5, %v687_v55, %v907_v45  ;;  %v900_v13 = vld [vmem:[#allocation2 + $0x74] sm:$0x1] }
  0x6b   : > { %1487 = vrot.lane.b32.xlu0 %v1296_v25, %s4877_s28  ;;  %v1266_v14 = vor.u32 %v1265_v0, %v1262_v39  ;;  %909 = vst [vmem:[#allocation2 + $0x80] sm:$0x1] %v908_v12  ;;  %v901_v16 = vsel %vm4928_vm5, %v670_v46, %v900_v13  ;;  %v5274_v4 = vrot.slane %v1300_v5, 4  ;;  %v297_v20 = vmul.f32 %v5279_v19, %v262_v53  ;;  %v5288_v17 = vld [vmem:[%s6959_s2] ss:$0 sm:$0xff] }
  0x6c   : > { %v5283_v24 = vrot.slane %v1269_v9, 5  ;;  %902 = vst [vmem:[#allocation2 + $0x74] sm:$0x1] %v901_v16  ;;  %v331_v26 = vadd.f32 %v5288_v17, %v296_v28  ;;  %v452_v27 = vsel %vm4928_vm5, 0, %v451_v6  ;;  %v437_v42 = vsel %vm4928_vm5, 0, %v436_v10 }
  0x6d   : > { %v1267_v29 = vrot.slane %v1266_v14, 4  ;;  %v332_v31 = vadd.f32 %v5288_v17, %v297_v20  ;;  %453 = vst [vmem:[#allocation2 + $0x90] sm:$0x1] %v452_v27  ;;  %v624_v32 = vshll.u32 %v5127_v22, 16  ;;  %v294_v34 = vmul.f32 %v5279_v19, %v259_v58  ;;  %v504_v38 = vld [vmem:[#allocation2 + $0xa4] sm:$0x1] }
  0x6e   : > { %v363_v52 = vmax.f32 %v331_v26, 0.0  ;;  %438 = vst [vmem:[#allocation2 + $0x54] sm:$0x1] %v437_v42  ;;  %v295_v35 = vmul.f32 %v5279_v19, %v260_v21  ;;  %v449_v28 = vsel %vm4928_vm5, 0, %v448_v23  ;;  %v298_v36 = vmul.f32 %v5279_v19, %v263_v7  ;;  %v2122_v8 = vld [vmem:[#allocation2 + $0x30] sm:$0xf] }
  0x6f   : > { %v1272_v41 = vsel %vm4983_vm9, %v1267_v29, %v5283_v24  ;;  %v364_v43 = vmax.f32 %v332_v31, 0.0  ;;  %v626_v22 = vor.u32 %v624_v32, %v5142_v57  ;;  %v329_v3 = vadd.f32 %v5288_v17, %v294_v34  ;;  %450 = vst [vmem:[#allocation2 + $0x84] sm:$0x1] %v449_v28 }
  0x70   : > { %1483 = vrot.lane.b32.xlu1 %v1272_v41, %s4877_s28  ;;  %v1033_v44 = vld [vmem:[#allocation2 + $0x44] sm:$0x1]  ;;  %v395_v45 = vpack.c.bf16 %v363_v52, %v363_v52  ;;  %v330_v46 = vadd.f32 %v5288_v17, %v295_v35  ;;  %v299_v48 = vmul.f32 %v5279_v19, %v264_v47  ;;  %v333_v61 = vadd.f32 %v5288_v17, %v298_v36  ;;  %v501_v36 = vld [vmem:[#allocation2 + $0x98] sm:$0x1] }
  0x71   : > { %v1047_v49 = vld [vmem:[#allocation2 + $0x7c] sm:$0xf]  ;;  %v1207_v50 = vshll.u32 %v1033_v44, 16  ;;  %v396_v51 = vpack.c.bf16 %v364_v43, %v364_v43  ;;  %v361_v63 = vmax.f32 %v329_v3, 0.0  ;;  %v505_v57 = vsel %vm4938_vm7, 0, %v504_v38 }
  0x72   : > { %v1048_v53 = vld [vmem:[#allocation2 + $0x80] sm:$0x1]  ;;  %v1317_v6 = vshll.u32 %v1047_v49, 16  ;;  %v1321_v54 = vshrl.u32 %v1047_v49, 16  ;;  %v706_v55 = vshrl.u32 %v395_v45, 16  ;;  %v709_v30 = vshll.u32 %v395_v45, 16 }
  0x73   : > { %v1327_v10 = vshll.u32 %v1048_v53, 16  ;;  %v1209_v58 = vrot.slane %v1207_v50, 5  ;;  %v1045_v39 = vld [vmem:[#allocation2 + $0x74] sm:$0x1]  ;;  %v714_v0 = vshrl.u32 %v396_v51, 16  ;;  %v717_v18 = vshll.u32 %v396_v51, 16 }
  0x74   : > { %v5314_v5 = vrot.slane %v1317_v6, 5  ;;  %v1323_v7 = vrot.slane %v1321_v54, 4  ;;  %v1303_v25 = vshll.u32 %v1045_v39, 16  ;;  %v708_v9 = vrot.slane %v706_v55, 7  ;;  %v917_v12 = vld [vmem:[#allocation2 + $0x90] sm:$0xf] }
  0x75   : > { %v1329_v13 = vrot.slane %v1327_v10, 5  ;;  %v1210_v14 = vsel %vm4983_vm9, %v5256_v56, %v1209_v58  ;;  %v5319_v16 = vrot.slane %v714_v0, 7  ;;  %v882_v20 = vld [vmem:[#allocation2 + $0x54] sm:$0xf]  ;;  %v362_v21 = vmax.f32 %v330_v46, 0.0  ;;  %v267_v50 = vld [vmem:[%s4961_s27 + $0xe0] sm:$0xff] }
  0x76   : > { %v1324_v23 = vor.u32 %v1323_v7, %v5314_v5  ;;  %1473 = vrot.lane.b32.xlu2 %v1210_v14, %s4877_s28  ;;  %v1305_v26 = vrot.slane %v1303_v25, 5  ;;  %v711_v27 = vor.u32 %v709_v30, %v708_v9  ;;  %v712_v42 = vrot.slane %v708_v9, 4  ;;  %506 = vst [vmem:[#allocation2 + $0xa4] sm:$0x1] %v505_v57  ;;  %v489_v56 = vld [vmem:[#allocation2 + $0x68] sm:$0x1] }
  0x77   : > { %v719_v29 = vor.u32 %v717_v18, %v5319_v16  ;;  %v883_v31 = vsel %vm4996_vm10, %v626_v22, %v882_v20  ;;  %v393_v32 = vpack.c.bf16 %v361_v63, %v361_v63  ;;  %v394_v34 = vpack.c.bf16 %v362_v21, %v362_v21  ;;  %v268_v51 = vld [vmem:[%s4961_s27 + $0xe8] sm:$0xff]  ;;  %v910_v63 = vld [vmem:[#allocation2 + $0x84] sm:$0xf]  ;;  %v265_v58 = vld [vmem:[%s4961_s27 + $0xd0] sm:$0xff] }
  0x78   : > { %v1325_v47 = vrot.slane %v1324_v23, 4  ;;  %v1306_v52 = vsel %vm4983_vm9, %v5274_v4, %v1305_v26  ;;  %v918_v35 = vsel %vm4996_vm10, %v711_v27, %v917_v12  ;;  %884 = vst [vmem:[#allocation2 + $0x54] sm:$0xf] %v883_v31  ;;  %v334_v28 = vadd.f32 %v5288_v17, %v299_v48 }
  0x79   : > { %1489 = vrot.lane.b32.xlu1 %v1306_v52, %s4877_s28  ;;  %v720_v38 = vsel %vm5002_vm11, %v712_v42, %v719_v29  ;;  %919 = vst [vmem:[#allocation2 + $0x90] sm:$0xf] %v918_v35  ;;  %v689_v41 = vshrl.u32 %v393_v32, 16  ;;  %v692_v43 = vshll.u32 %v393_v32, 16  ;;  %v697_v22 = vshrl.u32 %v394_v34, 16 }
  0x7a   : > { %v1330_v4 = vsel %vm4983_vm9, %v1325_v47, %v1329_v13  ;;  %920 = vst.msk [vmem:[#allocation2 + $0x94] sm:$0xf] %vm405_vm0, %v720_v38  ;;  %v700_v3 = vshll.u32 %v394_v34, 16  ;;  %v365_v44 = vmax.f32 %v333_v61, 0.0  ;;  %v366_v45 = vmax.f32 %v334_v28, 0.0 }
  0x7b   : > { %1493 = vrot.lane.b32.xlu0 %v1330_v4, %s4877_s28  ;;  %v691_v46 = vrot.slane %v689_v41, 7  ;;  %v5339_v48 = vrot.slane %v697_v22, 7  ;;  %v490_v49 = vsel %vm4938_vm7, 0, %v489_v56  ;;  %v5349_v61 = vrot.slane %v1273_v11, 4 }
  0x7c   : > { %v5345_v57 = vpack.c.bf16 %v365_v44, %v365_v44  ;;  %v398_v53 = vpack.c.bf16 %v366_v45, %v366_v45  ;;  %491 = vst [vmem:[#allocation2 + $0x68] sm:$0x1] %v490_v49  ;;  %v502_v6 = vsel %vm4938_vm7, 0, %v501_v36  ;;  %v653_v10 = vrot.slane %v5218_v59, 4  ;;  %v266_v59 = vld [vmem:[%s4961_s27 + $0xd8] sm:$0xff] }
  0x7d   : > { %v694_v54 = vor.u32 %v692_v43, %v691_v46  ;;  %v695_v55 = vrot.slane %v691_v46, 4  ;;  %v702_v30 = vor.u32 %v700_v3, %v5339_v48  ;;  %503 = vst [vmem:[#allocation2 + $0x98] sm:$0x1] %v502_v6  ;;  %v721_v60 = vrot.slane %v5319_v16, 4  ;;  %v928_v41 = vld [vmem:[#allocation2 + $0xa4] sm:$0x1] }
  0x7e   : > { %v723_v39 = vshrl.u32 %v5345_v57, 16  ;;  %v731_v0 = vshrl.u32 %v398_v53, 16  ;;  %v734_v18 = vshll.u32 %v398_v53, 16  ;;  %v302_v9 = vmul.f32 %v5279_v19, %v267_v50  ;;  %v460_v53 = vld [vmem:[#allocation2 + $0xb4] sm:$0x1] }
  0x7f   : > { %v1037_v11 = vld [vmem:[#allocation2 + $0x54] sm:$0xf]  ;;  %v703_v7 = vsel %vm5002_vm11, %v695_v55, %v702_v30  ;;  %v911_v25 = vsel %vm4996_vm10, %v694_v54, %v910_v63  ;;  %v303_v12 = vmul.f32 %v5279_v19, %v268_v51  ;;  %v1276_v21 = vor.u32 %v5349_v61, %v5283_v24 }
  0x80   : > { %v1052_v13 = vld [vmem:[#allocation2 + $0x90] sm:$0xf]  ;;  %v1236_v14 = vshrl.u32 %v1037_v11, 16  ;;  %v1239_v20 = vshll.u32 %v1037_v11, 16  ;;  %912 = vst [vmem:[#allocation2 + $0x84] sm:$0xf] %v911_v25  ;;  %v5368_v16 = vmul.f32 %v5279_v19, %v265_v58  ;;  %v337_v42 = vadd.f32 %v5288_v17, %v302_v9 }
  0x81   : > { %v1053_v23 = vld [vmem:[#allocation2 + $0x94] sm:$0xf]  ;;  %v1356_v26 = vshrl.u32 %v1052_v13, 16  ;;  %v1359_v27 = vshll.u32 %v1052_v13, 16  ;;  %913 = vst.msk [vmem:[#allocation2 + $0x88] sm:$0xf] %vm405_vm0, %v703_v7  ;;  %v338_v29 = vadd.f32 %v5288_v17, %v303_v12  ;;  %v301_v4 = vmul.f32 %v5279_v19, %v266_v59 }
  0x82   : > { %v1365_v31 = vshll.u32 %v1053_v23, 16  ;;  %v1369_v32 = vshrl.u32 %v1053_v23, 16  ;;  %v1238_v34 = vrot.slane %v1236_v14, 4  ;;  %v1241_v56 = vrot.slane %v1239_v20, 5  ;;  %v445_v59 = vld [vmem:[#allocation2 + $0x78] sm:$0x1] }
  0x83   : > { %v1358_v47 = vrot.slane %v1356_v26, 4  ;;  %v1361_v52 = vrot.slane %v1359_v27, 5  ;;  %v5373_v35 = vrot.slane %v723_v39, 7  ;;  %v733_v24 = vrot.slane %v731_v0, 7  ;;  %v893_v28 = vld [vmem:[#allocation2 + $0x68] sm:$0x1] }
  0x84   : > { %v1367_v36 = vrot.slane %v1365_v31, 5  ;;  %v1242_v38 = vor.u32 %v1241_v56, %v1238_v34  ;;  %v894_v43 = vsel %vm4928_vm5, %v653_v10, %v893_v28  ;;  %v921_v22 = vld [vmem:[#allocation2 + $0x98] sm:$0x1]  ;;  %v1371_v51 = vrot.slane %v1369_v32, 4 }
  0x85   : > { %v1362_v3 = vor.u32 %v1361_v52, %v1358_v47  ;;  %v729_v44 = vrot.slane %v5373_v35, 4  ;;  %v736_v45 = vor.u32 %v734_v18, %v733_v24  ;;  %v738_v46 = vrot.slane %v733_v24, 4  ;;  %895 = vst [vmem:[#allocation2 + $0x68] sm:$0x1] %v894_v43 }
  0x86   : > { %v1243_v49 = vrot.slane %v1242_v38, 4  ;;  %v922_v50 = vsel %vm4928_vm5, %v721_v60, %v921_v22  ;;  %v369_v63 = vmax.f32 %v337_v42, 0.0  ;;  %v370_v55 = vmax.f32 %v338_v29, 0.0 }
  0x87   : > { %v1363_v61 = vrot.slane %v1362_v3, 4  ;;  %v1049_v6 = vld [vmem:[#allocation2 + $0x84] sm:$0xf]  ;;  %v737_v54 = vsel %vm5002_vm11, %v729_v44, %v736_v45  ;;  %v929_v19 = vsel %vm4928_vm5, %v738_v46, %v928_v41  ;;  %923 = vst [vmem:[#allocation2 + $0x98] sm:$0x1] %v922_v50  ;;  %v1372_v0 = vor.u32 %v1371_v51, %v1367_v36 }
  0x88   : > { %v1248_v30 = vsel %vm4983_vm9, %v1243_v49, %v5205_v33  ;;  %v5388_v10 = vld [vmem:[#allocation2 + $0x88] sm:$0xf]  ;;  %v1332_v58 = vshrl.u32 %v1049_v6, 16  ;;  %v1335_v39 = vshll.u32 %v1049_v6, 16  ;;  %927 = vst.msk [vmem:[#allocation2 + $0xa0] sm:$0xf] %vm405_vm0, %v737_v54  ;;  %v401_v7 = vpack.c.bf16 %v369_v63, %v369_v63 }
  0x89   : > { %v1368_v18 = vsel %vm4983_vm9, %v1363_v61, %v1367_v36  ;;  %1479 = vrot.lane.b32.xlu2 %v1248_v30, %s4877_s28  ;;  %v1341_v60 = vshll.u32 %v5388_v10, 16  ;;  %930 = vst [vmem:[#allocation2 + $0xa4] sm:$0x1] %v929_v19  ;;  %v1277_v11 = vrot.slane %v1276_v21, 4  ;;  %v5396_v9 = vrot.slane %v1372_v0, 4 }
  0x8a   : > { %1499 = vrot.lane.b32.xlu0 %v1368_v18, %s4877_s28  ;;  %v1334_v33 = vrot.slane %v1332_v58, 4  ;;  %v1337_v25 = vrot.slane %v1335_v39, 5  ;;  %v402_v12 = vpack.c.bf16 %v370_v55, %v370_v55  ;;  %v461_v14 = vsel %vm4928_vm5, 0, %v460_v53  ;;  %v457_v50 = vld [vmem:[#allocation2 + $0xa8] sm:$0x1] }
  0x8b   : > { %v5398_v13 = vrot.slane %v1341_v60, 5  ;;  %v757_v20 = vshrl.u32 %v401_v7, 16  ;;  %v760_v23 = vshll.u32 %v401_v7, 16  ;;  %462 = vst [vmem:[#allocation2 + $0xb4] sm:$0x1] %v461_v14  ;;  %v446_v32 = vsel %vm4928_vm5, 0, %v445_v59 }
  0x8c   : > { %v1338_v26 = vor.u32 %v1337_v25, %v1334_v33  ;;  %v1042_v27 = vld [vmem:[#allocation2 + $0x68] sm:$0x1]  ;;  %v765_v21 = vshrl.u32 %v402_v12, 16  ;;  %v768_v42 = vshll.u32 %v402_v12, 16  ;;  %v675_v34 = vshll.u32 %v5232_v15, 16 }
  0x8d   : > { %v1279_v29 = vshll.u32 %v1042_v27, 16  ;;  %v759_v31 = vrot.slane %v757_v20, 7  ;;  %447 = vst [vmem:[#allocation2 + $0x78] sm:$0x1] %v446_v32  ;;  %v335_v24 = vadd.f32 %v5288_v17, %v5368_v16  ;;  %v336_v28 = vadd.f32 %v5288_v17, %v301_v4  ;;  %v498_v39 = vld [vmem:[#allocation2 + $0x8c] sm:$0x1] }
  0x8e   : > { %v1339_v56 = vrot.slane %v1338_v26, 4  ;;  %v1054_v47 = vld [vmem:[#allocation2 + $0x98] sm:$0x1]  ;;  %v5405_v52 = vrot.slane %v765_v21, 7  ;;  %v677_v4 = vor.u32 %v675_v34, %v5244_v37  ;;  %v458_v58 = vsel %vm4928_vm5, 0, %v457_v50 }
  0x8f   : > { %v1056_v36 = vld [vmem:[#allocation2 + $0xa0] sm:$0xf]  ;;  %v1281_v38 = vrot.slane %v1279_v29, 5  ;;  %v1375_v41 = vshll.u32 %v1054_v47, 16  ;;  %v762_v43 = vor.u32 %v760_v23, %v759_v31  ;;  %v763_v22 = vrot.slane %v759_v31, 4 }
  0x90   : > { %v1344_v3 = vsel %vm4983_vm9, %v1339_v56, %v5398_v13  ;;  %v1057_v15 = vld [vmem:[#allocation2 + $0xa4] sm:$0x1]  ;;  %v1389_v44 = vshll.u32 %v1056_v36, 16  ;;  %v1393_v45 = vshrl.u32 %v1056_v36, 16  ;;  %v770_v46 = vor.u32 %v768_v42, %v5405_v52  ;;  %459 = vst [vmem:[#allocation2 + $0xa8] sm:$0x1] %v458_v58 }
  0x91   : > { %1495 = vrot.lane.b32.xlu1 %v1344_v3, %s4877_s28  ;;  %v1399_v49 = vshll.u32 %v1057_v15, 16  ;;  %v1282_v17 = vsel %vm4983_vm9, %v1277_v11, %v1281_v38  ;;  %v1377_v16 = vrot.slane %v1375_v41, 5  ;;  %v367_v61 = vmax.f32 %v335_v24, 0.0  ;;  %v510_v11 = vld [vmem:[#allocation2 + $0xbc] sm:$0x1] }
  0x92   : > { %v5418_v51 = vrot.slane %v1389_v44, 5  ;;  %v1395_v63 = vrot.slane %v1393_v45, 4  ;;  %1485 = vrot.lane.b32.xlu2 %v1282_v17, %s4877_s28  ;;  %v771_v53 = vsel %vm5002_vm11, %v763_v22, %v770_v46  ;;  %v938_v54 = vld [vmem:[#allocation2 + $0xb4] sm:$0xf]  ;;  %v368_v19 = vmax.f32 %v336_v28, 0.0 }
  0x93   : > { %v1401_v6 = vrot.slane %v1399_v49, 5  ;;  %941 = vst.msk [vmem:[#allocation2 + $0xb8] sm:$0xf] %vm405_vm0, %v771_v53  ;;  %v939_v37 = vsel %vm4996_vm10, %v762_v43, %v938_v54  ;;  %v399_v30 = vpack.c.bf16 %v367_v61, %v367_v61  ;;  %v1378_v0 = vsel %vm4983_vm9, %v5396_v9, %v1377_v16  ;;  %v454_v21 = vld [vmem:[#allocation2 + $0x9c] sm:$0x1] }
  0x94   : > { %v1396_v55 = vor.u32 %v1395_v63, %v5418_v51  ;;  %940 = vst [vmem:[#allocation2 + $0xb4] sm:$0xf] %v939_v37  ;;  %v903_v18 = vld [vmem:[#allocation2 + $0x78] sm:$0xf]  ;;  %v400_v60 = vpack.c.bf16 %v368_v19, %v368_v19  ;;  %v499_v9 = vsel %vm4938_vm7, 0, %v498_v39  ;;  %v511_v27 = vsel %vm4938_vm7, 0, %v510_v11 }
  0x95   : > { %v904_v33 = vsel %vm4996_vm10, %v677_v4, %v903_v18  ;;  %v740_v25 = vshrl.u32 %v399_v30, 16  ;;  %v743_v12 = vshll.u32 %v399_v30, 16  ;;  %500 = vst [vmem:[#allocation2 + $0x8c] sm:$0x1] %v499_v9  ;;  %v704_v47 = vrot.slane %v5339_v48, 4 }
  0x96   : > { %v1397_v7 = vrot.slane %v1396_v55, 4  ;;  %905 = vst [vmem:[#allocation2 + $0x78] sm:$0xf] %v904_v33  ;;  %v748_v59 = vshrl.u32 %v400_v60, 16  ;;  %v751_v14 = vshll.u32 %v400_v60, 16  ;;  %v455_v43 = vsel %vm4928_vm5, 0, %v454_v21 }
  0x97   : > { %v742_v23 = vrot.slane %v740_v25, 7  ;;  %512 = vst [vmem:[#allocation2 + $0xbc] sm:$0x1] %v511_v27  ;;  %v931_v38 = vld [vmem:[#allocation2 + $0xa8] sm:$0xf]  ;;  %v1345_v22 = vshrl.u32 %v5388_v10, 16 }
  0x98   : > { %v1402_v20 = vsel %vm4983_vm9, %v1397_v7, %v1401_v6  ;;  %v5440_v26 = vrot.slane %v748_v59, 7  ;;  %v5451_v41 = vld [vmem:[#allocation2 + $0x4] sm:$0xf]  ;;  %v772_v48 = vrot.slane %v5405_v52, 4  ;;  %456 = vst [vmem:[#allocation2 + $0x9c] sm:$0x1] %v455_v43 }
  0x99   : > { %1505 = vrot.lane.b32.xlu0 %v1402_v20, %s4877_s28  ;;  %1501 = vrot.lane.b32.xlu1 %v1378_v0, %s4877_s28  ;;  %v745_v29 = vor.u32 %v743_v12, %v742_v23  ;;  %v746_v31 = vrot.slane %v742_v23, 4  ;;  %v726_v4 = vshll.u32 %v5345_v57, 16  ;;  %v507_v6 = vld [vmem:[#allocation2 + $0xb0] sm:$0x1]  ;;  %v1681_v52 = vrot.slane %v5451_v41, 5 }
  0x9a   : > { %v5444_v42 = vld [vmem:[#allocation2 + $0xb8] sm:$0xf]  ;;  %v753_v32 = vor.u32 %v751_v14, %v5440_v26  ;;  %v1347_v54 = vrot.slane %v1345_v22, 4  ;;  %v1582_v30 = vld [vmem:[#allocation2 + $0x8] sm:$0x1]  ;;  %v508_v39 = vsel %vm4938_vm7, 0, %v507_v6 }
  0x9b   : > { %v1061_v34 = vld [vmem:[#allocation2 + $0xb4] sm:$0xf]  ;;  %v1437_v56 = vshll.u32 %v5444_v42, 16  ;;  %v932_v15 = vsel %vm4996_vm10, %v745_v29, %v931_v38  ;;  %v1441_v57 = vshrl.u32 %v5444_v42, 16  ;;  %v728_v58 = vor.u32 %v726_v4, %v5373_v35  ;;  %509 = vst [vmem:[#allocation2 + $0xb0] sm:$0x1] %v508_v39 }
  0x9c   : > { %v1428_v24 = vshrl.u32 %v1061_v34, 16  ;;  %v1431_v28 = vshll.u32 %v1061_v34, 16  ;;  %v754_v36 = vsel %vm5002_vm11, %v746_v31, %v753_v32  ;;  %933 = vst [vmem:[#allocation2 + $0xa8] sm:$0xf] %v932_v15  ;;  %v914_v16 = vld [vmem:[#allocation2 + $0x8c] sm:$0x1]  ;;  %v1348_v35 = vor.u32 %v1347_v54, %v5398_v13 }
  0x9d   : > { %v1046_v3 = vld [vmem:[#allocation2 + $0x78] sm:$0xf]  ;;  %934 = vst.msk [vmem:[#allocation2 + $0xac] sm:$0xf] %vm405_vm0, %v754_v36  ;;  %v5460_v17 = vrot.slane %v1437_v56, 5  ;;  %v915_v53 = vsel %vm4928_vm5, %v704_v47, %v914_v16  ;;  %v1683_v7 = vrot.slane %v1681_v52, 4  ;;  %v1452_v56 = vpop.permute.xlu0 %1451 }
  0x9e   : > { %v1430_v44 = vrot.slane %v1428_v24, 4  ;;  %v1433_v45 = vrot.slane %v1431_v28, 5  ;;  %v1308_v46 = vshrl.u32 %v1046_v3, 16  ;;  %v1311_v49 = vshll.u32 %v1046_v3, 16  ;;  %v942_v61 = vld [vmem:[#allocation2 + $0xbc] sm:$0x1] }
  0x9f   : > { %916 = vst [vmem:[#allocation2 + $0x8c] sm:$0x1] %v915_v53  ;;  %v943_v19 = vsel %vm4928_vm5, %v772_v48, %v942_v61  ;;  %v1684_v33 = vrot.slane %v1582_v30, 5  ;;  %v924_v20 = vld [vmem:[#allocation2 + $0x9c] sm:$0xf]  ;;  %v1443_v9 = vrot.slane %v1441_v57, 4 }
  0xa0   : > { %v1434_v10 = vor.u32 %v1433_v45, %v1430_v44  ;;  %v1310_v50 = vrot.slane %v1308_v46, 4  ;;  %v1313_v63 = vrot.slane %v1311_v49, 5  ;;  %944 = vst [vmem:[#allocation2 + $0xbc] sm:$0x1] %v943_v19  ;;  %v925_v13 = vsel %vm4996_vm10, %v728_v58, %v924_v20  ;;  %v1586_v34 = vld [vmem:[#allocation2 + $0x18] sm:$0xe] }
  0xa1   : > { %v755_v27 = vrot.slane %v5440_v26, 4  ;;  %926 = vst [vmem:[#allocation2 + $0x9c] sm:$0xf] %v925_v13  ;;  %v1349_v29 = vrot.slane %v1348_v35, 4  ;;  %v1685_v28 = vsel %vm5487_vm14, %v1683_v7, %v1684_v33  ;;  %v5498_v36 = vld [vmem:[#allocation2 + $0x1c] sm:$0xf]  ;;  %v1444_v3 = vor.u32 %v1443_v9, %v5460_v17 }
  0xa2   : > { %v1435_v55 = vrot.slane %v1434_v10, 4  ;;  %v1314_v37 = vor.u32 %v1313_v63, %v1310_v50  ;;  %vm1547_vm15 = vcmask 60448   ;;  %v952_v38 = vld [vmem:[#allocation2] sm:$0xf]  ;;  %v935_v43 = vld [vmem:[#allocation2 + $0xb0] sm:$0x1] }
  0xa3   : > { %v1058_v11 = vld [vmem:[#allocation2 + $0xa8] sm:$0xf]  ;;  %984 = vst.msk [vmem:[#allocation3] sm:$0xf] %vm405_vm0, %v952_v38  ;;  %v936_v48 = vsel %vm4928_vm5, %v755_v27, %v935_v43  ;;  %v4680_v45 = vrot.slane %v1586_v34, 9  ;;  %v1695_v46 = vrot.slane %v5498_v36, 5 }
  0xa4   : > { %v1440_v0 = vsel %vm4983_vm9, %v1435_v55, %v5460_v17  ;;  %v1315_v18 = vrot.slane %v1314_v37, 4  ;;  %v5475_v60 = vld [vmem:[#allocation2 + $0xac] sm:$0xf]  ;;  %v1404_v12 = vshrl.u32 %v1058_v11, 16  ;;  %v1407_v59 = vshll.u32 %v1058_v11, 16 }
  0xa5   : > { %1511 = vrot.lane.b32.xlu0 %v1440_v0, %s4877_s28  ;;  %v1413_v14 = vshll.u32 %v5475_v60, 16  ;;  %1548 = vst.msk [vmem:[#allocation3] sm:$0xf] %vm1547_vm15, %v1452_v56  ;;  %v1417_v17 = vshrl.u32 %v5475_v60, 16  ;;  %v5515_v4 = vld [vmem:[#allocation2 + $0x28] sm:$0xf]  ;;  %v1696_v61 = vsel %vm5487_vm14, %v4680_v45, %v1695_v46  ;;  %v1454_v19 = vpop.permute.xlu0 %1453  ;;  %v1460_v55 = vpop.permute.xlu2 %1459 }
  0xa6   : > { %v1320_v25 = vsel %vm4983_vm9, %v1315_v18, %v5314_v5  ;;  %v1406_v21 = vrot.slane %v1404_v12, 4  ;;  %v1409_v5 = vrot.slane %v1407_v59, 5  ;;  %v1051_v42 = vld [vmem:[#allocation2 + $0x8c] sm:$0x1]  ;;  %937 = vst [vmem:[#allocation2 + $0xb0] sm:$0x1] %v936_v48  ;;  %v1456_v13 = vpop.permute.xlu1 %1455 }
  0xa7   : > { %1491 = vrot.lane.b32.xlu2 %v1320_v25, %s4877_s28  ;;  %v1351_v31 = vshll.u32 %v1051_v42, 16  ;;  %v1063_v32 = vld [vmem:[#allocation2 + $0xbc] sm:$0x1]  ;;  %v5494_v24 = vrot.slane %v1413_v14, 5  ;;  %v1445_v10 = vrot.slane %v1444_v3, 4  ;;  %v1702_v58 = vrot.slane %v5515_v4, 5 }
  0xa8   : > { %v1410_v47 = vor.u32 %v1409_v5, %v1406_v21  ;;  %v1447_v15 = vshll.u32 %v1063_v32, 16  ;;  %v1055_v16 = vld [vmem:[#allocation2 + $0x9c] sm:$0xf]  ;;  %v1591_v6 = vld [vmem:[#allocation2 + $0x2c] sm:$0x1]  ;;  %v1419_v39 = vrot.slane %v1417_v17, 4 }
  0xa9   : > { %v1353_v26 = vrot.slane %v1351_v31, 5  ;;  %v1380_v63 = vshrl.u32 %v1055_v16, 16  ;;  %v1383_v53 = vshll.u32 %v1055_v16, 16  ;;  %v953_v54 = vld [vmem:[#allocation2 + $0x4] sm:$0xf]  ;;  %v1705_v33 = vrot.slane %v1591_v6, 5 }
  0xaa   : > { %v1411_v22 = vrot.slane %v1410_v47, 4  ;;  %v1449_v50 = vrot.slane %v1447_v15, 5  ;;  %v956_v37 = vld [vmem:[#allocation2 + $0x18] sm:$0xf]  ;;  %985 = vst.msk [vmem:[#allocation3 + $0x4] sm:$0xf] %vm405_vm0, %v953_v54  ;;  %v1420_v12 = vor.u32 %v1419_v39, %v5494_v24 }
  0xab   : > { %v1354_v44 = vsel %vm4983_vm9, %v1349_v29, %v1353_v26  ;;  %v1382_v30 = vrot.slane %v1380_v63, 4  ;;  %v1385_v57 = vrot.slane %v1383_v53, 5  ;;  %1549 = vst.msk [vmem:[#allocation3 + $0x4] sm:$0xf] %vm1547_vm15, %v1454_v19  ;;  %v1583_v60 = vld [vmem:[#allocation2 + $0xc] sm:$0xe] }
  0xac   : > { %v1416_v49 = vsel %vm4983_vm9, %v1411_v22, %v5494_v24  ;;  %v1450_v0 = vsel %vm4983_vm9, %v1445_v10, %v1449_v50  ;;  %988 = vst.msk [vmem:[#allocation3 + $0x10] sm:$0xf] %vm405_vm0, %v956_v37  ;;  %v5528_v7 = vld [vmem:[#allocation2 + $0x10] sm:$0xf]  ;;  %v1704_v25 = vrot.slane %v1702_v58, 4  ;;  %v4679_v20 = vrot.slane %v1583_v60, 9 }
  0xad   : > { %1793 = vrot.lane.b32.xlu0 %v1685_v28, %s4878_s8  ;;  %1507 = vrot.lane.b32.xlu1 %v1416_v49, %s4877_s28  ;;  %v1386_v18 = vor.u32 %v1385_v57, %v1382_v30  ;;  %v1060_v11 = vld [vmem:[#allocation2 + $0xb0] sm:$0x1]  ;;  %1552 = vst.msk [vmem:[#allocation3 + $0x10] sm:$0xf] %vm1547_vm15, %v1460_v55  ;;  %v1688_v9 = vrot.slane %v5528_v7, 5  ;;  %v1464_v21 = vpop.permute.xlu0 %1463  ;;  %v1421_v29 = vrot.slane %v1420_v12, 4 }
  0xae   : > { %v1423_v59 = vshll.u32 %v1060_v11, 16  ;;  %v954_v27 = vld [vmem:[#allocation2 + $0xc] sm:$0xf]  ;;  %v958_v5 = vld [vmem:[#allocation2 + $0x24] sm:$0xf]  ;;  %v1706_v42 = vsel %vm5487_vm14, %v1704_v25, %v1705_v33  ;;  %v1697_v3 = vrot.slane %v1695_v46, 4 }
  0xaf   : > { %1497 = vrot.lane.b32.xlu2 %v1354_v44, %s4877_s28  ;;  %v1387_v35 = vrot.slane %v1386_v18, 4  ;;  %v1595_v32 = vld [vmem:[#allocation2 + $0x3c] sm:$0xe]  ;;  %986 = vst.msk [vmem:[#allocation3 + $0x8] sm:$0xf] %vm405_vm0, %v954_v27  ;;  %v1462_v56 = vpop.permute.xlu2 %1461  ;;  %v1689_v47 = vsel %vm5487_vm14, %v4679_v20, %v1688_v9  ;;  %v1458_v44 = vpop.permute.xlu1 %1457  ;;  %v1690_v18 = vrot.slane %v1688_v9, 4 }
  0xb0   : > { %v1425_v31 = vrot.slane %v1423_v59, 5  ;;  %v5543_v34 = vld [vmem:[#allocation2 + $0x40] sm:$0xf]  ;;  %1550 = vst.msk [vmem:[#allocation3 + $0x8] sm:$0xf] %vm1547_vm15, %v1456_v13  ;;  %v4683_v38 = vrot.slane %v1595_v32, 9 }
  0xb1   : > { %v1392_v14 = vsel %vm4983_vm9, %v1387_v35, %v5418_v51  ;;  %v957_v51 = vld [vmem:[#allocation2 + $0x1c] sm:$0xf]  ;;  %990 = vst.msk [vmem:[#allocation3 + $0x18] sm:$0xf] %vm405_vm0, %v958_v5  ;;  %v1588_v24 = vld [vmem:[#allocation2 + $0x20] sm:$0x1] }
  0xb2   : > { %1554 = vst.msk [vmem:[#allocation3 + $0x18] sm:$0xf] %vm1547_vm15, %v1464_v21  ;;  %v1426_v28 = vsel %vm4983_vm9, %v1421_v29, %v1425_v31  ;;  %v1716_v26 = vrot.slane %v5543_v34, 5  ;;  %v1580_v43 = vld [vmem:[#allocation2] sm:$0xe]  ;;  %v1698_v15 = vrot.slane %v1588_v24, 5 }
  0xb3   : > { %989 = vst.msk [vmem:[#allocation3 + $0x14] sm:$0xf] %vm405_vm0, %v957_v51  ;;  %v5558_v22 = vld [vmem:[#allocation2 + $0x4c] sm:$0xf]  ;;  %v955_v48 = vld [vmem:[#allocation2 + $0x10] sm:$0xf] }
  0xb4   : > { %1553 = vst.msk [vmem:[#allocation3 + $0x14] sm:$0xf] %vm1547_vm15, %v1462_v56  ;;  %v961_v45 = vld [vmem:[#allocation2 + $0x34] sm:$0xf]  ;;  %v1717_v17 = vsel %vm5487_vm14, %v4683_v38, %v1716_v26  ;;  %v4678_v16 = vrot.slane %v1580_v43, 9  ;;  %v1723_v10 = vrot.slane %v5558_v22, 5  ;;  %v1699_v46 = vsel %vm5487_vm14, %v1697_v3, %v1698_v15 }
  0xb5   : > { %1799 = vrot.lane.b32.xlu0 %v1696_v61, %s4878_s8  ;;  %1513 = vrot.lane.b32.xlu1 %v1450_v0, %s4877_s28  ;;  %v1470_v49 = vpop.permute.xlu0 %1469  ;;  %987 = vst.msk [vmem:[#allocation3 + $0xc] sm:$0xf] %vm405_vm0, %v955_v48  ;;  %v1600_v50 = vld [vmem:[#allocation2 + $0x50] sm:$0x1]  ;;  %v1592_v63 = vld [vmem:[#allocation2 + $0x30] sm:$0xe] }
  0xb6   : > { %1551 = vst.msk [vmem:[#allocation3 + $0xc] sm:$0xf] %vm1547_vm15, %v1458_v44  ;;  %v960_v36 = vld [vmem:[#allocation2 + $0x30] sm:$0xf]  ;;  %v5573_v53 = vld [vmem:[#allocation2 + $0x34] sm:$0xf]  ;;  %v1682_v6 = vsel %vm5487_vm14, %v4678_v16, %v1681_v52 }
  0xb7   : > { %1503 = vrot.lane.b32.xlu2 %v1392_v14, %s4877_s28  ;;  %993 = vst.msk [vmem:[#allocation3 + $0x24] sm:$0xf] %vm405_vm0, %v961_v45  ;;  %v1725_v54 = vrot.slane %v1723_v10, 4  ;;  %v1726_v19 = vrot.slane %v1600_v50, 5  ;;  %v1585_v55 = vld [vmem:[#allocation2 + $0x14] sm:$0x1]  ;;  %v1466_v57 = vpop.permute.xlu1 %1465 }
  0xb8   : > { %1557 = vst.msk [vmem:[#allocation3 + $0x24] sm:$0xf] %vm1547_vm15, %v1470_v49  ;;  %v4682_v37 = vrot.slane %v1592_v63, 9  ;;  %v1709_v30 = vrot.slane %v5573_v53, 5  ;;  %v959_v41 = vld [vmem:[#allocation2 + $0x28] sm:$0xf] }
  0xb9   : > { %992 = vst.msk [vmem:[#allocation3 + $0x20] sm:$0xf] %vm405_vm0, %v960_v36  ;;  %v964_v39 = vld [vmem:[#allocation2 + $0x48] sm:$0xf]  ;;  %v1727_v0 = vsel %vm5487_vm14, %v1725_v54, %v1726_v19  ;;  %v1691_v60 = vrot.slane %v1585_v55, 5  ;;  %v1718_v27 = vrot.slane %v1716_v26, 4 }
  0xba   : > { %v1604_v11 = vld [vmem:[#allocation2 + $0x60] sm:$0xe]  ;;  %991 = vst.msk [vmem:[#allocation3 + $0x1c] sm:$0xf] %vm405_vm0, %v959_v41  ;;  %v5592_v33 = vld [vmem:[#allocation2 + $0x64] sm:$0xf]  ;;  %v1710_v25 = vsel %vm5487_vm14, %v4682_v37, %v1709_v30 }
  0xbb   : > { %1555 = vst.msk [vmem:[#allocation3 + $0x1c] sm:$0xf] %vm1547_vm15, %v1466_v57  ;;  %v963_v35 = vld [vmem:[#allocation2 + $0x40] sm:$0xf]  ;;  %v1597_v12 = vld [vmem:[#allocation2 + $0x44] sm:$0x1]  ;;  %v1692_v7 = vsel %vm5487_vm14, %v1690_v18, %v1691_v60 }
  0xbc   : > { %996 = vst.msk [vmem:[#allocation3 + $0x30] sm:$0xf] %vm405_vm0, %v964_v39  ;;  %v4686_v59 = vrot.slane %v1604_v11, 9  ;;  %v1737_v14 = vrot.slane %v5592_v33, 5  ;;  %v1589_v20 = vld [vmem:[#allocation2 + $0x24] sm:$0xe] }
  0xbd   : > { %1805 = vrot.lane.b32.xlu0 %v1706_v42, %s4878_s8  ;;  %1795 = vrot.lane.b32.xlu1 %v1689_v47, %s4878_s8  ;;  %v1476_v52 = vpop.permute.xlu0 %1475  ;;  %995 = vst.msk [vmem:[#allocation3 + $0x2c] sm:$0xf] %vm405_vm0, %v963_v35  ;;  %v5605_v9 = vld [vmem:[#allocation2 + $0x70] sm:$0xf]  ;;  %v1719_v21 = vrot.slane %v1597_v12, 5  ;;  %v4681_v32 = vrot.slane %v1589_v20, 9 }
  0xbe   : > { %1560 = vst.msk [vmem:[#allocation3 + $0x30] sm:$0xf] %vm1547_vm15, %v1476_v52  ;;  %v962_v5 = vld [vmem:[#allocation2 + $0x3c] sm:$0xf]  ;;  %v967_v29 = vld [vmem:[#allocation2 + $0x58] sm:$0xf]  ;;  %v1738_v31 = vsel %vm5487_vm14, %v4686_v59, %v1737_v14 }
  0xbf   : > { %1509 = vrot.lane.b32.xlu2 %v1426_v28, %s4877_s28  ;;  %v1744_v34 = vrot.slane %v5605_v9, 5  ;;  %994 = vst.msk [vmem:[#allocation3 + $0x28] sm:$0xf] %vm405_vm0, %v962_v5  ;;  %v1609_v56 = vld [vmem:[#allocation2 + $0x74] sm:$0x1]  ;;  %v1720_v24 = vsel %vm5487_vm14, %v1718_v27, %v1719_v21  ;;  %v1703_v26 = vsel %vm5487_vm14, %v4681_v32, %v1702_v58  ;;  %vm1887_vm2 = vcmask 93248  }
  0xc0   : > { %v966_v47 = vld [vmem:[#allocation2 + $0x54] sm:$0xf]  ;;  %999 = vst.msk [vmem:[#allocation3 + $0x3c] sm:$0xf] %vm405_vm0, %v967_v29  ;;  %v5618_v38 = vld [vmem:[#allocation2 + $0x58] sm:$0xf] }
  0xc1   : > { %v1468_v61 = vpop.permute.xlu2 %1467  ;;  %v1601_v28 = vld [vmem:[#allocation2 + $0x54] sm:$0xe]  ;;  %v1746_v43 = vrot.slane %v1744_v34, 4  ;;  %v1747_v3 = vrot.slane %v1609_v56, 5  ;;  %998 = vst.msk [vmem:[#allocation3 + $0x38] sm:$0xf] %vm405_vm0, %v966_v47 }
  0xc2   : > { %1556 = vst.msk [vmem:[#allocation3 + $0x20] sm:$0xf] %vm1547_vm15, %v1468_v61  ;;  %v1594_v15 = vld [vmem:[#allocation2 + $0x38] sm:$0x1]  ;;  %v4685_v48 = vrot.slane %v1601_v28, 9  ;;  %v1730_v44 = vrot.slane %v5618_v38, 5 }
  0xc3   : > { %v965_v45 = vld [vmem:[#allocation2 + $0x4c] sm:$0xf]  ;;  %v1748_v58 = vsel %vm5487_vm14, %v1746_v43, %v1747_v3  ;;  %v1712_v16 = vrot.slane %v1594_v15, 5  ;;  %v1613_v50 = vld [vmem:[#allocation2 + $0x84] sm:$0xe]  ;;  %vm2641_vm3 = vcmask 158848  }
  0xc4   : > { %v970_v4 = vld [vmem:[#allocation2 + $0x6c] sm:$0xf]  ;;  %997 = vst.msk [vmem:[#allocation3 + $0x34] sm:$0xf] %vm405_vm0, %v965_v45  ;;  %v5634_v36 = vld [vmem:[#allocation2 + $0x88] sm:$0xf]  ;;  %v1731_v63 = vsel %vm5487_vm14, %v4685_v48, %v1730_v44 }
  0xc5   : > { %1811 = vrot.lane.b32.xlu0 %v1717_v17, %s4878_s8  ;;  %1801 = vrot.lane.b32.xlu1 %v1699_v46, %s4878_s8  ;;  %v1711_v17 = vrot.slane %v1709_v30, 4  ;;  %v969_v46 = vld [vmem:[#allocation2 + $0x64] sm:$0xf]  ;;  %1002 = vst.msk [vmem:[#allocation3 + $0x48] sm:$0xf] %vm405_vm0, %v970_v4  ;;  %v4689_v54 = vrot.slane %v1613_v50, 9 }
  0xc6   : > { %v1606_v61 = vld [vmem:[#allocation2 + $0x68] sm:$0x1]  ;;  %v1758_v19 = vrot.slane %v5634_v36, 5  ;;  %1001 = vst.msk [vmem:[#allocation3 + $0x44] sm:$0xf] %vm405_vm0, %v969_v46  ;;  %v1739_v30 = vrot.slane %v1737_v14, 4 }
  0xc7   : > { %1791 = vrot.lane.b32.xlu2 %v1682_v6, %s4878_s8  ;;  %v1713_v6 = vsel %vm5487_vm14, %v1711_v17, %v1712_v16  ;;  %v1598_v55 = vld [vmem:[#allocation2 + $0x48] sm:$0xe]  ;;  %v5647_v37 = vld [vmem:[#allocation2 + $0x94] sm:$0xf]  ;;  %v1740_v41 = vrot.slane %v1606_v61, 5  ;;  %vm2978_vm4 = vcmask 191648  }
  0xc8   : > { %v968_v57 = vld [vmem:[#allocation2 + $0x60] sm:$0xf]  ;;  %v1759_v52 = vsel %vm5487_vm14, %v4689_v54, %v1758_v19  ;;  %v1765_v18 = vrot.slane %v5647_v37, 5  ;;  %v973_v11 = vld [vmem:[#allocation2 + $0x7c] sm:$0xf]  ;;  %vm3172_vm6 = vcmask 224448  }
  0xc9   : > { %v1472_v42 = vpop.permute.xlu1 %1471  ;;  %1000 = vst.msk [vmem:[#allocation3 + $0x40] sm:$0xf] %vm405_vm0, %v968_v57  ;;  %v1618_v33 = vld [vmem:[#allocation2 + $0x98] sm:$0x1]  ;;  %v1610_v12 = vld [vmem:[#allocation2 + $0x78] sm:$0xe] }
  0xca   : > { %1558 = vst.msk [vmem:[#allocation3 + $0x28] sm:$0xf] %vm1547_vm15, %v1472_v42  ;;  %v972_v35 = vld [vmem:[#allocation2 + $0x78] sm:$0xf]  ;;  %v1767_v14 = vrot.slane %v1765_v18, 4  ;;  %v1768_v20 = vrot.slane %v1618_v33, 5 }
  0xcb   : > { %1005 = vst.msk [vmem:[#allocation3 + $0x54] sm:$0xf] %vm405_vm0, %v973_v11  ;;  %v4688_v27 = vrot.slane %v1610_v12, 9  ;;  %v971_v5 = vld [vmem:[#allocation2 + $0x70] sm:$0xf]  ;;  %v1732_v42 = vrot.slane %v1730_v44, 4 }
  0xcc   : > { %1004 = vst.msk [vmem:[#allocation3 + $0x50] sm:$0xf] %vm405_vm0, %v972_v35  ;;  %v1769_v22 = vsel %vm5487_vm14, %v1767_v14, %v1768_v20  ;;  %v1622_v29 = vld [vmem:[#allocation2 + $0xa8] sm:$0xe]  ;;  %v1623_v32 = vld [vmem:[#allocation2 + $0xac] sm:$0xf] }
  0xcd   : > { %1817 = vrot.lane.b32.xlu0 %v1727_v0, %s4878_s8  ;;  %1807 = vrot.lane.b32.xlu1 %v1710_v25, %s4878_s8  ;;  %v4684_v0 = vrot.slane %v1598_v55, 9  ;;  %v1741_v25 = vsel %vm5487_vm14, %v1739_v30, %v1740_v41  ;;  %1003 = vst.msk [vmem:[#allocation3 + $0x4c] sm:$0xf] %vm405_vm0, %v971_v5  ;;  %v976_v56 = vld [vmem:[#allocation2 + $0x90] sm:$0xf]  ;;  %v4692_v43 = vrot.slane %v1622_v29, 9 }
  0xce   : > { %v975_v28 = vld [vmem:[#allocation2 + $0x88] sm:$0xf]  ;;  %v1615_v38 = vld [vmem:[#allocation2 + $0x8c] sm:$0x1]  ;;  %v1779_v3 = vrot.slane %v1623_v32, 5  ;;  %v1760_v44 = vrot.slane %v1758_v19, 4 }
  0xcf   : > { %1797 = vrot.lane.b32.xlu2 %v1692_v7, %s4878_s8  ;;  %v5659_v7 = vld [vmem:[#allocation2 + $0x7c] sm:$0xf]  ;;  %v1724_v59 = vsel %vm5487_vm14, %v4684_v0, %v1723_v10  ;;  %1008 = vst.msk [vmem:[#allocation3 + $0x60] sm:$0xf] %vm405_vm0, %v976_v56  ;;  %v1607_v15 = vld [vmem:[#allocation2 + $0x6c] sm:$0xe] }
  0xd0   : > { %v1474_v13 = vpop.permute.xlu2 %1473  ;;  %v1751_v21 = vrot.slane %v5659_v7, 5  ;;  %v5685_v48 = vld [vmem:[#allocation2 + $0xb8] sm:$0xf]  ;;  %1007 = vst.msk [vmem:[#allocation3 + $0x5c] sm:$0xf] %vm405_vm0, %v975_v28  ;;  %v1761_v45 = vrot.slane %v1615_v38, 5  ;;  %v1780_v17 = vsel %vm5487_vm14, %v4692_v43, %v1779_v3 }
  0xd1   : > { %1559 = vst.msk [vmem:[#allocation3 + $0x2c] sm:$0xf] %vm1547_vm15, %v1474_v13  ;;  %v1478_v49 = vpop.permute.xlu1 %1477  ;;  %v1603_v13 = vld [vmem:[#allocation2 + $0x5c] sm:$0x1]  ;;  %v979_v4 = vld [vmem:[#allocation2 + $0xa0] sm:$0xf] }
  0xd2   : > { %v1482_v51 = vpop.permute.xlu0 %1481  ;;  %1561 = vst.msk [vmem:[#allocation3 + $0x34] sm:$0xf] %vm1547_vm15, %v1478_v49  ;;  %v1733_v10 = vrot.slane %v1603_v13, 5  ;;  %v1752_v47 = vsel %vm5487_vm14, %v4688_v27, %v1751_v21  ;;  %v974_v49 = vld [vmem:[#allocation2 + $0x84] sm:$0xf]  ;;  %v4687_v16 = vrot.slane %v1607_v15, 9  ;;  %v1762_v46 = vsel %vm5487_vm14, %v1760_v44, %v1761_v45 }
  0xd3   : > { %1563 = vst.msk [vmem:[#allocation3 + $0x3c] sm:$0xf] %vm1547_vm15, %v1482_v51  ;;  %v1786_v50 = vrot.slane %v5685_v48, 5  ;;  %v1627_v36 = vld [vmem:[#allocation2 + $0xbc] sm:$0x1]  ;;  %v1753_v9 = vrot.slane %v1751_v21, 4 }
  0xd4   : > { %1006 = vst.msk [vmem:[#allocation3 + $0x58] sm:$0xf] %vm405_vm0, %v974_v49  ;;  %v1745_v61 = vsel %vm5487_vm14, %v4687_v16, %v1744_v34  ;;  %v1789_v54 = vrot.slane %v1627_v36, 5  ;;  %v1612_v19 = vld [vmem:[#allocation2 + $0x80] sm:$0x1]  ;;  %v269_v36 = vld [vmem:[%s4961_s27 + $0xf0] sm:$0xff] }
  0xd5   : > { %1823 = vrot.lane.b32.xlu0 %v1738_v31, %s4878_s8  ;;  %1813 = vrot.lane.b32.xlu1 %v1720_v24, %s4878_s8  ;;  %1011 = vst.msk [vmem:[#allocation3 + $0x6c] sm:$0xf] %vm405_vm0, %v979_v4  ;;  %v977_v41 = vld [vmem:[#allocation2 + $0x94] sm:$0xf]  ;;  %v981_v34 = vld [vmem:[#allocation2 + $0xac] sm:$0xf] }
  0xd6   : > { %v982_v57 = vld [vmem:[#allocation2 + $0xb4] sm:$0xf]  ;;  %1009 = vst.msk [vmem:[#allocation3 + $0x64] sm:$0xf] %vm405_vm0, %v977_v41  ;;  %v1624_v11 = vld [vmem:[#allocation2 + $0xb0] sm:$0x1] }
  0xd7   : > { %1803 = vrot.lane.b32.xlu2 %v1703_v26, %s4878_s8  ;;  %v1734_v26 = vsel %vm5487_vm14, %v1732_v42, %v1733_v10  ;;  %1014 = vst.msk [vmem:[#allocation3 + $0x78] sm:$0xf] %vm405_vm0, %v982_v57  ;;  %v1616_v35 = vld [vmem:[#allocation2 + $0x90] sm:$0xe]  ;;  %v1782_v12 = vrot.slane %v1624_v11, 5  ;;  %vm4070_vm8 = vcmask 290048  }
  0xd8   : > { %1013 = vst.msk [vmem:[#allocation3 + $0x74] sm:$0xf] %vm405_vm0, %v981_v34  ;;  %v1922_v14 = vld [vmem:[#allocation2 + $0x18] sm:$0xf]  ;;  %v4690_v20 = vrot.slane %v1616_v35, 9 }
  0xd9   : > { %v1621_v5 = vld [vmem:[#allocation2 + $0xa4] sm:$0x1]  ;;  %v1925_v29 = vld [vmem:[#allocation2 + $0x28] sm:$0xf]  ;;  %v1920_v37 = vld [vmem:[#allocation2 + $0xc] sm:$0xf] }
  0xda   : > { %v1766_v21 = vsel %vm5487_vm14, %v4690_v20, %v1765_v18  ;;  %v1775_v10 = vrot.slane %v1621_v5, 5  ;;  %v1625_v56 = vld [vmem:[#allocation2 + $0xb4] sm:$0xe]  ;;  %v1923_v38 = vld [vmem:[#allocation2 + $0x1c] sm:$0xf] }
  0xdb   : > { %v1926_v44 = vld [vmem:[#allocation2 + $0x30] sm:$0xf]  ;;  %v1934_v4 = vld [vmem:[#allocation2 + $0x60] sm:$0xf]  ;;  %v1924_v16 = vld [vmem:[#allocation2 + $0x24] sm:$0xf] }
  0xdc   : > { %v1921_v45 = vld [vmem:[#allocation2 + $0x10] sm:$0xf]  ;;  %v463_v41 = vld [vmem:[#allocation2 + $0xc0] sm:$0x1]  ;;  %v1927_v57 = vld [vmem:[#allocation2 + $0x34] sm:$0xf] }
  0xdd   : > { %v1488_v53 = vpop.permute.xlu0 %1487  ;;  %1829 = vrot.lane.b32.xlu0 %v1748_v58, %s4878_s8  ;;  %1819 = vrot.lane.b32.xlu1 %v1731_v63, %s4878_s8  ;;  %v978_v58 = vld [vmem:[#allocation2 + $0x9c] sm:$0xf]  ;;  %v5940_v2 = vld [vmem:[#allocation2 + $0xa0] sm:$0xf] }
  0xde   : > { %1566 = vst.msk [vmem:[#allocation3 + $0x48] sm:$0xf] %vm1547_vm15, %v1488_v53  ;;  %v1619_v63 = vld [vmem:[#allocation2 + $0x9c] sm:$0xe]  ;;  %v1620_v53 = vld [vmem:[#allocation2 + $0xa0] sm:$0xf] }
  0xdf   : > { %1809 = vrot.lane.b32.xlu2 %v1713_v6, %s4878_s8  ;;  %1010 = vst.msk [vmem:[#allocation3 + $0x68] sm:$0xf] %vm405_vm0, %v978_v58  ;;  %v1788_v6 = vrot.slane %v1786_v50, 4  ;;  %v4691_v55 = vrot.slane %v1619_v63, 9  ;;  %v1772_v30 = vrot.slane %v1620_v53, 5 }
  0xe0   : > { %v4866_v63 = vld [vmem:[%s6958_s1] ss:$0 sm:$0xff] }
  0xe1   : > { %v1774_v42 = vrot.slane %v1772_v30, 4  ;;  %v304_v53 = vmul.f32 %v4866_v63, %v269_v36  ;;  %v1949_v36 = vld [vmem:[#allocation2 + $0xb8] sm:$0xf] }
  0xe2   : > { %v1484_v39 = vpop.permute.xlu1 %1483 }
  0xe3   : > { %v1480_v60 = vpop.permute.xlu2 %1479  ;;  %1564 = vst.msk [vmem:[#allocation3 + $0x40] sm:$0xf] %vm1547_vm15, %v1484_v39  ;;  %v1790_v39 = vsel %vm5487_vm14, %v1788_v6, %v1789_v54  ;;  %v1776_v18 = vsel %vm5487_vm14, %v1774_v42, %v1775_v10  ;;  %v4867_v54 = vld [vmem:[%s6959_s2] ss:$0 sm:$0xff]  ;;  %v1938_v42 = vld [vmem:[#allocation2 + $0x78] sm:$0xf] }
  0xe4   : > { %1562 = vst.msk [vmem:[#allocation3 + $0x38] sm:$0xf] %vm1547_vm15, %v1480_v60  ;;  %v1773_v60 = vsel %vm5487_vm14, %v4691_v55, %v1772_v30  ;;  %v1932_v55 = vld [vmem:[#allocation2 + $0x54] sm:$0xf] }
  0xe5   : > { %1835 = vrot.lane.b32.xlu0 %v1759_v52, %s4878_s8  ;;  %1825 = vrot.lane.b32.xlu1 %v1741_v25, %s4878_s8  ;;  %v1754_v52 = vrot.slane %v1612_v19, 5  ;;  %v1781_v25 = vrot.slane %v1779_v3, 4  ;;  %v1931_v3 = vld [vmem:[#allocation2 + $0x4c] sm:$0xf]  ;;  %v339_v19 = vadd.f32 %v4867_v54, %v304_v53 }
  0xe7   : > { %1815 = vrot.lane.b32.xlu2 %v1724_v59, %s4878_s8  ;;  %v1755_v33 = vsel %vm5487_vm14, %v1753_v9, %v1754_v52  ;;  %v980_v59 = vld [vmem:[#allocation2 + $0xa8] sm:$0xf]  ;;  %v1783_v27 = vsel %vm5487_vm14, %v1781_v25, %v1782_v12  ;;  %v371_v30 = vmax.f32 %v339_v19, 0.0  ;;  %v1935_v25 = vld [vmem:[#allocation2 + $0x64] sm:$0xf] }
  0xe8   : > { %1012 = vst.msk [vmem:[#allocation3 + $0x70] sm:$0xf] %vm405_vm0, %v980_v59 }
  0xe9   : > { %v403_v52 = vpack.c.bf16 %v371_v30, %v371_v30 }
  0xeb   : > { %v1490_v31 = vpop.permute.xlu1 %1489  ;;  %v777_v35 = vshll.u32 %v403_v52, 16 }
  0xec   : > { %v1486_v51 = vpop.permute.xlu2 %1485  ;;  %1567 = vst.msk [vmem:[#allocation3 + $0x4c] sm:$0xf] %vm1547_vm15, %v1490_v31 }
  0xed   : > { %1565 = vst.msk [vmem:[#allocation3 + $0x44] sm:$0xf] %vm1547_vm15, %v1486_v51  ;;  %v1494_v24 = vpop.permute.xlu0 %1493  ;;  %1841 = vrot.lane.b32.xlu0 %v1769_v22, %s4878_s8  ;;  %1831 = vrot.lane.b32.xlu1 %v1752_v47, %s4878_s8  ;;  %v983_v51 = vld [vmem:[#allocation2 + $0xb8] sm:$0xf]  ;;  %v1928_v47 = vld [vmem:[#allocation2 + $0x3c] sm:$0xf] }
  0xee   : > { %1569 = vst.msk [vmem:[#allocation3 + $0x54] sm:$0xf] %vm1547_vm15, %v1494_v24  ;;  %v4693_v24 = vrot.slane %v1625_v56, 9  ;;  %v2162_v56 = vshrl.u32 %v2113_v62, 16 }
  0xef   : > { %1821 = vrot.lane.b32.xlu2 %v1734_v26, %s4878_s8  ;;  %1015 = vst.msk [vmem:[#allocation3 + $0x7c] sm:$0xf] %vm405_vm0, %v983_v51 }
  0xf0   : > { %v1787_v26 = vsel %vm5487_vm14, %v4693_v24, %v1786_v50 }
  0xf5   : > { %1847 = vrot.lane.b32.xlu0 %v1780_v17, %s4878_s8  ;;  %1837 = vrot.lane.b32.xlu1 %v1762_v46, %s4878_s8  ;;  %v1929_v17 = vld [vmem:[#allocation2 + $0x40] sm:$0xf] }
  0xf7   : > { %1827 = vrot.lane.b32.xlu2 %v1745_v61, %s4878_s8  ;;  %v1937_v61 = vld [vmem:[#allocation2 + $0x70] sm:$0xf] }
  0xfc   : > { %v1500_v0 = vpop.permute.xlu0 %1499 }
  0xfd   : > { %1572 = vst.msk [vmem:[#allocation3 + $0x60] sm:$0xf] %vm1547_vm15, %v1500_v0  ;;  %1853 = vrot.lane.b32.xlu0 %v1790_v39, %s4878_s8  ;;  %1843 = vrot.lane.b32.xlu1 %v1773_v60, %s4878_s8  ;;  %v464_v39 = vsel %vm4928_vm5, 0, %v463_v41  ;;  %v774_v0 = vshrl.u32 %v403_v52, 16  ;;  %v1940_v60 = vld [vmem:[#allocation2 + $0x84] sm:$0xf] }
  0xfe   : > { %465 = vst [vmem:[#allocation2 + $0xc0] sm:$0x1] %v464_v39 }
  0xff   : > { %1833 = vrot.lane.b32.xlu2 %v1755_v33, %s4878_s8  ;;  %v5776_v33 = vrot.slane %v774_v0, 7 }
 0x101   : > { %v1492_v7 = vpop.permute.xlu2 %1491  ;;  %v779_v12 = vor.u32 %v777_v35, %v5776_v33  ;;  %v1947_v35 = vld [vmem:[#allocation2 + $0xac] sm:$0xf] }
 0x102   : > { %1568 = vst.msk [vmem:[#allocation3 + $0x50] sm:$0xf] %vm1547_vm15, %v1492_v7  ;;  %v1930_v7 = vld [vmem:[#allocation2 + $0x48] sm:$0xf] }
 0x103   : > { %v1496_v13 = vpop.permute.xlu1 %1495 }
 0x104   : > { %1570 = vst.msk [vmem:[#allocation3 + $0x58] sm:$0xf] %vm1547_vm15, %v1496_v13 }
 0x105   : > { %1988 = vrot.lane.b32.xlu0 %v1922_v14, %s4879_s9  ;;  %1849 = vrot.lane.b32.xlu1 %v1783_v27, %s4878_s8  ;;  %v945_v14 = vld [vmem:[#allocation2 + $0xc0] sm:$0xf]  ;;  %v270_v27 = vld [vmem:[%s4961_s27 + $0xf8] sm:$0xff] }
 0x106   : > { %v946_v13 = vsel %vm4996_vm10, %v779_v12, %v945_v14  ;;  %v305_v5 = vmul.f32 %v4866_v63, %v270_v27  ;;  %vm4235_vm10 = vcmask 293888  }
 0x107   : > { %1839 = vrot.lane.b32.xlu2 %v1766_v21, %s4878_s8  ;;  %v1943_v21 = vld [vmem:[#allocation2 + $0x94] sm:$0xf]  ;;  %947 = vst [vmem:[#allocation2 + $0xc0] sm:$0xf] %v946_v13  ;;  %v2126_v13 = vld [vmem:[#allocation2 + $0x40] sm:$0xf] }
 0x108   : > { %v340_v10 = vadd.f32 %v4867_v54, %v305_v5  ;;  %v2119_v5 = vld [vmem:[#allocation2 + $0x24] sm:$0xf] }
 0x109   : > { %v1498_v22 = vpop.permute.xlu2 %1497 }
 0x10a   : > { %1571 = vst.msk [vmem:[#allocation3 + $0x5c] sm:$0xf] %vm1547_vm15, %v1498_v22 }
 0x10b   : > { %v1506_v31 = vpop.permute.xlu0 %1505  ;;  %v1502_v32 = vpop.permute.xlu1 %1501 }
 0x10c   : > { %1575 = vst.msk [vmem:[#allocation3 + $0x6c] sm:$0xf] %vm1547_vm15, %v1506_v31  ;;  %v372_v31 = vmax.f32 %v340_v10, 0.0 }
 0x10d   : > { %1573 = vst.msk [vmem:[#allocation3 + $0x64] sm:$0xf] %vm1547_vm15, %v1502_v32  ;;  %1994 = vrot.lane.b32.xlu0 %v1925_v29, %s4879_s9  ;;  %1984 = vrot.lane.b32.xlu1 %v1920_v37, %s4879_s9  ;;  %v1933_v29 = vld [vmem:[#allocation2 + $0x58] sm:$0xf] }
 0x10e   : > { %v404_v51 = vpack.c.bf16 %v372_v31, %v372_v31  ;;  %v2267_v31 = vshll.u32 %v2126_v13, 16 }
 0x10f   : > { %1845 = vrot.lane.b32.xlu2 %v1776_v18, %s4878_s8  ;;  %v1946_v18 = vld [vmem:[#allocation2 + $0xa8] sm:$0xf] }
 0x111   : > { %v1504_v28 = vpop.permute.xlu2 %1503 }
 0x112   : > { %1574 = vst.msk [vmem:[#allocation3 + $0x68] sm:$0xf] %vm1547_vm15, %v1504_v28  ;;  %v1941_v28 = vld [vmem:[#allocation2 + $0x88] sm:$0xf] }
 0x115   : > { %2000 = vrot.lane.b32.xlu0 %v1928_v47, %s4879_s9  ;;  %1990 = vrot.lane.b32.xlu1 %v1923_v38, %s4879_s9  ;;  %v2165_v47 = vshll.u32 %v2113_v62, 16  ;;  %v782_v38 = vshrl.u32 %v404_v51, 16 }
 0x117   : > { %v1512_v43 = vpop.permute.xlu0 %1511  ;;  %1851 = vrot.lane.b32.xlu2 %v1787_v26, %s4878_s8  ;;  %v785_v26 = vshll.u32 %v404_v51, 16  ;;  %s235_s8 = scalar_lea.vmem %s6962_s5, %s4677_s22 }
 0x118   : > { %1578 = vst.msk [vmem:[#allocation3 + $0x78] sm:$0xf] %vm1547_vm15, %v1512_v43  ;;  %v1936_v43 = vld [vmem:[#allocation2 + $0x6c] sm:$0xf] }
 0x119   : > { %v1510_v15 = vpop.permute.xlu2 %1509 }
 0x11a   : > { %1577 = vst.msk [vmem:[#allocation3 + $0x74] sm:$0xf] %vm1547_vm15, %v1510_v15  ;;  %v2167_v15 = vrot.slane %v2165_v47, 5  ;;  %v1950_v47 = vld [vmem:[#allocation2 + $0xc0] sm:$0xf] }
 0x11d   : > { %2006 = vrot.lane.b32.xlu0 %v1931_v3, %s4879_s9  ;;  %1996 = vrot.lane.b32.xlu1 %v1926_v44, %s4879_s9  ;;  %v2164_v3 = vrot.slane %v2162_v56, 4  ;;  %v2117_v44 = vld [vmem:[#allocation2 + $0x1c] sm:$0xf] }
 0x11f   : > { %v1794_v48 = vpop.permute.xlu0 %1793  ;;  %1986 = vrot.lane.b32.xlu2 %v1921_v45, %s4879_s9  ;;  %v1508_v49 = vpop.permute.xlu1 %1507  ;;  %v780_v45 = vrot.slane %v5776_v33, 4 }
 0x120   : > { %1889 = vst.msk [vmem:[#allocation3 + $0x4] sm:$0xf] %vm1887_vm2, %v1794_v48  ;;  %v5797_v48 = vrot.slane %v782_v38, 7  ;;  %v1945_v38 = vld [vmem:[#allocation2 + $0xa0] sm:$0xf] }
 0x121   : > { %1576 = vst.msk [vmem:[#allocation3 + $0x70] sm:$0xf] %vm1547_vm15, %v1508_v49  ;;  %v1792_v58 = vpop.permute.xlu2 %1791 }
 0x122   : > { %1888 = vst.msk [vmem:[#allocation3] sm:$0xf] %vm1887_vm2, %v1792_v58  ;;  %v787_v58 = vor.u32 %v785_v26, %v5797_v48  ;;  %v5831_v26 = vrot.slane %v2267_v31, 5 }
 0x124   : > { %v788_v53 = vsel %vm5002_vm11, %v780_v45, %v787_v58  ;;  %v2131_v58 = vld [vmem:[#allocation2 + $0x54] sm:$0xf]  ;;  %vm4377_vm11 = vcmask 31744  }
 0x125   : > { %2012 = vrot.lane.b32.xlu0 %v1934_v4, %s4879_s9  ;;  %2002 = vrot.lane.b32.xlu1 %v1929_v17, %s4879_s9  ;;  %v2114_v4 = vld [vmem:[#allocation2 + $0x10] sm:$0xf]  ;;  %948 = vst.msk [vmem:[#allocation2 + $0xc4] sm:$0xf] %vm405_vm0, %v788_v53  ;;  %v2116_v53 = vld [vmem:[#allocation2 + $0x18] sm:$0xf] }
 0x126   : > { %v2171_v63 = vshll.u32 %v2114_v4, 16  ;;  %vm2080_vm0 = vcmask 126048  }
 0x127   : > { %v1800_v50 = vpop.permute.xlu0 %1799  ;;  %1992 = vrot.lane.b32.xlu2 %v1924_v16, %s4879_s9  ;;  %v1514_v46 = vpop.permute.xlu1 %1513  ;;  %v2195_v16 = vshll.u32 %v2117_v44, 16 }
 0x128   : > { %1892 = vst.msk [vmem:[#allocation3 + $0x10] sm:$0xf] %vm1887_vm2, %v1800_v50  ;;  %v2199_v50 = vshrl.u32 %v2117_v44, 16  ;;  %v2173_v41 = vrot.slane %v2171_v63, 5 }
 0x129   : > { %1579 = vst.msk [vmem:[#allocation3 + $0x7c] sm:$0xf] %vm1547_vm15, %v1514_v46  ;;  %v1798_v6 = vpop.permute.xlu2 %1797  ;;  %v2168_v46 = vor.u32 %v2167_v15, %v2164_v3  ;;  %v5809_v54 = vrot.slane %v2195_v16, 5 }
 0x12a   : > { %1891 = vst.msk [vmem:[#allocation3 + $0xc] sm:$0xf] %vm1887_vm2, %v1798_v6  ;;  %v1944_v6 = vld [vmem:[#allocation2 + $0x9c] sm:$0xf]  ;;  %v2201_v19 = vrot.slane %v2199_v50, 4 }
 0x12b   : > { %v2169_v30 = vrot.slane %v2168_v46, 4  ;;  %v5837_v50 = vld [vmem:[#allocation2 + $0x28] sm:$0xf] }
 0x12c   : > { %v2202_v52 = vor.u32 %v2201_v19, %v5809_v54  ;;  %v2306_v19 = vshrl.u32 %v2131_v58, 16 }
 0x12d   : > { %2018 = vrot.lane.b32.xlu0 %v1937_v61, %s4879_s9  ;;  %2008 = vrot.lane.b32.xlu1 %v1932_v55, %s4879_s9  ;;  %v1939_v55 = vld [vmem:[#allocation2 + $0x7c] sm:$0xf]  ;;  %v2174_v0 = vsel %vm4983_vm9, %v2169_v30, %v2173_v41 }
 0x12e   : > { %v2203_v12 = vrot.slane %v2202_v52, 4 }
 0x12f   : > { %v1806_v9 = vpop.permute.xlu0 %1805  ;;  %1998 = vrot.lane.b32.xlu2 %v1927_v57, %s4879_s9  ;;  %v1796_v34 = vpop.permute.xlu1 %1795  ;;  %v2118_v57 = vld [vmem:[#allocation2 + $0x20] sm:$0x1] }
 0x130   : > { %1895 = vst.msk [vmem:[#allocation3 + $0x1c] sm:$0xf] %vm1887_vm2, %v1806_v9 }
 0x131   : > { %1890 = vst.msk [vmem:[#allocation3 + $0x8] sm:$0xf] %vm1887_vm2, %v1796_v34  ;;  %v1804_v11 = vpop.permute.xlu2 %1803  ;;  %v2205_v34 = vshll.u32 %v2118_v57, 16  ;;  %v2219_v57 = vshll.u32 %v5837_v50, 16 }
 0x132   : > { %1894 = vst.msk [vmem:[#allocation3 + $0x18] sm:$0xf] %vm1887_vm2, %v1804_v11  ;;  %v2237_v11 = vshll.u32 %v2122_v8, 16 }
 0x135   : > { %2024 = vrot.lane.b32.xlu0 %v1940_v60, %s4879_s9  ;;  %2014 = vrot.lane.b32.xlu1 %v1935_v25, %s4879_s9  ;;  %v2234_v60 = vshrl.u32 %v2122_v8, 16  ;;  %v2175_v25 = vshrl.u32 %v2114_v4, 16  ;;  %v2186_v8 = vshrl.u32 %v2116_v53, 16 }
 0x137   : > { %v1812_v59 = vpop.permute.xlu0 %1811  ;;  %2004 = vrot.lane.b32.xlu2 %v1930_v7, %s4879_s9  ;;  %v1802_v20 = vpop.permute.xlu1 %1801  ;;  %v2207_v7 = vrot.slane %v2205_v34, 5  ;;  %v2236_v14 = vrot.slane %v2234_v60, 4 }
 0x138   : > { %1898 = vst.msk [vmem:[#allocation3 + $0x28] sm:$0xf] %vm1887_vm2, %v1812_v59  ;;  %v1942_v59 = vld [vmem:[#allocation2 + $0x90] sm:$0xf] }
 0x139   : > { %1893 = vst.msk [vmem:[#allocation3 + $0x14] sm:$0xf] %vm1887_vm2, %v1802_v20  ;;  %v1810_v22 = vpop.permute.xlu2 %1809  ;;  %v2239_v20 = vrot.slane %v2237_v11, 5  ;;  %v2208_v10 = vsel %vm4983_vm9, %v2203_v12, %v2207_v7  ;;  %v2308_v11 = vrot.slane %v2306_v19, 4  ;;  %v5854_v7 = vld [vmem:[#allocation2 + $0x58] sm:$0xf] }
 0x13a   : > { %1897 = vst.msk [vmem:[#allocation3 + $0x24] sm:$0xf] %vm1887_vm2, %v1810_v22  ;;  %v2177_v22 = vrot.slane %v2175_v25, 4  ;;  %v5852_v25 = vrot.slane %v2219_v57, 5  ;;  %v2125_v19 = vld [vmem:[#allocation2 + $0x3c] sm:$0xf] }
 0x13b   : > { %v2240_v62 = vor.u32 %v2239_v20, %v2236_v14  ;;  %v2188_v14 = vrot.slane %v2186_v8, 4  ;;  %v2319_v57 = vshrl.u32 %v5854_v7, 16 }
 0x13d   : > { %2030 = vrot.lane.b32.xlu0 %v1943_v21, %s4879_s9  ;;  %2020 = vrot.lane.b32.xlu1 %v1938_v42, %s4879_s9  ;;  %v5821_v21 = vld [vmem:[#allocation2 + $0x34] sm:$0xf]  ;;  %v2241_v3 = vrot.slane %v2240_v62, 4 }
 0x13e   : > { %v2243_v51 = vshll.u32 %v5821_v21, 16 }
 0x13f   : > { %v1818_v32 = vpop.permute.xlu0 %1817  ;;  %2010 = vrot.lane.b32.xlu2 %v1933_v29, %s4879_s9  ;;  %v1808_v37 = vpop.permute.xlu1 %1807  ;;  %v2115_v29 = vld [vmem:[#allocation2 + $0x14] sm:$0x1] }
 0x140   : > { %1901 = vst.msk [vmem:[#allocation3 + $0x34] sm:$0xf] %vm1887_vm2, %v1818_v32  ;;  %v2271_v32 = vshrl.u32 %v2126_v13, 16  ;;  %v5833_v15 = vrot.slane %v2243_v51, 5  ;;  %v2128_v13 = vld [vmem:[#allocation2 + $0x48] sm:$0xf] }
 0x141   : > { %1896 = vst.msk [vmem:[#allocation3 + $0x20] sm:$0xf] %vm1887_vm2, %v1808_v37  ;;  %v1816_v24 = vpop.permute.xlu2 %1815  ;;  %v2210_v37 = vshrl.u32 %v2119_v5, 16  ;;  %v2282_v51 = vshrl.u32 %v2128_v13, 16 }
 0x142   : > { %1900 = vst.msk [vmem:[#allocation3 + $0x30] sm:$0xf] %vm1887_vm2, %v1816_v24  ;;  %v2178_v24 = vor.u32 %v2177_v22, %v2173_v41  ;;  %v2247_v41 = vshrl.u32 %v5821_v21, 16 }
 0x143   : > { %v2212_v44 = vrot.slane %v2210_v37, 4  ;;  %v2285_v37 = vshll.u32 %v2128_v13, 16 }
 0x144   : > { %v2249_v12 = vrot.slane %v2247_v41, 4 }
 0x145   : > { %2036 = vrot.lane.b32.xlu0 %v1946_v18, %s4879_s9  ;;  %2026 = vrot.lane.b32.xlu1 %v1941_v28, %s4879_s9  ;;  %v2213_v18 = vshll.u32 %v2119_v5, 16  ;;  %v2181_v28 = vshll.u32 %v2115_v29, 16  ;;  %v2124_v5 = vld [vmem:[#allocation2 + $0x38] sm:$0x1] }
 0x146   : > { %v2250_v62 = vor.u32 %v2249_v12, %v5833_v15 }
 0x147   : > { %v1824_v49 = vpop.permute.xlu0 %1823  ;;  %2016 = vrot.lane.b32.xlu2 %v1936_v43, %s4879_s9  ;;  %v1814_v17 = vpop.permute.xlu1 %1813  ;;  %v2273_v43 = vrot.slane %v2271_v32, 4  ;;  %v2215_v45 = vrot.slane %v2213_v18, 5  ;;  %v2183_v16 = vrot.slane %v2181_v28, 5  ;;  %v2223_v32 = vshrl.u32 %v5837_v50, 16 }
 0x148   : > { %1904 = vst.msk [vmem:[#allocation3 + $0x40] sm:$0xf] %vm1887_vm2, %v1824_v49  ;;  %v2127_v49 = vld [vmem:[#allocation2 + $0x44] sm:$0x1] }
 0x149   : > { %1899 = vst.msk [vmem:[#allocation3 + $0x2c] sm:$0xf] %vm1887_vm2, %v1814_v17  ;;  %v1822_v61 = vpop.permute.xlu2 %1821  ;;  %v2179_v17 = vrot.slane %v2178_v24, 4  ;;  %v2274_v46 = vor.u32 %v2273_v43, %v5831_v26  ;;  %v2277_v63 = vshll.u32 %v2127_v49, 16  ;;  %v1951_v24 = vld [vmem:[#allocation2 + $0xc4] sm:$0xf] }
 0x14a   : > { %1903 = vst.msk [vmem:[#allocation3 + $0x3c] sm:$0xf] %vm1887_vm2, %v1822_v61  ;;  %v2246_v61 = vsel %vm4983_vm9, %v2241_v3, %v5833_v15  ;;  %v2136_v43 = vld [vmem:[#allocation2 + $0x68] sm:$0x1]  ;;  %v2284_v49 = vrot.slane %v2282_v51, 4 }
 0x14b   : > { %v2275_v52 = vrot.slane %v2274_v46, 4  ;;  %v2279_v34 = vrot.slane %v2277_v63, 5  ;;  %v2121_v63 = vld [vmem:[#allocation2 + $0x2c] sm:$0x1] }
 0x14d   : > { %2042 = vrot.lane.b32.xlu0 %v1949_v36, %s4879_s9  ;;  %2032 = vrot.lane.b32.xlu1 %v1944_v6, %s4879_s9  ;;  %v2216_v6 = vor.u32 %v2215_v45, %v2212_v44  ;;  %v2280_v21 = vsel %vm4983_vm9, %v2275_v52, %v2279_v34  ;;  %v2251_v45 = vrot.slane %v2250_v62, 4 }
 0x14f   : > { %v1830_v39 = vpop.permute.xlu0 %1829  ;;  %2022 = vrot.lane.b32.xlu2 %v1939_v55, %s4879_s9  ;;  %v1820_v9 = vpop.permute.xlu1 %1819  ;;  %v2309_v55 = vshll.u32 %v2131_v58, 16  ;;  %v2217_v60 = vrot.slane %v2216_v6, 4  ;;  %v2225_v58 = vrot.slane %v2223_v32, 4 }
 0x150   : > { %1907 = vst.msk [vmem:[#allocation3 + $0x4c] sm:$0xf] %vm1887_vm2, %v1830_v39  ;;  %v2184_v39 = vsel %vm4983_vm9, %v2179_v17, %v2183_v16  ;;  %v2140_v17 = vld [vmem:[#allocation2 + $0x78] sm:$0xf] }
 0x151   : > { %1902 = vst.msk [vmem:[#allocation3 + $0x38] sm:$0xf] %vm1887_vm2, %v1820_v9  ;;  %v1828_v33 = vpop.permute.xlu2 %1827  ;;  %v2189_v9 = vshll.u32 %v2116_v53, 16  ;;  %v2222_v18 = vsel %vm4983_vm9, %v2217_v60, %v5852_v25  ;;  %v2349_v53 = vshll.u32 %v2136_v43, 16  ;;  %v2258_v60 = vshrl.u32 %v2125_v19, 16 }
 0x152   : > { %1906 = vst.msk [vmem:[#allocation3 + $0x48] sm:$0xf] %vm1887_vm2, %v1828_v33  ;;  %v2311_v33 = vrot.slane %v2309_v55, 5  ;;  %v2378_v55 = vshrl.u32 %v2140_v17, 16 }
 0x153   : > { %v2191_v20 = vrot.slane %v2189_v9, 5  ;;  %v2226_v9 = vor.u32 %v2225_v58, %v5852_v25  ;;  %v2144_v25 = vld [vmem:[#allocation2 + $0x88] sm:$0xf] }
 0x154   : > { %v2312_v22 = vor.u32 %v2311_v33, %v2308_v11  ;;  %v2261_v11 = vshll.u32 %v2125_v19, 16  ;;  %v2380_v12 = vrot.slane %v2378_v55, 4 }
 0x155   : > { %2545 = vrot.lane.b32.xlu0 %v2174_v0, %s4880_s14  ;;  %2038 = vrot.lane.b32.xlu1 %v1947_v35, %s4879_s9  ;;  %v1948_v0 = vld [vmem:[#allocation2 + $0xb4] sm:$0xf]  ;;  %v2227_v13 = vrot.slane %v2226_v9, 4  ;;  %v2134_v9 = vld [vmem:[#allocation2 + $0x60] sm:$0xf] }
 0x156   : > { %v2313_v28 = vrot.slane %v2312_v22, 4 }
 0x157   : > { %v1836_v27 = vpop.permute.xlu0 %1835  ;;  %2028 = vrot.lane.b32.xlu2 %v1942_v59, %s4879_s9  ;;  %v1826_v42 = vpop.permute.xlu1 %1825  ;;  %v2135_v59 = vld [vmem:[#allocation2 + $0x64] sm:$0xf] }
 0x158   : > { %1910 = vst.msk [vmem:[#allocation3 + $0x58] sm:$0xf] %vm1887_vm2, %v1836_v27  ;;  %v2343_v29 = vshrl.u32 %v2135_v59, 16 }
 0x159   : > { %1905 = vst.msk [vmem:[#allocation3 + $0x44] sm:$0xf] %vm1887_vm2, %v1826_v42  ;;  %v1834_v56 = vpop.permute.xlu2 %1833  ;;  %v2315_v42 = vshll.u32 %v5854_v7, 16 }
 0x15a   : > { %1909 = vst.msk [vmem:[#allocation3 + $0x54] sm:$0xf] %vm1887_vm2, %v1834_v56  ;;  %v2253_v56 = vshll.u32 %v2124_v5, 16  ;;  %v2345_v15 = vrot.slane %v2343_v29, 4  ;;  %v2137_v5 = vld [vmem:[#allocation2 + $0x6c] sm:$0xf] }
 0x15b   : > { %v2411_v29 = vshll.u32 %v2144_v25, 16 }
 0x15c   : > { %v2255_v16 = vrot.slane %v2253_v56, 5 }
 0x15d   : > { %2551 = vrot.lane.b32.xlu0 %v2208_v10, %s4880_s14  ;;  %2044 = vrot.lane.b32.xlu1 %v1950_v47, %s4879_s9  ;;  %v2339_v10 = vshll.u32 %v2135_v59, 16  ;;  %v2192_v47 = vor.u32 %v2191_v20, %v2188_v14 }
 0x15e   : > { %v2256_v52 = vsel %vm4983_vm9, %v2251_v45, %v2255_v16  ;;  %v5911_v45 = vrot.slane %v2411_v29, 5 }
 0x15f   : > { %v1842_v4 = vpop.permute.xlu0 %1841  ;;  %2034 = vrot.lane.b32.xlu2 %v1945_v38, %s4879_s9  ;;  %v1832_v36 = vpop.permute.xlu1 %1831  ;;  %v5869_v38 = vrot.slane %v2315_v42, 5  ;;  %v5871_v3 = vrot.slane %v2339_v10, 5  ;;  %v2193_v50 = vrot.slane %v2192_v47, 4  ;;  %v2260_v42 = vrot.slane %v2258_v60, 4 }
 0x160   : > { %1913 = vst.msk [vmem:[#allocation3 + $0x64] sm:$0xf] %vm1887_vm2, %v1842_v4  ;;  %v2287_v4 = vrot.slane %v2285_v37, 5  ;;  %v2263_v10 = vrot.slane %v2261_v11, 5 }
 0x161   : > { %1908 = vst.msk [vmem:[#allocation3 + $0x50] sm:$0xf] %vm1887_vm2, %v1832_v36  ;;  %v1840_v30 = vpop.permute.xlu2 %1839  ;;  %v5875_v36 = vld [vmem:[#allocation2 + $0x4c] sm:$0xf]  ;;  %v2346_v6 = vor.u32 %v2345_v15, %v5871_v3  ;;  %v2198_v34 = vsel %vm4983_vm9, %v2193_v50, %v5809_v54  ;;  %v5896_v54 = vld [vmem:[#allocation2 + $0x7c] sm:$0xf] }
 0x162   : > { %1912 = vst.msk [vmem:[#allocation3 + $0x60] sm:$0xf] %vm1887_vm2, %v1840_v30  ;;  %v2381_v30 = vshll.u32 %v2140_v17, 16  ;;  %v2291_v8 = vshll.u32 %v5875_v36, 16  ;;  %v2387_v37 = vshll.u32 %v5896_v54, 16  ;;  %v2295_v15 = vshrl.u32 %v5875_v36, 16 }
 0x163   : > { %v2347_v33 = vrot.slane %v2346_v6, 4  ;;  %v2145_v17 = vld [vmem:[#allocation2 + $0x8c] sm:$0x1]  ;;  %v2391_v11 = vshrl.u32 %v5896_v54, 16 }
 0x164   : > { %v2383_v7 = vrot.slane %v2381_v30, 5  ;;  %v5894_v20 = vrot.slane %v2291_v8, 5  ;;  %v5915_v58 = vrot.slane %v2387_v37, 5  ;;  %v2297_v6 = vrot.slane %v2295_v15, 4  ;;  %v2130_v30 = vld [vmem:[#allocation2 + $0x50] sm:$0x1] }
 0x165   : > { %2557 = vrot.lane.b32.xlu0 %v2246_v61, %s4880_s14  ;;  %2547 = vrot.lane.b32.xlu1 %v2184_v39, %s4880_s14  ;;  %v2318_v61 = vsel %vm4983_vm9, %v2313_v28, %v5869_v38  ;;  %v2288_v39 = vor.u32 %v2287_v4, %v2284_v49  ;;  %v2357_v28 = vshll.u32 %v2137_v5, 16  ;;  %v2142_v37 = vld [vmem:[#allocation2 + $0x80] sm:$0x1]  ;;  %v789_v15 = vrot.slane %v5797_v48, 4 }
 0x166   : > { %v2384_v51 = vor.u32 %v2383_v7, %v2380_v12  ;;  %v2298_v12 = vor.u32 %v2297_v6, %v5894_v20  ;;  %v2301_v7 = vshll.u32 %v2130_v30, 16 }
 0x167   : > { %v1848_v35 = vpop.permute.xlu0 %1847  ;;  %2040 = vrot.lane.b32.xlu2 %v1948_v0, %s4879_s9  ;;  %v1838_v27 = vpop.permute.xlu1 %1837  ;;  %v2229_v0 = vshll.u32 %v2121_v63, 16  ;;  %v2289_v14 = vrot.slane %v2288_v39, 4  ;;  %v2359_v36 = vrot.slane %v2357_v28, 5  ;;  %v513_v39 = vld [vmem:[#allocation2 + $0xc8] sm:$0x1] }
 0x168   : > { %1916 = vst.msk [vmem:[#allocation3 + $0x70] sm:$0xf] %vm1887_vm2, %v1848_v35  ;;  %v2351_v35 = vrot.slane %v2349_v53, 5  ;;  %v2385_v4 = vrot.slane %v2384_v51, 4  ;;  %v2149_v53 = vld [vmem:[#allocation2 + $0x9c] sm:$0xf] }
 0x169   : > { %1911 = vst.msk [vmem:[#allocation3 + $0x5c] sm:$0xf] %vm1887_vm2, %v1838_v27  ;;  %v1846_v31 = vpop.permute.xlu2 %1845  ;;  %v2321_v27 = vrot.slane %v2319_v57, 4  ;;  %v2231_v32 = vrot.slane %v2229_v0, 5  ;;  %v2294_v43 = vsel %vm4983_vm9, %v2289_v14, %v5894_v20  ;;  %v2421_v57 = vshll.u32 %v2145_v17, 16 }
 0x16a   : > { %1915 = vst.msk [vmem:[#allocation3 + $0x6c] sm:$0xf] %vm1887_vm2, %v1846_v31  ;;  %v2415_v31 = vshrl.u32 %v2144_v25, 16  ;;  %v2352_v62 = vsel %vm4983_vm9, %v2347_v33, %v2351_v35  ;;  %v2390_v8 = vsel %vm4983_vm9, %v2385_v4, %v5915_v58  ;;  %v514_v25 = vsel %vm4938_vm7, 0, %v513_v39 }
 0x16b   : > { %v2322_v56 = vor.u32 %v2321_v27, %v5869_v38  ;;  %v2232_v38 = vsel %vm4983_vm9, %v2227_v13, %v2231_v32  ;;  %v2423_v14 = vrot.slane %v2421_v57, 5  ;;  %v2330_v13 = vshrl.u32 %v2134_v9, 16  ;;  %515 = vst [vmem:[#allocation2 + $0xc8] sm:$0x1] %v514_v25  ;;  %v2146_v32 = vld [vmem:[#allocation2 + $0x90] sm:$0xf] }
 0x16c   : > { %v2417_v49 = vrot.slane %v2415_v31, 4  ;;  %v2333_v27 = vshll.u32 %v2134_v9, 16  ;;  %v2299_v31 = vrot.slane %v2298_v12, 4  ;;  %v2429_v4 = vshll.u32 %v2146_v32, 16  ;;  %v2158_v57 = vld [vmem:[#allocation2 + $0xc0] sm:$0xf] }
 0x16d   : > { %2563 = vrot.lane.b32.xlu0 %v2280_v21, %s4880_s14  ;;  %2553 = vrot.lane.b32.xlu1 %v2222_v18, %s4880_s14  ;;  %v2133_v21 = vld [vmem:[#allocation2 + $0x5c] sm:$0x1]  ;;  %v2323_v50 = vrot.slane %v2322_v56, 4  ;;  %v5968_v9 = vld [vmem:[#allocation2 + $0x94] sm:$0xf]  ;;  %v2522_v12 = vshrl.u32 %v2158_v57, 16 }
 0x16e   : > { %v2325_v47 = vshll.u32 %v2133_v21, 16  ;;  %v2335_v56 = vrot.slane %v2333_v27, 5  ;;  %v2463_v27 = vshrl.u32 %v5940_v2, 16  ;;  %vm3733_vm7 = vcmask 257248  }
 0x16f   : > { %v1854_v44 = vpop.permute.xlu0 %1853  ;;  %2046 = vrot.lane.b32.xlu2 %v1951_v24, %s4879_s9  ;;  %v1844_v46 = vpop.permute.xlu1 %1843  ;;  %v2354_v24 = vshrl.u32 %v2137_v5, 16 }
 0x170   : > { %1919 = vst.msk [vmem:[#allocation3 + $0x7c] sm:$0xf] %vm1887_vm2, %v1854_v44  ;;  %v2264_v44 = vor.u32 %v2263_v10, %v2260_v42  ;;  %v2393_v42 = vrot.slane %v2391_v11, 4  ;;  %v2153_v10 = vld [vmem:[#allocation2 + $0xac] sm:$0xf] }
 0x171   : > { %1914 = vst.msk [vmem:[#allocation3 + $0x68] sm:$0xf] %vm1887_vm2, %v1844_v46  ;;  %v1852_v41 = vpop.permute.xlu2 %1851  ;;  %v2327_v46 = vrot.slane %v2325_v47, 5  ;;  %v2356_v63 = vrot.slane %v2354_v24, 4  ;;  %v2459_v24 = vshll.u32 %v5940_v2, 16  ;;  %v2483_v28 = vshll.u32 %v2153_v10, 16 }
 0x172   : > { %1918 = vst.msk [vmem:[#allocation3 + $0x78] sm:$0xf] %vm1887_vm2, %v1852_v41  ;;  %v2265_v55 = vrot.slane %v2264_v44, 4  ;;  %v2418_v41 = vor.u32 %v2417_v49, %v5911_v45  ;;  %v2394_v49 = vor.u32 %v2393_v42, %v5915_v58 }
 0x173   : > { %v2328_v60 = vsel %vm4983_vm9, %v2323_v50, %v2327_v46  ;;  %v2360_v33 = vor.u32 %v2359_v36, %v2356_v63  ;;  %v2397_v50 = vshll.u32 %v2142_v37, 16  ;;  %v949_v63 = vld [vmem:[#allocation2 + $0xc8] sm:$0x1]  ;;  %v5960_v58 = vrot.slane %v2459_v24, 5  ;;  %v2155_v24 = vld [vmem:[#allocation2 + $0xb4] sm:$0xf] }
 0x174   : > { %v2270_v54 = vsel %vm4983_vm9, %v2265_v55, %v5831_v26  ;;  %v2303_v26 = vrot.slane %v2301_v7, 5  ;;  %v5962_v6 = vrot.slane %v2483_v28, 5  ;;  %v2395_v30 = vrot.slane %v2394_v49, 4 }
 0x175   : > { %2569 = vrot.lane.b32.xlu0 %v2318_v61, %s4880_s14  ;;  %2559 = vrot.lane.b32.xlu1 %v2256_v52, %s4880_s14  ;;  %v5919_v61 = vld [vmem:[#allocation2 + $0x70] sm:$0xf]  ;;  %v2450_v52 = vshrl.u32 %v2149_v53, 16  ;;  %v950_v39 = vsel %vm4928_vm5, %v789_v15, %v949_v63  ;;  %v2525_v7 = vshll.u32 %v2158_v57, 16  ;;  %vm4284_vm5 = vcmask 1041408  }
 0x176   : > { %v2363_v35 = vshll.u32 %v5919_v61, 16  ;;  %v2304_v46 = vsel %vm4983_vm9, %v2299_v31, %v2303_v26  ;;  %951 = vst [vmem:[#allocation2 + $0xc8] sm:$0x1] %v950_v39  ;;  %v2524_v31 = vrot.slane %v2522_v12, 4 }
 0x177   : > { %v1989_v59 = vpop.permute.xlu0 %1988  ;;  %2549 = vrot.lane.b32.xlu2 %v2198_v34, %s4880_s14  ;;  %v1850_v22 = vpop.permute.xlu1 %1849  ;;  %v2453_v34 = vshll.u32 %v2149_v53, 16  ;;  %v2452_v21 = vrot.slane %v2450_v52, 4  ;;  %v2154_v53 = vld [vmem:[#allocation2 + $0xb0] sm:$0x1] }
 0x178   : > { %2083 = vst.msk [vmem:[#allocation3 + $0x8] sm:$0xf] %vm2080_vm0, %v1989_v59  ;;  %v2419_v59 = vrot.slane %v2418_v41, 4  ;;  %v5943_v29 = vrot.slane %v2363_v35, 5  ;;  %v2431_v41 = vrot.slane %v2429_v4, 5  ;;  %v2493_v11 = vshll.u32 %v2154_v53, 16 }
 0x179   : > { %1917 = vst.msk [vmem:[#allocation3 + $0x74] sm:$0xf] %vm1887_vm2, %v1850_v22  ;;  %v1987_v18 = vpop.permute.xlu2 %1986  ;;  %v2455_v5 = vrot.slane %v2453_v34, 5  ;;  %v2361_v22 = vrot.slane %v2360_v33, 4  ;;  %v2143_v35 = vld [vmem:[#allocation2 + $0x84] sm:$0xf] }
 0x17a   : > { %2082 = vst.msk [vmem:[#allocation3 + $0x4] sm:$0xf] %vm2080_vm0, %v1987_v18  ;;  %v2424_v51 = vsel %vm4983_vm9, %v2419_v59, %v2423_v14  ;;  %v2332_v18 = vrot.slane %v2330_v13, 4  ;;  %v2435_v14 = vshll.u32 %v5968_v9, 16 }
 0x17b   : > { %v2456_v47 = vor.u32 %v2455_v5, %v2452_v21  ;;  %v2366_v17 = vsel %vm4983_vm9, %v2361_v22, %v5943_v29  ;;  %v2405_v22 = vshll.u32 %v2143_v35, 16 }
 0x17c   : > { %v2336_v48 = vor.u32 %v2335_v56, %v2332_v18  ;;  %v5987_v2 = vrot.slane %v2435_v14, 5  ;;  %v2151_v18 = vld [vmem:[#allocation2 + $0xa4] sm:$0x1] }
 0x17d   : > { %2575 = vrot.lane.b32.xlu0 %v2352_v62, %s4880_s14  ;;  %2565 = vrot.lane.b32.xlu1 %v2294_v43, %s4880_s14  ;;  %v2487_v43 = vshrl.u32 %v2153_v10, 16  ;;  %v2457_v36 = vrot.slane %v2456_v47, 4  ;;  %v2495_v10 = vrot.slane %v2493_v11, 5  ;;  %v2407_v47 = vrot.slane %v2405_v22, 5  ;;  %v2148_v11 = vld [vmem:[#allocation2 + $0x98] sm:$0x1] }
 0x17f   : > { %v1995_v16 = vpop.permute.xlu0 %1994  ;;  %2555 = vrot.lane.b32.xlu2 %v2232_v38, %s4880_s14  ;;  %v1985_v19 = vpop.permute.xlu1 %1984  ;;  %v2426_v38 = vshrl.u32 %v2146_v32, 16  ;;  %v2462_v1 = vsel %vm4983_vm9, %v2457_v36, %v5960_v58  ;;  %v2527_v32 = vrot.slane %v2525_v7, 5 }
 0x180   : > { %2086 = vst.msk [vmem:[#allocation3 + $0x14] sm:$0xf] %vm2080_vm0, %v1995_v16  ;;  %v2367_v16 = vshrl.u32 %v5919_v61, 16 }
 0x181   : > { %2081 = vst.msk [vmem:[#allocation3] sm:$0xf] %vm2080_vm0, %v1985_v19  ;;  %v1993_v0 = vpop.permute.xlu2 %1992  ;;  %v2489_v19 = vrot.slane %v2487_v43, 4  ;;  %v2428_v61 = vrot.slane %v2426_v38, 4  ;;  %v2528_v15 = vor.u32 %v2527_v32, %v2524_v31 }
 0x182   : > { %2085 = vst.msk [vmem:[#allocation3 + $0x10] sm:$0xf] %vm2080_vm0, %v1993_v0  ;;  %v2369_v52 = vrot.slane %v2367_v16, 4  ;;  %v2337_v0 = vrot.slane %v2336_v48, 4  ;;  %v2498_v16 = vshrl.u32 %v2155_v24, 16  ;;  %v2439_v48 = vshrl.u32 %v5968_v9, 16 }
 0x183   : > { %v2490_v33 = vor.u32 %v2489_v19, %v5962_v6  ;;  %v2432_v59 = vor.u32 %v2431_v41, %v2428_v61  ;;  %v2529_v36 = vrot.slane %v2528_v15, 4 }
 0x184   : > { %v2342_v21 = vsel %vm4983_vm9, %v2337_v0, %v5871_v3  ;;  %v2500_v61 = vrot.slane %v2498_v16, 4  ;;  %v2152_v0 = vld [vmem:[#allocation2 + $0xa8] sm:$0xf] }
 0x185   : > { %2581 = vrot.lane.b32.xlu0 %v2390_v8, %s4880_s14  ;;  %2571 = vrot.lane.b32.xlu1 %v2328_v60, %s4880_s14  ;;  %v2399_v8 = vrot.slane %v2397_v50, 5  ;;  %v2139_v60 = vld [vmem:[#allocation2 + $0x74] sm:$0x1]  ;;  %v2491_v42 = vrot.slane %v2490_v33, 4  ;;  %v2433_v26 = vrot.slane %v2432_v59, 4  ;;  %v2501_v50 = vshll.u32 %v2155_v24, 16 }
 0x186   : > { %v2373_v5 = vshll.u32 %v2139_v60, 16  ;;  %v2474_v59 = vshrl.u32 %v2152_v0, 16  ;;  %v2477_v14 = vshll.u32 %v2152_v0, 16 }
 0x187   : > { %v2001_v20 = vpop.permute.xlu0 %2000  ;;  %2561 = vrot.lane.b32.xlu2 %v2270_v54, %s4880_s14  ;;  %v1991_v62 = vpop.permute.xlu1 %1990  ;;  %v2400_v13 = vsel %vm4983_vm9, %v2395_v30, %v2399_v8  ;;  %v2370_v54 = vor.u32 %v2369_v52, %v5943_v29  ;;  %v5989_v29 = vld [vmem:[#allocation2 + $0xc4] sm:$0xf]  ;;  %v2496_v43 = vsel %vm4983_vm9, %v2491_v42, %v2495_v10  ;;  %v2438_v38 = vsel %vm4983_vm9, %v2433_v26, %v5987_v2  ;;  %v6013_v8 = vld [vmem:[#allocation2 + $0xb8] sm:$0xf]  ;;  %v2160_v10 = vld [vmem:[#allocation2 + $0xc8] sm:$0x1] }
 0x188   : > { %2089 = vst.msk [vmem:[#allocation3 + $0x20] sm:$0xf] %vm2080_vm0, %v2001_v20  ;;  %v2402_v20 = vshrl.u32 %v2143_v35, 16  ;;  %v2375_v28 = vrot.slane %v2373_v5, 5  ;;  %v2503_v41 = vrot.slane %v2501_v50, 5  ;;  %v2441_v52 = vrot.slane %v2439_v48, 4 }
 0x189   : > { %2084 = vst.msk [vmem:[#allocation3 + $0xc] sm:$0xf] %vm2080_vm0, %v1991_v62  ;;  %v1999_v44 = vpop.permute.xlu2 %1998  ;;  %v2371_v3 = vrot.slane %v2370_v54, 4  ;;  %v2535_v35 = vshrl.u32 %v5989_v29, 16  ;;  %v2507_v7 = vshll.u32 %v6013_v8, 16  ;;  %v2476_v31 = vrot.slane %v2474_v59, 4 }
 0x18a   : > { %2088 = vst.msk [vmem:[#allocation3 + $0x1c] sm:$0xf] %vm2080_vm0, %v1999_v44  ;;  %v2404_v56 = vrot.slane %v2402_v20, 4  ;;  %v2531_v44 = vshll.u32 %v5989_v29, 16  ;;  %v2504_v12 = vor.u32 %v2503_v41, %v2500_v61  ;;  %v2479_v32 = vrot.slane %v2477_v14, 5 }
 0x18b   : > { %v2376_v63 = vsel %vm4983_vm9, %v2371_v3, %v2375_v28  ;;  %v2509_v22 = vrot.slane %v2507_v7, 5  ;;  %v2537_v42 = vrot.slane %v2535_v35, 4  ;;  %v2680_v3 = vld [vmem:[#allocation2 + $0x24] sm:$0xe]  ;;  %v2511_v24 = vshrl.u32 %v6013_v8, 16 }
 0x18c   : > { %v6006_v53 = vrot.slane %v2531_v44, 5  ;;  %v2505_v20 = vrot.slane %v2504_v12, 4  ;;  %v2678_v61 = vld [vmem:[#allocation2 + $0x1c] sm:$0xf]  ;;  %v2689_v35 = vld [vmem:[#allocation2 + $0x48] sm:$0xe] }
 0x18d   : > { %2587 = vrot.lane.b32.xlu0 %v2424_v51, %s4880_s14  ;;  %2577 = vrot.lane.b32.xlu1 %v2366_v17, %s4880_s14  ;;  %v2465_v51 = vrot.slane %v2463_v27, 4  ;;  %v2469_v17 = vshll.u32 %v2151_v18, 16  ;;  %v2445_v27 = vshll.u32 %v2148_v11, 16  ;;  %v2779_v0 = vrot.slane %v2678_v61, 5  ;;  %v2690_v12 = vld [vmem:[#allocation2 + $0x4c] sm:$0xf] }
 0x18e   : > { %v2534_v9 = vsel %vm4983_vm9, %v2529_v36, %v6006_v53  ;;  %v2538_v18 = vor.u32 %v2537_v42, %v6006_v53  ;;  %v2157_v36 = vld [vmem:[#allocation2 + $0xbc] sm:$0x1]  ;;  %v2685_v53 = vld [vmem:[#allocation2 + $0x38] sm:$0x1]  ;;  %v4699_v14 = vrot.slane %v2689_v35, 9 }
 0x18f   : > { %v2007_v55 = vpop.permute.xlu0 %2006  ;;  %2567 = vrot.lane.b32.xlu2 %v2304_v46, %s4880_s14  ;;  %v1997_v34 = vpop.permute.xlu1 %1996  ;;  %v2466_v4 = vor.u32 %v2465_v51, %v5960_v58  ;;  %v2408_v46 = vor.u32 %v2407_v47, %v2404_v56  ;;  %v2471_v30 = vrot.slane %v2469_v17, 5  ;;  %v2447_v26 = vrot.slane %v2445_v27, 5  ;;  %v6038_v51 = vld [vmem:[#allocation2 + $0x28] sm:$0xf] }
 0x190   : > { %2092 = vst.msk [vmem:[#allocation3 + $0x2c] sm:$0xf] %vm2080_vm0, %v2007_v55  ;;  %v6009_v55 = vld [vmem:[#allocation2 + $0x10] sm:$0xf]  ;;  %v2541_v56 = vshll.u32 %v2160_v10, 16  ;;  %v2480_v47 = vor.u32 %v2479_v32, %v2476_v31  ;;  %v2786_v15 = vrot.slane %v6038_v51, 5 }
 0x191   : > { %2087 = vst.msk [vmem:[#allocation3 + $0x18] sm:$0xf] %vm2080_vm0, %v1997_v34  ;;  %v2005_v25 = vpop.permute.xlu2 %2004  ;;  %v2467_v58 = vrot.slane %v2466_v4, 4  ;;  %v2409_v39 = vrot.slane %v2408_v46, 4  ;;  %v2772_v34 = vrot.slane %v6009_v55, 5  ;;  %v2513_v46 = vrot.slane %v2511_v24, 4 }
 0x192   : > { %2091 = vst.msk [vmem:[#allocation3 + $0x28] sm:$0xf] %vm2080_vm0, %v2005_v25  ;;  %v2543_v4 = vrot.slane %v2541_v56, 5  ;;  %v2481_v16 = vrot.slane %v2480_v47, 4  ;;  %v2796_v8 = vrot.slane %v2685_v53, 5  ;;  %v2781_v55 = vrot.slane %v2779_v0, 4 }
 0x193   : > { %v2472_v33 = vsel %vm4983_vm9, %v2467_v58, %v2471_v30  ;;  %v2414_v25 = vsel %vm4983_vm9, %v2409_v39, %v5911_v45  ;;  %v2774_v54 = vrot.slane %v2772_v34, 4  ;;  %v2677_v30 = vld [vmem:[#allocation2 + $0x18] sm:$0xe]  ;;  %v2514_v41 = vor.u32 %v2513_v46, %v2509_v22  ;;  %v2694_v32 = vld [vmem:[#allocation2 + $0x5c] sm:$0x1] }
 0x194   : > { %v2486_v58 = vsel %vm4983_vm9, %v2481_v16, %v5962_v6  ;;  %v2817_v51 = vrot.slane %v2694_v32, 5 }
 0x195   : > { %2593 = vrot.lane.b32.xlu0 %v2462_v1, %s4880_s14  ;;  %2583 = vrot.lane.b32.xlu1 %v2400_v13, %s4880_s14  ;;  %v2676_v1 = vld [vmem:[#allocation2 + $0x14] sm:$0x1]  ;;  %v2442_v13 = vor.u32 %v2441_v52, %v5987_v2  ;;  %v4695_v52 = vrot.slane %v2677_v30, 9 }
 0x197   : > { %v2013_v62 = vpop.permute.xlu0 %2012  ;;  %2573 = vrot.lane.b32.xlu2 %v2342_v21, %s4880_s14  ;;  %v2003_v37 = vpop.permute.xlu1 %2002  ;;  %v2775_v21 = vrot.slane %v2676_v1, 5  ;;  %v2780_v7 = vsel %vm5487_vm14, %v4695_v52, %v2779_v0  ;;  %v2696_v52 = vld [vmem:[#allocation2 + $0x64] sm:$0xf] }
 0x198   : > { %2095 = vst.msk [vmem:[#allocation3 + $0x38] sm:$0xf] %vm2080_vm0, %v2013_v62  ;;  %v2443_v62 = vrot.slane %v2442_v13, 4  ;;  %v2807_v13 = vrot.slane %v2690_v12, 5  ;;  %v2821_v35 = vrot.slane %v2696_v52, 5 }
 0x199   : > { %2090 = vst.msk [vmem:[#allocation3 + $0x24] sm:$0xf] %vm2080_vm0, %v2003_v37  ;;  %v2011_v49 = vpop.permute.xlu2 %2010  ;;  %v2776_v2 = vsel %vm5487_vm14, %v2774_v54, %v2775_v21  ;;  %v2510_v37 = vsel %vm4983_vm9, %v2505_v20, %v2509_v22  ;;  %v2674_v54 = vld [vmem:[#allocation2 + $0xc] sm:$0xe]  ;;  %v6080_v21 = vld [vmem:[#allocation2 + $0x58] sm:$0xf] }
 0x19a   : > { %2094 = vst.msk [vmem:[#allocation3 + $0x34] sm:$0xf] %vm2080_vm0, %v2011_v49  ;;  %v2448_v28 = vsel %vm4983_vm9, %v2443_v62, %v2447_v26  ;;  %v6050_v49 = vld [vmem:[#allocation2 + $0x34] sm:$0xf]  ;;  %v4694_v42 = vrot.slane %v2674_v54, 9  ;;  %v2814_v10 = vrot.slane %v6080_v21, 5 }
 0x19b   : > { %v2793_v48 = vrot.slane %v6050_v49, 5  ;;  %v2686_v26 = vld [vmem:[#allocation2 + $0x3c] sm:$0xe]  ;;  %v2809_v53 = vrot.slane %v2807_v13, 4 }
 0x19c   : > { %v4698_v56 = vrot.slane %v2686_v26, 9  ;;  %v3206_v52 = vld [vmem:[#allocation2 + $0x1c] sm:$0xf] }
 0x19d   : > { %2599 = vrot.lane.b32.xlu0 %v2496_v43, %s4880_s14  ;;  %2589 = vrot.lane.b32.xlu1 %v2438_v38, %s4880_s14  ;;  %v4696_v43 = vrot.slane %v2680_v3, 9  ;;  %v2539_v38 = vrot.slane %v2538_v18, 4  ;;  %v2795_v39 = vrot.slane %v2793_v48, 4  ;;  %v2816_v3 = vrot.slane %v2814_v10, 4  ;;  %v2679_v18 = vld [vmem:[#allocation2 + $0x20] sm:$0x1] }
 0x19f   : > { %v2019_v19 = vpop.permute.xlu0 %2018  ;;  %2579 = vrot.lane.b32.xlu2 %v2376_v63, %s4880_s14  ;;  %v2009_v57 = vpop.permute.xlu1 %2008  ;;  %v2787_v50 = vsel %vm5487_vm14, %v4696_v43, %v2786_v15  ;;  %v2797_v1 = vsel %vm5487_vm14, %v2795_v39, %v2796_v8  ;;  %v2703_v39 = vld [vmem:[#allocation2 + $0x80] sm:$0x1] }
 0x1a0   : > { %2098 = vst.msk [vmem:[#allocation3 + $0x44] sm:$0xf] %vm2080_vm0, %v2019_v19  ;;  %v2544_v19 = vsel %vm4983_vm9, %v2539_v38, %v2543_v4  ;;  %v2691_v4 = vld [vmem:[#allocation2 + $0x50] sm:$0x1] }
 0x1a1   : > { %2093 = vst.msk [vmem:[#allocation3 + $0x30] sm:$0xf] %vm2080_vm0, %v2009_v57  ;;  %v2017_v60 = vpop.permute.xlu2 %2016  ;;  %v2517_v57 = vshll.u32 %v2157_v36, 16  ;;  %v6111_v36 = vld [vmem:[#allocation2 + $0x7c] sm:$0xf] }
 0x1a2   : > { %2097 = vst.msk [vmem:[#allocation3 + $0x40] sm:$0xf] %vm2080_vm0, %v2017_v60  ;;  %v2515_v60 = vrot.slane %v2514_v41, 4  ;;  %v2835_v41 = vrot.slane %v6111_v36, 5 }
 0x1a3   : > { %v2519_v11 = vrot.slane %v2517_v57, 5 }
 0x1a5   : > { %2605 = vrot.lane.b32.xlu0 %v2534_v9, %s4880_s14  ;;  %2595 = vrot.lane.b32.xlu1 %v2472_v33, %s4880_s14  ;;  %v2520_v59 = vsel %vm4983_vm9, %v2515_v60, %v2519_v11  ;;  %v2838_v60 = vrot.slane %v2703_v39, 5 }
 0x1a7   : > { %v2025_v5 = vpop.permute.xlu0 %2024  ;;  %2585 = vrot.lane.b32.xlu2 %v2414_v25, %s4880_s14  ;;  %v2015_v45 = vpop.permute.xlu1 %2014  ;;  %v2682_v25 = vld [vmem:[#allocation2 + $0x2c] sm:$0x1] }
 0x1a8   : > { %2101 = vst.msk [vmem:[#allocation3 + $0x50] sm:$0xf] %vm2080_vm0, %v2025_v5  ;;  %v2788_v5 = vrot.slane %v2786_v15, 4  ;;  %v2789_v20 = vrot.slane %v2682_v25, 5  ;;  %v2698_v15 = vld [vmem:[#allocation2 + $0x6c] sm:$0xe] }
 0x1a9   : > { %2096 = vst.msk [vmem:[#allocation3 + $0x3c] sm:$0xf] %vm2080_vm0, %v2015_v45  ;;  %v2023_v29 = vpop.permute.xlu2 %2022  ;;  %v2808_v45 = vsel %vm5487_vm14, %v4699_v14, %v2807_v13  ;;  %v4702_v16 = vrot.slane %v2698_v15, 9  ;;  %v6135_v14 = vld [vmem:[#allocation2 + $0x94] sm:$0xf] }
 0x1aa   : > { %2100 = vst.msk [vmem:[#allocation3 + $0x4c] sm:$0xf] %vm2080_vm0, %v2023_v29  ;;  %v2790_v62 = vsel %vm5487_vm14, %v2788_v5, %v2789_v20  ;;  %v2773_v29 = vsel %vm5487_vm14, %v4694_v42, %v2772_v34  ;;  %v2818_v34 = vsel %vm5487_vm14, %v2816_v3, %v2817_v51  ;;  %v2849_v20 = vrot.slane %v6135_v14, 5  ;;  %v2692_v42 = vld [vmem:[#allocation2 + $0x54] sm:$0xe] }
 0x1ab   : > { %v4700_v26 = vrot.slane %v2692_v42, 9  ;;  %v2712_v51 = vld [vmem:[#allocation2 + $0xa4] sm:$0x1] }
 0x1ad   : > { %2884 = vrot.lane.b32.xlu0 %v2776_v2, %s4881_s15  ;;  %2601 = vrot.lane.b32.xlu1 %v2510_v37, %s4880_s14  ;;  %v2687_v2 = vld [vmem:[#allocation2 + $0x40] sm:$0xf] }
 0x1ae   : > { %v2800_v47 = vrot.slane %v2687_v2, 5 }
 0x1af   : > { %v2031_v44 = vpop.permute.xlu0 %2030  ;;  %2591 = vrot.lane.b32.xlu2 %v2448_v28, %s4880_s14  ;;  %v2021_v17 = vpop.permute.xlu1 %2020  ;;  %v2782_v28 = vrot.slane %v2679_v18, 5  ;;  %v2704_v18 = vld [vmem:[#allocation2 + $0x84] sm:$0xe] }
 0x1b0   : > { %2104 = vst.msk [vmem:[#allocation3 + $0x5c] sm:$0xf] %vm2080_vm0, %v2031_v44  ;;  %v2699_v44 = vld [vmem:[#allocation2 + $0x70] sm:$0xf]  ;;  %v2801_v38 = vsel %vm5487_vm14, %v4698_v56, %v2800_v47  ;;  %v2802_v49 = vrot.slane %v2800_v47, 4  ;;  %v2815_v47 = vsel %vm5487_vm14, %v4700_v26, %v2814_v10  ;;  %v4704_v15 = vrot.slane %v2704_v18, 9 }
 0x1b1   : > { %2099 = vst.msk [vmem:[#allocation3 + $0x48] sm:$0xf] %vm2080_vm0, %v2021_v17  ;;  %v2029_v63 = vpop.permute.xlu2 %2028  ;;  %v2783_v17 = vsel %vm5487_vm14, %v2781_v55, %v2782_v28  ;;  %v6157_v56 = vld [vmem:[#allocation2 + $0x88] sm:$0xf]  ;;  %v2859_v28 = vrot.slane %v2712_v51, 5 }
 0x1b2   : > { %2103 = vst.msk [vmem:[#allocation3 + $0x58] sm:$0xf] %vm2080_vm0, %v2029_v63  ;;  %v2683_v63 = vld [vmem:[#allocation2 + $0x30] sm:$0xe] }
 0x1b3   : > { %v4697_v30 = vrot.slane %v2683_v63, 9  ;;  %v6172_v63 = vld [vmem:[#allocation2 + $0xb8] sm:$0xf] }
 0x1b5   : > { %2890 = vrot.lane.b32.xlu0 %v2787_v50, %s4881_s15  ;;  %2607 = vrot.lane.b32.xlu1 %v2544_v19, %s4880_s14  ;;  %v2828_v50 = vrot.slane %v2699_v44, 5  ;;  %v2810_v19 = vrot.slane %v2691_v4, 5  ;;  %v2794_v0 = vsel %vm5487_vm14, %v4697_v30, %v2793_v48  ;;  %v2842_v44 = vrot.slane %v6157_v56, 5  ;;  %v2710_v56 = vld [vmem:[#allocation2 + $0x9c] sm:$0xe] }
 0x1b7   : > { %v2037_v9 = vpop.permute.xlu0 %2036  ;;  %2597 = vrot.lane.b32.xlu2 %v2486_v58, %s4880_s14  ;;  %v2027_v6 = vpop.permute.xlu1 %2026  ;;  %v2829_v61 = vsel %vm5487_vm14, %v4702_v16, %v2828_v50  ;;  %v2811_v8 = vsel %vm5487_vm14, %v2809_v53, %v2810_v19  ;;  %v2843_v53 = vsel %vm5487_vm14, %v4704_v15, %v2842_v44  ;;  %v2844_v36 = vrot.slane %v2842_v44, 4 }
 0x1b8   : > { %2107 = vst.msk [vmem:[#allocation3 + $0x68] sm:$0xf] %vm2080_vm0, %v2037_v9  ;;  %v2695_v9 = vld [vmem:[#allocation2 + $0x60] sm:$0xe] }
 0x1b9   : > { %2102 = vst.msk [vmem:[#allocation3 + $0x54] sm:$0xf] %vm2080_vm0, %v2027_v6  ;;  %v2035_v33 = vpop.permute.xlu2 %2034  ;;  %v2837_v6 = vrot.slane %v2835_v41, 4 }
 0x1ba   : > { %2106 = vst.msk [vmem:[#allocation3 + $0x64] sm:$0xf] %vm2080_vm0, %v2035_v33  ;;  %v4701_v33 = vrot.slane %v2695_v9, 9  ;;  %v2701_v9 = vld [vmem:[#allocation2 + $0x78] sm:$0xe] }
 0x1bb   : > { %v2839_v48 = vsel %vm5487_vm14, %v2837_v6, %v2838_v60 }
 0x1bc   : > { %v2822_v13 = vsel %vm5487_vm14, %v4701_v33, %v2821_v35 }
 0x1bd   : > { %2896 = vrot.lane.b32.xlu0 %v2797_v1, %s4881_s15  ;;  %2886 = vrot.lane.b32.xlu1 %v2780_v7, %s4881_s15  ;;  %v2688_v1 = vld [vmem:[#allocation2 + $0x44] sm:$0x1] }
 0x1be   : > { %v2803_v7 = vrot.slane %v2688_v1, 5 }
 0x1bf   : > { %v2043_v27 = vpop.permute.xlu0 %2042  ;;  %2603 = vrot.lane.b32.xlu2 %v2520_v59, %s4880_s14  ;;  %v2033_v22 = vpop.permute.xlu1 %2032  ;;  %v2707_v59 = vld [vmem:[#allocation2 + $0x90] sm:$0xe] }
 0x1c0   : > { %2110 = vst.msk [vmem:[#allocation3 + $0x74] sm:$0xf] %vm2080_vm0, %v2043_v27  ;;  %v2700_v27 = vld [vmem:[#allocation2 + $0x74] sm:$0x1]  ;;  %v2804_v54 = vsel %vm5487_vm14, %v2802_v49, %v2803_v7  ;;  %v4705_v5 = vrot.slane %v2707_v59, 9 }
 0x1c1   : > { %2105 = vst.msk [vmem:[#allocation3 + $0x60] sm:$0xf] %vm2080_vm0, %v2033_v22  ;;  %v2041_v31 = vpop.permute.xlu2 %2040  ;;  %v2831_v32 = vrot.slane %v2700_v27, 5  ;;  %v2713_v7 = vld [vmem:[#allocation2 + $0xa8] sm:$0xe] }
 0x1c2   : > { %2109 = vst.msk [vmem:[#allocation3 + $0x70] sm:$0xf] %vm2080_vm0, %v2041_v31  ;;  %v2830_v31 = vrot.slane %v2828_v50, 4  ;;  %v2850_v2 = vsel %vm5487_vm14, %v4705_v5, %v2849_v20  ;;  %v2706_v27 = vld [vmem:[#allocation2 + $0x8c] sm:$0x1]  ;;  %v4707_v5 = vrot.slane %v2713_v7, 9 }
 0x1c3   : > { %v2845_v42 = vrot.slane %v2706_v27, 5  ;;  %v3769_v7 = vld [vmem:[#allocation2 + $0x24] sm:$0xe]  ;;  %v3766_v27 = vld [vmem:[#allocation2 + $0x18] sm:$0xe] }
 0x1c5   : > { %2902 = vrot.lane.b32.xlu0 %v2808_v45, %s4881_s15  ;;  %2892 = vrot.lane.b32.xlu1 %v2790_v62, %s4881_s15  ;;  %v6145_v45 = vld [vmem:[#allocation2 + $0xa0] sm:$0xf] }
 0x1c7   : > { %v2546_v37 = vpop.permute.xlu0 %2545  ;;  %2882 = vrot.lane.b32.xlu2 %v2773_v29, %s4881_s15  ;;  %v2039_v24 = vpop.permute.xlu1 %2038  ;;  %v2856_v29 = vrot.slane %v6145_v45, 5 }
 0x1c8   : > { %2642 = vst.msk [vmem:[#allocation3] sm:$0xf] %vm2641_vm3, %v2546_v37  ;;  %v2832_v37 = vsel %vm5487_vm14, %v2830_v31, %v2831_v32 }
 0x1c9   : > { %2108 = vst.msk [vmem:[#allocation3 + $0x6c] sm:$0xf] %vm2080_vm0, %v2039_v24  ;;  %v2047_v43 = vpop.permute.xlu2 %2046  ;;  %v2697_v24 = vld [vmem:[#allocation2 + $0x68] sm:$0x1]  ;;  %v2858_v55 = vrot.slane %v2856_v29, 4 }
 0x1ca   : > { %2112 = vst.msk [vmem:[#allocation3 + $0x7c] sm:$0xf] %vm2080_vm0, %v2047_v43  ;;  %v3205_v43 = vld [vmem:[#allocation2 + $0x18] sm:$0xf]  ;;  %v2824_v4 = vrot.slane %v2697_v24, 5 }
 0x1cb   : > { %v2860_v10 = vsel %vm5487_vm14, %v2858_v55, %v2859_v28  ;;  %v3257_v16 = vshll.u32 %v3205_v43, 16  ;;  %v3207_v28 = vld [vmem:[#allocation2 + $0x20] sm:$0x1] }
 0x1cd   : > { %2908 = vrot.lane.b32.xlu0 %v2818_v34, %s4881_s15  ;;  %2898 = vrot.lane.b32.xlu1 %v2801_v38, %s4881_s15  ;;  %v2823_v38 = vrot.slane %v2821_v35, 4  ;;  %v3259_v39 = vrot.slane %v3257_v16, 5  ;;  %v3263_v35 = vshll.u32 %v3206_v52, 16 }
 0x1cf   : > { %v2552_v46 = vpop.permute.xlu0 %2551  ;;  %2888 = vrot.lane.b32.xlu2 %v2783_v17, %s4881_s15  ;;  %v2045_v58 = vpop.permute.xlu1 %2044  ;;  %v3254_v17 = vshrl.u32 %v3205_v43, 16  ;;  %v2825_v19 = vsel %vm5487_vm14, %v2823_v38, %v2824_v4  ;;  %v3265_v14 = vrot.slane %v3263_v35, 5  ;;  %v3012_v38 = vld [vmem:[#allocation2 + $0x18] sm:$0xf]  ;;  %v3217_v35 = vld [vmem:[#allocation2 + $0x48] sm:$0xf] }
 0x1d0   : > { %2645 = vst.msk [vmem:[#allocation3 + $0xc] sm:$0xf] %vm2641_vm3, %v2552_v46  ;;  %v2716_v46 = vld [vmem:[#allocation2 + $0xb4] sm:$0xe] }
 0x1d1   : > { %2111 = vst.msk [vmem:[#allocation3 + $0x78] sm:$0xf] %vm2080_vm0, %v2045_v58  ;;  %v2550_v57 = vpop.permute.xlu2 %2549  ;;  %v2709_v58 = vld [vmem:[#allocation2 + $0x98] sm:$0x1]  ;;  %v4708_v30 = vrot.slane %v2716_v46, 9 }
 0x1d2   : > { %2644 = vst.msk [vmem:[#allocation3 + $0x8] sm:$0xf] %vm2641_vm3, %v2550_v57  ;;  %v3256_v57 = vrot.slane %v3254_v17, 4  ;;  %v2852_v6 = vrot.slane %v2709_v58, 5 }
 0x1d4   : > { %v3260_v33 = vor.u32 %v3259_v39, %v3256_v57  ;;  %v3020_v39 = vld [vmem:[#allocation2 + $0x48] sm:$0xf] }
 0x1d5   : > { %2914 = vrot.lane.b32.xlu0 %v2829_v61, %s4881_s15  ;;  %2904 = vrot.lane.b32.xlu1 %v2811_v8, %s4881_s15  ;;  %v2870_v61 = vrot.slane %v6172_v63, 5 }
 0x1d6   : > { %v3261_v59 = vrot.slane %v3260_v33, 4 }
 0x1d7   : > { %v2558_v11 = vpop.permute.xlu0 %2557  ;;  %2894 = vrot.lane.b32.xlu2 %v2794_v0, %s4881_s15  ;;  %v2548_v12 = vpop.permute.xlu1 %2547  ;;  %v2851_v0 = vrot.slane %v2849_v20, 4  ;;  %v2871_v1 = vsel %vm5487_vm14, %v4708_v30, %v2870_v61 }
 0x1d8   : > { %2648 = vst.msk [vmem:[#allocation3 + $0x18] sm:$0xf] %vm2641_vm3, %v2558_v11  ;;  %v4703_v11 = vrot.slane %v2701_v9, 9 }
 0x1d9   : > { %2643 = vst.msk [vmem:[#allocation3 + $0x4] sm:$0xf] %vm2641_vm3, %v2548_v12  ;;  %v2556_v25 = vpop.permute.xlu2 %2555  ;;  %v2853_v49 = vsel %vm5487_vm14, %v2851_v0, %v2852_v6 }
 0x1da   : > { %2647 = vst.msk [vmem:[#allocation3 + $0x14] sm:$0xf] %vm2641_vm3, %v2556_v25  ;;  %v2836_v25 = vsel %vm5487_vm14, %v4703_v11, %v2835_v41  ;;  %v3266_v41 = vsel %vm4983_vm9, %v3261_v59, %v3265_v14  ;;  %v3350_v59 = vshrl.u32 %v3217_v35, 16 }
 0x1dd   : > { %2920 = vrot.lane.b32.xlu0 %v2839_v48, %s4881_s15  ;;  %2910 = vrot.lane.b32.xlu1 %v2822_v13, %s4881_s15  ;;  %v2714_v48 = vld [vmem:[#allocation2 + $0xac] sm:$0xf] }
 0x1de   : > { %v2863_v20 = vrot.slane %v2714_v48, 5  ;;  %v6245_v48 = vld [vmem:[#allocation2 + $0x28] sm:$0xf] }
 0x1df   : > { %v2564_v22 = vpop.permute.xlu0 %2563  ;;  %2900 = vrot.lane.b32.xlu2 %v2804_v54, %s4881_s15  ;;  %v2554_v62 = vpop.permute.xlu1 %2553  ;;  %v6198_v54 = vld [vmem:[#allocation2 + $0x1c] sm:$0xf] }
 0x1e0   : > { %2651 = vst.msk [vmem:[#allocation3 + $0x24] sm:$0xf] %vm2641_vm3, %v2564_v22  ;;  %v3864_v31 = vrot.slane %v6198_v54, 5  ;;  %v2864_v26 = vsel %vm5487_vm14, %v4707_v5, %v2863_v20  ;;  %v2865_v45 = vrot.slane %v2863_v20, 4  ;;  %v4711_v5 = vrot.slane %v3769_v7, 9 }
 0x1e1   : > { %2646 = vst.msk [vmem:[#allocation3 + $0x10] sm:$0xf] %vm2641_vm3, %v2554_v62  ;;  %v2562_v3 = vpop.permute.xlu2 %2561  ;;  %v3768_v62 = vld [vmem:[#allocation2 + $0x20] sm:$0x1]  ;;  %v3871_v20 = vrot.slane %v6245_v48, 5 }
 0x1e2   : > { %2650 = vst.msk [vmem:[#allocation3 + $0x20] sm:$0xf] %vm2641_vm3, %v2562_v3  ;;  %v2846_v3 = vsel %vm5487_vm14, %v2844_v36, %v2845_v42  ;;  %v3866_v51 = vrot.slane %v3864_v31, 4  ;;  %v3229_v42 = vld [vmem:[#allocation2 + $0x78] sm:$0xf] }
 0x1e5   : > { %2926 = vrot.lane.b32.xlu0 %v2850_v2, %s4881_s15  ;;  %2916 = vrot.lane.b32.xlu1 %v2832_v37, %s4881_s15  ;;  %v3267_v2 = vshrl.u32 %v3206_v52, 16  ;;  %v3867_v37 = vrot.slane %v3768_v62, 5 }
 0x1e7   : > { %v2570_v34 = vpop.permute.xlu0 %2569  ;;  %2906 = vrot.lane.b32.xlu2 %v2815_v47, %s4881_s15  ;;  %v2560_v21 = vpop.permute.xlu1 %2559  ;;  %v3209_v47 = vld [vmem:[#allocation2 + $0x28] sm:$0xf]  ;;  %v3269_v24 = vrot.slane %v3267_v2, 4  ;;  %v3868_v43 = vsel %vm5487_vm14, %v3866_v51, %v3867_v37  ;;  %v3218_v2 = vld [vmem:[#allocation2 + $0x4c] sm:$0xf]  ;;  %v3872_v51 = vsel %vm5487_vm14, %v4711_v5, %v3871_v20 }
 0x1e8   : > { %2654 = vst.msk [vmem:[#allocation3 + $0x30] sm:$0xf] %vm2641_vm3, %v2570_v34  ;;  %v4706_v34 = vrot.slane %v2710_v56, 9  ;;  %v3287_v15 = vshll.u32 %v3209_v47, 16  ;;  %v3291_v44 = vshrl.u32 %v3209_v47, 16  ;;  %v3449_v56 = vshll.u32 %v3229_v42, 16 }
 0x1e9   : > { %2649 = vst.msk [vmem:[#allocation3 + $0x1c] sm:$0xf] %vm2641_vm3, %v2560_v21  ;;  %v2568_v50 = vpop.permute.xlu2 %2567  ;;  %v3270_v4 = vor.u32 %v3269_v24, %v3265_v14  ;;  %v3353_v14 = vshll.u32 %v3217_v35, 16  ;;  %v3780_v37 = vld [vmem:[#allocation2 + $0x50] sm:$0x1] }
 0x1ea   : > { %2653 = vst.msk [vmem:[#allocation3 + $0x2c] sm:$0xf] %vm2641_vm3, %v2568_v50  ;;  %v2857_v17 = vsel %vm5487_vm14, %v4706_v34, %v2856_v29  ;;  %v6226_v16 = vrot.slane %v3287_v15, 5  ;;  %v3293_v50 = vrot.slane %v3291_v44, 4  ;;  %v3208_v24 = vld [vmem:[#allocation2 + $0x24] sm:$0xf] }
 0x1eb   : > { %v3271_v58 = vrot.slane %v3270_v4, 4  ;;  %v3359_v34 = vshll.u32 %v3218_v2, 16  ;;  %v3895_v44 = vrot.slane %v3780_v37, 5  ;;  %v3231_v37 = vld [vmem:[#allocation2 + $0x80] sm:$0x1] }
 0x1ed   : > { %2932 = vrot.lane.b32.xlu0 %v2860_v10, %s4881_s15  ;;  %2922 = vrot.lane.b32.xlu1 %v2843_v53, %s4881_s15  ;;  %v3273_v10 = vshll.u32 %v3207_v28, 16  ;;  %v2715_v53 = vld [vmem:[#allocation2 + $0xb0] sm:$0x1] }
 0x1ee   : > { %v2866_v29 = vrot.slane %v2715_v53, 5 }
 0x1ef   : > { %v2576_v8 = vpop.permute.xlu0 %2575  ;;  %2912 = vrot.lane.b32.xlu2 %v2825_v19, %s4881_s15  ;;  %v2566_v60 = vpop.permute.xlu1 %2565  ;;  %v3210_v19 = vld [vmem:[#allocation2 + $0x2c] sm:$0x1]  ;;  %v3275_v30 = vrot.slane %v3273_v10, 5  ;;  %v3451_v10 = vrot.slane %v3449_v56, 5 }
 0x1f0   : > { %2657 = vst.msk [vmem:[#allocation3 + $0x3c] sm:$0xf] %vm2641_vm3, %v2576_v8  ;;  %v3294_v8 = vor.u32 %v3293_v50, %v6226_v16  ;;  %v3297_v9 = vshll.u32 %v3210_v19, 16  ;;  %v2867_v6 = vsel %vm5487_vm14, %v2865_v45, %v2866_v29  ;;  %v3230_v50 = vld [vmem:[#allocation2 + $0x7c] sm:$0xf] }
 0x1f1   : > { %2652 = vst.msk [vmem:[#allocation3 + $0x28] sm:$0xf] %vm2641_vm3, %v2566_v60  ;;  %v2574_v12 = vpop.permute.xlu2 %2573  ;;  %v3276_v0 = vsel %vm4983_vm9, %v3271_v58, %v3275_v30 }
 0x1f2   : > { %2656 = vst.msk [vmem:[#allocation3 + $0x38] sm:$0xf] %vm2641_vm3, %v2574_v12  ;;  %v3295_v60 = vrot.slane %v3294_v8, 4  ;;  %v3299_v11 = vrot.slane %v3297_v9, 5  ;;  %v3771_v8 = vld [vmem:[#allocation2 + $0x2c] sm:$0x1] }
 0x1f3   : > { %v3015_v9 = vld [vmem:[#allocation2 + $0x28] sm:$0xf] }
 0x1f4   : > { %v3300_v12 = vsel %vm4983_vm9, %v3295_v60, %v3299_v11  ;;  %v6278_v11 = vld [vmem:[#allocation2 + $0x7c] sm:$0xf] }
 0x1f5   : > { %2938 = vrot.lane.b32.xlu0 %v2871_v1, %s4881_s15  ;;  %2928 = vrot.lane.b32.xlu1 %v2853_v49, %s4881_s15  ;;  %v3920_v48 = vrot.slane %v6278_v11, 5 }
 0x1f7   : > { %v2582_v13 = vpop.permute.xlu0 %2581  ;;  %2918 = vrot.lane.b32.xlu2 %v2836_v25, %s4881_s15  ;;  %v2572_v22 = vpop.permute.xlu1 %2571  ;;  %v3014_v25 = vld [vmem:[#allocation2 + $0x24] sm:$0xf] }
 0x1f8   : > { %2660 = vst.msk [vmem:[#allocation3 + $0x48] sm:$0xf] %vm2641_vm3, %v2582_v13  ;;  %v3013_v13 = vld [vmem:[#allocation2 + $0x1c] sm:$0xf] }
 0x1f9   : > { %2655 = vst.msk [vmem:[#allocation3 + $0x34] sm:$0xf] %vm2641_vm3, %v2572_v22  ;;  %v2580_v32 = vpop.permute.xlu2 %2579  ;;  %v6250_v22 = vld [vmem:[#allocation2 + $0x4c] sm:$0xf] }
 0x1fa   : > { %2659 = vst.msk [vmem:[#allocation3 + $0x44] sm:$0xf] %vm2641_vm3, %v2580_v32  ;;  %v3355_v32 = vrot.slane %v3353_v14, 5  ;;  %v3792_v14 = vld [vmem:[#allocation2 + $0x80] sm:$0x1] }
 0x1fd   : > { %3637 = vrot.lane.b32.xlu0 %v3266_v41, %s4882_s16  ;;  %2934 = vrot.lane.b32.xlu1 %v2864_v26, %s4881_s15  ;;  %v3352_v41 = vrot.slane %v3350_v59, 4  ;;  %v4710_v26 = vrot.slane %v3766_v27, 9  ;;  %v3219_v59 = vld [vmem:[#allocation2 + $0x50] sm:$0x1]  ;;  %v3459_v27 = vshrl.u32 %v3230_v50, 16 }
 0x1ff   : > { %v2588_v18 = vpop.permute.xlu0 %2587  ;;  %2924 = vrot.lane.b32.xlu2 %v2846_v3, %s4881_s15  ;;  %v2578_v55 = vpop.permute.xlu1 %2577  ;;  %v3892_v3 = vrot.slane %v6250_v22, 5  ;;  %v3356_v28 = vor.u32 %v3355_v32, %v3352_v41  ;;  %v3923_v41 = vrot.slane %v3792_v14, 5 }
 0x200   : > { %2663 = vst.msk [vmem:[#allocation3 + $0x54] sm:$0xf] %vm2641_vm3, %v2588_v18  ;;  %v3446_v18 = vshrl.u32 %v3229_v42, 16  ;;  %v3922_v42 = vrot.slane %v3920_v48, 4 }
 0x201   : > { %2658 = vst.msk [vmem:[#allocation3 + $0x40] sm:$0xf] %vm2641_vm3, %v2578_v55  ;;  %v2586_v21 = vpop.permute.xlu2 %2585  ;;  %v3021_v55 = vld [vmem:[#allocation2 + $0x4c] sm:$0xf]  ;;  %v3894_v15 = vrot.slane %v3892_v3, 4  ;;  %v3357_v54 = vrot.slane %v3356_v28, 4 }
 0x202   : > { %2662 = vst.msk [vmem:[#allocation3 + $0x50] sm:$0xf] %vm2641_vm3, %v2586_v21  ;;  %v3278_v21 = vshrl.u32 %v3208_v24, 16  ;;  %v3448_v4 = vrot.slane %v3446_v18, 4  ;;  %v3924_v18 = vsel %vm5487_vm14, %v3922_v42, %v3923_v41  ;;  %v3783_v41 = vld [vmem:[#allocation2 + $0x5c] sm:$0x1] }
 0x203   : > { %v3896_v53 = vsel %vm5487_vm14, %v3894_v15, %v3895_v44 }
 0x204   : > { %v3280_v19 = vrot.slane %v3278_v21, 4  ;;  %v3452_v30 = vor.u32 %v3451_v10, %v3448_v4  ;;  %v3213_v4 = vld [vmem:[#allocation2 + $0x38] sm:$0x1] }
 0x205   : > { %3976 = vrot.lane.b32.xlu0 %v3868_v43, %s4883_s17  ;;  %3076 = vrot.lane.b32.xlu1 %v3012_v38, %s4884_s20  ;;  %v3865_v43 = vsel %vm5487_vm14, %v4710_v26, %v3864_v31  ;;  %v3281_v38 = vshll.u32 %v3208_v24, 16  ;;  %v3461_v26 = vrot.slane %v3459_v27, 4 }
 0x207   : > { %v2594_v46 = vpop.permute.xlu0 %2593  ;;  %2930 = vrot.lane.b32.xlu2 %v2857_v17, %s4881_s15  ;;  %v2584_v57 = vpop.permute.xlu1 %2583  ;;  %v3283_v58 = vrot.slane %v3281_v38, 5  ;;  %v3778_v38 = vld [vmem:[#allocation2 + $0x48] sm:$0xe] }
 0x208   : > { %2666 = vst.msk [vmem:[#allocation3 + $0x60] sm:$0xf] %vm2641_vm3, %v2594_v46  ;;  %v3361_v46 = vrot.slane %v3359_v34, 5  ;;  %v3465_v34 = vshll.u32 %v3231_v37, 16 }
 0x209   : > { %2661 = vst.msk [vmem:[#allocation3 + $0x4c] sm:$0xf] %vm2641_vm3, %v2584_v57  ;;  %v2592_v52 = vpop.permute.xlu2 %2591  ;;  %v3455_v57 = vshll.u32 %v3230_v50, 16 }
 0x20a   : > { %2665 = vst.msk [vmem:[#allocation3 + $0x5c] sm:$0xf] %vm2641_vm3, %v2592_v52  ;;  %v3362_v29 = vsel %vm4983_vm9, %v3357_v54, %v3361_v46  ;;  %v3284_v52 = vor.u32 %v3283_v58, %v3280_v19  ;;  %v4714_v54 = vrot.slane %v3778_v38, 9 }
 0x20d   : > { %3092 = vrot.lane.b32.xlu0 %v3020_v39, %s4884_s20  ;;  %3639 = vrot.lane.b32.xlu1 %v3276_v0, %s4882_s16  ;;  %v3363_v39 = vshrl.u32 %v3218_v2, 16  ;;  %v3453_v0 = vrot.slane %v3452_v30, 4  ;;  %v3893_v30 = vsel %vm5487_vm14, %v4714_v54, %v3892_v3  ;;  %v3016_v3 = vld [vmem:[#allocation2 + $0x30] sm:$0xf] }
 0x20f   : > { %v2600_v1 = vpop.permute.xlu0 %2599  ;;  %2936 = vrot.lane.b32.xlu2 %v2867_v6, %s4881_s15  ;;  %v2590_v33 = vpop.permute.xlu1 %2589  ;;  %v3457_v6 = vrot.slane %v3455_v57, 5 }
 0x210   : > { %2669 = vst.msk [vmem:[#allocation3 + $0x6c] sm:$0xf] %vm2641_vm3, %v2600_v1  ;;  %v3873_v1 = vrot.slane %v3871_v20, 4 }
 0x211   : > { %2664 = vst.msk [vmem:[#allocation3 + $0x58] sm:$0xf] %vm2641_vm3, %v2590_v33  ;;  %v2598_v49 = vpop.permute.xlu2 %2597  ;;  %v3874_v33 = vrot.slane %v3771_v8, 5  ;;  %v3458_v7 = vsel %vm4983_vm9, %v3453_v0, %v3457_v6  ;;  %v3462_v28 = vor.u32 %v3461_v26, %v3457_v6  ;;  %v3220_v8 = vld [vmem:[#allocation2 + $0x54] sm:$0xf] }
 0x212   : > { %2668 = vst.msk [vmem:[#allocation3 + $0x68] sm:$0xf] %vm2641_vm3, %v2598_v49  ;;  %v3285_v49 = vrot.slane %v3284_v52, 4  ;;  %v3772_v52 = vld [vmem:[#allocation2 + $0x30] sm:$0xe]  ;;  %v3374_v6 = vshrl.u32 %v3220_v8, 16 }
 0x213   : > { %v3463_v10 = vrot.slane %v3462_v28, 4  ;;  %v6326_v0 = vld [vmem:[#allocation2 + $0x34] sm:$0xf] }
 0x214   : > { %v3290_v20 = vsel %vm4983_vm9, %v3285_v49, %v6226_v16  ;;  %v3790_v49 = vld [vmem:[#allocation2 + $0x78] sm:$0xe] }
 0x215   : > { %3643 = vrot.lane.b32.xlu0 %v3300_v12, %s4882_s16  ;;  %3080 = vrot.lane.b32.xlu1 %v3014_v25, %s4884_s20  ;;  %v3365_v12 = vrot.slane %v3363_v39, 4  ;;  %v4718_v27 = vrot.slane %v3790_v49, 9 }
 0x217   : > { %v2606_v36 = vpop.permute.xlu0 %2605  ;;  %3078 = vrot.lane.b32.xlu2 %v3013_v13, %s4884_s20  ;;  %v2596_v62 = vpop.permute.xlu1 %2595  ;;  %v3875_v13 = vsel %vm5487_vm14, %v3873_v1, %v3874_v33  ;;  %v3366_v5 = vor.u32 %v3365_v12, %v3361_v46  ;;  %v3022_v46 = vld [vmem:[#allocation2 + $0x54] sm:$0xf]  ;;  %v3029_v1 = vld [vmem:[#allocation2 + $0x7c] sm:$0xf]  ;;  %v4712_v33 = vrot.slane %v3772_v52, 9  ;;  %v3921_v37 = vsel %vm5487_vm14, %v4718_v27, %v3920_v48 }
 0x218   : > { %2672 = vst.msk [vmem:[#allocation3 + $0x78] sm:$0xf] %vm2641_vm3, %v2606_v36  ;;  %v3369_v36 = vshll.u32 %v3219_v59, 16 }
 0x219   : > { %2667 = vst.msk [vmem:[#allocation3 + $0x64] sm:$0xf] %vm2641_vm3, %v2596_v62  ;;  %v2604_v47 = vpop.permute.xlu2 %2603  ;;  %v3212_v62 = vld [vmem:[#allocation2 + $0x34] sm:$0xf] }
 0x21a   : > { %2671 = vst.msk [vmem:[#allocation3 + $0x74] sm:$0xf] %vm2641_vm3, %v2604_v47  ;;  %v3371_v16 = vrot.slane %v3369_v36, 5  ;;  %v3311_v56 = vshll.u32 %v3212_v62, 16  ;;  %v3315_v47 = vshrl.u32 %v3212_v62, 16 }
 0x21b   : > { %v3211_v36 = vld [vmem:[#allocation2 + $0x30] sm:$0xf] }
 0x21c   : > { %v6305_v15 = vrot.slane %v3311_v56, 5  ;;  %v3317_v44 = vrot.slane %v3315_v47, 4  ;;  %v3233_v47 = vld [vmem:[#allocation2 + $0x88] sm:$0xf] }
 0x21d   : > { %3978 = vrot.lane.b32.xlu0 %v3872_v51, %s4883_s17  ;;  %3094 = vrot.lane.b32.xlu1 %v3021_v55, %s4884_s20  ;;  %v3367_v51 = vrot.slane %v3366_v5, 4  ;;  %v3028_v55 = vld [vmem:[#allocation2 + $0x78] sm:$0xf] }
 0x21f   : > { %v2885_v17 = vpop.permute.xlu0 %2884  ;;  %3974 = vrot.lane.b32.xlu2 %v3865_v43, %s4883_s17  ;;  %v2602_v31 = vpop.permute.xlu1 %2601  ;;  %v3372_v43 = vsel %vm4983_vm9, %v3367_v51, %v3371_v16  ;;  %v3305_v51 = vshll.u32 %v3211_v36, 16 }
 0x220   : > { %2980 = vst.msk [vmem:[#allocation3 + $0x4] sm:$0xf] %vm2978_vm4, %v2885_v17  ;;  %v3467_v17 = vrot.slane %v3465_v34, 5 }
 0x221   : > { %2670 = vst.msk [vmem:[#allocation3 + $0x70] sm:$0xf] %vm2641_vm3, %v2602_v31  ;;  %v2883_v45 = vpop.permute.xlu2 %2882  ;;  %v3318_v31 = vor.u32 %v3317_v44, %v6305_v15  ;;  %v3307_v11 = vrot.slane %v3305_v51, 5  ;;  %v3483_v44 = vshrl.u32 %v3233_v47, 16 }
 0x222   : > { %2979 = vst.msk [vmem:[#allocation3] sm:$0xf] %vm2978_vm4, %v2883_v45  ;;  %v3468_v58 = vsel %vm4983_vm9, %v3463_v10, %v3467_v17  ;;  %v3774_v10 = vld [vmem:[#allocation2 + $0x38] sm:$0x1] }
 0x223   : > { %v3319_v57 = vrot.slane %v3318_v31, 4 }
 0x225   : > { %3992 = vrot.lane.b32.xlu0 %v3896_v53, %s4883_s17  ;;  %3653 = vrot.lane.b32.xlu1 %v3362_v29, %s4882_s16  ;;  %v3321_v53 = vshll.u32 %v3213_v4, 16 }
 0x227   : > { %v2891_v60 = vpop.permute.xlu0 %2890  ;;  %3082 = vrot.lane.b32.xlu2 %v3015_v9, %s4884_s20  ;;  %v2608_v35 = vpop.permute.xlu1 %2607  ;;  %v3323_v45 = vrot.slane %v3321_v53, 5  ;;  %v3234_v53 = vld [vmem:[#allocation2 + $0x8c] sm:$0x1] }
 0x228   : > { %2983 = vst.msk [vmem:[#allocation3 + $0x10] sm:$0xf] %vm2978_vm4, %v2891_v60  ;;  %v3377_v60 = vshll.u32 %v3220_v8, 16  ;;  %v3489_v8 = vshll.u32 %v3234_v53, 16 }
 0x229   : > { %2673 = vst.msk [vmem:[#allocation3 + $0x7c] sm:$0xf] %vm2641_vm3, %v2608_v35  ;;  %v2889_v25 = vpop.permute.xlu2 %2888  ;;  %v3324_v9 = vsel %vm4983_vm9, %v3319_v57, %v3323_v45  ;;  %v3878_v35 = vrot.slane %v6326_v0, 5 }
 0x22a   : > { %2982 = vst.msk [vmem:[#allocation3 + $0xc] sm:$0xf] %vm2978_vm4, %v2889_v25  ;;  %v3376_v25 = vrot.slane %v3374_v6, 4  ;;  %v3379_v59 = vrot.slane %v3377_v60, 5  ;;  %v4139_v6 = vld [vmem:[%s6960_s3 + $0x10] sm:$0x3] }
 0x22b   : > { %v3879_v5 = vsel %vm5487_vm14, %v4712_v33, %v3878_v35  ;;  %v3491_v33 = vrot.slane %v3489_v8, 5 }
 0x22c   : > { %v3380_v62 = vor.u32 %v3379_v59, %v3376_v25  ;;  %v3241_v25 = vld [vmem:[#allocation2 + $0xa8] sm:$0xf] }
 0x22d   : > { %3669 = vrot.lane.b32.xlu0 %v3458_v7, %s4882_s16  ;;  %3980 = vrot.lane.b32.xlu1 %v3875_v13, %s4883_s17  ;;  %v6332_v7 = vld [vmem:[#allocation2 + $0x58] sm:$0xf] }
 0x22e   : > { %v3221_v13 = vld [vmem:[#allocation2 + $0x58] sm:$0xf] }
 0x22f   : > { %v2897_v32 = vpop.permute.xlu0 %2896  ;;  %3641 = vrot.lane.b32.xlu2 %v3290_v20, %s4882_s16  ;;  %v2887_v2 = vpop.permute.xlu1 %2886  ;;  %v3899_v20 = vrot.slane %v6332_v7, 5  ;;  %v3383_v26 = vshll.u32 %v3221_v13, 16  ;;  %v3387_v4 = vshrl.u32 %v3221_v13, 16 }
 0x230   : > { %2986 = vst.msk [vmem:[#allocation3 + $0x1c] sm:$0xf] %vm2978_vm4, %v2897_v32  ;;  %v3023_v32 = vld [vmem:[#allocation2 + $0x58] sm:$0xf] }
 0x231   : > { %2981 = vst.msk [vmem:[#allocation3 + $0x8] sm:$0xf] %vm2978_vm4, %v2887_v2  ;;  %v2895_v24 = vpop.permute.xlu2 %2894  ;;  %v3302_v2 = vshrl.u32 %v3211_v36, 16  ;;  %v3901_v16 = vrot.slane %v3899_v20, 4  ;;  %v3389_v45 = vrot.slane %v3387_v4, 4 }
 0x232   : > { %2985 = vst.msk [vmem:[#allocation3 + $0x18] sm:$0xf] %vm2978_vm4, %v2895_v24  ;;  %v3381_v24 = vrot.slane %v3380_v62, 4  ;;  %v3030_v36 = vld [vmem:[#allocation2 + $0x84] sm:$0xf]  ;;  %v3545_v62 = vshll.u32 %v3241_v25, 16 }
 0x233   : > { %v3304_v34 = vrot.slane %v3302_v2, 4  ;;  %v3037_v4 = vld [vmem:[#allocation2 + $0xac] sm:$0xf] }
 0x235   : > { %4008 = vrot.lane.b32.xlu0 %v3924_v18, %s4883_s17  ;;  %3108 = vrot.lane.b32.xlu1 %v3028_v55, %s4884_s20  ;;  %v3902_v18 = vrot.slane %v3783_v41, 5  ;;  %v3385_v55 = vrot.slane %v3383_v26, 5  ;;  %v3308_v17 = vor.u32 %v3307_v11, %v3304_v34  ;;  %v6381_v41 = vld [vmem:[#allocation2 + $0x88] sm:$0xf]  ;;  %v3242_v34 = vld [vmem:[#allocation2 + $0xac] sm:$0xf] }
 0x236   : > { %v4835_v26 = vld [vmem:[%s6960_s3 + $0x8] sm:$0xff] }
 0x237   : > { %v2903_v21 = vpop.permute.xlu0 %2902  ;;  %3655 = vrot.lane.b32.xlu2 %v3372_v43, %s4882_s16  ;;  %v2893_v50 = vpop.permute.xlu1 %2892  ;;  %v3903_v48 = vsel %vm5487_vm14, %v3901_v16, %v3902_v18  ;;  %v3479_v43 = vshll.u32 %v3233_v47, 16  ;;  %v3386_v38 = vsel %vm4983_vm9, %v3381_v24, %v3385_v55  ;;  %v3309_v57 = vrot.slane %v3308_v17, 4  ;;  %v3781_v18 = vld [vmem:[#allocation2 + $0x54] sm:$0xe] }
 0x238   : > { %2989 = vst.msk [vmem:[#allocation3 + $0x28] sm:$0xf] %vm2978_vm4, %v2903_v21  ;;  %v3547_v24 = vrot.slane %v3545_v62, 5  ;;  %v4715_v11 = vrot.slane %v3781_v18, 9  ;;  %v3551_v17 = vshll.u32 %v3242_v34, 16 }
 0x239   : > { %2984 = vst.msk [vmem:[#allocation3 + $0x14] sm:$0xf] %vm2978_vm4, %v2893_v50  ;;  %v2901_v19 = vpop.permute.xlu2 %2900  ;;  %v3017_v50 = vld [vmem:[#allocation2 + $0x34] sm:$0xf]  ;;  %v6358_v54 = vrot.slane %v3479_v43, 5  ;;  %v3314_v0 = vsel %vm4983_vm9, %v3309_v57, %v6305_v15 }
 0x23a   : > { %2988 = vst.msk [vmem:[#allocation3 + $0x24] sm:$0xf] %vm2978_vm4, %v2901_v19  ;;  %v3880_v19 = vrot.slane %v3878_v35, 4  ;;  %v4229_v35 = vunpack.c.l.b16 %v4139_v6  ;;  %v3555_v6 = vshrl.u32 %v3242_v34, 16  ;;  %v3223_v18 = vld [vmem:[#allocation2 + $0x60] sm:$0xf] }
 0x23b   : > { %v6445_v34 = vld [vmem:[#allocation2 + $0x40] sm:$0xf] }
 0x23c   : > { %v4232_v49 = vpack.c.b16 %v4229_v35, %v4229_v35 }
 0x23d   : > { %3096 = vrot.lane.b32.xlu0 %v3022_v46, %s4884_s20  ;;  %3671 = vrot.lane.b32.xlu1 %v3468_v58, %s4882_s16  ;;  %v3485_v46 = vrot.slane %v3483_v44, 4  ;;  %v3881_v58 = vrot.slane %v3774_v10, 5  ;;  %v3232_v44 = vld [vmem:[#allocation2 + $0x84] sm:$0xf] }
 0x23e   : > { %v4286_v27 = vsel %vm4284_vm5, %v4232_v49, 0 }
 0x23f   : > { %v2909_v29 = vpop.permute.xlu0 %2908  ;;  %3990 = vrot.lane.b32.xlu2 %v3893_v30, %s4883_s17  ;;  %v2899_v39 = vpop.permute.xlu1 %2898  ;;  %v3882_v52 = vsel %vm5487_vm14, %v3880_v19, %v3881_v58  ;;  %4293 = vmatpush.bf16.msra.mxu0 %v4286_v27 }
 0x240   : > { %2992 = vst.msk [vmem:[#allocation3 + $0x34] sm:$0xf] %vm2978_vm4, %v2909_v29  ;;  %v3036_v29 = vld [vmem:[#allocation2 + $0xa8] sm:$0xf]  ;;  %4836 = vmatpush.bf16.msra.mxu1 %v4286_v27  ;;  %4837 = vmatpush.bf16.msra.mxu2 %v4286_v27 }
 0x241   : > { %2987 = vst.msk [vmem:[#allocation3 + $0x20] sm:$0xf] %vm2978_vm4, %v2899_v39  ;;  %v2907_v22 = vpop.permute.xlu2 %2906  ;;  %v3486_v39 = vor.u32 %v3485_v46, %v6358_v54  ;;  %4838 = vmatpush.bf16.msra.mxu3 %v4286_v27  ;;  %v3473_v46 = vshll.u32 %v3232_v44, 16 }
 0x242   : > { %2991 = vst.msk [vmem:[#allocation3 + $0x30] sm:$0xf] %vm2978_vm4, %v2907_v22  ;;  %v3222_v22 = vld [vmem:[#allocation2 + $0x5c] sm:$0x1] }
 0x243   : > { %v3393_v60 = vshll.u32 %v3222_v22, 16  ;;  %4294 = vmatpush.bf16.msra.mxu0 %v4835_v26  ;;  %v3475_v8 = vrot.slane %v3473_v46, 5 }
 0x244   : > { %4839 = vmatpush.bf16.msra.mxu1 %v4835_v26  ;;  %4840 = vmatpush.bf16.msra.mxu2 %v4835_v26 }
 0x245   : > { %3647 = vrot.lane.b32.xlu0 %v3324_v9, %s4882_s16  ;;  %3084 = vrot.lane.b32.xlu1 %v3016_v3, %s4884_s20  ;;  %v3390_v3 = vor.u32 %v3389_v45, %v3385_v55  ;;  %v4834_v55 = vld [vmem:[%s6960_s3] sm:$0xff]  ;;  %v3553_v45 = vrot.slane %v3551_v17, 5 }
 0x246   : > { %4841 = vmatpush.bf16.msra.mxu3 %v4835_v26 }
 0x247   : > { %v2915_v12 = vpop.permute.xlu0 %2914  ;;  %3110 = vrot.lane.b32.xlu2 %v3029_v1, %s4884_s20  ;;  %v2905_v14 = vpop.permute.xlu1 %2904  ;;  %v3487_v1 = vrot.slane %v3486_v39, 4  ;;  %v3391_v59 = vrot.slane %v3390_v3, 4  ;;  %4295 = vmatpush.bf16.msra.mxu0 %v4834_v55 }
 0x248   : > { %2995 = vst.msk [vmem:[#allocation3 + $0x40] sm:$0xf] %vm2978_vm4, %v2915_v12  ;;  %4842 = vmatpush.bf16.msra.mxu1 %v4834_v55  ;;  %4843 = vmatpush.bf16.msra.mxu2 %v4834_v55 }
 0x249   : > { %2990 = vst.msk [vmem:[#allocation3 + $0x2c] sm:$0xf] %vm2978_vm4, %v2905_v14  ;;  %v2913_v42 = vpop.permute.xlu2 %2912  ;;  %v3395_v14 = vrot.slane %v3393_v60, 5  ;;  %v3492_v13 = vsel %vm4983_vm9, %v3487_v1, %v3491_v33  ;;  %v3031_v60 = vld [vmem:[#allocation2 + $0x88] sm:$0xf] }
 0x24a   : > { %2994 = vst.msk [vmem:[#allocation3 + $0x3c] sm:$0xf] %vm2978_vm4, %v2913_v42  ;;  %v3793_v42 = vld [vmem:[#allocation2 + $0x84] sm:$0xe]  ;;  %4844 = vmatpush.bf16.msra.mxu3 %v4834_v55 }
 0x24b   : > { %v3396_v2 = vsel %vm4983_vm9, %v3391_v59, %v3395_v14  ;;  %v4719_v51 = vrot.slane %v3793_v42, 9  ;;  %v3024_v14 = vld [vmem:[#allocation2 + $0x60] sm:$0xf]  ;;  %v3243_v42 = vld [vmem:[#allocation2 + $0xb0] sm:$0x1] }
 0x24c   : > { %v3561_v26 = vshll.u32 %v3243_v42, 16  ;;  %v3019_v42 = vld [vmem:[#allocation2 + $0x40] sm:$0xf] }
 0x24d   : > { %3982 = vrot.lane.b32.xlu0 %v3879_v5, %s4883_s17  ;;  %3098 = vrot.lane.b32.xlu1 %v3023_v32, %s4884_s20  ;;  %v3542_v32 = vshrl.u32 %v3241_v25, 16 }
 0x24f   : > { %v2921_v56 = vpop.permute.xlu0 %2920  ;;  %4006 = vrot.lane.b32.xlu2 %v3921_v37, %s4883_s17  ;;  %v2911_v28 = vpop.permute.xlu1 %2910  ;;  %v3927_v37 = vrot.slane %v6381_v41, 5  ;;  %v3544_v47 = vrot.slane %v3542_v32, 4 }
 0x250   : > { %2998 = vst.msk [vmem:[#allocation3 + $0x4c] sm:$0xf] %vm2978_vm4, %v2921_v56  ;;  %v6392_v56 = vld [vmem:[#allocation2 + $0xac] sm:$0xf] }
 0x251   : > { %2993 = vst.msk [vmem:[#allocation3 + $0x38] sm:$0xf] %vm2978_vm4, %v2911_v28  ;;  %v2919_v21 = vpop.permute.xlu2 %2918  ;;  %v3948_v43 = vrot.slane %v6392_v56, 5  ;;  %v3548_v10 = vor.u32 %v3547_v24, %v3544_v47  ;;  %v3929_v49 = vrot.slane %v3927_v37, 4  ;;  %v3563_v24 = vrot.slane %v3561_v26, 5 }
 0x252   : > { %2997 = vst.msk [vmem:[#allocation3 + $0x48] sm:$0xf] %vm2978_vm4, %v2919_v21  ;;  %v3237_v26 = vld [vmem:[#allocation2 + $0x98] sm:$0x1] }
 0x253   : > { %v3950_v53 = vrot.slane %v3948_v43, 4  ;;  %v3549_v57 = vrot.slane %v3548_v10, 4  ;;  %v3885_v10 = vrot.slane %v6445_v34, 5 }
 0x255   : > { %3996 = vrot.lane.b32.xlu0 %v3903_v48, %s4883_s17  ;;  %3657 = vrot.lane.b32.xlu1 %v3386_v38, %s4882_s16  ;;  %v3928_v48 = vsel %vm5487_vm14, %v4719_v51, %v3927_v37  ;;  %v3804_v38 = vld [vmem:[#allocation2 + $0xb0] sm:$0x1] }
 0x256   : > { %v3951_v19 = vrot.slane %v3804_v38, 5  ;;  %v3802_v38 = vld [vmem:[#allocation2 + $0xa8] sm:$0xe] }
 0x257   : > { %v2927_v31 = vpop.permute.xlu0 %2926  ;;  %3086 = vrot.lane.b32.xlu2 %v3017_v50, %s4884_s20  ;;  %v2917_v30 = vpop.permute.xlu1 %2916  ;;  %v3470_v50 = vshrl.u32 %v3232_v44, 16  ;;  %v3401_v44 = vshll.u32 %v3223_v18, 16 }
 0x258   : > { %3001 = vst.msk [vmem:[#allocation3 + $0x58] sm:$0xf] %vm2978_vm4, %v2927_v31  ;;  %v3900_v31 = vsel %vm5487_vm14, %v4715_v11, %v3899_v20  ;;  %v3952_v7 = vsel %vm5487_vm14, %v3950_v53, %v3951_v19  ;;  %v3018_v11 = vld [vmem:[#allocation2 + $0x3c] sm:$0xf]  ;;  %v4722_v19 = vrot.slane %v3802_v38, 9 }
 0x259   : > { %2996 = vst.msk [vmem:[#allocation3 + $0x44] sm:$0xf] %vm2978_vm4, %v2917_v30  ;;  %v2925_v9 = vpop.permute.xlu2 %2924  ;;  %v3215_v30 = vld [vmem:[#allocation2 + $0x40] sm:$0xf]  ;;  %v3472_v39 = vrot.slane %v3470_v50, 4 }
 0x25a   : > { %3000 = vst.msk [vmem:[#allocation3 + $0x54] sm:$0xf] %vm2978_vm4, %v2925_v9  ;;  %v3335_v20 = vshll.u32 %v3215_v30, 16  ;;  %v3339_v9 = vshrl.u32 %v3215_v30, 16  ;;  %v6453_v50 = vld [vmem:[#allocation2 + $0x64] sm:$0xf] }
 0x25b   : > { %v3476_v3 = vor.u32 %v3475_v8, %v3472_v39  ;;  %v3786_v8 = vld [vmem:[#allocation2 + $0x68] sm:$0x1] }
 0x25c   : > { %v6422_v1 = vrot.slane %v3335_v20, 5  ;;  %v3341_v33 = vrot.slane %v3339_v9, 4 }
 0x25d   : > { %3124 = vrot.lane.b32.xlu0 %v3036_v29, %s4884_s20  ;;  %3984 = vrot.lane.b32.xlu1 %v3882_v52, %s4883_s17  ;;  %v3554_v52 = vsel %vm4983_vm9, %v3549_v57, %v3553_v45  ;;  %v3477_v59 = vrot.slane %v3476_v3, 4 }
 0x25e   : > { %v3342_v27 = vor.u32 %v3341_v33, %v6422_v1  ;;  %v3236_v33 = vld [vmem:[#allocation2 + $0x94] sm:$0xf] }
 0x25f   : > { %v2933_v12 = vpop.permute.xlu0 %2932  ;;  %3645 = vrot.lane.b32.xlu2 %v3314_v0, %s4882_s16  ;;  %v2923_v15 = vpop.permute.xlu1 %2922  ;;  %v3795_v0 = vld [vmem:[#allocation2 + $0x8c] sm:$0x1]  ;;  %v3482_v32 = vsel %vm4983_vm9, %v3477_v59, %v6358_v54  ;;  %v3507_v59 = vshrl.u32 %v3236_v33, 16 }
 0x260   : > { %3004 = vst.msk [vmem:[#allocation3 + $0x64] sm:$0xf] %vm2978_vm4, %v2933_v12  ;;  %v3216_v12 = vld [vmem:[#allocation2 + $0x44] sm:$0x1] }
 0x261   : > { %2999 = vst.msk [vmem:[#allocation3 + $0x50] sm:$0xf] %vm2978_vm4, %v2923_v15  ;;  %v2931_v5 = vpop.permute.xlu2 %2930  ;;  %v3930_v15 = vrot.slane %v3795_v0, 5  ;;  %v3949_v0 = vsel %vm5487_vm14, %v4722_v19, %v3948_v43 }
 0x262   : > { %3003 = vst.msk [vmem:[#allocation3 + $0x60] sm:$0xf] %vm2978_vm4, %v2931_v5  ;;  %v3345_v5 = vshll.u32 %v3216_v12, 16 }
 0x263   : > { %v3931_v41 = vsel %vm5487_vm14, %v3929_v49, %v3930_v15 }
 0x264   : > { %v3347_v51 = vrot.slane %v3345_v5, 5 }
 0x265   : > { %3675 = vrot.lane.b32.xlu0 %v3492_v13, %s4882_s16  ;;  %3112 = vrot.lane.b32.xlu1 %v3030_v36, %s4884_s20  ;;  %v3557_v13 = vrot.slane %v3555_v6, 4  ;;  %v3909_v6 = vrot.slane %v3786_v8, 5 }
 0x267   : > { %v2939_v16 = vpop.permute.xlu0 %2938  ;;  %3659 = vrot.lane.b32.xlu2 %v3396_v2, %s4882_s16  ;;  %v2929_v28 = vpop.permute.xlu1 %2928  ;;  %v3558_v62 = vor.u32 %v3557_v13, %v3553_v45  ;;  %v3343_v2 = vrot.slane %v3342_v27, 4  ;;  %v3906_v45 = vrot.slane %v6453_v50, 5  ;;  %v3777_v27 = vld [vmem:[#allocation2 + $0x44] sm:$0x1] }
 0x268   : > { %3007 = vst.msk [vmem:[#allocation3 + $0x70] sm:$0xf] %vm2978_vm4, %v2939_v16 }
 0x269   : > { %3002 = vst.msk [vmem:[#allocation3 + $0x5c] sm:$0xf] %vm2978_vm4, %v2929_v28  ;;  %v2937_v21 = vpop.permute.xlu2 %2936  ;;  %v3559_v47 = vrot.slane %v3558_v62, 4  ;;  %v3348_v54 = vsel %vm4983_vm9, %v3343_v2, %v3347_v51  ;;  %v3775_v28 = vld [vmem:[#allocation2 + $0x3c] sm:$0xe]  ;;  %v3908_v3 = vrot.slane %v3906_v45, 4 }
 0x26a   : > { %3006 = vst.msk [vmem:[#allocation3 + $0x6c] sm:$0xf] %vm2978_vm4, %v2937_v21  ;;  %v3887_v2 = vrot.slane %v3885_v10, 4  ;;  %v3888_v51 = vrot.slane %v3777_v27, 5 }
 0x26b   : > { %v3564_v21 = vsel %vm4983_vm9, %v3559_v47, %v3563_v24  ;;  %v3910_v43 = vsel %vm5487_vm14, %v3908_v3, %v3909_v6 }
 0x26c   : > { %v3889_v34 = vsel %vm5487_vm14, %v3887_v2, %v3888_v51 }
 0x26d   : > { %4010 = vrot.lane.b32.xlu0 %v3928_v48, %s4883_s17  ;;  %3126 = vrot.lane.b32.xlu1 %v3037_v4, %s4884_s20  ;;  %v3398_v48 = vshrl.u32 %v3223_v18, 16  ;;  %v4713_v4 = vrot.slane %v3775_v28, 9  ;;  %v3038_v18 = vld [vmem:[#allocation2 + $0xb4] sm:$0xf]  ;;  %v3225_v28 = vld [vmem:[#allocation2 + $0x68] sm:$0x1] }
 0x26f   : > { %v3638_v58 = vpop.permute.xlu0 %3637  ;;  %3994 = vrot.lane.b32.xlu2 %v3900_v31, %s4883_s17  ;;  %v2935_v29 = vpop.permute.xlu1 %2934  ;;  %v3400_v46 = vrot.slane %v3398_v48, 4  ;;  %v3403_v31 = vrot.slane %v3401_v44, 5  ;;  %v3886_v57 = vsel %vm5487_vm14, %v4713_v4, %v3885_v10  ;;  %v3417_v44 = vshll.u32 %v3225_v28, 16 }
 0x270   : > { %3005 = vst.msk [vmem:[#allocation3 + $0x68] sm:$0xf] %vm2978_vm4, %v2935_v29  ;;  %v3214_v29 = vld [vmem:[#allocation2 + $0x3c] sm:$0xf] }
 0x271   : > { %v3079_v22 = vpop.permute.xlu2 %3078  ;;  %v3404_v20 = vor.u32 %v3403_v31, %v3400_v46  ;;  %v3419_v31 = vrot.slane %v3417_v44, 5  ;;  %v3798_v44 = vld [vmem:[#allocation2 + $0x98] sm:$0x1] }
 0x272   : > { %3174 = vst.msk [vmem:[#allocation3 + $0x4] sm:$0xf] %vm3172_vm6, %v3079_v22  ;;  %v3326_v22 = vshrl.u32 %v3214_v29, 16 }
 0x274   : > { %v3328_v15 = vrot.slane %v3326_v22, 4  ;;  %v6507_v22 = vld [vmem:[#allocation2 + $0xb8] sm:$0xf] }
 0x275   : > { %4024 = vrot.lane.b32.xlu0 %v3952_v7, %s4883_s17  ;;  %3685 = vrot.lane.b32.xlu1 %v3554_v52, %s4882_s16  ;;  %v3025_v7 = vld [vmem:[#allocation2 + $0x64] sm:$0xf]  ;;  %v3329_v52 = vshll.u32 %v3214_v29, 16 }
 0x277   : > { %v3977_v35 = vpop.permute.xlu0 %3976  ;;  %3114 = vrot.lane.b32.xlu2 %v3031_v60, %s4884_s20  ;;  %v3077_v25 = vpop.permute.xlu1 %3076  ;;  %v3331_v56 = vrot.slane %v3329_v52, 5 }
 0x278   : > { %3173 = vst.msk [vmem:[#allocation3] sm:$0xf] %vm3172_vm6, %v3077_v25  ;;  %v3503_v25 = vshll.u32 %v3236_v33, 16 }
 0x279   : > { %v3975_v36 = vpop.permute.xlu2 %3974  ;;  %3734 = vst.msk [vmem:[#allocation3] sm:$0xf] %vm3733_vm7, %v3638_v58  ;;  %v3224_v58 = vld [vmem:[#allocation2 + $0x64] sm:$0xf]  ;;  %v3332_v5 = vor.u32 %v3331_v56, %v3328_v15  ;;  %v3807_v56 = vld [vmem:[#allocation2 + $0xbc] sm:$0x1] }
 0x27a   : > { %4071 = vst.msk [vmem:[#allocation3] sm:$0xf] %vm4070_vm8, %v3975_v36  ;;  %v3407_v9 = vshll.u32 %v3224_v58, 16  ;;  %v3411_v36 = vshrl.u32 %v3224_v58, 16  ;;  %v3796_v58 = vld [vmem:[#allocation2 + $0x90] sm:$0xe] }
 0x27c   : > { %v3409_v12 = vrot.slane %v3407_v9, 5  ;;  %v3413_v47 = vrot.slane %v3411_v36, 4 }
 0x27d   : > { %3100 = vrot.lane.b32.xlu0 %v3024_v14, %s4884_s20  ;;  %4012 = vrot.lane.b32.xlu1 %v3931_v41, %s4883_s17  ;;  %v6480_v41 = vrot.slane %v3503_v25, 5 }
 0x27e   : > { %v3414_v48 = vor.u32 %v3413_v47, %v3409_v12 }
 0x27f   : > { %v3093_v37 = vpop.permute.xlu0 %3092  ;;  %3673 = vrot.lane.b32.xlu2 %v3482_v32, %s4882_s16  ;;  %v3640_v16 = vpop.permute.xlu1 %3639  ;;  %v3509_v32 = vrot.slane %v3507_v59, 4 }
 0x280   : > { %3181 = vst.msk [vmem:[#allocation3 + $0x20] sm:$0xf] %vm3172_vm6, %v3093_v37  ;;  %v3415_v46 = vrot.slane %v3414_v48, 4 }
 0x281   : > { %3735 = vst.msk [vmem:[#allocation3 + $0x4] sm:$0xf] %vm3733_vm7, %v3640_v16  ;;  %v3083_v55 = vpop.permute.xlu2 %3082  ;;  %v3333_v16 = vrot.slane %v3332_v5, 4  ;;  %v3510_v24 = vor.u32 %v3509_v32, %v6480_v41  ;;  %v3958_v32 = vrot.slane %v3807_v56, 5 }
 0x282   : > { %4072 = vst.msk [vmem:[#allocation3 + $0x4] sm:$0xf] %vm4070_vm8, %v3977_v35  ;;  %v3405_v35 = vrot.slane %v3404_v20, 4  ;;  %v3420_v8 = vsel %vm4983_vm9, %v3415_v46, %v3419_v31  ;;  %v4720_v20 = vrot.slane %v3796_v58, 9  ;;  %v6539_v46 = vld [vmem:[#allocation2 + $0x70] sm:$0xf] }
 0x283   : > { %3176 = vst.msk [vmem:[#allocation3 + $0xc] sm:$0xf] %vm3172_vm6, %v3083_v55 }
 0x284   : > { %v3410_v13 = vsel %vm4983_vm9, %v3405_v35, %v3409_v12  ;;  %v3245_v12 = vld [vmem:[#allocation2 + $0xb8] sm:$0xf] }
 0x285   : > { %3651 = vrot.lane.b32.xlu0 %v3348_v54, %s4882_s16  ;;  %3088 = vrot.lane.b32.xlu1 %v3018_v11, %s4884_s20  ;;  %v3513_v54 = vshll.u32 %v3237_v26, 16  ;;  %v3338_v11 = vsel %vm4983_vm9, %v3333_v16, %v6422_v1  ;;  %v3575_v5 = vshll.u32 %v3245_v12, 16  ;;  %v3227_v16 = vld [vmem:[#allocation2 + $0x70] sm:$0xf]  ;;  %v3579_v48 = vshrl.u32 %v3245_v12, 16 }
 0x286   : > { %v3431_v28 = vshll.u32 %v3227_v16, 16 }
 0x287   : > { %v3644_v17 = vpop.permute.xlu0 %3643  ;;  %3687 = vrot.lane.b32.xlu2 %v3564_v21, %s4882_s16  ;;  %v3081_v53 = vpop.permute.xlu1 %3080  ;;  %v3511_v21 = vrot.slane %v3510_v24, 4  ;;  %v3515_v38 = vrot.slane %v3513_v54, 5 }
 0x288   : > { %3737 = vst.msk [vmem:[#allocation3 + $0xc] sm:$0xf] %vm3733_vm7, %v3644_v17  ;;  %v3244_v17 = vld [vmem:[#allocation2 + $0xb4] sm:$0xf] }
 0x289   : > { %3175 = vst.msk [vmem:[#allocation3 + $0x8] sm:$0xf] %vm3172_vm6, %v3081_v53  ;;  %v4818_v30 = vld [vmem:[#allocation3] sm:$0xff]  ;;  %v3642_v39 = vpop.permute.xlu2 %3641  ;;  %v3516_v1 = vsel %vm4983_vm9, %v3511_v21, %v3515_v38  ;;  %v3566_v29 = vshrl.u32 %v3244_v17, 16  ;;  %v3033_v21 = vld [vmem:[#allocation2 + $0x94] sm:$0xf] }
 0x28a   : > { %3736 = vst.msk [vmem:[#allocation3 + $0x8] sm:$0xf] %vm3733_vm7, %v3642_v39  ;;  %4798 = vmatmul.msk.bf16.vlgmr.msra.gmra.mxu0 %vm4235_vm10, %v4818_v30  ;;  %v6499_v30 = vld [vmem:[#allocation2 + $0x94] sm:$0xf]  ;;  %v3569_v39 = vshll.u32 %v3244_v17, 16 }
 0x28b   : > { %v3934_v9 = vrot.slane %v6499_v30, 5  ;;  %v3568_v3 = vrot.slane %v3566_v29, 4 }
 0x28c   : > { %v3571_v6 = vrot.slane %v3569_v39, 5  ;;  %v3913_v39 = vrot.slane %v6539_v46, 5 }
 0x28d   : > { %3986 = vrot.lane.b32.xlu0 %v3886_v57, %s4883_s17  ;;  %3102 = vrot.lane.b32.xlu1 %v3025_v7, %s4884_s20  ;;  %v3032_v57 = vld [vmem:[#allocation2 + $0x90] sm:$0xf]  ;;  %v3784_v7 = vld [vmem:[#allocation2 + $0x60] sm:$0xe]  ;;  %v3935_v15 = vsel %vm5487_vm14, %v4720_v20, %v3934_v9  ;;  %v3936_v31 = vrot.slane %v3934_v9, 4  ;;  %v3435_v9 = vshrl.u32 %v3227_v16, 16 }
 0x28e   : > { %v4716_v35 = vrot.slane %v3784_v7, 9  ;;  %v3572_v27 = vor.u32 %v3571_v6, %v3568_v3  ;;  %v3246_v7 = vld [vmem:[#allocation2 + $0xbc] sm:$0x1]  ;;  %v3789_v20 = vld [vmem:[#allocation2 + $0x74] sm:$0x1]  ;;  %v3915_v6 = vrot.slane %v3913_v39, 4 }
 0x28f   : > { %v3979_v60 = vpop.permute.xlu0 %3978  ;;  %4022 = vrot.lane.b32.xlu2 %v3949_v0, %s4883_s17  ;;  %v3095_v49 = vpop.permute.xlu1 %3094  ;;  %v3226_v0 = vld [vmem:[#allocation2 + $0x6c] sm:$0xf]  ;;  %v3585_v3 = vshll.u32 %v3246_v7, 16  ;;  %v3437_v12 = vrot.slane %v3435_v9, 4 }
 0x290   : > { %4073 = vst.msk [vmem:[#allocation3 + $0x8] sm:$0xf] %vm4070_vm8, %v3979_v60  ;;  %v3425_v25 = vshll.u32 %v3226_v0, 16  ;;  %v3907_v36 = vsel %vm5487_vm14, %v4716_v35, %v3906_v45  ;;  %v3573_v50 = vrot.slane %v3572_v27, 4  ;;  %v3238_v35 = vld [vmem:[#allocation2 + $0x9c] sm:$0xf] }
 0x291   : > { %3182 = vst.msk [vmem:[#allocation3 + $0x24] sm:$0xf] %vm3172_vm6, %v3095_v49  ;;  %v3656_v14 = vpop.permute.xlu2 %3655  ;;  %v3955_v49 = vrot.slane %v6507_v22, 5  ;;  %v3026_v27 = vld [vmem:[#allocation2 + $0x6c] sm:$0xf]  ;;  %v2872_v22 = vrot.slane %v2870_v61, 4 }
 0x292   : > { %3743 = vst.msk [vmem:[#allocation3 + $0x24] sm:$0xf] %vm3733_vm7, %v3656_v14  ;;  %v3235_v14 = vld [vmem:[#allocation2 + $0x90] sm:$0xf]  ;;  %v3427_v51 = vrot.slane %v3425_v25, 5 }
 0x293   : > { %v3497_v26 = vshll.u32 %v3235_v14, 16  ;;  %v3787_v9 = vld [vmem:[#allocation2 + $0x6c] sm:$0xe] }
 0x295   : > { %4000 = vrot.lane.b32.xlu0 %v3910_v43, %s4883_s17  ;;  %3661 = vrot.lane.b32.xlu1 %v3410_v13, %s4882_s16  ;;  %v3422_v43 = vshrl.u32 %v3226_v0, 16  ;;  %v3039_v13 = vld [vmem:[#allocation2 + $0xb8] sm:$0xf]  ;;  %v3499_v54 = vrot.slane %v3497_v26, 5 }
 0x297   : > { %v3993_v62 = vpop.permute.xlu0 %3992  ;;  %3090 = vrot.lane.b32.xlu2 %v3019_v42, %s4884_s20  ;;  %v3654_v37 = vpop.permute.xlu1 %3653  ;;  %v3957_v42 = vrot.slane %v3955_v49, 4  ;;  %v3424_v2 = vrot.slane %v3422_v43, 4  ;;  %v3228_v43 = vld [vmem:[#allocation2 + $0x74] sm:$0x1] }
 0x298   : > { %4080 = vst.msk [vmem:[#allocation3 + $0x24] sm:$0xf] %vm4070_vm8, %v3993_v62  ;;  %v3494_v62 = vshrl.u32 %v3235_v14, 16  ;;  %v3521_v14 = vshll.u32 %v3238_v35, 16 }
 0x299   : > { %3742 = vst.msk [vmem:[#allocation3 + $0x20] sm:$0xf] %vm3733_vm7, %v3654_v37  ;;  %v3991_v55 = vpop.permute.xlu2 %3990  ;;  %v3959_v47 = vsel %vm5487_vm14, %v3957_v42, %v3958_v32  ;;  %v3805_v32 = vld [vmem:[#allocation2 + $0xb4] sm:$0xe] }
 0x29a   : > { %4079 = vst.msk [vmem:[#allocation3 + $0x20] sm:$0xf] %vm4070_vm8, %v3991_v55  ;;  %v3496_v24 = vrot.slane %v3494_v62, 4  ;;  %v3428_v55 = vor.u32 %v3427_v51, %v3424_v2  ;;  %v3523_v26 = vrot.slane %v3521_v14, 5  ;;  %v3239_v51 = vld [vmem:[#allocation2 + $0xa0] sm:$0xf] }
 0x29b   : > { %v3531_v61 = vshrl.u32 %v3239_v51, 16 }
 0x29c   : > { %v3500_v38 = vor.u32 %v3499_v54, %v3496_v24  ;;  %v3527_v54 = vshll.u32 %v3239_v51, 16 }
 0x29d   : > { %3128 = vrot.lane.b32.xlu0 %v3038_v18, %s4884_s20  ;;  %3988 = vrot.lane.b32.xlu1 %v3889_v34, %s4883_s17  ;;  %v3577_v18 = vrot.slane %v3575_v5, 5 }
 0x29f   : > { %v3670_v4 = vpop.permute.xlu0 %3669  ;;  %3649 = vrot.lane.b32.xlu2 %v3338_v11, %s4882_s16  ;;  %v3981_v10 = vpop.permute.xlu1 %3980  ;;  %v3578_v11 = vsel %vm4983_vm9, %v3573_v50, %v3577_v18 }
 0x2a0   : > { %4074 = vst.msk [vmem:[#allocation3 + $0xc] sm:$0xf] %vm4070_vm8, %v3981_v10  ;;  %v3433_v10 = vrot.slane %v3431_v28, 5 }
 0x2a1   : > { %v3111_v53 = vpop.permute.xlu2 %3110  ;;  %v4822_v19 = vld [vmem:[#allocation3 + $0x20] sm:$0xff] }
 0x2a2   : > { %3190 = vst.msk [vmem:[#allocation3 + $0x44] sm:$0xf] %vm3172_vm6, %v3111_v53  ;;  %4802 = vmatmul.msk.bf16.vlgmr.msra.gmra.mxu1 %vm4235_vm10, %v4822_v19  ;;  %v3581_v19 = vrot.slane %v3579_v48, 4  ;;  %v3438_v5 = vor.u32 %v3437_v12, %v3433_v10  ;;  %v3808_v12 = vld [vmem:[#allocation2 + $0xc0] sm:$0xe] }
 0x2a4   : > { %v3439_v16 = vrot.slane %v3438_v5, 4  ;;  %v3250_v5 = vld [vmem:[#allocation2 + $0xcc] sm:$0xf] }
 0x2a5   : > { %3679 = vrot.lane.b32.xlu0 %v3516_v1, %s4882_s16  ;;  %3116 = vrot.lane.b32.xlu1 %v3032_v57, %s4884_s20  ;;  %v3937_v1 = vrot.slane %v3798_v44, 5  ;;  %v3501_v57 = vrot.slane %v3500_v38, 4  ;;  %v2718_v44 = vld [vmem:[#allocation2 + $0xbc] sm:$0x1]  ;;  %v3529_v38 = vrot.slane %v3527_v54, 5 }
 0x2a7   : > { %v4009_v52 = vpop.permute.xlu0 %4008  ;;  %3663 = vrot.lane.b32.xlu2 %v3420_v8, %s4882_s16  ;;  %v3109_v60 = vpop.permute.xlu1 %3108  ;;  %v4819_v33 = vld [vmem:[#allocation3 + $0x8] sm:$0xff]  ;;  %v3938_v30 = vsel %vm5487_vm14, %v3936_v31, %v3937_v1  ;;  %v3506_v0 = vsel %vm4983_vm9, %v3501_v57, %v6480_v41  ;;  %v3587_v41 = vrot.slane %v3585_v3, 5  ;;  %v3249_v31 = vld [vmem:[#allocation2 + $0xc8] sm:$0x1]  ;;  %v2873_v1 = vrot.slane %v2718_v44, 5 }
 0x2a8   : > { %3189 = vst.msk [vmem:[#allocation3 + $0x40] sm:$0xf] %vm3172_vm6, %v3109_v60  ;;  %4799 = vmatmul.msk.bf16.gmra.mxu0 %vm4235_vm10, %v4819_v33  ;;  %v3916_v60 = vrot.slane %v3789_v20, 5 }
 0x2a9   : > { %3750 = vst.msk [vmem:[#allocation3 + $0x40] sm:$0xf] %vm3733_vm7, %v3670_v4  ;;  %v4007_v59 = vpop.permute.xlu2 %4006  ;;  %v3429_v4 = vrot.slane %v3428_v55, 4  ;;  %v2874_v63 = vsel %vm5487_vm14, %v2872_v22, %v2873_v1 }
 0x2aa   : > { %4087 = vst.msk [vmem:[#allocation3 + $0x40] sm:$0xf] %vm4070_vm8, %v4007_v59  ;;  %v3917_v25 = vsel %vm5487_vm14, %v3915_v6, %v3916_v60  ;;  %v3518_v59 = vshrl.u32 %v3238_v35, 16  ;;  %v3240_v6 = vld [vmem:[#allocation2 + $0xa4] sm:$0x1]  ;;  %v4717_v60 = vrot.slane %v3787_v9, 9 }
 0x2ab   : > { %v3434_v29 = vsel %vm4983_vm9, %v3429_v4, %v3433_v10 }
 0x2ac   : > { %v3520_v62 = vrot.slane %v3518_v59, 4  ;;  %v4724_v59 = vrot.slane %v3808_v12, 9 }
 0x2ad   : > { %4014 = vrot.lane.b32.xlu0 %v3935_v15, %s4883_s17  ;;  %3130 = vrot.lane.b32.xlu1 %v3039_v13, %s4884_s20 }
 0x2ae   : > { %v3524_v24 = vor.u32 %v3523_v26, %v3520_v62  ;;  %v2721_v62 = vld [vmem:[#allocation2 + $0xc8] sm:$0x1]  ;;  %v3614_v26 = vshrl.u32 %v3250_v5, 16 }
 0x2af   : > { %v3097_v37 = vpop.permute.xlu0 %3096  ;;  %3998 = vrot.lane.b32.xlu2 %v3907_v36, %s4883_s17  ;;  %v3672_v45 = vpop.permute.xlu1 %3671  ;;  %v3441_v36 = vshll.u32 %v3228_v43, 16 }
 0x2b0   : > { %3183 = vst.msk [vmem:[#allocation3 + $0x28] sm:$0xf] %vm3172_vm6, %v3097_v37  ;;  %v3248_v37 = vld [vmem:[#allocation2 + $0xc4] sm:$0xf] }
 0x2b1   : > { %3751 = vst.msk [vmem:[#allocation3 + $0x44] sm:$0xf] %vm3733_vm7, %v3672_v45  ;;  %v3087_v34 = vpop.permute.xlu2 %3086  ;;  %v3443_v50 = vrot.slane %v3441_v36, 5  ;;  %v4723_v45 = vrot.slane %v3805_v32, 9  ;;  %v3599_v55 = vshll.u32 %v3248_v37, 16  ;;  %v3603_v28 = vshrl.u32 %v3248_v37, 16 }
 0x2b2   : > { %4088 = vst.msk [vmem:[#allocation3 + $0x44] sm:$0xf] %vm4070_vm8, %v4009_v52  ;;  %v3582_v52 = vor.u32 %v3581_v19, %v3577_v18  ;;  %v3247_v37 = vld [vmem:[#allocation2 + $0xc0] sm:$0xf] }
 0x2b3   : > { %3178 = vst.msk [vmem:[#allocation3 + $0x14] sm:$0xf] %vm3172_vm6, %v3087_v34  ;;  %v3956_v48 = vsel %vm5487_vm14, %v4723_v45, %v3955_v49  ;;  %v6581_v4 = vrot.slane %v3599_v55, 5  ;;  %v3605_v10 = vrot.slane %v3603_v28, 4  ;;  %v3590_v54 = vshrl.u32 %v3247_v37, 16 }
 0x2b4   : > { %v3583_v56 = vrot.slane %v3582_v52, 4  ;;  %v3533_v52 = vrot.slane %v3531_v61, 4  ;;  %v3593_v55 = vshll.u32 %v3247_v37, 16  ;;  %v3616_v28 = vrot.slane %v3614_v26, 4 }
 0x2b5   : > { %4028 = vrot.lane.b32.xlu0 %v3959_v47, %s4883_s17  ;;  %3689 = vrot.lane.b32.xlu1 %v3578_v11, %s4882_s16  ;;  %v3035_v47 = vld [vmem:[#allocation2 + $0xa0] sm:$0xf]  ;;  %v3444_v11 = vsel %vm4983_vm9, %v3439_v16, %v3443_v50  ;;  %v3606_v19 = vor.u32 %v3605_v10, %v6581_v4  ;;  %v3799_v50 = vld [vmem:[#allocation2 + $0x9c] sm:$0xe] }
 0x2b6   : > { %v3588_v42 = vsel %vm4983_vm9, %v3583_v56, %v3587_v41  ;;  %v3040_v56 = vld [vmem:[#allocation2 + $0xc0] sm:$0xf]  ;;  %v3534_v43 = vor.u32 %v3533_v52, %v3529_v38  ;;  %v3537_v41 = vshll.u32 %v3240_v6, 16  ;;  %v4721_v44 = vrot.slane %v3799_v50, 9 }
 0x2b7   : > { %v3648_v17 = vpop.permute.xlu0 %3647  ;;  %3118 = vrot.lane.b32.xlu2 %v3033_v21, %s4884_s20  ;;  %v3085_v53 = vpop.permute.xlu1 %3084  ;;  %v3525_v21 = vrot.slane %v3524_v24, 4  ;;  %v3607_v7 = vrot.slane %v3606_v19, 4  ;;  %v3034_v24 = vld [vmem:[#allocation2 + $0x9c] sm:$0xf]  ;;  %v3810_v19 = vld [vmem:[#allocation2 + $0xc8] sm:$0x1] }
 0x2b8   : > { %3739 = vst.msk [vmem:[#allocation3 + $0x14] sm:$0xf] %vm3733_vm7, %v3648_v17  ;;  %v3535_v36 = vrot.slane %v3534_v43, 4 }
 0x2b9   : > { %3177 = vst.msk [vmem:[#allocation3 + $0x10] sm:$0xf] %vm3172_vm6, %v3085_v53  ;;  %v4826_v58 = vld [vmem:[#allocation3 + $0x40] sm:$0xff]  ;;  %v3646_v8 = vpop.permute.xlu2 %3645  ;;  %v3530_v53 = vsel %vm4983_vm9, %v3525_v21, %v3529_v38 }
 0x2ba   : > { %3738 = vst.msk [vmem:[#allocation3 + $0x10] sm:$0xf] %vm3733_vm7, %v3646_v8  ;;  %4806 = vmatmul.msk.bf16.vlgmr.msra.gmra.mxu2 %vm4235_vm10, %v4826_v58  ;;  %v3609_v58 = vshll.u32 %v3249_v31, 16  ;;  %v3027_v8 = vld [vmem:[#allocation2 + $0x70] sm:$0xf]  ;;  %v3595_v31 = vrot.slane %v3593_v55, 5 }
 0x2bc   : > { %v3611_v20 = vrot.slane %v3609_v58, 5  ;;  %v3041_v58 = vld [vmem:[#allocation2 + $0xc4] sm:$0xf] }
 0x2bd   : > { %3665 = vrot.lane.b32.xlu0 %v3434_v29, %s4882_s16  ;;  %4016 = vrot.lane.b32.xlu1 %v3938_v30, %s4883_s17 }
 0x2bf   : > { %v3983_v33 = vpop.permute.xlu0 %3982  ;;  %3677 = vrot.lane.b32.xlu2 %v3506_v0, %s4882_s16  ;;  %v3099_v15 = vpop.permute.xlu1 %3098 }
 0x2c0   : > { %4075 = vst.msk [vmem:[#allocation3 + $0x10] sm:$0xf] %vm4070_vm8, %v3983_v33  ;;  %v3612_v33 = vsel %vm4983_vm9, %v3607_v7, %v3611_v20  ;;  %v3965_v20 = vrot.slane %v3810_v19, 5 }
 0x2c1   : > { %3184 = vst.msk [vmem:[#allocation3 + $0x2c] sm:$0xf] %vm3172_vm6, %v3099_v15  ;;  %v3660_v13 = vpop.permute.xlu2 %3659  ;;  %v6604_v15 = vld [vmem:[#allocation2 + $0xc4] sm:$0xf] }
 0x2c2   : > { %3745 = vst.msk [vmem:[#allocation3 + $0x2c] sm:$0xf] %vm3733_vm7, %v3660_v13  ;;  %v3962_v14 = vrot.slane %v6604_v15, 5  ;;  %v6613_v13 = vld [vmem:[#allocation2 + $0xc4] sm:$0xf] }
 0x2c3   : > { %v2877_v46 = vrot.slane %v6613_v13, 5 }
 0x2c4   : > { %v3964_v7 = vrot.slane %v3962_v14, 4 }
 0x2c5   : > { %4004 = vrot.lane.b32.xlu0 %v3917_v25, %s4883_s17  ;;  %3104 = vrot.lane.b32.xlu1 %v3026_v27, %s4884_s20  ;;  %v3914_v25 = vsel %vm5487_vm14, %v4717_v60, %v3913_v39  ;;  %v3963_v39 = vsel %vm5487_vm14, %v4724_v59, %v3962_v14  ;;  %v2879_v45 = vrot.slane %v2877_v46, 4  ;;  %v3813_v60 = vld [vmem:[#allocation2 + $0xd4] sm:$0x1] }
 0x2c7   : > { %v3997_v2 = vpop.permute.xlu0 %3996  ;;  %3691 = vrot.lane.b32.xlu2 %v3588_v42, %s4882_s16  ;;  %v3658_v18 = vpop.permute.xlu1 %3657  ;;  %v3539_v42 = vrot.slane %v3537_v41, 5  ;;  %v3801_v41 = vld [vmem:[#allocation2 + $0xa4] sm:$0x1] }
 0x2c8   : > { %4082 = vst.msk [vmem:[#allocation3 + $0x2c] sm:$0xf] %vm4070_vm8, %v3997_v2  ;;  %v3617_v2 = vshll.u32 %v3250_v5, 16 }
 0x2c9   : > { %3744 = vst.msk [vmem:[#allocation3 + $0x28] sm:$0xf] %vm3733_vm7, %v3658_v18  ;;  %v3995_v34 = vpop.permute.xlu2 %3994  ;;  %v3540_v16 = vsel %vm4983_vm9, %v3535_v36, %v3539_v42  ;;  %v6625_v18 = vld [vmem:[#allocation2 + $0xa0] sm:$0xf] }
 0x2ca   : > { %4081 = vst.msk [vmem:[#allocation3 + $0x28] sm:$0xf] %vm4070_vm8, %v3995_v34  ;;  %v3619_v34 = vrot.slane %v3617_v2, 5  ;;  %v3941_v21 = vrot.slane %v6625_v18, 5 }
 0x2cc   : > { %v3620_v22 = vor.u32 %v3619_v34, %v3616_v28  ;;  %v3943_v5 = vrot.slane %v3941_v21, 4  ;;  %v3811_v34 = vld [vmem:[#allocation2 + $0xcc] sm:$0xe] }
 0x2cd   : > { %3122 = vrot.lane.b32.xlu0 %v3035_v47, %s4884_s20  ;;  %3667 = vrot.lane.b32.xlu1 %v3444_v11, %s4882_s16  ;;  %v2880_v47 = vrot.slane %v2721_v62, 5 }
 0x2cf   : > { %v3125_v17 = vpop.permute.xlu0 %3124  ;;  %4026 = vrot.lane.b32.xlu2 %v3956_v48, %s4883_s17  ;;  %v3985_v49 = vpop.permute.xlu1 %3984  ;;  %v3251_v48 = vld [vmem:[#allocation2 + $0xd0] sm:$0xf]  ;;  %v2881_v10 = vsel %vm5487_vm14, %v2879_v45, %v2880_v47 }
 0x2d0   : > { %3197 = vst.msk [vmem:[#allocation3 + $0x60] sm:$0xf] %vm3172_vm6, %v3125_v17  ;;  %v3592_v17 = vrot.slane %v3590_v54, 4  ;;  %v3623_v1 = vshll.u32 %v3251_v48, 16 }
 0x2d1   : > { %4076 = vst.msk [vmem:[#allocation3 + $0x14] sm:$0xf] %vm4070_vm8, %v3985_v49  ;;  %v3115_v57 = vpop.permute.xlu2 %3114  ;;  %v4823_v29 = vld [vmem:[#allocation3 + $0x28] sm:$0xff] }
 0x2d2   : > { %3192 = vst.msk [vmem:[#allocation3 + $0x4c] sm:$0xf] %vm3172_vm6, %v3115_v57  ;;  %4803 = vmatmul.msk.bf16.gmra.mxu1 %vm4235_vm10, %v4823_v29  ;;  %v3596_v57 = vor.u32 %v3595_v31, %v3592_v17  ;;  %v3621_v29 = vrot.slane %v3620_v22, 4  ;;  %v4725_v17 = vrot.slane %v3811_v34, 9 }
 0x2d4   : > { %v3597_v9 = vrot.slane %v3596_v57, 4 }
 0x2d5   : > { %3681 = vrot.lane.b32.xlu0 %v3530_v53, %s4882_s16  ;;  %2940 = vrot.lane.b32.xlu1 %v2874_v63, %s4881_s15  ;;  %v3942_v53 = vsel %vm5487_vm14, %v4721_v44, %v3941_v21  ;;  %v3625_v63 = vrot.slane %v3623_v1, 5 }
 0x2d6   : > { %v3602_v12 = vsel %vm4983_vm9, %v3597_v9, %v6581_v4  ;;  %v3944_v4 = vrot.slane %v3801_v41, 5 }
 0x2d7   : > { %v3676_v30 = vpop.permute.xlu0 %3675  ;;  %v3113_v0 = vpop.permute.xlu1 %3112  ;;  %3106 = vrot.lane.b32.xlu2 %v3027_v8, %s4884_s20  ;;  %v6642_v8 = vld [vmem:[#allocation2 + $0xd0] sm:$0xf]  ;;  %v3626_v52 = vsel %vm4983_vm9, %v3621_v29, %v3625_v63 }
 0x2d8   : > { %3753 = vst.msk [vmem:[#allocation3 + $0x4c] sm:$0xf] %vm3733_vm7, %v3676_v30  ;;  %v4820_v3 = vld [vmem:[#allocation3 + $0x10] sm:$0xff]  ;;  %v3945_v26 = vsel %vm5487_vm14, %v3943_v5, %v3944_v4 }
 0x2d9   : > { %3191 = vst.msk [vmem:[#allocation3 + $0x48] sm:$0xf] %vm3172_vm6, %v3113_v0  ;;  %v3674_v35 = vpop.permute.xlu2 %3673  ;;  %4800 = vmatmul.msk.bf16.gmra.mxu0 %vm4235_vm10, %v4820_v3  ;;  %v3969_v0 = vrot.slane %v6642_v8, 5 }
 0x2da   : > { %3752 = vst.msk [vmem:[#allocation3 + $0x48] sm:$0xf] %vm3733_vm7, %v3674_v35  ;;  %v3627_v35 = vshrl.u32 %v3251_v48, 16 }
 0x2db   : > { %v3971_v15 = vrot.slane %v3969_v0, 4 }
 0x2dd   : > { %3695 = vrot.lane.b32.xlu0 %v3612_v33, %s4882_s16  ;;  %3132 = vrot.lane.b32.xlu1 %v3040_v56, %s4884_s20  ;;  %v3966_v33 = vsel %vm5487_vm14, %v3964_v7, %v3965_v20  ;;  %v3972_v56 = vrot.slane %v3813_v60, 5 }
 0x2df   : > { %v4011_v27 = vpop.permute.xlu0 %4010  ;;  %v3127_v32 = vpop.permute.xlu1 %3126  ;;  %4002 = vrot.lane.b32.xlu2 %v3914_v25, %s4883_s17  ;;  %v3629_v25 = vrot.slane %v3627_v35, 4  ;;  %v3973_v36 = vsel %vm5487_vm14, %v3971_v15, %v3972_v56 }
 0x2e0   : > { %4089 = vst.msk [vmem:[#allocation3 + $0x48] sm:$0xf] %vm4070_vm8, %v4011_v27  ;;  %v3252_v27 = vld [vmem:[#allocation2 + $0xd4] sm:$0x1] }
 0x2e1   : > { %3198 = vst.msk [vmem:[#allocation3 + $0x64] sm:$0xf] %vm3172_vm6, %v3127_v32  ;;  %v3688_v51 = vpop.permute.xlu2 %3687  ;;  %v3042_v32 = vld [vmem:[#allocation2 + $0xcc] sm:$0xf]  ;;  %v3633_v62 = vshll.u32 %v3252_v27, 16 }
 0x2e2   : > { %3759 = vst.msk [vmem:[#allocation3 + $0x64] sm:$0xf] %vm3733_vm7, %v3688_v51  ;;  %v2719_v51 = vld [vmem:[#allocation2 + $0xc0] sm:$0xe] }
 0x2e3   : > { %v4709_v18 = vrot.slane %v2719_v51, 9 }
 0x2e5   : > { %4030 = vrot.lane.b32.xlu0 %v3963_v39, %s4883_s17  ;;  %3683 = vrot.lane.b32.xlu1 %v3540_v16, %s4882_s16  ;;  %v3630_v39 = vor.u32 %v3629_v25, %v3625_v63  ;;  %v3635_v16 = vrot.slane %v3633_v62, 5 }
 0x2e7   : > { %v4025_v11 = vpop.permute.xlu0 %4024  ;;  %v3686_v38 = vpop.permute.xlu1 %3685  ;;  %3120 = vrot.lane.b32.xlu2 %v3034_v24, %s4884_s20  ;;  %v3631_v37 = vrot.slane %v3630_v39, 4  ;;  %v2878_v24 = vsel %vm5487_vm14, %v4709_v18, %v2877_v46  ;;  %v3043_v46 = vld [vmem:[#allocation2 + $0xd0] sm:$0xf] }
 0x2e8   : > { %4096 = vst.msk [vmem:[#allocation3 + $0x64] sm:$0xf] %vm4070_vm8, %v4025_v11 }
 0x2e9   : > { %3758 = vst.msk [vmem:[#allocation3 + $0x60] sm:$0xf] %vm3733_vm7, %v3686_v38  ;;  %v4023_v49 = vpop.permute.xlu2 %4022  ;;  %v3636_v47 = vsel %vm4983_vm9, %v3631_v37, %v3635_v16 }
 0x2ea   : > { %4095 = vst.msk [vmem:[#allocation3 + $0x60] sm:$0xf] %vm4070_vm8, %v4023_v49 }
 0x2ed   : > { %2944 = vrot.lane.b32.xlu0 %v2881_v10, %s4881_s15  ;;  %4018 = vrot.lane.b32.xlu1 %v3942_v53, %s4883_s17 }
 0x2ef   : > { %v3101_v61 = vpop.permute.xlu0 %3100  ;;  %v4013_v30 = vpop.permute.xlu1 %4012  ;;  %3134 = vrot.lane.b32.xlu2 %v3041_v58, %s4884_s20  ;;  %v3970_v58 = vsel %vm5487_vm14, %v4725_v17, %v3969_v0 }
 0x2f0   : > { %3185 = vst.msk [vmem:[#allocation3 + $0x30] sm:$0xf] %vm3172_vm6, %v3101_v61 }
 0x2f1   : > { %4090 = vst.msk [vmem:[#allocation3 + $0x4c] sm:$0xf] %vm4070_vm8, %v4013_v30  ;;  %v3091_v3 = vpop.permute.xlu2 %3090  ;;  %v4830_v6 = vld [vmem:[#allocation3 + $0x60] sm:$0xff] }
 0x2f2   : > { %3180 = vst.msk [vmem:[#allocation3 + $0x1c] sm:$0xf] %vm3172_vm6, %v3091_v3  ;;  %4810 = vmatmul.msk.bf16.vlgmr.msra.gmra.mxu3 %vm4235_vm10, %v4830_v6 }
 0x2f5   : > { %3697 = vrot.lane.b32.xlu0 %v3626_v52, %s4882_s16  ;;  %4032 = vrot.lane.b32.xlu1 %v3966_v33, %s4883_s17 }
 0x2f7   : > { %v3652_v43 = vpop.permute.xlu0 %3651  ;;  %v3089_v59 = vpop.permute.xlu1 %3088  ;;  %3693 = vrot.lane.b32.xlu2 %v3602_v12, %s4882_s16 }
 0x2f8   : > { %3741 = vst.msk [vmem:[#allocation3 + $0x1c] sm:$0xf] %vm3733_vm7, %v3652_v43  ;;  %v4827_v14 = vld [vmem:[#allocation3 + $0x48] sm:$0xff] }
 0x2f9   : > { %3179 = vst.msk [vmem:[#allocation3 + $0x18] sm:$0xf] %vm3172_vm6, %v3089_v59  ;;  %v3650_v42 = vpop.permute.xlu2 %3649  ;;  %4807 = vmatmul.msk.bf16.gmra.mxu2 %vm4235_vm10, %v4827_v14 }
 0x2fa   : > { %3740 = vst.msk [vmem:[#allocation3 + $0x18] sm:$0xf] %vm3733_vm7, %v3650_v42 }
 0x2fd   : > { %4036 = vrot.lane.b32.xlu0 %v3973_v36, %s4883_s17  ;;  %3136 = vrot.lane.b32.xlu1 %v3042_v32, %s4884_s20 }
 0x2ff   : > { %v3987_v2 = vpop.permute.xlu0 %3986  ;;  %v3103_v50 = vpop.permute.xlu1 %3102  ;;  %4020 = vrot.lane.b32.xlu2 %v3945_v26, %s4883_s17 }
 0x300   : > { %4077 = vst.msk [vmem:[#allocation3 + $0x18] sm:$0xf] %vm4070_vm8, %v3987_v2 }
 0x301   : > { %3186 = vst.msk [vmem:[#allocation3 + $0x34] sm:$0xf] %vm3172_vm6, %v3103_v50  ;;  %v3664_v45 = vpop.permute.xlu2 %3663 }
 0x302   : > { %3747 = vst.msk [vmem:[#allocation3 + $0x34] sm:$0xf] %vm3733_vm7, %v3664_v45 }
 0x305   : > { %3699 = vrot.lane.b32.xlu1 %v3636_v47, %s4882_s16 }
 0x307   : > { %v4001_v54 = vpop.permute.xlu0 %4000  ;;  %v3662_v40 = vpop.permute.xlu1 %3661  ;;  %2942 = vrot.lane.b32.xlu2 %v2878_v24, %s4881_s15 }
 0x308   : > { %4084 = vst.msk [vmem:[#allocation3 + $0x34] sm:$0xf] %vm4070_vm8, %v4001_v54  ;;  %v4297_v55 = vpop.f32.mrf.mxu0 }
 0x309   : > { %3746 = vst.msk [vmem:[#allocation3 + $0x30] sm:$0xf] %vm3733_vm7, %v3662_v40  ;;  %v3999_v13 = vpop.permute.xlu2 %3998  ;;  %v4480_v11 = vmul.f32 %v4297_v55, %v4297_v55  ;;  %v4410_v21 = vsel %vm4377_vm11, %v4297_v55, 0.0 }
 0x30a   : > { %4378 = vst.msk [vmem:[%s6689_s30] sm:$0xff] %vm4377_vm11, %v4297_v55 }
 0x30b   : > { %4083 = vst.msk [vmem:[#allocation3 + $0x30] sm:$0xf] %vm4070_vm8, %v3999_v13  ;;  %v4512_v49 = vsel %vm4377_vm11, %v4480_v11, 0.0 }
 0x30f   : > { %v3129_v28 = vpop.permute.xlu0 %3128  ;;  %v3989_v48 = vpop.permute.xlu1 %3988  ;;  %3138 = vrot.lane.b32.xlu2 %v3043_v46, %s4884_s20 }
 0x310   : > { %3199 = vst.msk [vmem:[#allocation3 + $0x68] sm:$0xf] %vm3172_vm6, %v3129_v28  ;;  %v4299_v44 = vpop.f32.mrf.mxu0 }
 0x311   : > { %4078 = vst.msk [vmem:[#allocation3 + $0x1c] sm:$0xf] %vm4070_vm8, %v3989_v48  ;;  %v4411_v38 = vsel %vm4377_vm11, %v4299_v44, 0.0  ;;  %v4481_v10 = vmul.f32 %v4299_v44, %v4299_v44  ;;  %v3119_v31 = vpop.permute.xlu2 %3118 }
 0x312   : > { %4379 = vst.msk [vmem:[%s6689_s30 + $0x8] sm:$0xff] %vm4377_vm11, %v4299_v44  ;;  %v4412_v22 = vadd.f32 %v4411_v38, %v4410_v21  ;;  %v4824_v1 = vld [vmem:[#allocation3 + $0x30] sm:$0xff] }
 0x313   : > { %3194 = vst.msk [vmem:[#allocation3 + $0x54] sm:$0xf] %vm3172_vm6, %v3119_v31  ;;  %v4513_v53 = vsel %vm4377_vm11, %v4481_v10, 0.0  ;;  %4804 = vmatmul.msk.bf16.gmra.mxu1 %vm4235_vm10, %v4824_v1 }
 0x314   : > { %v4514_v19 = vadd.f32 %v4513_v53, %v4512_v49 }
 0x317   : > { %v3680_v57 = vpop.permute.xlu0 %3679  ;;  %v3117_v29 = vpop.permute.xlu1 %3116  ;;  %4034 = vrot.lane.b32.xlu2 %v3970_v58, %s4883_s17 }
 0x318   : > { %3755 = vst.msk [vmem:[#allocation3 + $0x54] sm:$0xf] %vm3733_vm7, %v3680_v57  ;;  %v4821_v63 = vld [vmem:[#allocation3 + $0x18] sm:$0xff] }
 0x319   : > { %3193 = vst.msk [vmem:[#allocation3 + $0x50] sm:$0xf] %vm3172_vm6, %v3117_v29  ;;  %v3678_v61 = vpop.permute.xlu2 %3677  ;;  %4801 = vmatmul.msk.bf16.gmra.mxu0 %vm4235_vm10, %v4821_v63 }
 0x31a   : > { %3754 = vst.msk [vmem:[#allocation3 + $0x50] sm:$0xf] %vm3733_vm7, %v3678_v61 }
 0x31f   : > { %v4015_v8 = vpop.permute.xlu0 %4014  ;;  %v3131_v23 = vpop.permute.xlu1 %3130 }
 0x320   : > { %4091 = vst.msk [vmem:[#allocation3 + $0x50] sm:$0xf] %vm4070_vm8, %v4015_v8  ;;  %v6718_v7 = vpop.f32.mrf.mxu1 }
 0x321   : > { %3200 = vst.msk [vmem:[#allocation3 + $0x6c] sm:$0xf] %vm3172_vm6, %v3131_v23  ;;  %v3692_v20 = vpop.permute.xlu2 %3691 }
 0x322   : > { %4386 = vst.msk [vmem:[%s6689_s30 + $0x40] sm:$0xff] %vm4377_vm11, %v6718_v7 }
 0x323   : > { %3761 = vst.msk [vmem:[#allocation3 + $0x6c] sm:$0xf] %vm3733_vm7, %v3692_v20 }
 0x325   : > { %v4302_v9 = vpop.f32.mrf.mxu0 }
 0x326   : > { %4380 = vst.msk [vmem:[%s6689_s30 + $0x10] sm:$0xff] %vm4377_vm11, %v4302_v9  ;;  %v4413_v0 = vsel %vm4377_vm11, %v4302_v9, 0.0  ;;  %v4482_v3 = vmul.f32 %v4302_v9, %v4302_v9 }
 0x327   : > { %v4029_v30 = vpop.permute.xlu0 %4028  ;;  %v3690_v52 = vpop.permute.xlu1 %3689  ;;  %v4414_v6 = vadd.f32 %v4413_v0, %v4412_v22 }
 0x328   : > { %4098 = vst.msk [vmem:[#allocation3 + $0x6c] sm:$0xf] %vm4070_vm8, %v4029_v30  ;;  %v6729_v60 = vpop.f32.mrf.mxu1  ;;  %v4515_v33 = vsel %vm4377_vm11, %v4482_v3, 0.0 }
 0x329   : > { %3760 = vst.msk [vmem:[#allocation3 + $0x68] sm:$0xf] %vm3733_vm7, %v3690_v52  ;;  %v4027_v35 = vpop.permute.xlu2 %4026  ;;  %v4516_v12 = vadd.f32 %v4515_v33, %v4514_v19 }
 0x32a   : > { %4387 = vst.msk [vmem:[%s6689_s30 + $0x48] sm:$0xff] %vm4377_vm11, %v6729_v60 }
 0x32b   : > { %4097 = vst.msk [vmem:[#allocation3 + $0x68] sm:$0xf] %vm4070_vm8, %v4027_v35 }
 0x32d   : > { %v4304_v56 = vpop.f32.mrf.mxu0 }
 0x32e   : > { %4381 = vst.msk [vmem:[%s6689_s30 + $0x18] sm:$0xff] %vm4377_vm11, %v4304_v56  ;;  %v4415_v41 = vsel %vm4377_vm11, %v4304_v56, 0.0  ;;  %v4483_v25 = vmul.f32 %v4304_v56, %v4304_v56 }
 0x32f   : > { %v3666_v15 = vpop.permute.xlu0 %3665  ;;  %v4017_v43 = vpop.permute.xlu1 %4016  ;;  %v4416_v59 = vadd.f32 %v4415_v41, %v4414_v6 }
 0x330   : > { %4092 = vst.msk [vmem:[#allocation3 + $0x54] sm:$0xf] %vm4070_vm8, %v4017_v43  ;;  %v4517_v14 = vsel %vm4377_vm11, %v4483_v25, 0.0 }
 0x331   : > { %v3107_v5 = vpop.permute.xlu2 %3106  ;;  %v4518_v4 = vadd.f32 %v4517_v14, %v4516_v12 }
 0x332   : > { %v4831_v27 = vld [vmem:[#allocation3 + $0x68] sm:$0xff]  ;;  %3188 = vst.msk [vmem:[#allocation3 + $0x3c] sm:$0xf] %vm3172_vm6, %v3107_v5 }
 0x333   : > { %4811 = vmatmul.msk.bf16.gmra.mxu3 %vm4235_vm10, %v4831_v27  ;;  %v4488_v27 = vmul.f32 %v6718_v7, %v6718_v7 }
 0x337   : > { %v4005_v36 = vpop.permute.xlu0 %4004  ;;  %v3105_v42 = vpop.permute.xlu1 %3104  ;;  %v4828_v32 = vld [vmem:[#allocation3 + $0x50] sm:$0xff] }
 0x338   : > { %3187 = vst.msk [vmem:[#allocation3 + $0x38] sm:$0xf] %vm3172_vm6, %v3105_v42  ;;  %4808 = vmatmul.msk.bf16.gmra.mxu2 %vm4235_vm10, %v4828_v32  ;;  %v4425_v42 = vsel %vm4377_vm11, %v6718_v7, 0.0  ;;  %v4489_v32 = vmul.f32 %v6729_v60, %v6729_v60 }
 0x339   : > { %3748 = vst.msk [vmem:[#allocation3 + $0x38] sm:$0xf] %vm3733_vm7, %v3666_v15  ;;  %v4003_v39 = vpop.permute.xlu2 %4002 }
 0x33a   : > { %4085 = vst.msk [vmem:[#allocation3 + $0x38] sm:$0xf] %vm4070_vm8, %v4003_v39 }
 0x33d   : > { %v6747_v62 = vpop.f32.mrf.mxu2 }
 0x33e   : > { %4394 = vst.msk [vmem:[%s6689_s30 + $0x80] sm:$0xff] %vm4377_vm11, %v6747_v62 }
 0x33f   : > { %v3123_v26 = vpop.permute.xlu0 %3122  ;;  %v3668_v2 = vpop.permute.xlu1 %3667 }
 0x340   : > { %3196 = vst.msk [vmem:[#allocation3 + $0x5c] sm:$0xf] %vm3172_vm6, %v3123_v26 }
 0x341   : > { %3749 = vst.msk [vmem:[#allocation3 + $0x3c] sm:$0xf] %vm3733_vm7, %v3668_v2  ;;  %v3121_v51 = vpop.permute.xlu2 %3120 }
 0x342   : > { %4086 = vst.msk [vmem:[#allocation3 + $0x3c] sm:$0xf] %vm4070_vm8, %v4005_v36 }
 0x343   : > { %3195 = vst.msk [vmem:[#allocation3 + $0x58] sm:$0xf] %vm3172_vm6, %v3121_v51  ;;  %v4527_v51 = vsel %vm4377_vm11, %v4488_v27, 0.0 }
 0x345   : > { %v6756_v37 = vpop.f32.mrf.mxu2 }
 0x346   : > { %4395 = vst.msk [vmem:[%s6689_s30 + $0x88] sm:$0xff] %vm4377_vm11, %v6756_v37 }
 0x347   : > { %v3682_v16 = vpop.permute.xlu0 %3681  ;;  %v2941_v50 = vpop.permute.xlu1 %2940 }
 0x348   : > { %3756 = vst.msk [vmem:[#allocation3 + $0x58] sm:$0xf] %vm3733_vm7, %v3682_v16  ;;  %v4427_v16 = vsel %vm4377_vm11, %v6729_v60, 0.0 }
 0x349   : > { %3008 = vst.msk [vmem:[#allocation3 + $0x74] sm:$0xf] %vm2978_vm4, %v2941_v50  ;;  %v4825_v18 = vld [vmem:[#allocation3 + $0x38] sm:$0xff]  ;;  %v3135_v45 = vpop.permute.xlu2 %3134 }
 0x34a   : > { %4805 = vmatmul.msk.bf16.gmra.mxu1 %vm4235_vm10, %v4825_v18  ;;  %3202 = vst.msk [vmem:[#allocation3 + $0x74] sm:$0xf] %vm3172_vm6, %v3135_v45 }
 0x34f   : > { %v3696_v47 = vpop.permute.xlu0 %3695  ;;  %v3133_v24 = vpop.permute.xlu1 %3132 }
 0x350   : > { %3763 = vst.msk [vmem:[#allocation3 + $0x74] sm:$0xf] %vm3733_vm7, %v3696_v47  ;;  %v6767_v54 = vpop.f32.mrf.mxu1  ;;  %v4529_v47 = vsel %vm4377_vm11, %v4489_v32, 0.0 }
 0x351   : > { %3201 = vst.msk [vmem:[#allocation3 + $0x70] sm:$0xf] %vm3172_vm6, %v3133_v24  ;;  %v3694_v40 = vpop.permute.xlu2 %3693  ;;  %v4490_v50 = vmul.f32 %v6767_v54, %v6767_v54  ;;  %v4429_v7 = vsel %vm4377_vm11, %v6767_v54, 0.0 }
 0x352   : > { %4388 = vst.msk [vmem:[%s6689_s30 + $0x50] sm:$0xff] %vm4377_vm11, %v6767_v54 }
 0x353   : > { %3762 = vst.msk [vmem:[#allocation3 + $0x70] sm:$0xf] %vm3733_vm7, %v3694_v40 }
 0x356   : > { %v4307_v13 = vpop.f32.mrf.mxu0 }
 0x357   : > { %v4031_v55 = vpop.permute.xlu0 %4030  ;;  %v3684_v46 = vpop.permute.xlu1 %3683  ;;  %4382 = vst.msk [vmem:[%s6689_s30 + $0x20] sm:$0xff] %vm4377_vm11, %v4307_v13  ;;  %v4417_v28 = vsel %vm4377_vm11, %v4307_v13, 0.0  ;;  %v4484_v34 = vmul.f32 %v4307_v13, %v4307_v13  ;;  %v4531_v13 = vsel %vm4377_vm11, %v4490_v50, 0.0 }
 0x358   : > { %4099 = vst.msk [vmem:[#allocation3 + $0x70] sm:$0xf] %vm4070_vm8, %v4031_v55  ;;  %v4418_v11 = vadd.f32 %v4417_v28, %v4416_v59  ;;  %v6778_v48 = vpop.f32.mrf.mxu1 }
 0x359   : > { %3757 = vst.msk [vmem:[#allocation3 + $0x5c] sm:$0xf] %vm3733_vm7, %v3684_v46  ;;  %v4519_v44 = vsel %vm4377_vm11, %v4484_v34, 0.0  ;;  %v4021_v21 = vpop.permute.xlu2 %4020  ;;  %v4491_v24 = vmul.f32 %v6778_v48, %v6778_v48  ;;  %v4431_v60 = vsel %vm4377_vm11, %v6778_v48, 0.0 }
 0x35a   : > { %4389 = vst.msk [vmem:[%s6689_s30 + $0x58] sm:$0xff] %vm4377_vm11, %v6778_v48  ;;  %v4520_v38 = vadd.f32 %v4519_v44, %v4518_v4 }
 0x35b   : > { %4094 = vst.msk [vmem:[#allocation3 + $0x5c] sm:$0xf] %vm4070_vm8, %v4021_v21 }
 0x35e   : > { %v4309_v17 = vpop.f32.mrf.mxu0 }
 0x35f   : > { %v2945_v10 = vpop.permute.xlu0 %2944  ;;  %v4019_v31 = vpop.permute.xlu1 %4018  ;;  %4383 = vst.msk [vmem:[%s6689_s30 + $0x28] sm:$0xff] %vm4377_vm11, %v4309_v17  ;;  %v4419_v22 = vsel %vm4377_vm11, %v4309_v17, 0.0  ;;  %v4485_v1 = vmul.f32 %v4309_v17, %v4309_v17 }
 0x360   : > { %3010 = vst.msk [vmem:[#allocation3 + $0x7c] sm:$0xf] %vm2978_vm4, %v2945_v10  ;;  %v4420_v49 = vadd.f32 %v4419_v22, %v4418_v11  ;;  %v4533_v11 = vsel %vm4377_vm11, %v4491_v24, 0.0 }
 0x361   : > { %4093 = vst.msk [vmem:[#allocation3 + $0x58] sm:$0xf] %vm4070_vm8, %v4019_v31  ;;  %v4521_v53 = vsel %vm4377_vm11, %v4485_v1, 0.0  ;;  %v2943_v19 = vpop.permute.xlu2 %2942 }
 0x362   : > { %v4522_v58 = vadd.f32 %v4521_v53, %v4520_v38  ;;  %3009 = vst.msk [vmem:[#allocation3 + $0x78] sm:$0xf] %vm2978_vm4, %v2943_v19 }
 0x367   : > { %v4033_v57 = vpop.permute.xlu1 %4032  ;;  %v3698_v61 = vpop.permute.xlu0 %3697 }
 0x368   : > { %v4829_v29 = vld [vmem:[#allocation3 + $0x58] sm:$0xff]  ;;  %4100 = vst.msk [vmem:[#allocation3 + $0x74] sm:$0xf] %vm4070_vm8, %v4033_v57 }
 0x369   : > { %4809 = vmatmul.msk.bf16.gmra.mxu2 %vm4235_vm10, %v4829_v29  ;;  %v3139_v63 = vpop.permute.xlu2 %3138 }
 0x36a   : > { %3204 = vst.msk [vmem:[#allocation3 + $0x7c] sm:$0xf] %vm3172_vm6, %v3139_v63 }
 0x36f   : > { %v3137_v8 = vpop.permute.xlu1 %3136  ;;  %v4832_v23 = vld [vmem:[#allocation3 + $0x70] sm:$0xff]  ;;  %v4037_v9 = vpop.permute.xlu0 %4036 }
 0x370   : > { %3203 = vst.msk [vmem:[#allocation3 + $0x78] sm:$0xf] %vm3172_vm6, %v3137_v8  ;;  %4812 = vmatmul.msk.bf16.gmra.mxu3 %vm4235_vm10, %v4832_v23 }
 0x371   : > { %3764 = vst.msk [vmem:[#allocation3 + $0x78] sm:$0xf] %vm3733_vm7, %v3698_v61  ;;  %v4035_v20 = vpop.permute.xlu2 %4034 }
 0x372   : > { %4101 = vst.msk [vmem:[#allocation3 + $0x78] sm:$0xf] %vm4070_vm8, %v4035_v20  ;;  %v4496_v20 = vmul.f32 %v6747_v62, %v6747_v62 }
 0x375   : > { %v6799_v30 = vpop.f32.mrf.mxu3 }
 0x376   : > { %4402 = vst.msk [vmem:[%s6689_s30 + $0xc0] sm:$0xff] %vm4377_vm11, %v6799_v30 }
 0x377   : > { %v3700_v52 = vpop.permute.xlu1 %3699 }
 0x378   : > { %3765 = vst.msk [vmem:[#allocation3 + $0x7c] sm:$0xf] %vm3733_vm7, %v3700_v52 }
 0x379   : > { %4102 = vst.msk [vmem:[#allocation3 + $0x7c] sm:$0xf] %vm4070_vm8, %v4037_v9 }
 0x37c   : > { %v6806_v0 = vpop.f32.mrf.mxu2 }
 0x37d   : > { %4396 = vst.msk [vmem:[%s6689_s30 + $0x90] sm:$0xff] %vm4377_vm11, %v6806_v0  ;;  %v6811_v3 = vpop.f32.mrf.mxu3 }
 0x37e   : > { %4403 = vst.msk [vmem:[%s6689_s30 + $0xc8] sm:$0xff] %vm4377_vm11, %v6811_v3 }
 0x380   : > { %v4833_v6 = vld [vmem:[#allocation3 + $0x78] sm:$0xff] }
 0x381   : > { %4813 = vmatmul.msk.bf16.gmra.mxu3 %vm4235_vm10, %v4833_v6 }
 0x384   : > { %v6817_v33 = vpop.f32.mrf.mxu2 }
 0x385   : > { %4397 = vst.msk [vmem:[%s6689_s30 + $0x98] sm:$0xff] %vm4377_vm11, %v6817_v33 }
 0x390   : > { %v4327_v35 = vpop.f32.mrf.mxu1 }
 0x391   : > { %4390 = vst.msk [vmem:[%s6689_s30 + $0x60] sm:$0xff] %vm4377_vm11, %v4327_v35  ;;  %v4492_v46 = vmul.f32 %v4327_v35, %v4327_v35  ;;  %v4433_v54 = vsel %vm4377_vm11, %v4327_v35, 0.0 }
 0x393   : > { %v4535_v10 = vsel %vm4377_vm11, %v4492_v46, 0.0 }
 0x396   : > { %v4312_v12 = vpop.f32.mrf.mxu0 }
 0x397   : > { %4384 = vst.msk [vmem:[%s6689_s30 + $0x30] sm:$0xff] %vm4377_vm11, %v4312_v12  ;;  %v4421_v15 = vsel %vm4377_vm11, %v4312_v12, 0.0  ;;  %v4486_v56 = vmul.f32 %v4312_v12, %v4312_v12  ;;  %v4441_v12 = vsel %vm4377_vm11, %v6747_v62, 0.0 }
 0x398   : > { %v4422_v43 = vadd.f32 %v4421_v15, %v4420_v49  ;;  %v4329_v41 = vpop.f32.mrf.mxu1  ;;  %v4497_v15 = vmul.f32 %v6756_v37, %v6756_v37 }
 0x399   : > { %v4523_v25 = vsel %vm4377_vm11, %v4486_v56, 0.0  ;;  %4391 = vst.msk [vmem:[%s6689_s30 + $0x68] sm:$0xff] %vm4377_vm11, %v4329_v41  ;;  %v4493_v44 = vmul.f32 %v4329_v41, %v4329_v41  ;;  %v4435_v17 = vsel %vm4377_vm11, %v4329_v41, 0.0 }
 0x39a   : > { %v4524_v59 = vadd.f32 %v4523_v25, %v4522_v58  ;;  %v4543_v25 = vsel %vm4377_vm11, %v4496_v20, 0.0  ;;  %v4545_v62 = vsel %vm4377_vm11, %v4497_v15, 0.0 }
 0x39b   : > { %v4537_v22 = vsel %vm4377_vm11, %v4493_v44, 0.0  ;;  %v4504_v44 = vmul.f32 %v6799_v30, %v6799_v30 }
 0x39e   : > { %v4314_v14 = vpop.f32.mrf.mxu0 }
 0x39f   : > { %4385 = vst.msk [vmem:[%s6689_s30 + $0x38] sm:$0xff] %vm4377_vm11, %v4314_v14  ;;  %v4423_v5 = vsel %vm4377_vm11, %v4314_v14, 0.0  ;;  %v4487_v4 = vmul.f32 %v4314_v14, %v4314_v14  ;;  %v4498_v14 = vmul.f32 %v6806_v0, %v6806_v0 }
 0x3a0   : > { %v4424_v36 = vadd.f32 %v4423_v5, %v4422_v43 }
 0x3a1   : > { %v4525_v39 = vsel %vm4377_vm11, %v4487_v4, 0.0  ;;  %v4445_v4 = vsel %vm4377_vm11, %v6806_v0, 0.0 }
 0x3a2   : > { %v4426_v26 = vadd.f32 %v4425_v42, %v4424_v36  ;;  %v4526_v2 = vadd.f32 %v4525_v39, %v4524_v59  ;;  %v4443_v59 = vsel %vm4377_vm11, %v6756_v37, 0.0  ;;  %v4499_v36 = vmul.f32 %v6817_v33, %v6817_v33 }
 0x3a3   : > { %v4547_v39 = vsel %vm4377_vm11, %v4498_v14, 0.0  ;;  %v4447_v37 = vsel %vm4377_vm11, %v6817_v33, 0.0 }
 0x3a4   : > { %v4428_v18 = vadd.f32 %v4427_v16, %v4426_v26  ;;  %v4528_v45 = vadd.f32 %v4527_v51, %v4526_v2  ;;  %v4549_v51 = vsel %vm4377_vm11, %v4499_v36, 0.0 }
 0x3a6   : > { %v4430_v40 = vadd.f32 %v4429_v7, %v4428_v18  ;;  %v4530_v55 = vadd.f32 %v4529_v47, %v4528_v45 }
 0x3a8   : > { %v4532_v28 = vadd.f32 %v4531_v13, %v4530_v55  ;;  %v4432_v34 = vadd.f32 %v4431_v60, %v4430_v40 }
 0x3aa   : > { %v4434_v21 = vadd.f32 %v4433_v54, %v4432_v34  ;;  %v4534_v38 = vadd.f32 %v4533_v11, %v4532_v28 }
 0x3ac   : > { %v4436_v48 = vadd.f32 %v4435_v17, %v4434_v21  ;;  %v4536_v31 = vadd.f32 %v4535_v10, %v4534_v38 }
 0x3ae   : > { %v4538_v1 = vadd.f32 %v4537_v22, %v4536_v31  ;;  %v4505_v31 = vmul.f32 %v6811_v3, %v6811_v3 }
 0x3b6   : > { %v6858_v49 = vpop.f32.mrf.mxu3 }
 0x3b7   : > { %4404 = vst.msk [vmem:[%s6689_s30 + $0xd0] sm:$0xff] %vm4377_vm11, %v6858_v49 }
 0x3bb   : > { %v4347_v53 = vpop.f32.mrf.mxu2 }
 0x3bc   : > { %4398 = vst.msk [vmem:[%s6689_s30 + $0xa0] sm:$0xff] %vm4377_vm11, %v4347_v53  ;;  %v4500_v50 = vmul.f32 %v4347_v53, %v4347_v53  ;;  %v4449_v45 = vsel %vm4377_vm11, %v4347_v53, 0.0 }
 0x3be   : > { %v6865_v19 = vpop.f32.mrf.mxu3  ;;  %v4551_v47 = vsel %vm4377_vm11, %v4500_v50, 0.0 }
 0x3bf   : > { %4405 = vst.msk [vmem:[%s6689_s30 + $0xd8] sm:$0xff] %vm4377_vm11, %v6865_v19 }
 0x3c3   : > { %v4349_v58 = vpop.f32.mrf.mxu2 }
 0x3c4   : > { %4399 = vst.msk [vmem:[%s6689_s30 + $0xa8] sm:$0xff] %vm4377_vm11, %v4349_v58  ;;  %v4501_v7 = vmul.f32 %v4349_v58, %v4349_v58  ;;  %v4451_v33 = vsel %vm4377_vm11, %v4349_v58, 0.0  ;;  %v4559_v58 = vsel %vm4377_vm11, %v4504_v44, 0.0 }
 0x3c6   : > { %v4553_v60 = vsel %vm4377_vm11, %v4501_v7, 0.0 }
 0x3c7   : > { %v4332_v57 = vpop.f32.mrf.mxu1 }
 0x3c8   : > { %4392 = vst.msk [vmem:[%s6689_s30 + $0x70] sm:$0xff] %vm4377_vm11, %v4332_v57  ;;  %v4494_v29 = vmul.f32 %v4332_v57, %v4332_v57  ;;  %v4437_v63 = vsel %vm4377_vm11, %v4332_v57, 0.0  ;;  %v4459_v57 = vsel %vm4377_vm11, %v6811_v3, 0.0  ;;  %v4463_v3 = vsel %vm4377_vm11, %v6865_v19, 0.0 }
 0x3c9   : > { %v4438_v8 = vadd.f32 %v4437_v63, %v4436_v48  ;;  %v4457_v48 = vsel %vm4377_vm11, %v6799_v30, 0.0  ;;  %v4561_v30 = vsel %vm4377_vm11, %v4505_v31, 0.0 }
 0x3ca   : > { %v4539_v61 = vsel %vm4377_vm11, %v4494_v29, 0.0  ;;  %v4506_v29 = vmul.f32 %v6858_v49, %v6858_v49 }
 0x3cb   : > { %v4540_v6 = vadd.f32 %v4539_v61, %v4538_v1 }
 0x3cf   : > { %v4334_v23 = vpop.f32.mrf.mxu1 }
 0x3d0   : > { %4393 = vst.msk [vmem:[%s6689_s30 + $0x78] sm:$0xff] %vm4377_vm11, %v4334_v23  ;;  %v4439_v9 = vsel %vm4377_vm11, %v4334_v23, 0.0  ;;  %v4495_v52 = vmul.f32 %v4334_v23, %v4334_v23  ;;  %v4507_v23 = vmul.f32 %v6865_v19, %v6865_v19 }
 0x3d1   : > { %v4440_v35 = vadd.f32 %v4439_v9, %v4438_v8  ;;  %v4461_v8 = vsel %vm4377_vm11, %v6858_v49, 0.0 }
 0x3d2   : > { %v4541_v56 = vsel %vm4377_vm11, %v4495_v52, 0.0  ;;  %v4565_v15 = vsel %vm4377_vm11, %v4507_v23, 0.0 }
 0x3d3   : > { %v4442_v43 = vadd.f32 %v4441_v12, %v4440_v35  ;;  %v4542_v41 = vadd.f32 %v4541_v56, %v4540_v6  ;;  %v4563_v6 = vsel %vm4377_vm11, %v4506_v29, 0.0 }
 0x3d5   : > { %v4444_v27 = vadd.f32 %v4443_v59, %v4442_v43  ;;  %v4544_v5 = vadd.f32 %v4543_v25, %v4542_v41 }
 0x3d7   : > { %v4446_v42 = vadd.f32 %v4445_v4, %v4444_v27  ;;  %v4546_v32 = vadd.f32 %v4545_v62, %v4544_v5 }
 0x3d9   : > { %v4548_v26 = vadd.f32 %v4547_v39, %v4546_v32  ;;  %v4448_v2 = vadd.f32 %v4447_v37, %v4446_v42 }
 0x3db   : > { %v4550_v16 = vadd.f32 %v4549_v51, %v4548_v26  ;;  %v4450_v0 = vadd.f32 %v4449_v45, %v4448_v2 }
 0x3dd   : > { %v4552_v40 = vadd.f32 %v4551_v47, %v4550_v16  ;;  %v4452_v13 = vadd.f32 %v4451_v33, %v4450_v0 }
 0x3df   : > { %v4554_v34 = vadd.f32 %v4553_v60, %v4552_v40 }
 0x3ec   : > { %v4352_v18 = vpop.f32.mrf.mxu2 }
 0x3ed   : > { %4400 = vst.msk [vmem:[%s6689_s30 + $0xb0] sm:$0xff] %vm4377_vm11, %v4352_v18  ;;  %v4502_v24 = vmul.f32 %v4352_v18, %v4352_v18  ;;  %v4453_v55 = vsel %vm4377_vm11, %v4352_v18, 0.0 }
 0x3ee   : > { %v4454_v28 = vadd.f32 %v4453_v55, %v4452_v13 }
 0x3ef   : > { %v4555_v46 = vsel %vm4377_vm11, %v4502_v24, 0.0 }
 0x3f0   : > { %v4556_v10 = vadd.f32 %v4555_v46, %v4554_v34 }
 0x3f3   : > { %v4367_v54 = vpop.f32.mrf.mxu3 }
 0x3f4   : > { %v4354_v11 = vpop.f32.mrf.mxu2  ;;  %4406 = vst.msk [vmem:[%s6689_s30 + $0xe0] sm:$0xff] %vm4377_vm11, %v4367_v54  ;;  %v4508_v43 = vmul.f32 %v4367_v54, %v4367_v54  ;;  %v4465_v41 = vsel %vm4377_vm11, %v4367_v54, 0.0 }
 0x3f5   : > { %4401 = vst.msk [vmem:[%s6689_s30 + $0xb8] sm:$0xff] %vm4377_vm11, %v4354_v11  ;;  %v4455_v21 = vsel %vm4377_vm11, %v4354_v11, 0.0  ;;  %v4503_v38 = vmul.f32 %v4354_v11, %v4354_v11 }
 0x3f6   : > { %v4456_v17 = vadd.f32 %v4455_v21, %v4454_v28  ;;  %v4567_v59 = vsel %vm4377_vm11, %v4508_v43, 0.0 }
 0x3f7   : > { %v4557_v22 = vsel %vm4377_vm11, %v4503_v38, 0.0 }
 0x3f8   : > { %v4458_v1 = vadd.f32 %v4457_v48, %v4456_v17  ;;  %v4558_v53 = vadd.f32 %v4557_v22, %v4556_v10 }
 0x3fa   : > { %v4460_v63 = vadd.f32 %v4459_v57, %v4458_v1  ;;  %v4560_v61 = vadd.f32 %v4559_v58, %v4558_v53 }
 0x3fb   : > { %v4369_v52 = vpop.f32.mrf.mxu3 }
 0x3fc   : > { %v4562_v20 = vadd.f32 %v4561_v30, %v4560_v61  ;;  %v4462_v9 = vadd.f32 %v4461_v8, %v4460_v63  ;;  %4407 = vst.msk [vmem:[%s6689_s30 + $0xe8] sm:$0xff] %vm4377_vm11, %v4369_v52  ;;  %v4509_v14 = vmul.f32 %v4369_v52, %v4369_v52  ;;  %v4467_v5 = vsel %vm4377_vm11, %v4369_v52, 0.0 }
 0x3fe   : > { %v4464_v35 = vadd.f32 %v4463_v3, %v4462_v9  ;;  %v4564_v12 = vadd.f32 %v4563_v6, %v4562_v20  ;;  %v4569_v36 = vsel %vm4377_vm11, %v4509_v14, 0.0 }
 0x400   : > { %v4566_v56 = vadd.f32 %v4565_v15, %v4564_v12  ;;  %v4466_v25 = vadd.f32 %v4465_v41, %v4464_v35 }
 0x402   : > { %v4568_v19 = vadd.f32 %v4567_v59, %v4566_v56  ;;  %v4468_v4 = vadd.f32 %v4467_v5, %v4466_v25 }
 0x404   : > { %v4372_v49 = vpop.f32.mrf.mxu3  ;;  %v4570_v32 = vadd.f32 %v4569_v36, %v4568_v19 }
 0x405   : > { %4408 = vst.msk [vmem:[%s6689_s30 + $0xf0] sm:$0xff] %vm4377_vm11, %v4372_v49  ;;  %v4510_v27 = vmul.f32 %v4372_v49, %v4372_v49  ;;  %v4469_v62 = vsel %vm4377_vm11, %v4372_v49, 0.0 }
 0x406   : > { %v4470_v39 = vadd.f32 %v4469_v62, %v4468_v4 }
 0x407   : > { %v4571_v42 = vsel %vm4377_vm11, %v4510_v27, 0.0 }
 0x408   : > { %v4572_v51 = vadd.f32 %v4571_v42, %v4570_v32 }
 0x40c   : > { %v4374_v37 = vpop.f32.mrf.mxu3 }
 0x40d   : > { %4409 = vst.msk [vmem:[%s6689_s30 + $0xf8] sm:$0xff] %vm4377_vm11, %v4374_v37  ;;  %v4471_v26 = vsel %vm4377_vm11, %v4374_v37, 0.0  ;;  %v4511_v2 = vmul.f32 %v4374_v37, %v4374_v37 }
 0x40e   : > { %v4472_v16 = vadd.f32 %v4471_v26, %v4470_v39 }
 0x40f   : > { %v4573_v50 = vsel %vm4377_vm11, %v4511_v2, 0.0 }
 0x410   : > { %v4473_v18 = vrot.slane %v4472_v16, 4  ;;  %v4574_v45 = vadd.f32 %v4573_v50, %v4572_v51 }
 0x412   : > { %v4474_v0 = vadd.f32 %v4473_v18, %v4472_v16  ;;  %v4575_v47 = vrot.slane %v4574_v45, 4 }
 0x414   : > { %v4475_v7 = vrot.slane %v4474_v0, 2  ;;  %v4576_v24 = vadd.f32 %v4575_v47, %v4574_v45 }
 0x416   : > { %v4476_v40 = vadd.f32 %v4475_v7, %v4474_v0  ;;  %v4577_v33 = vrot.slane %v4576_v24, 2 }
 0x418   : > { %v4477_v55 = vrot.slane %v4476_v40, 1  ;;  %v4578_v13 = vadd.f32 %v4577_v33, %v4576_v24 }
 0x41a   : > { %v4478_v60 = vadd.f32 %v4477_v55, %v4476_v40  ;;  %v4579_v46 = vrot.slane %v4578_v13, 1 }
 0x41c   : > { %4479 = vst.msk [vmem:[%s235_s8] sm:$0x1] %vm408_vm1, %v4478_v60  ;;  %v4580_v28 = vadd.f32 %v4579_v46, %v4578_v13 }
 0x41e   : > { %4581 = vst.msk [vmem:[%s235_s8 + $0x1] sm:$0x1] %vm408_vm1, %v4580_v28 }
 0x41f PF: > { %s16_s18 = sadd.s32 1, %s4874_s18  }
 0x420   : > { %p13_p4 = scmp.ge.s32.totalorder %s16_s18, 4  }
 0x422   :  { %15 = sbr.rel (!%p13_p4) target bundleno = 1 (0x1), region = 81 }

</bundles_post_ra>
